<compile_context>
chip_gen: v7x
topology: tpu7x:2x2x1
jax: 0.10.0
libtpu: 0.0.40
codegen_flags: <defaults>
</compile_context>

<pallas_src>
import jax
import jax.numpy as jnp
import numpy as np
from jax import lax
from jax.experimental import pallas as pl
from jax.experimental.pallas import tpu as pltpu


# -----------------------------------------------------------------------------
# Fused dense-block kernel (all layers, one image per grid step)
# -----------------------------------------------------------------------------
def _make_dense_block_kernel(n_layers, c0, f, kh, kw, h, w):
    ph, pw = (kh - 1) // 2, (kw - 1) // 2
    hp, wp = h + 2 * ph, w + 2 * pw
    taps = kh * kw
    tc = taps * f  # channels of the per-tap partial-sum buffer

    def kernel(*refs):
        x_ref = refs[0]                                   # (H*W, C0) f32
        layer_refs = refs[1:1 + 4 * n_layers]             # scale, shift, w, b per layer
        o_ref = refs[1 + 4 * n_layers]                    # (H*W, L*F) f32
        t_pad = refs[2 + 4 * n_layers]                    # (Hp, Wp, 9F) f32 scratch

        # Zero ONLY the halo border of the tap buffer (it supplies the conv's
        # 'same' zero padding).  The interior is fully overwritten every layer,
        # so the halo is never clobbered.  Re-done each grid step so it stays
        # correct when the batch axis is split across TensorCores.
        t_pad[0:ph, :, :] = jnp.zeros((ph, wp, tc), jnp.float32)
        t_pad[ph + h:hp, :, :] = jnp.zeros((ph, wp, tc), jnp.float32)
        t_pad[ph:ph + h, 0:pw, :] = jnp.zeros((h, pw, tc), jnp.float32)
        t_pad[ph:ph + h, pw + w:wp, :] = jnp.zeros((h, pw, tc), jnp.float32)

        xf = x_ref[...]                                   # original block input

        for i in range(n_layers):
            cin = c0 + i * f
            sc_ref, sh_ref, w_ref, b_ref = layer_refs[4 * i:4 * i + 4]
            sc = sc_ref[...]                              # (1, Cin) folded BN scale
            sh = sh_ref[...]                              # (1, Cin) folded BN shift

            # BatchNorm (inference, folded) + ReLU, then one bf16 MXU matmul per
            # activation source against the tap-combined weight (Cin, KH*KW*F).
            y_x = jnp.maximum(xf * sc[:, 0:c0] + sh[:, 0:c0], 0.0)
            t = jnp.dot(y_x.astype(jnp.bfloat16), w_ref[0:c0, :],
                        preferred_element_type=jnp.float32)        # (H*W, 9F)
            if i > 0:
                prev = o_ref[:, 0:i * f]   # outputs of earlier layers (VMEM-resident)
                y_p = jnp.maximum(prev * sc[:, c0:cin] + sh[:, c0:cin], 0.0)
                t = t + jnp.dot(y_p.astype(jnp.bfloat16), w_ref[c0:cin, :],
                                preferred_element_type=jnp.float32)

            # Write the per-tap partial sums into the zero-haloed buffer and
            # reduce the KH*KW taps with VPU adds (no im2col copies, no tiny
            # per-tap matmuls).
            t_pad[ph:ph + h, pw:pw + w, :] = t.reshape(h, w, tc)
            acc = jnp.zeros((h, w, f), jnp.float32)
            for dkh in range(kh):
                for dkw in range(kw):
                    tap = dkh * kw + dkw
                    acc = acc + t_pad[dkh:dkh + h, dkw:dkw + w,
                                      tap * f:(tap + 1) * f]

            # Layer i output lands directly in its channel slice of the output
            # block => the torch.cat of the layer outputs is free.
            o_ref[:, i * f:(i + 1) * f] = acc.reshape(h * w, f) + b_ref[...]

    return kernel


# -----------------------------------------------------------------------------
# DenseBlock forward wrapper (public NCHW interface, like the PyTorch module)
# -----------------------------------------------------------------------------
def dense_block_forward(x_nchw, params, n_filters, filter_size):
    n, c0, h, w = x_nchw.shape
    l = len(params)
    f = n_filters
    khw = filter_size
    assert khw % 2 == 1, "Pallas DenseBlock supports odd filter_size only"
    lf = l * f
    taps = khw * khw
    ph = (khw - 1) // 2

    # One NCHW -> channels-last transpose per block; the flatten to (H*W, C) is free.
    x_flat = jnp.transpose(x_nchw, (0, 2, 3, 1)).reshape(n, h * w, c0)

    inputs = [x_flat]
    in_specs = [pl.BlockSpec((pl.Squeezed(), h * w, c0), lambda b: (b, 0, 0))]

    for i, p in enumerate(params):
        cin = c0 + i * f
        # torch concat order for layer i input is [out_{i-1}, ..., out_0, x];
        # the kernel keeps [x, out_0, ..., out_{i-1}] -> permute the Cin axis.
        perm = np.concatenate(
            [np.arange(i * f, i * f + c0)]
            + [np.arange((i - 1 - k) * f, (i - k) * f) for k in range(i)]
        ).astype(np.int32)
        scale = p["scale"][perm].reshape(1, cin).astype(jnp.float32)
        shift = p["shift"][perm].reshape(1, cin).astype(jnp.float32)
        # HWIO weight -> (Cin, KH*KW*F) with taps folded into the output axis,
        # stored as bf16 (MXU-native; halves weight DMA + VMEM footprint).
        w_comb = jnp.transpose(p["w"][:, :, perm, :], (2, 0, 1, 3))
        w_comb = w_comb.reshape(cin, taps * f).astype(jnp.bfloat16)
        bias = p["b"].reshape(1, f).astype(jnp.float32)
        inputs += [scale, shift, w_comb, bias]
        in_specs += [
            pl.BlockSpec((1, cin), lambda b: (0, 0)),
            pl.BlockSpec((1, cin), lambda b: (0, 0)),
            pl.BlockSpec((cin, taps * f), lambda b: (0, 0)),
            pl.BlockSpec((1, f), lambda b: (0, 0)),
        ]

    out_specs = pl.BlockSpec((pl.Squeezed(), h * w, lf), lambda b: (b, 0, 0))
    scratch = [pltpu.VMEM((h + 2 * ph, w + 2 * ph, taps * f), jnp.float32)]

    # Explicit VMEM budget: double-buffered in/out blocks + params + tap scratch,
    # with headroom, capped at 48 MiB (safe on v7x's 64 MiB per TensorCore).
    est = (2 * (h * w * c0 * 4 + h * w * lf * 4)
           + (h + 2 * ph) * (w + 2 * ph) * taps * f * 4
           + 2 * sum(int(np.prod(a.shape)) * a.dtype.itemsize for a in inputs[1:]))
    vmem_limit = int(min(48 * 2 ** 20, max(8 * 2 ** 20, 4 * est)))

    kernel = _make_dense_block_kernel(l, c0, f, khw, khw, h, w)
    out_flat = pl.pallas_call(
        kernel,
        out_shape=jax.ShapeDtypeStruct((n, h * w, lf), jnp.float32),
        grid_spec=pltpu.PrefetchScalarGridSpec(
            num_scalar_prefetch=0,
            grid=(n,),
            in_specs=in_specs,
            out_specs=out_specs,
            scratch_shapes=scratch,
        ),
        compiler_params=pltpu.CompilerParams(
            dimension_semantics=("parallel",),
            vmem_limit_bytes=vmem_limit,
        ),
    )(*inputs)

    # (N, H*W, L*F) -> NCHW (reshape is free; one small transpose at the boundary).
    return jnp.transpose(out_flat.reshape(n, h, w, lf), (0, 3, 1, 2))


# -----------------------------------------------------------------------------
# Deterministic parameter init (shapes follow DenseBlock.__init__ / Dense_layer)
# -----------------------------------------------------------------------------
def init_params(key, input_depth, n_filters, filter_size, n_layers):
    params = []
    c_in = input_depth
    eps = 1e-5
    for _ in range(n_layers):
        key, k1, k2, k3, k4, k5, k6 = jax.random.split(key, 7)
        fan_in = c_in * filter_size * filter_size
        w = jax.random.normal(k1, (filter_size, filter_size, c_in, n_filters),
                              jnp.float32) / np.sqrt(fan_in)
        b = 0.01 * jax.random.normal(k2, (n_filters,), jnp.float32)
        gamma = 1.0 + 0.1 * jax.random.normal(k3, (c_in,), jnp.float32)
        beta = 0.1 * jax.random.normal(k4, (c_in,), jnp.float32)
        mean = 0.1 * jax.random.normal(k5, (c_in,), jnp.float32)
        var = jnp.abs(1.0 + 0.1 * jax.random.normal(k6, (c_in,), jnp.float32))
        scale = gamma / jnp.sqrt(var + eps)   # folded BN (inference mode)
        shift = beta - mean * scale
        params.append(dict(w=w, b=b, scale=scale, shift=shift))
        c_in += n_filters
    return params


# -----------------------------------------------------------------------------
# Pure-JAX f32 reference with the exact torch concat semantics
# -----------------------------------------------------------------------------
def reference_block(x_nchw, params):
    x = jnp.transpose(x_nchw, (0, 2, 3, 1))
    concat_list = []
    inp = x
    for p in params:
        y = jnp.maximum(inp * p["scale"].reshape(1, 1, 1, -1)
                        + p["shift"].reshape(1, 1, 1, -1), 0.0)
        out = lax.conv_general_dilated(
            y, p["w"], window_strides=(1, 1), padding="SAME",
            dimension_numbers=("NHWC", "HWIO", "NHWC"),
        ) + p["b"].reshape(1, 1, 1, -1)
        concat_list.append(out)
        inp = jnp.concatenate([out, inp], axis=-1)   # torch.cat((output, input), dim=1)
    out = jnp.concatenate(concat_list, axis=-1)
    return jnp.transpose(out, (0, 3, 1, 2))


if __name__ == "__main__":
    # Small deterministic configuration.
    n, input_depth, hh, ww = 2, 4, 16, 16
    n_filters, filter_size, n_layers = 8, 3, 3

    key = jax.random.PRNGKey(0)
    key, kx = jax.random.split(key)
    x = jax.random.normal(kx, (n, input_depth, hh, ww), jnp.float32)  # NCHW

    params = init_params(key, input_depth, n_filters, filter_size, n_layers)

    out = dense_block_forward(x, params, n_filters, filter_size)
    out = jax.block_until_ready(out)

    expected_shape = (n, n_layers * n_filters, hh, ww)
    assert out.shape == expected_shape, (out.shape, expected_shape)

    ref = jax.block_until_ready(reference_block(x, params))
    # Kernel uses bf16 MXU inputs with f32 accumulation; f32 reference -> loose tol.
    np.testing.assert_allclose(np.asarray(out), np.asarray(ref),
                               rtol=3e-2, atol=3e-2)

    print("KERNEL_OK")
</pallas_src>

<mosaic_0001>
module attributes {stable_mosaic.version = 11 : i64} {
  func.func @kernel(%arg0: i32, %arg1: memref<1x256x4xf32, #tpu.memory_space<vmem>>, %arg2: memref<1x4xf32, #tpu.memory_space<vmem>>, %arg3: memref<1x4xf32, #tpu.memory_space<vmem>>, %arg4: memref<4x72xbf16, #tpu.memory_space<vmem>>, %arg5: memref<1x8xf32, #tpu.memory_space<vmem>>, %arg6: memref<1x12xf32, #tpu.memory_space<vmem>>, %arg7: memref<1x12xf32, #tpu.memory_space<vmem>>, %arg8: memref<12x72xbf16, #tpu.memory_space<vmem>>, %arg9: memref<1x8xf32, #tpu.memory_space<vmem>>, %arg10: memref<1x20xf32, #tpu.memory_space<vmem>>, %arg11: memref<1x20xf32, #tpu.memory_space<vmem>>, %arg12: memref<20x72xbf16, #tpu.memory_space<vmem>>, %arg13: memref<1x8xf32, #tpu.memory_space<vmem>>, %arg14: memref<1x256x24xf32, #tpu.memory_space<vmem>>, %arg15: memref<18x18x72xf32, #tpu.memory_space<vmem>>) attributes {dimension_semantics = [#tpu.dimension_semantics<parallel>], iteration_bounds = array<i64: 2>, scalar_prefetch = 0 : i64, scratch_operands = 1 : i64, tpu.core_type = #tpu.core_type<tc>, window_params = [{transform_indices = @transform_0, window_bounds = array<i64: 1, 256, 4>}, {pipeline_mode = #tpu.pipeline_mode<synchronous>, transform_indices = @transform_1, window_bounds = array<i64: 1, 4>}, {pipeline_mode = #tpu.pipeline_mode<synchronous>, transform_indices = @transform_2, window_bounds = array<i64: 1, 4>}, {pipeline_mode = #tpu.pipeline_mode<synchronous>, transform_indices = @transform_3, window_bounds = array<i64: 4, 72>}, {pipeline_mode = #tpu.pipeline_mode<synchronous>, transform_indices = @transform_4, window_bounds = array<i64: 1, 8>}, {pipeline_mode = #tpu.pipeline_mode<synchronous>, transform_indices = @transform_5, window_bounds = array<i64: 1, 12>}, {pipeline_mode = #tpu.pipeline_mode<synchronous>, transform_indices = @transform_6, window_bounds = array<i64: 1, 12>}, {pipeline_mode = #tpu.pipeline_mode<synchronous>, transform_indices = @transform_7, window_bounds = array<i64: 12, 72>}, {pipeline_mode = #tpu.pipeline_mode<synchronous>, transform_indices = @transform_8, window_bounds = array<i64: 1, 8>}, {pipeline_mode = #tpu.pipeline_mode<synchronous>, transform_indices = @transform_9, window_bounds = array<i64: 1, 20>}, {pipeline_mode = #tpu.pipeline_mode<synchronous>, transform_indices = @transform_10, window_bounds = array<i64: 1, 20>}, {pipeline_mode = #tpu.pipeline_mode<synchronous>, transform_indices = @transform_11, window_bounds = array<i64: 20, 72>}, {pipeline_mode = #tpu.pipeline_mode<synchronous>, transform_indices = @transform_12, window_bounds = array<i64: 1, 8>}, {transform_indices = @transform_13, window_bounds = array<i64: 1, 256, 24>}]} {
    %cst = arith.constant 0.000000e+00 : f32
    %0 = vector.broadcast %cst : f32 to vector<1x18x72xf32>
    %c0 = arith.constant 0 : index
    %c0_0 = arith.constant 0 : index
    %c0_1 = arith.constant 0 : index
    %1 = vector.load %arg15[%c0, %c0_0, %c0_1] : memref<18x18x72xf32, #tpu.memory_space<vmem>>, vector<1x18x72xf32>
    tpu.vector_store %arg15[%c0, %c0_0, %c0_1], %0 {strides = array<i32>} : memref<18x18x72xf32, #tpu.memory_space<vmem>>, vector<1x18x72xf32>,
    %cst_2 = arith.constant 0.000000e+00 : f32
    %2 = vector.broadcast %cst_2 : f32 to vector<1x18x72xf32>
    %c17 = arith.constant 17 : index
    %c0_3 = arith.constant 0 : index
    %c0_4 = arith.constant 0 : index
    %3 = vector.load %arg15[%c17, %c0_3, %c0_4] : memref<18x18x72xf32, #tpu.memory_space<vmem>>, vector<1x18x72xf32>
    tpu.vector_store %arg15[%c17, %c0_3, %c0_4], %2 {strides = array<i32>} : memref<18x18x72xf32, #tpu.memory_space<vmem>>, vector<1x18x72xf32>,
    %cst_5 = arith.constant 0.000000e+00 : f32
    %4 = vector.broadcast %cst_5 : f32 to vector<16x1x72xf32>
    %c1 = arith.constant 1 : index
    %c0_6 = arith.constant 0 : index
    %c0_7 = arith.constant 0 : index
    %5 = vector.load %arg15[%c1, %c0_6, %c0_7] : memref<18x18x72xf32, #tpu.memory_space<vmem>>, vector<16x1x72xf32>
    tpu.vector_store %arg15[%c1, %c0_6, %c0_7], %4 {strides = array<i32>} : memref<18x18x72xf32, #tpu.memory_space<vmem>>, vector<16x1x72xf32>,
    %cst_8 = arith.constant 0.000000e+00 : f32
    %6 = vector.broadcast %cst_8 : f32 to vector<16x1x72xf32>
    %c1_9 = arith.constant 1 : index
    %c17_10 = arith.constant 17 : index
    %c0_11 = arith.constant 0 : index
    %7 = vector.load %arg15[%c1_9, %c17_10, %c0_11] : memref<18x18x72xf32, #tpu.memory_space<vmem>>, vector<16x1x72xf32>
    tpu.vector_store %arg15[%c1_9, %c17_10, %c0_11], %6 {strides = array<i32>} : memref<18x18x72xf32, #tpu.memory_space<vmem>>, vector<16x1x72xf32>,
    %c0_12 = arith.constant 0 : index
    %c0_13 = arith.constant 0 : index
    %c0_14 = arith.constant 0 : index
    %8 = vector.load %arg1[%c0_12, %c0_13, %c0_14] : memref<1x256x4xf32, #tpu.memory_space<vmem>>, vector<1x256x4xf32>
    %9 = vector.shape_cast %8 : vector<1x256x4xf32> to vector<256x4xf32>
    %c0_15 = arith.constant 0 : index
    %c0_16 = arith.constant 0 : index
    %10 = vector.load %arg2[%c0_15, %c0_16] : memref<1x4xf32, #tpu.memory_space<vmem>>, vector<1x4xf32>
    %c0_17 = arith.constant 0 : index
    %c0_18 = arith.constant 0 : index
    %11 = vector.load %arg3[%c0_17, %c0_18] : memref<1x4xf32, #tpu.memory_space<vmem>>, vector<1x4xf32>
    %12 = vector.broadcast %10 : vector<1x4xf32> to vector<256x4xf32>
    %13 = arith.mulf %9, %12 : vector<256x4xf32>
    %14 = vector.broadcast %11 : vector<1x4xf32> to vector<256x4xf32>
    %15 = arith.addf %13, %14 : vector<256x4xf32>
    %cst_19 = arith.constant 0.000000e+00 : f32
    %16 = vector.broadcast %cst_19 : f32 to vector<256x4xf32>
    %17 = arith.maximumf %15, %16 : vector<256x4xf32>
    %18 = arith.truncf %17 : vector<256x4xf32> to vector<256x4xbf16>
    %c0_20 = arith.constant 0 : index
    %c0_21 = arith.constant 0 : index
    %19 = vector.load %arg4[%c0_20, %c0_21] : memref<4x72xbf16, #tpu.memory_space<vmem>>, vector<4x72xbf16>
    %cst_22 = arith.constant dense<0.000000e+00> : vector<256x72xf32>
    %20 = tpu.matmul %18, %19, %cst_22 {dimension_numbers = #tpu.dot_dimension_numbers<[1], [0], [0], [1], [0, 0, 1, 1], [], []>} : vector<256x4xbf16>, vector<4x72xbf16>, vector<256x72xf32> -> vector<256x72xf32>
    %21 = vector.shape_cast %20 : vector<256x72xf32> to vector<16x16x72xf32>
    %c1_23 = arith.constant 1 : index
    %c1_24 = arith.constant 1 : index
    %c0_25 = arith.constant 0 : index
    %22 = vector.load %arg15[%c1_23, %c1_24, %c0_25] : memref<18x18x72xf32, #tpu.memory_space<vmem>>, vector<16x16x72xf32>
    tpu.vector_store %arg15[%c1_23, %c1_24, %c0_25], %21 {strides = array<i32>} : memref<18x18x72xf32, #tpu.memory_space<vmem>>, vector<16x16x72xf32>,
    %cst_26 = arith.constant 0.000000e+00 : f32
    %23 = vector.broadcast %cst_26 : f32 to vector<16x16x8xf32>
    %c0_27 = arith.constant 0 : index
    %c0_28 = arith.constant 0 : index
    %c0_29 = arith.constant 0 : index
    %24 = vector.load %arg15[%c0_27, %c0_28, %c0_29] : memref<18x18x72xf32, #tpu.memory_space<vmem>>, vector<16x16x8xf32>
    %25 = arith.addf %23, %24 : vector<16x16x8xf32>
    %c0_30 = arith.constant 0 : index
    %c1_31 = arith.constant 1 : index
    %c8 = arith.constant 8 : index
    %26 = vector.load %arg15[%c0_30, %c1_31, %c8] : memref<18x18x72xf32, #tpu.memory_space<vmem>>, vector<16x16x8xf32>
    %27 = arith.addf %25, %26 : vector<16x16x8xf32>
    %c0_32 = arith.constant 0 : index
    %c2 = arith.constant 2 : index
    %c16 = arith.constant 16 : index
    %28 = vector.load %arg15[%c0_32, %c2, %c16] : memref<18x18x72xf32, #tpu.memory_space<vmem>>, vector<16x16x8xf32>
    %29 = arith.addf %27, %28 : vector<16x16x8xf32>
    %c1_33 = arith.constant 1 : index
    %c0_34 = arith.constant 0 : index
    %c24 = arith.constant 24 : index
    %30 = vector.load %arg15[%c1_33, %c0_34, %c24] : memref<18x18x72xf32, #tpu.memory_space<vmem>>, vector<16x16x8xf32>
    %31 = arith.addf %29, %30 : vector<16x16x8xf32>
    %c1_35 = arith.constant 1 : index
    %c1_36 = arith.constant 1 : index
    %c32 = arith.constant 32 : index
    %32 = vector.load %arg15[%c1_35, %c1_36, %c32] : memref<18x18x72xf32, #tpu.memory_space<vmem>>, vector<16x16x8xf32>
    %33 = arith.addf %31, %32 : vector<16x16x8xf32>
    %c1_37 = arith.constant 1 : index
    %c2_38 = arith.constant 2 : index
    %c40 = arith.constant 40 : index
    %34 = vector.load %arg15[%c1_37, %c2_38, %c40] : memref<18x18x72xf32, #tpu.memory_space<vmem>>, vector<16x16x8xf32>
    %35 = arith.addf %33, %34 : vector<16x16x8xf32>
    %c2_39 = arith.constant 2 : index
    %c0_40 = arith.constant 0 : index
    %c48 = arith.constant 48 : index
    %36 = vector.load %arg15[%c2_39, %c0_40, %c48] : memref<18x18x72xf32, #tpu.memory_space<vmem>>, vector<16x16x8xf32>
    %37 = arith.addf %35, %36 : vector<16x16x8xf32>
    %c2_41 = arith.constant 2 : index
    %c1_42 = arith.constant 1 : index
    %c56 = arith.constant 56 : index
    %38 = vector.load %arg15[%c2_41, %c1_42, %c56] : memref<18x18x72xf32, #tpu.memory_space<vmem>>, vector<16x16x8xf32>
    %39 = arith.addf %37, %38 : vector<16x16x8xf32>
    %c2_43 = arith.constant 2 : index
    %c2_44 = arith.constant 2 : index
    %c64 = arith.constant 64 : index
    %40 = vector.load %arg15[%c2_43, %c2_44, %c64] : memref<18x18x72xf32, #tpu.memory_space<vmem>>, vector<16x16x8xf32>
    %41 = arith.addf %39, %40 : vector<16x16x8xf32>
    %42 = vector.shape_cast %41 : vector<16x16x8xf32> to vector<256x8xf32>
    %c0_45 = arith.constant 0 : index
    %c0_46 = arith.constant 0 : index
    %43 = vector.load %arg5[%c0_45, %c0_46] : memref<1x8xf32, #tpu.memory_space<vmem>>, vector<1x8xf32>
    %44 = vector.broadcast %43 : vector<1x8xf32> to vector<256x8xf32>
    %45 = arith.addf %42, %44 : vector<256x8xf32>
    %c0_47 = arith.constant 0 : index
    %c0_48 = arith.constant 0 : index
    %c0_49 = arith.constant 0 : index
    %46 = vector.load %arg14[%c0_47, %c0_48, %c0_49] : memref<1x256x24xf32, #tpu.memory_space<vmem>>, vector<1x256x8xf32>
    %47 = vector.shape_cast %46 : vector<1x256x8xf32> to vector<256x8xf32>
    %48 = vector.shape_cast %45 : vector<256x8xf32> to vector<1x256x8xf32>
    tpu.vector_store %arg14[%c0_47, %c0_48, %c0_49], %48 {strides = array<i32>} : memref<1x256x24xf32, #tpu.memory_space<vmem>>, vector<1x256x8xf32>,
    %c0_50 = arith.constant 0 : index
    %c0_51 = arith.constant 0 : index
    %49 = vector.load %arg6[%c0_50, %c0_51] : memref<1x12xf32, #tpu.memory_space<vmem>>, vector<1x12xf32>
    %c0_52 = arith.constant 0 : index
    %c0_53 = arith.constant 0 : index
    %50 = vector.load %arg7[%c0_52, %c0_53] : memref<1x12xf32, #tpu.memory_space<vmem>>, vector<1x12xf32>
    %51 = vector.extract_strided_slice %49 {offsets = [0, 0], sizes = [1, 4], strides = [1, 1]} : vector<1x12xf32> to vector<1x4xf32>
    %52 = vector.broadcast %51 : vector<1x4xf32> to vector<256x4xf32>
    %53 = arith.mulf %9, %52 : vector<256x4xf32>
    %54 = vector.extract_strided_slice %50 {offsets = [0, 0], sizes = [1, 4], strides = [1, 1]} : vector<1x12xf32> to vector<1x4xf32>
    %55 = vector.broadcast %54 : vector<1x4xf32> to vector<256x4xf32>
    %56 = arith.addf %53, %55 : vector<256x4xf32>
    %cst_54 = arith.constant 0.000000e+00 : f32
    %57 = vector.broadcast %cst_54 : f32 to vector<256x4xf32>
    %58 = arith.maximumf %56, %57 : vector<256x4xf32>
    %59 = arith.truncf %58 : vector<256x4xf32> to vector<256x4xbf16>
    %c0_55 = arith.constant 0 : index
    %c0_56 = arith.constant 0 : index
    %60 = vector.load %arg8[%c0_55, %c0_56] : memref<12x72xbf16, #tpu.memory_space<vmem>>, vector<4x72xbf16>
    %cst_57 = arith.constant dense<0.000000e+00> : vector<256x72xf32>
    %61 = tpu.matmul %59, %60, %cst_57 {dimension_numbers = #tpu.dot_dimension_numbers<[1], [0], [0], [1], [0, 0, 1, 1], [], []>} : vector<256x4xbf16>, vector<4x72xbf16>, vector<256x72xf32> -> vector<256x72xf32>
    %c0_58 = arith.constant 0 : index
    %c0_59 = arith.constant 0 : index
    %c0_60 = arith.constant 0 : index
    %62 = vector.load %arg14[%c0_58, %c0_59, %c0_60] : memref<1x256x24xf32, #tpu.memory_space<vmem>>, vector<1x256x8xf32>
    %63 = vector.shape_cast %62 : vector<1x256x8xf32> to vector<256x8xf32>
    %64 = vector.extract_strided_slice %49 {offsets = [0, 4], sizes = [1, 8], strides = [1, 1]} : vector<1x12xf32> to vector<1x8xf32>
    %65 = vector.broadcast %64 : vector<1x8xf32> to vector<256x8xf32>
    %66 = arith.mulf %63, %65 : vector<256x8xf32>
    %67 = vector.extract_strided_slice %50 {offsets = [0, 4], sizes = [1, 8], strides = [1, 1]} : vector<1x12xf32> to vector<1x8xf32>
    %68 = vector.broadcast %67 : vector<1x8xf32> to vector<256x8xf32>
    %69 = arith.addf %66, %68 : vector<256x8xf32>
    %cst_61 = arith.constant 0.000000e+00 : f32
    %70 = vector.broadcast %cst_61 : f32 to vector<256x8xf32>
    %71 = arith.maximumf %69, %70 : vector<256x8xf32>
    %72 = arith.truncf %71 : vector<256x8xf32> to vector<256x8xbf16>
    %c4 = arith.constant 4 : index
    %c0_62 = arith.constant 0 : index
    %73 = vector.load %arg8[%c4, %c0_62] : memref<12x72xbf16, #tpu.memory_space<vmem>>, vector<8x72xbf16>
    %cst_63 = arith.constant dense<0.000000e+00> : vector<256x72xf32>
    %74 = tpu.matmul %72, %73, %cst_63 {dimension_numbers = #tpu.dot_dimension_numbers<[1], [0], [0], [1], [0, 0, 1, 1], [], []>} : vector<256x8xbf16>, vector<8x72xbf16>, vector<256x72xf32> -> vector<256x72xf32>
    %75 = arith.addf %61, %74 : vector<256x72xf32>
    %76 = vector.shape_cast %75 : vector<256x72xf32> to vector<16x16x72xf32>
    %c1_64 = arith.constant 1 : index
    %c1_65 = arith.constant 1 : index
    %c0_66 = arith.constant 0 : index
    %77 = vector.load %arg15[%c1_64, %c1_65, %c0_66] : memref<18x18x72xf32, #tpu.memory_space<vmem>>, vector<16x16x72xf32>
    tpu.vector_store %arg15[%c1_64, %c1_65, %c0_66], %76 {strides = array<i32>} : memref<18x18x72xf32, #tpu.memory_space<vmem>>, vector<16x16x72xf32>,
    %cst_67 = arith.constant 0.000000e+00 : f32
    %78 = vector.broadcast %cst_67 : f32 to vector<16x16x8xf32>
    %c0_68 = arith.constant 0 : index
    %c0_69 = arith.constant 0 : index
    %c0_70 = arith.constant 0 : index
    %79 = vector.load %arg15[%c0_68, %c0_69, %c0_70] : memref<18x18x72xf32, #tpu.memory_space<vmem>>, vector<16x16x8xf32>
    %80 = arith.addf %78, %79 : vector<16x16x8xf32>
    %c0_71 = arith.constant 0 : index
    %c1_72 = arith.constant 1 : index
    %c8_73 = arith.constant 8 : index
    %81 = vector.load %arg15[%c0_71, %c1_72, %c8_73] : memref<18x18x72xf32, #tpu.memory_space<vmem>>, vector<16x16x8xf32>
    %82 = arith.addf %80, %81 : vector<16x16x8xf32>
    %c0_74 = arith.constant 0 : index
    %c2_75 = arith.constant 2 : index
    %c16_76 = arith.constant 16 : index
    %83 = vector.load %arg15[%c0_74, %c2_75, %c16_76] : memref<18x18x72xf32, #tpu.memory_space<vmem>>, vector<16x16x8xf32>
    %84 = arith.addf %82, %83 : vector<16x16x8xf32>
    %c1_77 = arith.constant 1 : index
    %c0_78 = arith.constant 0 : index
    %c24_79 = arith.constant 24 : index
    %85 = vector.load %arg15[%c1_77, %c0_78, %c24_79] : memref<18x18x72xf32, #tpu.memory_space<vmem>>, vector<16x16x8xf32>
    %86 = arith.addf %84, %85 : vector<16x16x8xf32>
    %c1_80 = arith.constant 1 : index
    %c1_81 = arith.constant 1 : index
    %c32_82 = arith.constant 32 : index
    %87 = vector.load %arg15[%c1_80, %c1_81, %c32_82] : memref<18x18x72xf32, #tpu.memory_space<vmem>>, vector<16x16x8xf32>
    %88 = arith.addf %86, %87 : vector<16x16x8xf32>
    %c1_83 = arith.constant 1 : index
    %c2_84 = arith.constant 2 : index
    %c40_85 = arith.constant 40 : index
    %89 = vector.load %arg15[%c1_83, %c2_84, %c40_85] : memref<18x18x72xf32, #tpu.memory_space<vmem>>, vector<16x16x8xf32>
    %90 = arith.addf %88, %89 : vector<16x16x8xf32>
    %c2_86 = arith.constant 2 : index
    %c0_87 = arith.constant 0 : index
    %c48_88 = arith.constant 48 : index
    %91 = vector.load %arg15[%c2_86, %c0_87, %c48_88] : memref<18x18x72xf32, #tpu.memory_space<vmem>>, vector<16x16x8xf32>
    %92 = arith.addf %90, %91 : vector<16x16x8xf32>
    %c2_89 = arith.constant 2 : index
    %c1_90 = arith.constant 1 : index
    %c56_91 = arith.constant 56 : index
    %93 = vector.load %arg15[%c2_89, %c1_90, %c56_91] : memref<18x18x72xf32, #tpu.memory_space<vmem>>, vector<16x16x8xf32>
    %94 = arith.addf %92, %93 : vector<16x16x8xf32>
    %c2_92 = arith.constant 2 : index
    %c2_93 = arith.constant 2 : index
    %c64_94 = arith.constant 64 : index
    %95 = vector.load %arg15[%c2_92, %c2_93, %c64_94] : memref<18x18x72xf32, #tpu.memory_space<vmem>>, vector<16x16x8xf32>
    %96 = arith.addf %94, %95 : vector<16x16x8xf32>
    %97 = vector.shape_cast %96 : vector<16x16x8xf32> to vector<256x8xf32>
    %c0_95 = arith.constant 0 : index
    %c0_96 = arith.constant 0 : index
    %98 = vector.load %arg9[%c0_95, %c0_96] : memref<1x8xf32, #tpu.memory_space<vmem>>, vector<1x8xf32>
    %99 = vector.broadcast %98 : vector<1x8xf32> to vector<256x8xf32>
    %100 = arith.addf %97, %99 : vector<256x8xf32>
    %c0_97 = arith.constant 0 : index
    %c0_98 = arith.constant 0 : index
    %c8_99 = arith.constant 8 : index
    %101 = vector.load %arg14[%c0_97, %c0_98, %c8_99] : memref<1x256x24xf32, #tpu.memory_space<vmem>>, vector<1x256x8xf32>
    %102 = vector.shape_cast %101 : vector<1x256x8xf32> to vector<256x8xf32>
    %103 = vector.shape_cast %100 : vector<256x8xf32> to vector<1x256x8xf32>
    tpu.vector_store %arg14[%c0_97, %c0_98, %c8_99], %103 {strides = array<i32>} : memref<1x256x24xf32, #tpu.memory_space<vmem>>, vector<1x256x8xf32>,
    %c0_100 = arith.constant 0 : index
    %c0_101 = arith.constant 0 : index
    %104 = vector.load %arg10[%c0_100, %c0_101] : memref<1x20xf32, #tpu.memory_space<vmem>>, vector<1x20xf32>
    %c0_102 = arith.constant 0 : index
    %c0_103 = arith.constant 0 : index
    %105 = vector.load %arg11[%c0_102, %c0_103] : memref<1x20xf32, #tpu.memory_space<vmem>>, vector<1x20xf32>
    %106 = vector.extract_strided_slice %104 {offsets = [0, 0], sizes = [1, 4], strides = [1, 1]} : vector<1x20xf32> to vector<1x4xf32>
    %107 = vector.broadcast %106 : vector<1x4xf32> to vector<256x4xf32>
    %108 = arith.mulf %9, %107 : vector<256x4xf32>
    %109 = vector.extract_strided_slice %105 {offsets = [0, 0], sizes = [1, 4], strides = [1, 1]} : vector<1x20xf32> to vector<1x4xf32>
    %110 = vector.broadcast %109 : vector<1x4xf32> to vector<256x4xf32>
    %111 = arith.addf %108, %110 : vector<256x4xf32>
    %cst_104 = arith.constant 0.000000e+00 : f32
    %112 = vector.broadcast %cst_104 : f32 to vector<256x4xf32>
    %113 = arith.maximumf %111, %112 : vector<256x4xf32>
    %114 = arith.truncf %113 : vector<256x4xf32> to vector<256x4xbf16>
    %c0_105 = arith.constant 0 : index
    %c0_106 = arith.constant 0 : index
    %115 = vector.load %arg12[%c0_105, %c0_106] : memref<20x72xbf16, #tpu.memory_space<vmem>>, vector<4x72xbf16>
    %cst_107 = arith.constant dense<0.000000e+00> : vector<256x72xf32>
    %116 = tpu.matmul %114, %115, %cst_107 {dimension_numbers = #tpu.dot_dimension_numbers<[1], [0], [0], [1], [0, 0, 1, 1], [], []>} : vector<256x4xbf16>, vector<4x72xbf16>, vector<256x72xf32> -> vector<256x72xf32>
    %c0_108 = arith.constant 0 : index
    %c0_109 = arith.constant 0 : index
    %c0_110 = arith.constant 0 : index
    %117 = vector.load %arg14[%c0_108, %c0_109, %c0_110] : memref<1x256x24xf32, #tpu.memory_space<vmem>>, vector<1x256x16xf32>
    %118 = vector.shape_cast %117 : vector<1x256x16xf32> to vector<256x16xf32>
    %119 = vector.extract_strided_slice %104 {offsets = [0, 4], sizes = [1, 16], strides = [1, 1]} : vector<1x20xf32> to vector<1x16xf32>
    %120 = vector.broadcast %119 : vector<1x16xf32> to vector<256x16xf32>
    %121 = arith.mulf %118, %120 : vector<256x16xf32>
    %122 = vector.extract_strided_slice %105 {offsets = [0, 4], sizes = [1, 16], strides = [1, 1]} : vector<1x20xf32> to vector<1x16xf32>
    %123 = vector.broadcast %122 : vector<1x16xf32> to vector<256x16xf32>
    %124 = arith.addf %121, %123 : vector<256x16xf32>
    %cst_111 = arith.constant 0.000000e+00 : f32
    %125 = vector.broadcast %cst_111 : f32 to vector<256x16xf32>
    %126 = arith.maximumf %124, %125 : vector<256x16xf32>
    %127 = arith.truncf %126 : vector<256x16xf32> to vector<256x16xbf16>
    %c4_112 = arith.constant 4 : index
    %c0_113 = arith.constant 0 : index
    %128 = vector.load %arg12[%c4_112, %c0_113] : memref<20x72xbf16, #tpu.memory_space<vmem>>, vector<16x72xbf16>
    %cst_114 = arith.constant dense<0.000000e+00> : vector<256x72xf32>
    %129 = tpu.matmul %127, %128, %cst_114 {dimension_numbers = #tpu.dot_dimension_numbers<[1], [0], [0], [1], [0, 0, 1, 1], [], []>} : vector<256x16xbf16>, vector<16x72xbf16>, vector<256x72xf32> -> vector<256x72xf32>
    %130 = arith.addf %116, %129 : vector<256x72xf32>
    %131 = vector.shape_cast %130 : vector<256x72xf32> to vector<16x16x72xf32>
    %c1_115 = arith.constant 1 : index
    %c1_116 = arith.constant 1 : index
    %c0_117 = arith.constant 0 : index
    %132 = vector.load %arg15[%c1_115, %c1_116, %c0_117] : memref<18x18x72xf32, #tpu.memory_space<vmem>>, vector<16x16x72xf32>
    tpu.vector_store %arg15[%c1_115, %c1_116, %c0_117], %131 {strides = array<i32>} : memref<18x18x72xf32, #tpu.memory_space<vmem>>, vector<16x16x72xf32>,
    %cst_118 = arith.constant 0.000000e+00 : f32
    %133 = vector.broadcast %cst_118 : f32 to vector<16x16x8xf32>
    %c0_119 = arith.constant 0 : index
    %c0_120 = arith.constant 0 : index
    %c0_121 = arith.constant 0 : index
    %134 = vector.load %arg15[%c0_119, %c0_120, %c0_121] : memref<18x18x72xf32, #tpu.memory_space<vmem>>, vector<16x16x8xf32>
    %135 = arith.addf %133, %134 : vector<16x16x8xf32>
    %c0_122 = arith.constant 0 : index
    %c1_123 = arith.constant 1 : index
    %c8_124 = arith.constant 8 : index
    %136 = vector.load %arg15[%c0_122, %c1_123, %c8_124] : memref<18x18x72xf32, #tpu.memory_space<vmem>>, vector<16x16x8xf32>
    %137 = arith.addf %135, %136 : vector<16x16x8xf32>
    %c0_125 = arith.constant 0 : index
    %c2_126 = arith.constant 2 : index
    %c16_127 = arith.constant 16 : index
    %138 = vector.load %arg15[%c0_125, %c2_126, %c16_127] : memref<18x18x72xf32, #tpu.memory_space<vmem>>, vector<16x16x8xf32>
    %139 = arith.addf %137, %138 : vector<16x16x8xf32>
    %c1_128 = arith.constant 1 : index
    %c0_129 = arith.constant 0 : index
    %c24_130 = arith.constant 24 : index
    %140 = vector.load %arg15[%c1_128, %c0_129, %c24_130] : memref<18x18x72xf32, #tpu.memory_space<vmem>>, vector<16x16x8xf32>
    %141 = arith.addf %139, %140 : vector<16x16x8xf32>
    %c1_131 = arith.constant 1 : index
    %c1_132 = arith.constant 1 : index
    %c32_133 = arith.constant 32 : index
    %142 = vector.load %arg15[%c1_131, %c1_132, %c32_133] : memref<18x18x72xf32, #tpu.memory_space<vmem>>, vector<16x16x8xf32>
    %143 = arith.addf %141, %142 : vector<16x16x8xf32>
    %c1_134 = arith.constant 1 : index
    %c2_135 = arith.constant 2 : index
    %c40_136 = arith.constant 40 : index
    %144 = vector.load %arg15[%c1_134, %c2_135, %c40_136] : memref<18x18x72xf32, #tpu.memory_space<vmem>>, vector<16x16x8xf32>
    %145 = arith.addf %143, %144 : vector<16x16x8xf32>
    %c2_137 = arith.constant 2 : index
    %c0_138 = arith.constant 0 : index
    %c48_139 = arith.constant 48 : index
    %146 = vector.load %arg15[%c2_137, %c0_138, %c48_139] : memref<18x18x72xf32, #tpu.memory_space<vmem>>, vector<16x16x8xf32>
    %147 = arith.addf %145, %146 : vector<16x16x8xf32>
    %c2_140 = arith.constant 2 : index
    %c1_141 = arith.constant 1 : index
    %c56_142 = arith.constant 56 : index
    %148 = vector.load %arg15[%c2_140, %c1_141, %c56_142] : memref<18x18x72xf32, #tpu.memory_space<vmem>>, vector<16x16x8xf32>
    %149 = arith.addf %147, %148 : vector<16x16x8xf32>
    %c2_143 = arith.constant 2 : index
    %c2_144 = arith.constant 2 : index
    %c64_145 = arith.constant 64 : index
    %150 = vector.load %arg15[%c2_143, %c2_144, %c64_145] : memref<18x18x72xf32, #tpu.memory_space<vmem>>, vector<16x16x8xf32>
    %151 = arith.addf %149, %150 : vector<16x16x8xf32>
    %152 = vector.shape_cast %151 : vector<16x16x8xf32> to vector<256x8xf32>
    %c0_146 = arith.constant 0 : index
    %c0_147 = arith.constant 0 : index
    %153 = vector.load %arg13[%c0_146, %c0_147] : memref<1x8xf32, #tpu.memory_space<vmem>>, vector<1x8xf32>
    %154 = vector.broadcast %153 : vector<1x8xf32> to vector<256x8xf32>
    %155 = arith.addf %152, %154 : vector<256x8xf32>
    %c0_148 = arith.constant 0 : index
    %c0_149 = arith.constant 0 : index
    %c16_150 = arith.constant 16 : index
    %156 = vector.load %arg14[%c0_148, %c0_149, %c16_150] : memref<1x256x24xf32, #tpu.memory_space<vmem>>, vector<1x256x8xf32>
    %157 = vector.shape_cast %156 : vector<1x256x8xf32> to vector<256x8xf32>
    %158 = vector.shape_cast %155 : vector<256x8xf32> to vector<1x256x8xf32>
    tpu.vector_store %arg14[%c0_148, %c0_149, %c16_150], %158 {strides = array<i32>} : memref<1x256x24xf32, #tpu.memory_space<vmem>>, vector<1x256x8xf32>,
    return
  }
  func.func @transform_0(%arg0: i32) -> (i32, i32, i32) {
    %c0_i32 = arith.constant 0 : i32
    %c0_i32_0 = arith.constant 0 : i32
    %c0_i32_1 = arith.constant 0 : i32
    return %arg0, %c0_i32, %c0_i32_0 : i32, i32, i32
  }
  func.func @transform_1(%arg0: i32) -> (i32, i32) {
    %c0_i32 = arith.constant 0 : i32
    %c0_i32_0 = arith.constant 0 : i32
    %c0_i32_1 = arith.constant 0 : i32
    return %c0_i32, %c0_i32_0 : i32, i32
  }
  func.func @transform_2(%arg0: i32) -> (i32, i32) {
    %c0_i32 = arith.constant 0 : i32
    %c0_i32_0 = arith.constant 0 : i32
    %c0_i32_1 = arith.constant 0 : i32
    return %c0_i32, %c0_i32_0 : i32, i32
  }
  func.func @transform_3(%arg0: i32) -> (i32, i32) {
    %c0_i32 = arith.constant 0 : i32
    %c0_i32_0 = arith.constant 0 : i32
    %c0_i32_1 = arith.constant 0 : i32
    return %c0_i32, %c0_i32_0 : i32, i32
  }
  func.func @transform_4(%arg0: i32) -> (i32, i32) {
    %c0_i32 = arith.constant 0 : i32
    %c0_i32_0 = arith.constant 0 : i32
    %c0_i32_1 = arith.constant 0 : i32
    return %c0_i32, %c0_i32_0 : i32, i32
  }
  func.func @transform_5(%arg0: i32) -> (i32, i32) {
    %c0_i32 = arith.constant 0 : i32
    %c0_i32_0 = arith.constant 0 : i32
    %c0_i32_1 = arith.constant 0 : i32
    return %c0_i32, %c0_i32_0 : i32, i32
  }
  func.func @transform_6(%arg0: i32) -> (i32, i32) {
    %c0_i32 = arith.constant 0 : i32
    %c0_i32_0 = arith.constant 0 : i32
    %c0_i32_1 = arith.constant 0 : i32
    return %c0_i32, %c0_i32_0 : i32, i32
  }
  func.func @transform_7(%arg0: i32) -> (i32, i32) {
    %c0_i32 = arith.constant 0 : i32
    %c0_i32_0 = arith.constant 0 : i32
    %c0_i32_1 = arith.constant 0 : i32
    return %c0_i32, %c0_i32_0 : i32, i32
  }
  func.func @transform_8(%arg0: i32) -> (i32, i32) {
    %c0_i32 = arith.constant 0 : i32
    %c0_i32_0 = arith.constant 0 : i32
    %c0_i32_1 = arith.constant 0 : i32
    return %c0_i32, %c0_i32_0 : i32, i32
  }
  func.func @transform_9(%arg0: i32) -> (i32, i32) {
    %c0_i32 = arith.constant 0 : i32
    %c0_i32_0 = arith.constant 0 : i32
    %c0_i32_1 = arith.constant 0 : i32
    return %c0_i32, %c0_i32_0 : i32, i32
  }
  func.func @transform_10(%arg0: i32) -> (i32, i32) {
    %c0_i32 = arith.constant 0 : i32
    %c0_i32_0 = arith.constant 0 : i32
    %c0_i32_1 = arith.constant 0 : i32
    return %c0_i32, %c0_i32_0 : i32, i32
  }
  func.func @transform_11(%arg0: i32) -> (i32, i32) {
    %c0_i32 = arith.constant 0 : i32
    %c0_i32_0 = arith.constant 0 : i32
    %c0_i32_1 = arith.constant 0 : i32
    return %c0_i32, %c0_i32_0 : i32, i32
  }
  func.func @transform_12(%arg0: i32) -> (i32, i32) {
    %c0_i32 = arith.constant 0 : i32
    %c0_i32_0 = arith.constant 0 : i32
    %c0_i32_1 = arith.constant 0 : i32
    return %c0_i32, %c0_i32_0 : i32, i32
  }
  func.func @transform_13(%arg0: i32) -> (i32, i32, i32) {
    %c0_i32 = arith.constant 0 : i32
    %c0_i32_0 = arith.constant 0 : i32
    %c0_i32_1 = arith.constant 0 : i32
    return %arg0, %c0_i32, %c0_i32_0 : i32, i32, i32
  }
}

</mosaic_0001>

<bundles_post_ra>
// kernel: tpu_custom_call.1
= control target key start
LH: loop header
LB: loop body
LE: loop exit
PB: predicated region body
PF: predicated region fallthrough
CT: control target
= control target key end

     0   :  { %s8404_s25 = smov 0   ;;  %s13490_s0 = inlined_call_operand.vmem [shape: f32[2,256,4], index: 0, kind: input, shape index: {}]   ;;  %s13491_s1 = inlined_call_operand.vmem [shape: f32[1,4], index: 1, kind: input, shape index: {}]   ;;  %s13492_s2 = inlined_call_operand.vmem [shape: f32[1,4], index: 2, kind: input, shape index: {}]   ;;  %s13493_s3 = inlined_call_operand.vmem [shape: bf16[4,72], index: 3, kind: input, shape index: {}]   ;;  %s13494_s4 = inlined_call_operand.vmem [shape: f32[1,8], index: 4, kind: input, shape index: {}]   ;;  %s13495_s5 = inlined_call_operand.vmem [shape: f32[1,12], index: 5, kind: input, shape index: {}]   ;;  %s13496_s6 = inlined_call_operand.vmem [shape: f32[1,12], index: 6, kind: input, shape index: {}]   ;;  %s13497_s7 = inlined_call_operand.vmem [shape: bf16[12,72], index: 7, kind: input, shape index: {}]   ;;  %s13498_s8 = inlined_call_operand.vmem [shape: f32[1,8], index: 8, kind: input, shape index: {}]   ;;  %s13499_s9 = inlined_call_operand.vmem [shape: f32[1,20], index: 9, kind: input, shape index: {}]   ;;  %s13500_s10 = inlined_call_operand.vmem [shape: f32[1,20], index: 10, kind: input, shape index: {}]   ;;  %s13501_s11 = inlined_call_operand.vmem [shape: bf16[20,72], index: 11, kind: input, shape index: {}]   ;;  %s13502_s12 = inlined_call_operand.vmem [shape: f32[1,8], index: 12, kind: input, shape index: {}]   ;;  %s13503_s13 = inlined_call_operand.vmem [shape: f32[2,256,24], index: 13, kind: output, shape index: {}]  }
   0x1 LB: > { %s7707_s26 = sadd.s32 4294967295, %s8320_s25   ;;  %p7711_p0 = scmp.ge.s32.totalorder %s8320_s25, 1  ;;  %s8320_s25 = sphi %s8404_s25, %s23_s25  }
   0x2   : > { %p387_p1 = scmp.lt.s32.totalorder %s8320_s25, 3 }
   0x4   : > { %p388_p2 = pnand %p7711_p0, %p387_p1 }
   0x6   : > { %391 = sbr.rel (%p388_p2) target bundleno = 2932 (0xb74), region = 72 }
   0xd   : > { %v643_v0 = vld [vmem:[%s13493_s3] sm:$0x3]  ;;  %vm693_vm0 = vcmask 1041408   ;;  %p431_p3 = scmp.lt.s32.totalorder %s7707_s26, 1  ;;  %vm442_vm1 = vcmask 588800   ;;  %v8322_v3 = vmov 0.0  }
   0xe   : > { %8133 = vmatprep.subr.msk.bf16.mxu0 %vm693_vm0, %v643_v0  ;;  %v695_v1 = vsel %vm693_vm0, %v643_v0, 0  ;;  %8134 = vmatprep.subr.msk.bf16.mxu1 %vm693_vm0, %v643_v0  ;;  %v8423_v2 = vld [vmem:[%s13491_s1] ss:$0 sm:$0xff]  ;;  %443 = vst.msk [vmem:[#allocation2] sm:$0xff] %vm442_vm1, %v8322_v3  ;;  %444 = vst.msk [vmem:[#allocation2 + $0x8] sm:$0xff] %vm442_vm1, %v8322_v3  ;;  %vm644_vm2 = vcmask 31744  }
   0xf   : > { %7898 = vmatpush3.bf16.msra.mxu0 %v695_v1  ;;  %s14771_s26 = smov (!%p431_p3, %s7707_s26), 1  ;;  %8068 = vmatpush3.bf16.msra.mxu1 %v695_v1  ;;  %448 = vst.msk [vmem:[#allocation2 + $0x198] sm:$0xff] %vm442_vm1, %v8322_v3  ;;  %449 = vst.msk [vmem:[#allocation2 + $0x1a0] sm:$0xff] %vm442_vm1, %v8322_v3  ;;  %v8444_v4 = vld [vmem:[%s13492_s2] ss:$0 sm:$0xff]  ;;  %s8323_s20 = smov 120  }
  0x10   : > { %s7810_s14 = sshll.u32 %s14771_s26, 8  ;;  %vm445_vm3 = vcmask 582656   ;;  %vm452_vm4 = vcmask 581632   ;;  %s8324_s21 = smov 112   ;;  %vm2896_vm5 = vcmask 1043456   ;;  %vm2530_vm6 = vcmask 64512  }
  0x11   : > { %s8439_s17 = scalar_lea.vmem %s13490_s0, %s7810_s14  ;;  %446 = vst.msk [vmem:[#allocation2 + $0x10] sm:$0x3] %vm445_vm3, %v8322_v3  ;;  %450 = vst.msk [vmem:[#allocation2 + $0x1a8] sm:$0x3] %vm445_vm3, %v8322_v3  ;;  %s8325_s22 = smov 104   ;;  %vm5393_vm7 = vcmask 1045504  }
  0x12   : > { %v485_v5 = vld [vmem:[%s8439_s17] sm:$0xff]  ;;  %v486_v6 = vld [vmem:[%s8439_s17 + $0x8] sm:$0xff]  ;;  %v487_v7 = vld [vmem:[%s8439_s17 + $0x10] sm:$0xff]  ;;  %454 = vst.msk [vmem:[#allocation2 + $0x30] sm:$0x1] %vm452_vm4, %v8322_v3  ;;  %s8326_s23 = smov 96  }
  0x13   : > { %v525_v8 = vmul.f32 %v8423_v2, %v485_v5  ;;  %v526_v9 = vmul.f32 %v8423_v2, %v486_v6  ;;  %v488_v10 = vld [vmem:[%s8439_s17 + $0x18] sm:$0xff]  ;;  %v527_v11 = vmul.f32 %v8423_v2, %v487_v7  ;;  %v501_v17 = vld [vmem:[%s8439_s17 + $0x80] sm:$0xff]  ;;  %v502_v20 = vld [vmem:[%s8439_s17 + $0x88] sm:$0xff]  ;;  %453 = vst.msk [vmem:[#allocation2 + $0x18] sm:$0x1] %vm452_vm4, %v8322_v3  ;;  %s8327_s24 = smov 88  }
  0x14   : > { %v528_v12 = vmul.f32 %v8423_v2, %v488_v10  ;;  %v541_v24 = vmul.f32 %v8423_v2, %v501_v17  ;;  %v503_v25 = vld [vmem:[%s8439_s17 + $0x90] sm:$0xff]  ;;  %v504_v26 = vld [vmem:[%s8439_s17 + $0x98] sm:$0xff]  ;;  %v542_v28 = vmul.f32 %v8423_v2, %v502_v20  ;;  %v489_v29 = vld [vmem:[%s8439_s17 + $0x20] sm:$0xff]  ;;  %455 = vst.msk [vmem:[#allocation2 + $0x48] sm:$0x1] %vm452_vm4, %v8322_v3  ;;  %s8328_s27 = smov 80  }
  0x15   : > { %v563_v13 = vadd.f32 %v8444_v4, %v525_v8  ;;  %v564_v14 = vadd.f32 %v8444_v4, %v526_v9  ;;  %v565_v15 = vadd.f32 %v8444_v4, %v527_v11  ;;  %v490_v30 = vld [vmem:[%s8439_s17 + $0x28] sm:$0xff]  ;;  %v491_v31 = vld [vmem:[%s8439_s17 + $0x30] sm:$0xff]  ;;  %v492_v33 = vld [vmem:[%s8439_s17 + $0x38] sm:$0xff]  ;;  %v543_v35 = vmul.f32 %v8423_v2, %v503_v25  ;;  %456 = vst.msk [vmem:[#allocation2 + $0x60] sm:$0x1] %vm452_vm4, %v8322_v3  ;;  %s8329_s28 = smov 72  }
  0x16   : > { %v566_v16 = vadd.f32 %v8444_v4, %v528_v12  ;;  %v579_v32 = vadd.f32 %v8444_v4, %v541_v24  ;;  %v580_v34 = vadd.f32 %v8444_v4, %v542_v28  ;;  %v544_v36 = vmul.f32 %v8423_v2, %v504_v26  ;;  %v505_v37 = vld [vmem:[%s8439_s17 + $0xa0] sm:$0xff]  ;;  %v506_v47 = vld [vmem:[%s8439_s17 + $0xa8] sm:$0xff]  ;;  %v507_v52 = vld [vmem:[%s8439_s17 + $0xb0] sm:$0xff]  ;;  %457 = vst.msk [vmem:[#allocation2 + $0x78] sm:$0x1] %vm452_vm4, %v8322_v3  ;;  %s8330_s29 = smov 64  }
  0x17   : > { %v595_v18 = vmax.f32 %v563_v13, 0.0  ;;  %v596_v19 = vmax.f32 %v564_v14, 0.0  ;;  %v597_v21 = vmax.f32 %v565_v15, 0.0  ;;  %v954_v38 = vld [vmem:[#allocation2 + $0x1] sm:$0xff]  ;;  %v529_v40 = vmul.f32 %v8423_v2, %v489_v29  ;;  %v508_v57 = vld [vmem:[%s8439_s17 + $0xb8] sm:$0xff]  ;;  %v495_v7 = vld [vmem:[%s8439_s17 + $0x50] sm:$0xff] }
  0x18   : > { %v598_v22 = vmax.f32 %v566_v16, 0.0  ;;  %v611_v39 = vmax.f32 %v579_v32, 0.0  ;;  %v530_v41 = vmul.f32 %v8423_v2, %v490_v30  ;;  %v531_v42 = vmul.f32 %v8423_v2, %v491_v31  ;;  %1018 = vrot.lane.b32.xlu0 %v954_v38, %s8323_s20  ;;  %v493_v58 = vld [vmem:[%s8439_s17 + $0x40] sm:$0xff]  ;;  %v494_v63 = vld [vmem:[%s8439_s17 + $0x48] sm:$0xff]  ;;  %v496_v12 = vld [vmem:[%s8439_s17 + $0x58] sm:$0xff]  ;;  %s13507_s15 = smov 124  }
  0x19   : > { %v627_v23 = vpack.c.bf16 %v596_v19, %v595_v18  ;;  %v612_v43 = vmax.f32 %v580_v34, 0.0  ;;  %v581_v44 = vadd.f32 %v8444_v4, %v543_v35  ;;  %v582_v45 = vadd.f32 %v8444_v4, %v544_v36  ;;  %v509_v13 = vld [vmem:[%s8439_s17 + $0xc0] sm:$0xff]  ;;  %v512_v28 = vld [vmem:[%s8439_s17 + $0xd8] sm:$0xff]  ;;  %v498_v38 = vld [vmem:[%s8439_s17 + $0x68] sm:$0xff]  ;;  %458 = vst.msk [vmem:[#allocation2 + $0x90] sm:$0x1] %vm452_vm4, %v8322_v3 }
  0x1a   : > { %v628_v27 = vpack.c.bf16 %v598_v22, %v597_v21  ;;  %v532_v46 = vmul.f32 %v8423_v2, %v492_v33  ;;  %v567_v48 = vadd.f32 %v8444_v4, %v529_v40  ;;  %v568_v49 = vadd.f32 %v8444_v4, %v530_v41  ;;  %v510_v22 = vld [vmem:[%s8439_s17 + $0xc8] sm:$0xff]  ;;  %459 = vst.msk [vmem:[#allocation2 + $0xa8] sm:$0x1] %vm452_vm4, %v8322_v3  ;;  %s8332_s26 = smov 8  }
  0x1b   : > { %7899 = vmatprep.mubr.msk.bf16.mxu0 %vm644_vm2, %v627_v23  ;;  %v569_v50 = vadd.f32 %v8444_v4, %v531_v42  ;;  %v545_v51 = vmul.f32 %v8423_v2, %v505_v37  ;;  %v635_v53 = vpack.c.bf16 %v612_v43, %v611_v39  ;;  %v613_v54 = vmax.f32 %v581_v44, 0.0  ;;  %v497_v37 = vld [vmem:[%s8439_s17 + $0x60] sm:$0xff]  ;;  %v499_v43 = vld [vmem:[%s8439_s17 + $0x70] sm:$0xff]  ;;  %v500_v44 = vld [vmem:[%s8439_s17 + $0x78] sm:$0xff]  ;;  %460 = vst.msk [vmem:[#allocation2 + $0xc0] sm:$0x1] %vm452_vm4, %v8322_v3 }
  0x1c   : > { %7900 = vmatmul.mubr.msk.bf16.vlgmr.msra.gmra.mrb[0].mxu0 %vm644_vm2, %v628_v27  ;;  %v614_v55 = vmax.f32 %v582_v45, 0.0  ;;  %v570_v56 = vadd.f32 %v8444_v4, %v532_v46  ;;  %v599_v59 = vmax.f32 %v567_v48, 0.0  ;;  %v600_v60 = vmax.f32 %v568_v49, 0.0  ;;  %v511_v27 = vld [vmem:[%s8439_s17 + $0xd0] sm:$0xff]  ;;  %461 = vst.msk [vmem:[#allocation2 + $0xd8] sm:$0x1] %vm452_vm4, %v8322_v3 }
  0x1d   : > { %v601_v61 = vmax.f32 %v569_v50, 0.0  ;;  %v546_v62 = vmul.f32 %v8423_v2, %v506_v47  ;;  %7915 = vmatprep.mubr.msk.bf16.mxu1 %vm644_vm2, %v635_v53  ;;  %v583_v5 = vadd.f32 %v8444_v4, %v545_v51  ;;  %v547_v6 = vmul.f32 %v8423_v2, %v507_v52  ;;  %v513_v53 = vld [vmem:[%s8439_s17 + $0xe0] sm:$0xff]  ;;  %462 = vst.msk [vmem:[#allocation2 + $0xf0] sm:$0x1] %vm452_vm4, %v8322_v3 }
  0x1e   : > { %v636_v0 = vpack.c.bf16 %v614_v55, %v613_v54  ;;  %v602_v1 = vmax.f32 %v570_v56, 0.0  ;;  %v629_v8 = vpack.c.bf16 %v600_v60, %v599_v59  ;;  %v548_v10 = vmul.f32 %v8423_v2, %v508_v57  ;;  %463 = vst.msk [vmem:[#allocation2 + $0x108] sm:$0x1] %vm452_vm4, %v8322_v3  ;;  %464 = vst.msk [vmem:[#allocation2 + $0x120] sm:$0x1] %vm452_vm4, %v8322_v3 }
  0x1f   : > { %v584_v9 = vadd.f32 %v8444_v4, %v546_v62  ;;  %v533_v11 = vmul.f32 %v8423_v2, %v493_v58  ;;  %v615_v15 = vmax.f32 %v583_v5, 0.0  ;;  %v585_v16 = vadd.f32 %v8444_v4, %v547_v6  ;;  %v514_v58 = vld [vmem:[%s8439_s17 + $0xe8] sm:$0xff]  ;;  %465 = vst.msk [vmem:[#allocation2 + $0x138] sm:$0x1] %vm452_vm4, %v8322_v3  ;;  %466 = vst.msk [vmem:[#allocation2 + $0x150] sm:$0x1] %vm452_vm4, %v8322_v3 }
  0x20   : > { %7916 = vmatmul.mubr.msk.bf16.vlgmr.msra.gmra.mrb[0].mxu1 %vm644_vm2, %v636_v0  ;;  %v630_v14 = vpack.c.bf16 %v602_v1, %v601_v61  ;;  %v534_v17 = vmul.f32 %v8423_v2, %v494_v63  ;;  %7903 = vmatprep.mubr.msk.bf16.mxu0 %vm644_vm2, %v629_v8  ;;  %v586_v19 = vadd.f32 %v8444_v4, %v548_v10  ;;  %v515_v63 = vld [vmem:[%s8439_s17 + $0xf0] sm:$0xff]  ;;  %vm5072_vm8 = vcmask 130112  }
  0x21   : > { %v616_v18 = vmax.f32 %v584_v9, 0.0  ;;  %v571_v20 = vadd.f32 %v8444_v4, %v533_v11  ;;  %v535_v21 = vmul.f32 %v8423_v2, %v495_v7  ;;  %v617_v23 = vmax.f32 %v585_v16, 0.0  ;;  %v516_v7 = vld [vmem:[%s8439_s17 + $0xf8] sm:$0xff]  ;;  %467 = vst.msk [vmem:[#allocation2 + $0x168] sm:$0x1] %vm452_vm4, %v8322_v3 }
  0x22   : > { %v572_v24 = vadd.f32 %v8444_v4, %v534_v17  ;;  %v536_v25 = vmul.f32 %v8423_v2, %v496_v12  ;;  %v549_v26 = vmul.f32 %v8423_v2, %v509_v13  ;;  %v618_v30 = vmax.f32 %v586_v19, 0.0  ;;  %468 = vst.msk [vmem:[#allocation2 + $0x180] sm:$0x1] %vm452_vm4, %v8322_v3  ;;  %469 = vst.msk [vmem:[#allocation2 + $0x29] sm:$0x1] %vm452_vm4, %v8322_v3 }
  0x23   : > { %v637_v29 = vpack.c.bf16 %v616_v18, %v615_v15  ;;  %v603_v31 = vmax.f32 %v571_v20, 0.0  ;;  %v573_v32 = vadd.f32 %v8444_v4, %v535_v21  ;;  %v550_v35 = vmul.f32 %v8423_v2, %v510_v22  ;;  %470 = vst.msk [vmem:[#allocation2 + $0x41] sm:$0x1] %vm452_vm4, %v8322_v3  ;;  %471 = vst.msk [vmem:[#allocation2 + $0x59] sm:$0x1] %vm452_vm4, %v8322_v3 }
  0x24   : > { %7904 = vmatmul.mubr.msk.bf16.gmra.mrb[4].mxu0 %vm644_vm2, %v630_v14  ;;  %v604_v33 = vmax.f32 %v572_v24, 0.0  ;;  %v574_v34 = vadd.f32 %v8444_v4, %v536_v25  ;;  %v587_v36 = vadd.f32 %v8444_v4, %v549_v26  ;;  %v638_v39 = vpack.c.bf16 %v618_v30, %v617_v23  ;;  %472 = vst.msk [vmem:[#allocation2 + $0x71] sm:$0x1] %vm452_vm4, %v8322_v3 }
  0x25   : > { %7919 = vmatprep.mubr.msk.bf16.mxu1 %vm644_vm2, %v637_v29  ;;  %v605_v40 = vmax.f32 %v573_v32, 0.0  ;;  %v551_v41 = vmul.f32 %v8423_v2, %v511_v27  ;;  %v552_v42 = vmul.f32 %v8423_v2, %v512_v28  ;;  %v588_v47 = vadd.f32 %v8444_v4, %v550_v35  ;;  %473 = vst.msk [vmem:[#allocation2 + $0x89] sm:$0x1] %vm452_vm4, %v8322_v3  ;;  %v1147_v28 = vld [vmem:[#allocation2 + $0xa] sm:$0xff] }
  0x26   : > { %v631_v45 = vpack.c.bf16 %v604_v33, %v603_v31  ;;  %v606_v46 = vmax.f32 %v574_v34, 0.0  ;;  %v619_v48 = vmax.f32 %v587_v36, 0.0  ;;  %v537_v51 = vmul.f32 %v8423_v2, %v497_v37  ;;  %474 = vst.msk [vmem:[#allocation2 + $0xa1] sm:$0x1] %vm452_vm4, %v8322_v3  ;;  %475 = vst.msk [vmem:[#allocation2 + $0xb9] sm:$0x1] %vm452_vm4, %v8322_v3  ;;  %1212 = vrot.lane.b32.xlu1 %v1147_v28, %s8324_s21 }
  0x27   : > { %v589_v49 = vadd.f32 %v8444_v4, %v551_v41  ;;  %v590_v50 = vadd.f32 %v8444_v4, %v552_v42  ;;  %v538_v52 = vmul.f32 %v8423_v2, %v498_v38  ;;  %v620_v55 = vmax.f32 %v588_v47, 0.0  ;;  %476 = vst.msk [vmem:[#allocation2 + $0xd1] sm:$0x1] %vm452_vm4, %v8322_v3  ;;  %477 = vst.msk [vmem:[#allocation2 + $0xe9] sm:$0x1] %vm452_vm4, %v8322_v3 }
  0x28   : > { %7920 = vmatmul.mubr.msk.bf16.gmra.mrb[4].mxu1 %vm644_vm2, %v638_v39  ;;  %7907 = vmatprep.mubr.msk.bf16.mxu0 %vm644_vm2, %v631_v45  ;;  %v632_v54 = vpack.c.bf16 %v606_v46, %v605_v40  ;;  %v539_v56 = vmul.f32 %v8423_v2, %v499_v43  ;;  %v540_v57 = vmul.f32 %v8423_v2, %v500_v44  ;;  %vm5398_vm9 = vcmask 130048  }
  0x29   : > { %v621_v59 = vmax.f32 %v589_v49, 0.0  ;;  %v622_v60 = vmax.f32 %v590_v50, 0.0  ;;  %v575_v61 = vadd.f32 %v8444_v4, %v537_v51  ;;  %v576_v62 = vadd.f32 %v8444_v4, %v538_v52  ;;  %478 = vst.msk [vmem:[#allocation2 + $0x101] sm:$0x1] %vm452_vm4, %v8322_v3  ;;  %479 = vst.msk [vmem:[#allocation2 + $0x119] sm:$0x1] %vm452_vm4, %v8322_v3 }
  0x2a   : > { %v639_v0 = vpack.c.bf16 %v620_v55, %v619_v48  ;;  %v577_v1 = vadd.f32 %v8444_v4, %v539_v56  ;;  %v578_v5 = vadd.f32 %v8444_v4, %v540_v57  ;;  %v553_v6 = vmul.f32 %v8423_v2, %v513_v53  ;;  %480 = vst.msk [vmem:[#allocation2 + $0x131] sm:$0x1] %vm452_vm4, %v8322_v3 }
  0x2b   : > { %v640_v8 = vpack.c.bf16 %v622_v60, %v621_v59  ;;  %v607_v9 = vmax.f32 %v575_v61, 0.0  ;;  %v608_v10 = vmax.f32 %v576_v62, 0.0  ;;  %v554_v11 = vmul.f32 %v8423_v2, %v514_v58  ;;  %481 = vst.msk [vmem:[#allocation2 + $0x149] sm:$0x1] %vm452_vm4, %v8322_v3  ;;  %482 = vst.msk [vmem:[#allocation2 + $0x161] sm:$0x1] %vm452_vm4, %v8322_v3 }
  0x2c   : > { %7908 = vmatmul.mubr.msk.bf16.gmra.mrb[8].mxu0 %vm644_vm2, %v632_v54  ;;  %7923 = vmatprep.mubr.msk.bf16.mxu1 %vm644_vm2, %v639_v0  ;;  %v609_v12 = vmax.f32 %v577_v1, 0.0  ;;  %v610_v13 = vmax.f32 %v578_v5, 0.0  ;;  %v591_v14 = vadd.f32 %v8444_v4, %v553_v6  ;;  %v555_v15 = vmul.f32 %v8423_v2, %v515_v63  ;;  %483 = vst.msk [vmem:[#allocation2 + $0x179] sm:$0x1] %vm452_vm4, %v8322_v3 }
  0x2d   : > { %v633_v16 = vpack.c.bf16 %v608_v10, %v607_v9  ;;  %v592_v17 = vadd.f32 %v8444_v4, %v554_v11  ;;  %v556_v18 = vmul.f32 %v8423_v2, %v516_v7  ;;  %v955_v2 = vld [vmem:[#allocation2 + $0x9] sm:$0xff]  ;;  %484 = vst.msk [vmem:[#allocation2 + $0x191] sm:$0x1] %vm452_vm4, %v8322_v3  ;;  %vm7619_vm10 = vcmask 195712  }
  0x2e   : > { %v634_v19 = vpack.c.bf16 %v610_v13, %v609_v12  ;;  %v623_v20 = vmax.f32 %v591_v14, 0.0  ;;  %v593_v21 = vadd.f32 %v8444_v4, %v555_v15  ;;  %1020 = vrot.lane.b32.xlu0 %v955_v2, %s8323_s20 }
  0x2f   : > { %7911 = vmatprep.mubr.msk.bf16.mxu0 %vm644_vm2, %v633_v16  ;;  %v624_v22 = vmax.f32 %v592_v17, 0.0  ;;  %v594_v23 = vadd.f32 %v8444_v4, %v556_v18  ;;  %v1146_v4 = vld [vmem:[#allocation2 + $0x2] sm:$0xff] }
  0x30   : > { %7924 = vmatmul.mubr.msk.bf16.gmra.mrb[8].mxu1 %vm644_vm2, %v640_v8  ;;  %v625_v24 = vmax.f32 %v593_v21, 0.0 }
  0x31   : > { %v641_v25 = vpack.c.bf16 %v624_v22, %v623_v20  ;;  %v626_v26 = vmax.f32 %v594_v23, 0.0 }
  0x32   : > { %1210 = vrot.lane.b32.xlu0 %v1146_v4, %s8324_s21 }
  0x33   : > { %7927 = vmatprep.mubr.msk.bf16.mxu1 %vm644_vm2, %v641_v25  ;;  %v642_v27 = vpack.c.bf16 %v626_v26, %v625_v24 }
  0x34   : > { %7912 = vmatmul.mubr.msk.bf16.gmra.mrb[12].mxu0 %vm644_vm2, %v634_v19 }
  0x38   : > { %7928 = vmatmul.mubr.msk.bf16.gmra.mrb[12].mxu1 %vm644_vm2, %v642_v27 }
  0xef   : > { %v7901_v29 = vpop.f32.mrb[0].mxu0 }
  0xf0   : > { %860 = vst.msk [vmem:[#allocation2 + $0x31] sm:$0xff] %vm442_vm1, %v7901_v29  ;;  %v731_v30 = vpop.f32.mrb[1].mxu0 }
  0xf1   : > { %858 = vst.msk [vmem:[#allocation2 + $0x19] sm:$0xff] %vm442_vm1, %v731_v30  ;;  %v7902_v31 = vpop.f32.mrb[2].mxu0 }
  0xf2   : > { %861 = vst.msk [vmem:[#allocation2 + $0x39] sm:$0xff] %vm442_vm1, %v7902_v31  ;;  %v734_v32 = vpop.f32.mrb[3].mxu0 }
  0xf3   : > { %859 = vst.msk [vmem:[#allocation2 + $0x21] sm:$0xff] %vm442_vm1, %v734_v32  ;;  %v7917_v3 = vpop.f32.mrb[0].mxu1  ;;  %v8737_v32 = vpop.permute.xlu0 %1018 }
  0xf4   : > { %876 = vst.msk [vmem:[#allocation2 + $0xf1] sm:$0xff] %vm442_vm1, %v7917_v3  ;;  %v795_v34 = vpop.f32.mrb[1].mxu1  ;;  %13545 = vst [vmem:[#allocation3_spill] sm:$0xff] %v8737_v32 }
  0xf5   : > { %874 = vst.msk [vmem:[#allocation2 + $0xd9] sm:$0xff] %vm442_vm1, %v795_v34  ;;  %v7918_v36 = vpop.f32.mrb[2].mxu1 }
  0xf6   : > { %877 = vst.msk [vmem:[#allocation2 + $0xf9] sm:$0xff] %vm442_vm1, %v7918_v36  ;;  %v798_v38 = vpop.f32.mrb[3].mxu1 }
  0xf7   : > { %v958_v33 = vld [vmem:[#allocation2 + $0x31] sm:$0xff]  ;;  %v7905_v37 = vpop.f32.mrb[4].mxu0  ;;  %875 = vst.msk [vmem:[#allocation2 + $0xe1] sm:$0xff] %vm442_vm1, %v798_v38  ;;  %v8745_v34 = vpop.permute.xlu0 %1020 }
  0xf8   : > { %1026 = vrot.lane.b32.xlu0 %v958_v33, %s8323_s20  ;;  %v8634_v35 = vld [vmem:[#allocation2 + $0x19] sm:$0xff]  ;;  %864 = vst.msk [vmem:[#allocation2 + $0x61] sm:$0xff] %vm442_vm1, %v7905_v37  ;;  %v747_v39 = vpop.f32.mrb[5].mxu0  ;;  %v1340_v51 = vld [vmem:[#allocation2 + $0x30] sm:$0xff]  ;;  %13546 = vst [vmem:[#allocation4_spill] sm:$0xff] %v8745_v34  ;;  %v8749_v37 = vpop.permute.xlu1 %1212 }
  0xf9   : > { %1022 = vrot.lane.b32.xlu1 %v8634_v35, %s8323_s20  ;;  %862 = vst.msk [vmem:[#allocation2 + $0x49] sm:$0xff] %vm442_vm1, %v747_v39  ;;  %v7906_v40 = vpop.f32.mrb[6].mxu0  ;;  %v959_v41 = vld [vmem:[#allocation2 + $0x39] sm:$0xff]  ;;  %13547 = vst [vmem:[#allocation5_spill] sm:$0xff] %v8749_v37 }
  0xfa   : > { %865 = vst.msk [vmem:[#allocation2 + $0x69] sm:$0xff] %vm442_vm1, %v7906_v40  ;;  %v750_v42 = vpop.f32.mrb[7].mxu0  ;;  %v1151_v54 = vld [vmem:[#allocation2 + $0x3a] sm:$0xff]  ;;  %v1150_v7 = vld [vmem:[#allocation2 + $0x32] sm:$0xff]  ;;  %v1149_v8 = vld [vmem:[#allocation2 + $0x22] sm:$0xff] }
  0xfb   : > { %863 = vst.msk [vmem:[#allocation2 + $0x51] sm:$0xff] %vm442_vm1, %v750_v42  ;;  %v974_v43 = vld [vmem:[#allocation2 + $0xf1] sm:$0xff]  ;;  %v7921_v44 = vpop.f32.mrb[4].mxu1  ;;  %v957_v5 = vld [vmem:[#allocation2 + $0x21] sm:$0xff]  ;;  %v8752_v38 = vpop.permute.xlu0 %1210 }
  0xfc   : > { %1058 = vrot.lane.b32.xlu0 %v974_v43, %s8323_s20  ;;  %880 = vst.msk [vmem:[#allocation2 + $0x121] sm:$0xff] %vm442_vm1, %v7921_v44  ;;  %v811_v45 = vpop.f32.mrb[5].mxu1  ;;  %v1356_v55 = vld [vmem:[#allocation2 + $0xf0] sm:$0xff]  ;;  %v1341_v61 = vld [vmem:[#allocation2 + $0x38] sm:$0xff]  ;;  %v1339_v11 = vld [vmem:[#allocation2 + $0x20] sm:$0xff] }
  0xfd   : > { %1028 = vrot.lane.b32.xlu1 %v959_v41, %s8323_s20  ;;  %v975_v46 = vld [vmem:[#allocation2 + $0xf9] sm:$0xff]  ;;  %878 = vst.msk [vmem:[#allocation2 + $0x109] sm:$0xff] %vm442_vm1, %v811_v45  ;;  %v7922_v47 = vpop.f32.mrb[6].mxu1  ;;  %13548 = vst [vmem:[#allocation6_spill] sm:$0xff] %v8752_v38 }
  0xfe   : > { %881 = vst.msk [vmem:[#allocation2 + $0x129] sm:$0xff] %vm442_vm1, %v7922_v47  ;;  %v814_v49 = vpop.f32.mrb[7].mxu1  ;;  %v8660_v58 = vld [vmem:[#allocation2 + $0xfa] sm:$0xff]  ;;  %v8684_v9 = vld [vmem:[#allocation2 + $0xf2] sm:$0xff]  ;;  %v8688_v10 = vld [vmem:[#allocation2 + $0xe2] sm:$0xff] }
  0xff   : > { %v7909_v48 = vpop.f32.mrb[8].mxu0  ;;  %879 = vst.msk [vmem:[#allocation2 + $0x111] sm:$0xff] %vm442_vm1, %v814_v49  ;;  %v1357_v62 = vld [vmem:[#allocation2 + $0xf8] sm:$0xff]  ;;  %v973_v6 = vld [vmem:[#allocation2 + $0xe1] sm:$0xff] }
 0x100   : > { %868 = vst.msk [vmem:[#allocation2 + $0x91] sm:$0xff] %vm442_vm1, %v7909_v48  ;;  %v763_v50 = vpop.f32.mrb[9].mxu0  ;;  %1406 = vrot.lane.b32.xlu0 %v1340_v51, %s8325_s22  ;;  %v972_v63 = vld [vmem:[#allocation2 + $0xd9] sm:$0xff]  ;;  %v962_v17 = vld [vmem:[#allocation2 + $0x61] sm:$0xff]  ;;  %v960_v30 = vld [vmem:[#allocation2 + $0x49] sm:$0xff] }
 0x101   : > { %1060 = vrot.lane.b32.xlu1 %v975_v46, %s8323_s20  ;;  %866 = vst.msk [vmem:[#allocation2 + $0x79] sm:$0xff] %vm442_vm1, %v763_v50  ;;  %v7910_v52 = vpop.f32.mrb[10].mxu0  ;;  %v1338_v0 = vld [vmem:[#allocation2 + $0x18] sm:$0xff]  ;;  %v1355_v13 = vld [vmem:[#allocation2 + $0xe0] sm:$0xff]  ;;  %v963_v25 = vld [vmem:[#allocation2 + $0x69] sm:$0xff] }
 0x102   : > { %869 = vst.msk [vmem:[#allocation2 + $0x99] sm:$0xff] %vm442_vm1, %v7910_v52  ;;  %v766_v53 = vpop.f32.mrb[11].mxu0  ;;  %v1354_v1 = vld [vmem:[#allocation2 + $0xd8] sm:$0xff]  ;;  %v8712_v24 = vld [vmem:[#allocation2 + $0x60] sm:$0xff]  ;;  %v8721_v4 = vld [vmem:[#allocation2 + $0x6a] sm:$0xff] }
 0x103   : > { %867 = vst.msk [vmem:[#allocation2 + $0x81] sm:$0xff] %vm442_vm1, %v766_v53  ;;  %v7925_v56 = vpop.f32.mrb[8].mxu1  ;;  %v1148_v12 = vld [vmem:[#allocation2 + $0x1a] sm:$0xff]  ;;  %v8731_v29 = vld [vmem:[#allocation2 + $0x68] sm:$0xff]  ;;  %v961_v36 = vld [vmem:[#allocation2 + $0x51] sm:$0xff] }
 0x104   : > { %1438 = vrot.lane.b32.xlu0 %v1356_v55, %s8325_s22  ;;  %884 = vst.msk [vmem:[#allocation2 + $0x151] sm:$0xff] %vm442_vm1, %v7925_v56  ;;  %v827_v57 = vpop.f32.mrb[9].mxu1  ;;  %v8696_v14 = vld [vmem:[#allocation2 + $0xda] sm:$0xff]  ;;  %v976_v3 = vld [vmem:[#allocation2 + $0x109] sm:$0xff]  ;;  %v8761_v42 = vld [vmem:[#allocation2 + $0x52] sm:$0xff] }
 0x105   : > { %1220 = vrot.lane.b32.xlu1 %v1151_v54, %s8324_s21  ;;  %882 = vst.msk [vmem:[#allocation2 + $0x139] sm:$0xff] %vm442_vm1, %v827_v57  ;;  %v7926_v59 = vpop.f32.mrb[10].mxu1  ;;  %v978_v21 = vld [vmem:[#allocation2 + $0x121] sm:$0xff]  ;;  %v979_v2 = vld [vmem:[#allocation2 + $0x129] sm:$0xff] }
 0x106   : > { %885 = vst.msk [vmem:[#allocation2 + $0x159] sm:$0xff] %vm442_vm1, %v7926_v59  ;;  %v830_v60 = vpop.f32.mrb[11].mxu1  ;;  %v1360_v27 = vld [vmem:[#allocation2 + $0x120] sm:$0xff]  ;;  %v8726_v28 = vld [vmem:[#allocation2 + $0x12a] sm:$0xff]  ;;  %v8771_v45 = vld [vmem:[#allocation2 + $0x112] sm:$0xff] }
 0x107   : > { %883 = vst.msk [vmem:[#allocation2 + $0x141] sm:$0xff] %vm442_vm1, %v830_v60  ;;  %v7913_v15 = vpop.f32.mrb[12].mxu0  ;;  %v1361_v31 = vld [vmem:[#allocation2 + $0x128] sm:$0xff]  ;;  %v977_v39 = vld [vmem:[#allocation2 + $0x111] sm:$0xff] }
 0x108   : > { %1598 = vrot.lane.b32.xlu0 %v958_v33, %s8326_s23  ;;  %872 = vst.msk [vmem:[#allocation2 + $0xc1] sm:$0xff] %vm442_vm1, %v7913_v15  ;;  %v779_v16 = vpop.f32.mrb[13].mxu0  ;;  %v8741_v33 = vld [vmem:[#allocation2 + $0x48] sm:$0xff]  ;;  %v8783_v49 = vld [vmem:[#allocation2 + $0x50] sm:$0xff] }
 0x109   : > { %1252 = vrot.lane.b32.xlu1 %v8660_v58, %s8324_s21  ;;  %870 = vst.msk [vmem:[#allocation2 + $0xa9] sm:$0xff] %vm442_vm1, %v779_v16  ;;  %v7914_v18 = vpop.f32.mrb[14].mxu0  ;;  %v8777_v47 = vld [vmem:[#allocation2 + $0x122] sm:$0xff]  ;;  %v8789_v51 = vld [vmem:[#allocation2 + $0x4a] sm:$0xff] }
 0x10a   : > { %873 = vst.msk [vmem:[#allocation2 + $0xc9] sm:$0xff] %vm442_vm1, %v7914_v18  ;;  %v782_v19 = vpop.f32.mrb[15].mxu0  ;;  %v8795_v53 = vld [vmem:[#allocation2 + $0x110] sm:$0xff] }
 0x10b   : > { %v7929_v20 = vpop.f32.mrb[12].mxu1  ;;  %871 = vst.msk [vmem:[#allocation2 + $0xb1] sm:$0xff] %vm442_vm1, %v782_v19  ;;  %v8801_v55 = vld [vmem:[#allocation2 + $0x10a] sm:$0xff] }
 0x10c   : > { %1630 = vrot.lane.b32.xlu0 %v974_v43, %s8326_s23  ;;  %888 = vst.msk [vmem:[#allocation2 + $0x181] sm:$0xff] %vm442_vm1, %v7929_v20  ;;  %v843_v22 = vpop.f32.mrb[13].mxu1  ;;  %v8765_v43 = vld [vmem:[#allocation2 + $0x62] sm:$0xff]  ;;  %v966_v57 = vld [vmem:[#allocation2 + $0x91] sm:$0xff] }
 0x10d   : > { %1408 = vrot.lane.b32.xlu1 %v1341_v61, %s8325_s22  ;;  %886 = vst.msk [vmem:[#allocation2 + $0x169] sm:$0xff] %vm442_vm1, %v843_v22  ;;  %v7930_v23 = vpop.f32.mrb[14].mxu1  ;;  %v982_v61 = vld [vmem:[#allocation2 + $0x151] sm:$0xff]  ;;  %v8861_v22 = vld [vmem:[#allocation2 + $0x79] sm:$0xff] }
 0x10e   : > { %889 = vst.msk [vmem:[#allocation2 + $0x189] sm:$0xff] %vm442_vm1, %v7930_v23  ;;  %v846_v26 = vpop.f32.mrb[15].mxu1  ;;  %v8855_v20 = vld [vmem:[#allocation2 + $0x98] sm:$0xff] }
 0x10f   : > { %887 = vst.msk [vmem:[#allocation2 + $0x171] sm:$0xff] %vm442_vm1, %v846_v26 }
 0x110   : > { %1054 = vrot.lane.b32.xlu0 %v972_v63, %s8323_s20 }
 0x111   : > { %1440 = vrot.lane.b32.xlu1 %v1357_v62, %s8325_s22 }
 0x112   : > { %v9045_v37 = vld [vmem:[#allocation2 + $0xb1] sm:$0xff] }
 0x114   : > { %1402 = vrot.lane.b32.xlu0 %v1338_v0, %s8325_s22  ;;  %v8819_v0 = vld [vmem:[#allocation2 + $0x90] sm:$0xff] }
 0x115   : > { %1600 = vrot.lane.b32.xlu1 %v959_v41, %s8326_s23 }
 0x118   : > { %1434 = vrot.lane.b32.xlu0 %v1354_v1, %s8325_s22  ;;  %v967_v1 = vld [vmem:[#allocation2 + $0x99] sm:$0xff] }
 0x119   : > { %1632 = vrot.lane.b32.xlu1 %v975_v46, %s8326_s23 }
 0x11c   : > { %1594 = vrot.lane.b32.xlu0 %v8634_v35, %s8326_s23  ;;  %v1358_v35 = vld [vmem:[#allocation2 + $0x108] sm:$0xff] }
 0x11d   : > { %1792 = vrot.lane.b32.xlu1 %v1151_v54, %s8327_s24 }
 0x120   : > { %1626 = vrot.lane.b32.xlu0 %v972_v63, %s8326_s23 }
 0x121   : > { %1024 = vrot.lane.b32.xlu1 %v957_v5, %s8323_s20 }
 0x124   : > { %1218 = vrot.lane.b32.xlu0 %v1150_v7, %s8324_s21 }
 0x125   : > { %1056 = vrot.lane.b32.xlu1 %v973_v6, %s8323_s20 }
 0x128   : > { %1250 = vrot.lane.b32.xlu0 %v8684_v9, %s8324_s21 }
 0x129   : > { %1216 = vrot.lane.b32.xlu1 %v1149_v8, %s8324_s21 }
 0x12c   : > { %1790 = vrot.lane.b32.xlu0 %v1150_v7, %s8327_s24  ;;  %v8828_v7 = vld [vmem:[#allocation2 + $0x150] sm:$0xff] }
 0x12d   : > { %1248 = vrot.lane.b32.xlu1 %v8688_v10, %s8324_s21 }
 0x130   : > { %1214 = vrot.lane.b32.xlu0 %v1148_v12, %s8324_s21 }
 0x131   : > { %1404 = vrot.lane.b32.xlu1 %v1339_v11, %s8325_s22 }
 0x134   : > { %1246 = vrot.lane.b32.xlu0 %v8696_v14, %s8324_s21 }
 0x135   : > { %1436 = vrot.lane.b32.xlu1 %v1355_v13, %s8325_s22  ;;  %v8837_v13 = vld [vmem:[#allocation2 + $0x9a] sm:$0xff] }
 0x138   : > { %1786 = vrot.lane.b32.xlu0 %v1148_v12, %s8327_s24 }
 0x139   : > { %1596 = vrot.lane.b32.xlu1 %v957_v5, %s8326_s23 }
 0x13c   : > { %1034 = vrot.lane.b32.xlu0 %v962_v17, %s8323_s20 }
 0x13d   : > { %1628 = vrot.lane.b32.xlu1 %v973_v6, %s8326_s23 }
 0x140   : > { %1066 = vrot.lane.b32.xlu0 %v978_v21, %s8323_s20 }
 0x141   : > { %1788 = vrot.lane.b32.xlu1 %v1149_v8, %s8327_s24  ;;  %v983_v8 = vld [vmem:[#allocation2 + $0x159] sm:$0xff] }
 0x144   : > { %1414 = vrot.lane.b32.xlu0 %v8712_v24, %s8325_s22 }
 0x145   : > { %1036 = vrot.lane.b32.xlu1 %v963_v25, %s8323_s20 }
 0x148   : > { %1446 = vrot.lane.b32.xlu0 %v1360_v27, %s8325_s22  ;;  %v980_v27 = vld [vmem:[#allocation2 + $0x139] sm:$0xff] }
 0x149   : > { %1068 = vrot.lane.b32.xlu1 %v979_v2, %s8323_s20 }
 0x14c   : > { %1606 = vrot.lane.b32.xlu0 %v962_v17, %s8326_s23  ;;  %v8846_v17 = vld [vmem:[#allocation2 + $0x15a] sm:$0xff] }
 0x14d   : > { %1228 = vrot.lane.b32.xlu1 %v8721_v4, %s8324_s21 }
 0x150   : > { %1638 = vrot.lane.b32.xlu0 %v978_v21, %s8326_s23 }
 0x151   : > { %1260 = vrot.lane.b32.xlu1 %v8726_v28, %s8324_s21 }
 0x154   : > { %1030 = vrot.lane.b32.xlu0 %v960_v30, %s8323_s20 }
 0x155   : > { %1416 = vrot.lane.b32.xlu1 %v8731_v29, %s8325_s22 }
 0x158   : > { %1062 = vrot.lane.b32.xlu0 %v976_v3, %s8323_s20 }
 0x159   : > { %1448 = vrot.lane.b32.xlu1 %v1361_v31, %s8325_s22  ;;  %v8879_v31 = vld [vmem:[#allocation2 + $0x78] sm:$0xff] }
 0x15c   : > { %1410 = vrot.lane.b32.xlu0 %v8741_v33, %s8325_s22 }
 0x15d   : > { %1608 = vrot.lane.b32.xlu1 %v963_v25, %s8326_s23  ;;  %v8867_v25 = vld [vmem:[#allocation2 + $0x158] sm:$0xff] }
 0x160   : > { %1442 = vrot.lane.b32.xlu0 %v1358_v35, %s8325_s22 }
 0x161   : > { %1640 = vrot.lane.b32.xlu1 %v979_v2, %s8326_s23 }
 0x164   : > { %1602 = vrot.lane.b32.xlu0 %v960_v30, %s8326_s23 }
 0x165   : > { %1032 = vrot.lane.b32.xlu1 %v961_v36, %s8323_s20 }
 0x168   : > { %1634 = vrot.lane.b32.xlu0 %v976_v3, %s8326_s23 }
 0x169   : > { %1064 = vrot.lane.b32.xlu1 %v977_v39, %s8323_s20 }
 0x16a   : > { %v8759_v41 = vpop.permute.xlu0 %1026 }
 0x16b   : > { %v8756_v40 = vpop.permute.xlu1 %1022  ;;  %13549 = vst [vmem:[#allocation7_spill] sm:$0xff] %v8759_v41 }
 0x16c   : > { %1226 = vrot.lane.b32.xlu0 %v8765_v43, %s8324_s21 }
 0x16d   : > { %1224 = vrot.lane.b32.xlu1 %v8761_v42, %s8324_s21 }
 0x16e   : > { %v8773_v46 = vpop.permute.xlu0 %1058 }
 0x16f   : > { %v8767_v44 = vpop.permute.xlu1 %1028  ;;  %13551 = vst [vmem:[#allocation9_spill] sm:$0xff] %v8773_v46  ;;  %v9001_v46 = vld [vmem:[#allocation2 + $0xc8] sm:$0xff] }
 0x170   : > { %13550 = vst [vmem:[#allocation8_spill] sm:$0xff] %v8767_v44  ;;  %1258 = vrot.lane.b32.xlu0 %v8777_v47, %s8324_s21  ;;  %v9033_v44 = vld [vmem:[#allocation2 + $0x189] sm:$0xff] }
 0x171   : > { %1256 = vrot.lane.b32.xlu1 %v8771_v45, %s8324_s21 }
 0x172   : > { %v8785_v50 = vpop.permute.xlu0 %1406 }
 0x173   : > { %v8781_v48 = vpop.permute.xlu1 %1060  ;;  %13553 = vst [vmem:[#allocation11_spill] sm:$0xff] %v8785_v50 }
 0x174   : > { %13552 = vst [vmem:[#allocation10_spill] sm:$0xff] %v8781_v48  ;;  %1222 = vrot.lane.b32.xlu0 %v8789_v51, %s8324_s21 }
 0x175   : > { %1412 = vrot.lane.b32.xlu1 %v8783_v49, %s8325_s22 }
 0x176   : > { %v8797_v54 = vpop.permute.xlu0 %1438 }
 0x177   : > { %v8793_v52 = vpop.permute.xlu1 %1220  ;;  %13555 = vst [vmem:[#allocation13_spill] sm:$0xff] %v8797_v54 }
 0x178   : > { %13554 = vst [vmem:[#allocation12_spill] sm:$0xff] %v8793_v52  ;;  %1254 = vrot.lane.b32.xlu0 %v8801_v55, %s8324_s21 }
 0x179   : > { %1444 = vrot.lane.b32.xlu1 %v8795_v53, %s8325_s22 }
 0x17a   : > { %v8807_v59 = vpop.permute.xlu0 %1598 }
 0x17b   : > { %v8805_v56 = vpop.permute.xlu1 %1252  ;;  %13557 = vst [vmem:[#allocation15_spill] sm:$0xff] %v8807_v59 }
 0x17c   : > { %13556 = vst [vmem:[#allocation14_spill] sm:$0xff] %v8805_v56  ;;  %1042 = vrot.lane.b32.xlu0 %v966_v57, %s8323_s20 }
 0x17d   : > { %1604 = vrot.lane.b32.xlu1 %v961_v36, %s8326_s23  ;;  %v8888_v36 = vld [vmem:[#allocation2 + $0x138] sm:$0xff] }
 0x17e   : > { %v8813_v62 = vpop.permute.xlu0 %1630 }
 0x17f   : > { %v8811_v60 = vpop.permute.xlu1 %1408  ;;  %13559 = vst [vmem:[#allocation17_spill] sm:$0xff] %v8813_v62  ;;  %v8910_v62 = vld [vmem:[#allocation2 + $0x82] sm:$0xff] }
 0x180   : > { %13558 = vst [vmem:[#allocation16_spill] sm:$0xff] %v8811_v60  ;;  %1074 = vrot.lane.b32.xlu0 %v982_v61, %s8323_s20 }
 0x181   : > { %1636 = vrot.lane.b32.xlu1 %v977_v39, %s8326_s23 }
 0x182   : > { %v8821_v5 = vpop.permute.xlu0 %1054 }
 0x183   : > { %v8817_v63 = vpop.permute.xlu1 %1440  ;;  %13561 = vst [vmem:[#allocation19_spill] sm:$0xff] %v8821_v5  ;;  %v9089_v5 = vld [vmem:[#allocation2 + $0xb0] sm:$0xff] }
 0x184   : > { %13560 = vst [vmem:[#allocation18_spill] sm:$0xff] %v8817_v63  ;;  %1422 = vrot.lane.b32.xlu0 %v8819_v0, %s8325_s22  ;;  %13613 = vst [vmem:[#allocation71_spill] sm:$0xff] %v9089_v5 }
 0x185   : > { %1044 = vrot.lane.b32.xlu1 %v967_v1, %s8323_s20 }
 0x186   : > { %v8830_v11 = vpop.permute.xlu0 %1402 }
 0x187   : > { %v8826_v6 = vpop.permute.xlu1 %1600  ;;  %13563 = vst [vmem:[#allocation21_spill] sm:$0xff] %v8830_v11  ;;  %v8979_v11 = vld [vmem:[#allocation2 + $0xc9] sm:$0xff] }
 0x188   : > { %13562 = vst [vmem:[#allocation20_spill] sm:$0xff] %v8826_v6  ;;  %1454 = vrot.lane.b32.xlu0 %v8828_v7, %s8325_s22 }
 0x189   : > { %1076 = vrot.lane.b32.xlu1 %v983_v8, %s8323_s20 }
 0x18a   : > { %v8839_v15 = vpop.permute.xlu0 %1434 }
 0x18b   : > { %v8835_v12 = vpop.permute.xlu1 %1632  ;;  %13565 = vst [vmem:[#allocation23_spill] sm:$0xff] %v8839_v15 }
 0x18c   : > { %13564 = vst [vmem:[#allocation22_spill] sm:$0xff] %v8835_v12  ;;  %1614 = vrot.lane.b32.xlu0 %v966_v57, %s8326_s23  ;;  %v8894_v57 = vld [vmem:[#allocation2 + $0x81] sm:$0xff] }
 0x18d   : > { %1236 = vrot.lane.b32.xlu1 %v8837_v13, %s8324_s21  ;;  %v8922_v12 = vld [vmem:[#allocation2 + $0x142] sm:$0xff] }
 0x18e   : > { %v8848_v18 = vpop.permute.xlu0 %1594 }
 0x18f   : > { %v8844_v16 = vpop.permute.xlu1 %1792  ;;  %13567 = vst [vmem:[#allocation25_spill] sm:$0xff] %v8848_v18  ;;  %v8946_v18 = vld [vmem:[#allocation2 + $0x140] sm:$0xff] }
 0x190   : > { %13566 = vst [vmem:[#allocation24_spill] sm:$0xff] %v8844_v16  ;;  %1646 = vrot.lane.b32.xlu0 %v982_v61, %s8326_s23 }
 0x191   : > { %1268 = vrot.lane.b32.xlu1 %v8846_v17, %s8324_s21 }
 0x192   : > { %v8857_v21 = vpop.permute.xlu0 %1626 }
 0x193   : > { %v8853_v19 = vpop.permute.xlu1 %1024  ;;  %13568 = vst [vmem:[#allocation26_spill] sm:$0xff] %v8857_v21 }
 0x194   : > { %1038 = vrot.lane.b32.xlu0 %v8861_v22, %s8323_s20 }
 0x195   : > { %1424 = vrot.lane.b32.xlu1 %v8855_v20, %s8325_s22 }
 0x196   : > { %v8869_v26 = vpop.permute.xlu0 %1218 }
 0x197   : > { %v8865_v23 = vpop.permute.xlu1 %1056  ;;  %13570 = vst [vmem:[#allocation28_spill] sm:$0xff] %v8869_v26 }
 0x198   : > { %13569 = vst [vmem:[#allocation27_spill] sm:$0xff] %v8865_v23  ;;  %1070 = vrot.lane.b32.xlu0 %v980_v27, %s8323_s20  ;;  %v9101_v23 = vld [vmem:[#allocation2 + $0x170] sm:$0xff] }
 0x199   : > { %1456 = vrot.lane.b32.xlu1 %v8867_v25, %s8325_s22 }
 0x19a   : > { %v8876_v30 = vpop.permute.xlu0 %1250 }
 0x19b   : > { %v8874_v2 = vpop.permute.xlu1 %1216  ;;  %13572 = vst [vmem:[#allocation30_spill] sm:$0xff] %v8876_v30 }
 0x19c   : > { %13571 = vst [vmem:[#allocation29_spill] sm:$0xff] %v8874_v2  ;;  %1418 = vrot.lane.b32.xlu0 %v8879_v31, %s8325_s22 }
 0x19d   : > { %1616 = vrot.lane.b32.xlu1 %v967_v1, %s8326_s23 }
 0x19e   : > { %v8885_v35 = vpop.permute.xlu0 %1790 }
 0x19f   : > { %v8883_v3 = vpop.permute.xlu1 %1248  ;;  %13574 = vst [vmem:[#allocation32_spill] sm:$0xff] %v8885_v35  ;;  %v8916_v35 = vld [vmem:[#allocation2 + $0x92] sm:$0xff] }
 0x1a0   : > { %13573 = vst [vmem:[#allocation31_spill] sm:$0xff] %v8883_v3  ;;  %1450 = vrot.lane.b32.xlu0 %v8888_v36, %s8325_s22 }
 0x1a1   : > { %1648 = vrot.lane.b32.xlu1 %v983_v8, %s8326_s23  ;;  %v981_v8 = vld [vmem:[#allocation2 + $0x141] sm:$0xff] }
 0x1a2   : > { %v8896_v61 = vpop.permute.xlu0 %1214 }
 0x1a3   : > { %v8892_v39 = vpop.permute.xlu1 %1404  ;;  %13576 = vst [vmem:[#allocation34_spill] sm:$0xff] %v8896_v61 }
 0x1a4   : > { %13575 = vst [vmem:[#allocation33_spill] sm:$0xff] %v8892_v39  ;;  %1610 = vrot.lane.b32.xlu0 %v8861_v22, %s8326_s23  ;;  %v8958_v39 = vld [vmem:[#allocation2 + $0xc1] sm:$0xff] }
 0x1a5   : > { %1040 = vrot.lane.b32.xlu1 %v8894_v57, %s8323_s20 }
 0x1a6   : > { %v8904_v21 = vpop.permute.xlu0 %1246 }
 0x1a7   : > { %v8902_v1 = vpop.permute.xlu1 %1436  ;;  %13578 = vst [vmem:[#allocation36_spill] sm:$0xff] %v8904_v21  ;;  %v9057_v21 = vld [vmem:[#allocation2 + $0x171] sm:$0xff] }
 0x1a8   : > { %13577 = vst [vmem:[#allocation35_spill] sm:$0xff] %v8902_v1  ;;  %1642 = vrot.lane.b32.xlu0 %v980_v27, %s8326_s23  ;;  %v8928_v27 = vld [vmem:[#allocation2 + $0x152] sm:$0xff] }
 0x1a9   : > { %1072 = vrot.lane.b32.xlu1 %v981_v8, %s8323_s20 }
 0x1aa   : > { %v8912_v16 = vpop.permute.xlu0 %1786 }
 0x1ab   : > { %v8908_v15 = vpop.permute.xlu1 %1596  ;;  %13580 = vst [vmem:[#allocation38_spill] sm:$0xff] %v8912_v16 }
 0x1ac   : > { %13579 = vst [vmem:[#allocation37_spill] sm:$0xff] %v8908_v15  ;;  %1234 = vrot.lane.b32.xlu0 %v8916_v35, %s8324_s21  ;;  %v8934_v15 = vld [vmem:[#allocation2 + $0x80] sm:$0xff] }
 0x1ad   : > { %1232 = vrot.lane.b32.xlu1 %v8910_v62, %s8324_s21 }
 0x1ae   : > { %v8924_v30 = vpop.permute.xlu0 %1034 }
 0x1af   : > { %v8920_v1 = vpop.permute.xlu1 %1628  ;;  %13582 = vst [vmem:[#allocation40_spill] sm:$0xff] %v8924_v30 }
 0x1b0   : > { %13581 = vst [vmem:[#allocation39_spill] sm:$0xff] %v8920_v1  ;;  %1266 = vrot.lane.b32.xlu0 %v8928_v27, %s8324_s21  ;;  %v8940_v1 = vld [vmem:[#allocation2 + $0x7a] sm:$0xff] }
 0x1b1   : > { %1264 = vrot.lane.b32.xlu1 %v8922_v12, %s8324_s21 }
 0x1b2   : > { %v8936_v26 = vpop.permute.xlu0 %1066 }
 0x1b3   : > { %v8932_v16 = vpop.permute.xlu1 %1788  ;;  %13584 = vst [vmem:[#allocation42_spill] sm:$0xff] %v8936_v26 }
 0x1b4   : > { %13583 = vst [vmem:[#allocation41_spill] sm:$0xff] %v8932_v16  ;;  %1230 = vrot.lane.b32.xlu0 %v8940_v1, %s8324_s21  ;;  %v8952_v16 = vld [vmem:[#allocation2 + $0x13a] sm:$0xff] }
 0x1b5   : > { %1420 = vrot.lane.b32.xlu1 %v8934_v15, %s8325_s22 }
 0x1b6   : > { %v8948_v56 = vpop.permute.xlu0 %1414 }
 0x1b7   : > { %v8944_v30 = vpop.permute.xlu1 %1036  ;;  %13586 = vst [vmem:[#allocation44_spill] sm:$0xff] %v8948_v56 }
 0x1b8   : > { %13585 = vst [vmem:[#allocation43_spill] sm:$0xff] %v8944_v30  ;;  %1262 = vrot.lane.b32.xlu0 %v8952_v16, %s8324_s21  ;;  %v8968_v30 = vld [vmem:[#allocation2 + $0xc0] sm:$0xff] }
 0x1b9   : > { %1452 = vrot.lane.b32.xlu1 %v8946_v18, %s8325_s22 }
 0x1ba   : > { %v8960_v52 = vpop.permute.xlu0 %1446 }
 0x1bb   : > { %v8956_v26 = vpop.permute.xlu1 %1068  ;;  %13588 = vst [vmem:[#allocation46_spill] sm:$0xff] %v8960_v52  ;;  %v8977_v52 = vld [vmem:[#allocation2 + $0x180] sm:$0xff] }
 0x1bc   : > { %13587 = vst [vmem:[#allocation45_spill] sm:$0xff] %v8956_v26  ;;  %1050 = vrot.lane.b32.xlu0 %v8958_v39, %s8323_s20 }
 0x1bd   : > { %1612 = vrot.lane.b32.xlu1 %v8894_v57, %s8326_s23 }
 0x1be   : > { %v8970_v54 = vpop.permute.xlu0 %1606 }
 0x1bf   : > { %v8966_v56 = vpop.permute.xlu1 %1228  ;;  %13590 = vst [vmem:[#allocation48_spill] sm:$0xff] %v8970_v54 }
 0x1c0   : > { %13589 = vst [vmem:[#allocation47_spill] sm:$0xff] %v8966_v56  ;;  %1430 = vrot.lane.b32.xlu0 %v8968_v30, %s8325_s22 }
 0x1c1   : > { %1644 = vrot.lane.b32.xlu1 %v981_v8, %s8326_s23  ;;  %v8989_v8 = vld [vmem:[#allocation2 + $0xca] sm:$0xff] }
 0x1c2   : > { %v8981_v48 = vpop.permute.xlu0 %1638 }
 0x1c3   : > { %v8975_v26 = vpop.permute.xlu1 %1260  ;;  %13592 = vst [vmem:[#allocation50_spill] sm:$0xff] %v8981_v48  ;;  %v8999_v48 = vld [vmem:[#allocation2 + $0x181] sm:$0xff] }
 0x1c4   : > { %13591 = vst [vmem:[#allocation49_spill] sm:$0xff] %v8975_v26  ;;  %1462 = vrot.lane.b32.xlu0 %v8977_v52, %s8325_s22 }
 0x1c5   : > { %1052 = vrot.lane.b32.xlu1 %v8979_v11, %s8323_s20 }
 0x1c6   : > { %v8991_v56 = vpop.permute.xlu0 %1030 }
 0x1c7   : > { %v8987_v54 = vpop.permute.xlu1 %1416  ;;  %13594 = vst [vmem:[#allocation52_spill] sm:$0xff] %v8991_v56  ;;  %v9011_v56 = vld [vmem:[#allocation2 + $0x188] sm:$0xff] }
 0x1c8   : > { %13593 = vst [vmem:[#allocation51_spill] sm:$0xff] %v8987_v54  ;;  %1622 = vrot.lane.b32.xlu0 %v8958_v39, %s8326_s23 }
 0x1c9   : > { %1244 = vrot.lane.b32.xlu1 %v8989_v8, %s8324_s21 }
 0x1ca   : > { %v9003_v59 = vpop.permute.xlu0 %1062 }
 0x1cb   : > { %v8997_v26 = vpop.permute.xlu1 %1448  ;;  %13596 = vst [vmem:[#allocation54_spill] sm:$0xff] %v9003_v59 }
 0x1cc   : > { %13595 = vst [vmem:[#allocation53_spill] sm:$0xff] %v8997_v26  ;;  %1654 = vrot.lane.b32.xlu0 %v8999_v48, %s8326_s23  ;;  %v9017_v26 = vld [vmem:[#allocation2 + $0xa9] sm:$0xff] }
 0x1cd   : > { %1432 = vrot.lane.b32.xlu1 %v9001_v46, %s8325_s22 }
 0x1ce   : > { %v9013_v63 = vpop.permute.xlu0 %1410 }
 0x1cf   : > { %v9009_v54 = vpop.permute.xlu1 %1608  ;;  %13598 = vst [vmem:[#allocation56_spill] sm:$0xff] %v9013_v63 }
 0x1d0   : > { %13597 = vst [vmem:[#allocation55_spill] sm:$0xff] %v9009_v54  ;;  %1046 = vrot.lane.b32.xlu0 %v9017_v26, %s8323_s20  ;;  %v9027_v54 = vld [vmem:[#allocation2 + $0x169] sm:$0xff] }
 0x1d1   : > { %1464 = vrot.lane.b32.xlu1 %v9011_v56, %s8325_s22 }
 0x1d2   : > { %v9023_v6 = vpop.permute.xlu0 %1442 }
 0x1d3   : > { %v9021_v59 = vpop.permute.xlu1 %1640  ;;  %13600 = vst [vmem:[#allocation58_spill] sm:$0xff] %v9023_v6 }
 0x1d4   : > { %13599 = vst [vmem:[#allocation57_spill] sm:$0xff] %v9021_v59  ;;  %1078 = vrot.lane.b32.xlu0 %v9027_v54, %s8323_s20  ;;  %v9039_v59 = vld [vmem:[#allocation2 + $0xa8] sm:$0xff] }
 0x1d5   : > { %1624 = vrot.lane.b32.xlu1 %v8979_v11, %s8326_s23  ;;  %13603 = vst [vmem:[#allocation61_spill] sm:$0xff] %v9039_v59 }
 0x1d6   : > { %v9035_v41 = vpop.permute.xlu0 %1602 }
 0x1d7   : > { %v9031_v63 = vpop.permute.xlu1 %1032  ;;  %13602 = vst [vmem:[#allocation60_spill] sm:$0xff] %v9035_v41 }
 0x1d8   : > { %13601 = vst [vmem:[#allocation59_spill] sm:$0xff] %v9031_v63  ;;  %1426 = vrot.lane.b32.xlu0 %v9039_v59, %s8325_s22  ;;  %v9051_v63 = vld [vmem:[#allocation2 + $0x168] sm:$0xff] }
 0x1d9   : > { %1656 = vrot.lane.b32.xlu1 %v9033_v44, %s8326_s23 }
 0x1da   : > { %v9047_v38 = vpop.permute.xlu0 %1634 }
 0x1db   : > { %v9043_v6 = vpop.permute.xlu1 %1064  ;;  %13605 = vst [vmem:[#allocation63_spill] sm:$0xff] %v9047_v38 }
 0x1dc   : > { %13604 = vst [vmem:[#allocation62_spill] sm:$0xff] %v9043_v6  ;;  %1458 = vrot.lane.b32.xlu0 %v9051_v63, %s8325_s22  ;;  %v9067_v6 = vld [vmem:[#allocation2 + $0xb2] sm:$0xff] }
 0x1dd   : > { %1048 = vrot.lane.b32.xlu1 %v9045_v37, %s8323_s20 }
 0x1de   : > { %v9059_v50 = vpop.permute.xlu0 %1226 }
 0x1df   : > { %v9055_v41 = vpop.permute.xlu1 %1224  ;;  %13607 = vst [vmem:[#allocation65_spill] sm:$0xff] %v9059_v50  ;;  %v9077_v50 = vld [vmem:[#allocation2 + $0x172] sm:$0xff] }
 0x1e0   : > { %13606 = vst [vmem:[#allocation64_spill] sm:$0xff] %v9055_v41  ;;  %1618 = vrot.lane.b32.xlu0 %v9017_v26, %s8326_s23 }
 0x1e1   : > { %1080 = vrot.lane.b32.xlu1 %v9057_v21, %s8323_s20 }
 0x1e2   : > { %v9069_v3 = vpop.permute.xlu0 %1258 }
 0x1e3   : > { %v9065_v38 = vpop.permute.xlu1 %1256  ;;  %13609 = vst [vmem:[#allocation67_spill] sm:$0xff] %v9069_v3 }
 0x1e4   : > { %13608 = vst [vmem:[#allocation66_spill] sm:$0xff] %v9065_v38  ;;  %1650 = vrot.lane.b32.xlu0 %v9027_v54, %s8326_s23  ;;  %v9083_v38 = vld [vmem:[#allocation2 + $0xc2] sm:$0xff] }
 0x1e5   : > { %1240 = vrot.lane.b32.xlu1 %v9067_v6, %s8324_s21 }
 0x1e6   : > { %v9079_v60 = vpop.permute.xlu0 %1222 }
 0x1e7   : > { %v9075_v41 = vpop.permute.xlu1 %1412  ;;  %13611 = vst [vmem:[#allocation69_spill] sm:$0xff] %v9079_v60 }
 0x1e8   : > { %13610 = vst [vmem:[#allocation68_spill] sm:$0xff] %v9075_v41  ;;  %1242 = vrot.lane.b32.xlu0 %v9083_v38, %s8324_s21  ;;  %v9095_v41 = vld [vmem:[#allocation2 + $0xaa] sm:$0xff] }
 0x1e9   : > { %1272 = vrot.lane.b32.xlu1 %v9077_v50, %s8324_s21 }
 0x1ea   : > { %v9091_v34 = vpop.permute.xlu0 %1254 }
 0x1eb   : > { %v9087_v3 = vpop.permute.xlu1 %1444  ;;  %13614 = vst [vmem:[#allocation72_spill] sm:$0xff] %v9091_v34 }
 0x1ec   : > { %13612 = vst [vmem:[#allocation70_spill] sm:$0xff] %v9087_v3  ;;  %1238 = vrot.lane.b32.xlu0 %v9095_v41, %s8324_s21  ;;  %v9107_v3 = vld [vmem:[#allocation2 + $0x16a] sm:$0xff] }
 0x1ed   : > { %1428 = vrot.lane.b32.xlu1 %v9089_v5, %s8325_s22 }
 0x1ee   : > { %v9103_v32 = vpop.permute.xlu0 %1042 }
 0x1ef   : > { %v9099_v60 = vpop.permute.xlu1 %1604  ;;  %13616 = vst [vmem:[#allocation74_spill] sm:$0xff] %v9103_v32 }
 0x1f0   : > { %13615 = vst [vmem:[#allocation73_spill] sm:$0xff] %v9099_v60  ;;  %1270 = vrot.lane.b32.xlu0 %v9107_v3, %s8324_s21 }
 0x1f1   : > { %1460 = vrot.lane.b32.xlu1 %v9101_v23, %s8325_s22 }
 0x1f2   : > { %v9113_v61 = vpop.permute.xlu0 %1074 }
 0x1f3   : > { %v9111_v34 = vpop.permute.xlu1 %1636  ;;  %13618 = vst [vmem:[#allocation76_spill] sm:$0xff] %v9113_v61 }
 0x1f4   : > { %13617 = vst [vmem:[#allocation75_spill] sm:$0xff] %v9111_v34  ;;  %1794 = vrot.lane.b32.xlu0 %v8789_v51, %s8327_s24 }
 0x1f5   : > { %1620 = vrot.lane.b32.xlu1 %v9045_v37, %s8326_s23 }
 0x1f6   : > { %v9121_v32 = vpop.permute.xlu0 %1422 }
 0x1f7   : > { %v9119_v60 = vpop.permute.xlu1 %1044 }
 0x1f8   : > { %1798 = vrot.lane.b32.xlu0 %v8765_v43, %s8327_s24 }
 0x1f9   : > { %1652 = vrot.lane.b32.xlu1 %v9057_v21, %s8326_s23 }
 0x1fa   : > { %v9129_v34 = vpop.permute.xlu0 %1454 }
 0x1fb   : > { %v9127_v2 = vpop.permute.xlu1 %1076  ;;  %13620 = vst [vmem:[#allocation78_spill] sm:$0xff] %v9129_v34  ;;  %v9234_v34 = vld [vmem:[#allocation2 + $0x18a] sm:$0xff] }
 0x1fc   : > { %13619 = vst [vmem:[#allocation77_spill] sm:$0xff] %v9127_v2  ;;  %1802 = vrot.lane.b32.xlu0 %v8940_v1, %s8327_s24 }
 0x1fd   : > { %1796 = vrot.lane.b32.xlu1 %v8761_v42, %s8327_s24 }
 0x1fe   : > { %v9137_v61 = vpop.permute.xlu0 %1614 }
 0x1ff   : > { %v9135_v51 = vpop.permute.xlu1 %1236  ;;  %13621 = vst [vmem:[#allocation79_spill] sm:$0xff] %v9137_v61  ;;  %v8173_v61 = vld [vmem:[#allocation2 + $0x48] sm:$0xff] }
 0x200   : > { %1806 = vrot.lane.b32.xlu0 %v8916_v35, %s8327_s24 }
 0x201   : > { %1800 = vrot.lane.b32.xlu1 %v8721_v4, %s8327_s24 }
 0x202   : > { %v9145_v2 = vpop.permute.xlu0 %1646 }
 0x203   : > { %v9143_v43 = vpop.permute.xlu1 %1268  ;;  %13623 = vst [vmem:[#allocation81_spill] sm:$0xff] %v9145_v2 }
 0x204   : > { %13622 = vst [vmem:[#allocation80_spill] sm:$0xff] %v9143_v43  ;;  %1810 = vrot.lane.b32.xlu0 %v9095_v41, %s8327_s24 }
 0x205   : > { %1804 = vrot.lane.b32.xlu1 %v8910_v62, %s8327_s24 }
 0x206   : > { %v9153_v1 = vpop.permute.xlu0 %1038 }
 0x207   : > { %v9151_v42 = vpop.permute.xlu1 %1424 }
 0x208   : > { %1814 = vrot.lane.b32.xlu0 %v9083_v38, %s8327_s24 }
 0x209   : > { %1808 = vrot.lane.b32.xlu1 %v8837_v13, %s8327_s24 }
 0x20a   : > { %v9161_v35 = vpop.permute.xlu0 %1070 }
 0x20b   : > { %v9159_v4 = vpop.permute.xlu1 %1456  ;;  %13625 = vst [vmem:[#allocation83_spill] sm:$0xff] %v9161_v35 }
 0x20c   : > { %13624 = vst [vmem:[#allocation82_spill] sm:$0xff] %v9159_v4  ;;  %1818 = vrot.lane.b32.xlu0 %v8696_v14, %s8327_s24 }
 0x20d   : > { %1812 = vrot.lane.b32.xlu1 %v9067_v6, %s8327_s24 }
 0x20e   : > { %v9169_v43 = vpop.permute.xlu0 %1418 }
 0x20f   : > { %v9167_v62 = vpop.permute.xlu1 %1616 }
 0x210   : > { %13626 = vst [vmem:[#allocation84_spill] sm:$0xff] %v9167_v62  ;;  %1822 = vrot.lane.b32.xlu0 %v8684_v9, %s8327_s24 }
 0x211   : > { %1816 = vrot.lane.b32.xlu1 %v8989_v8, %s8327_s24 }
 0x212   : > { %v9177_v4 = vpop.permute.xlu0 %1450 }
 0x213   : > { %v9175_v13 = vpop.permute.xlu1 %1648  ;;  %13628 = vst [vmem:[#allocation86_spill] sm:$0xff] %v9177_v4 }
 0x214   : > { %13627 = vst [vmem:[#allocation85_spill] sm:$0xff] %v9175_v13  ;;  %1826 = vrot.lane.b32.xlu0 %v8801_v55, %s8327_s24 }
 0x215   : > { %1820 = vrot.lane.b32.xlu1 %v8688_v10, %s8327_s24 }
 0x216   : > { %v9185_v2 = vpop.permute.xlu0 %1610 }
 0x217   : > { %v9183_v14 = vpop.permute.xlu1 %1040 }
 0x218   : > { %1830 = vrot.lane.b32.xlu0 %v8777_v47, %s8327_s24 }
 0x219   : > { %1824 = vrot.lane.b32.xlu1 %v8660_v58, %s8327_s24 }
 0x21a   : > { %v9193_v8 = vpop.permute.xlu0 %1642 }
 0x21b   : > { %v9191_v9 = vpop.permute.xlu1 %1072  ;;  %13630 = vst [vmem:[#allocation88_spill] sm:$0xff] %v9193_v8  ;;  %v1933_v8 = vld [vmem:[#allocation2 + $0x108] sm:$0xff] }
 0x21c   : > { %13629 = vst [vmem:[#allocation87_spill] sm:$0xff] %v9191_v9  ;;  %1834 = vrot.lane.b32.xlu0 %v8952_v16, %s8327_s24  ;;  %v1930_v9 = vld [vmem:[#allocation2 + $0xe0] sm:$0xff] }
 0x21d   : > { %1828 = vrot.lane.b32.xlu1 %v8771_v45, %s8327_s24 }
 0x21e   : > { %v9201_v55 = vpop.permute.xlu0 %1234 }
 0x21f   : > { %v9199_v10 = vpop.permute.xlu1 %1232 }
 0x220   : > { %1838 = vrot.lane.b32.xlu0 %v8928_v27, %s8327_s24 }
 0x221   : > { %1832 = vrot.lane.b32.xlu1 %v8726_v28, %s8327_s24  ;;  %v9221_v28 = vld [vmem:[#allocation2 + $0x182] sm:$0xff] }
 0x222   : > { %v9209_v47 = vpop.permute.xlu0 %1266 }
 0x223   : > { %v9207_v58 = vpop.permute.xlu1 %1264  ;;  %13632 = vst [vmem:[#allocation90_spill] sm:$0xff] %v9209_v47 }
 0x224   : > { %13631 = vst [vmem:[#allocation89_spill] sm:$0xff] %v9207_v58  ;;  %1842 = vrot.lane.b32.xlu0 %v9107_v3, %s8327_s24  ;;  %v1916_v58 = vld [vmem:[#allocation2 + $0x38] sm:$0xff] }
 0x225   : > { %1836 = vrot.lane.b32.xlu1 %v8922_v12, %s8327_s24  ;;  %v1915_v12 = vld [vmem:[#allocation2 + $0x30] sm:$0xff] }
 0x226   : > { %v9217_v16 = vpop.permute.xlu0 %1230 }
 0x227   : > { %v9215_v45 = vpop.permute.xlu1 %1420 }
 0x228   : > { %1846 = vrot.lane.b32.xlu0 %v9221_v28, %s8327_s24 }
 0x229   : > { %1840 = vrot.lane.b32.xlu1 %v8846_v17, %s8327_s24 }
 0x22a   : > { %v9227_v13 = vpop.permute.xlu0 %1262 }
 0x22b   : > { %v9225_v27 = vpop.permute.xlu1 %1452  ;;  %13634 = vst [vmem:[#allocation92_spill] sm:$0xff] %v9227_v13 }
 0x22c   : > { %13633 = vst [vmem:[#allocation91_spill] sm:$0xff] %v9225_v27  ;;  %1979 = vrot.lane.b32.xlu0 %v1915_v12, %s8328_s27 }
 0x22d   : > { %1844 = vrot.lane.b32.xlu1 %v9077_v50, %s8327_s24 }
 0x22e   : > { %v9236_v17 = vpop.permute.xlu0 %1050 }
 0x22f   : > { %v9232_v47 = vpop.permute.xlu1 %1612  ;;  %13636 = vst [vmem:[#allocation94_spill] sm:$0xff] %v9236_v17 }
 0x230   : > { %13635 = vst [vmem:[#allocation93_spill] sm:$0xff] %v9232_v47  ;;  %1983 = vrot.lane.b32.xlu0 %v8741_v33, %s8328_s27 }
 0x231   : > { %1848 = vrot.lane.b32.xlu1 %v9234_v34, %s8327_s24 }
 0x232   : > { %v9244_v50 = vpop.permute.xlu0 %1430 }
 0x233   : > { %v9242_v27 = vpop.permute.xlu1 %1644  ;;  %13638 = vst [vmem:[#allocation96_spill] sm:$0xff] %v9244_v50 }
 0x234   : > { %13637 = vst [vmem:[#allocation95_spill] sm:$0xff] %v9242_v27  ;;  %1987 = vrot.lane.b32.xlu0 %v8712_v24, %s8328_s27 }
 0x235   : > { %1981 = vrot.lane.b32.xlu1 %v1916_v58, %s8328_s27 }
 0x236   : > { %v9251_v13 = vpop.permute.xlu0 %1462 }
 0x237   : > { %v9249_v12 = vpop.permute.xlu1 %1052  ;;  %13640 = vst [vmem:[#allocation98_spill] sm:$0xff] %v9251_v13 }
 0x238   : > { %13639 = vst [vmem:[#allocation97_spill] sm:$0xff] %v9249_v12  ;;  %1991 = vrot.lane.b32.xlu0 %v8879_v31, %s8328_s27 }
 0x239   : > { %1985 = vrot.lane.b32.xlu1 %v8783_v49, %s8328_s27 }
 0x23a   : > { %v9259_v27 = vpop.permute.xlu0 %1622 }
 0x23b   : > { %v9257_v33 = vpop.permute.xlu1 %1244  ;;  %13642 = vst [vmem:[#allocation100_spill] sm:$0xff] %v9259_v27 }
 0x23c   : > { %13641 = vst [vmem:[#allocation99_spill] sm:$0xff] %v9257_v33  ;;  %1995 = vrot.lane.b32.xlu0 %v8819_v0, %s8328_s27 }
 0x23d   : > { %1989 = vrot.lane.b32.xlu1 %v8731_v29, %s8328_s27 }
 0x23e   : > { %v9267_v58 = vpop.permute.xlu0 %1654 }
 0x23f   : > { %v9265_v24 = vpop.permute.xlu1 %1432  ;;  %13644 = vst [vmem:[#allocation102_spill] sm:$0xff] %v9267_v58  ;;  %v1929_v58 = vld [vmem:[#allocation2 + $0xd8] sm:$0xff] }
 0x240   : > { %13643 = vst [vmem:[#allocation101_spill] sm:$0xff] %v9265_v24  ;;  %1999 = vrot.lane.b32.xlu0 %v9039_v59, %s8328_s27 }
 0x241   : > { %1993 = vrot.lane.b32.xlu1 %v8934_v15, %s8328_s27 }
 0x242   : > { %v9275_v31 = vpop.permute.xlu0 %1046 }
 0x243   : > { %v9273_v49 = vpop.permute.xlu1 %1464 }
 0x244   : > { %13645 = vst [vmem:[#allocation103_spill] sm:$0xff] %v9273_v49  ;;  %2003 = vrot.lane.b32.xlu0 %v8968_v30, %s8328_s27 }
 0x245   : > { %1997 = vrot.lane.b32.xlu1 %v8855_v20, %s8328_s27  ;;  %v1931_v20 = vld [vmem:[#allocation2 + $0xf0] sm:$0xff] }
 0x246   : > { %v9283_v0 = vpop.permute.xlu0 %1078 }
 0x247   : > { %v9281_v29 = vpop.permute.xlu1 %1624  ;;  %13647 = vst [vmem:[#allocation105_spill] sm:$0xff] %v9283_v0 }
 0x248   : > { %13646 = vst [vmem:[#allocation104_spill] sm:$0xff] %v9281_v29  ;;  %2007 = vrot.lane.b32.xlu0 %v1929_v58, %s8328_s27 }
 0x249   : > { %2001 = vrot.lane.b32.xlu1 %v9089_v5, %s8328_s27  ;;  %v13742_v5 = vld [vmem:[#allocation31_spill] sm:$0xff] }
 0x24a   : > { %v9290_v49 = vpop.permute.xlu0 %1426 }
 0x24b   : > { %v9288_v13 = vpop.permute.xlu1 %1656  ;;  %13649 = vst [vmem:[#allocation107_spill] sm:$0xff] %v9290_v49 }
 0x24c   : > { %13648 = vst [vmem:[#allocation106_spill] sm:$0xff] %v9288_v13  ;;  %2011 = vrot.lane.b32.xlu0 %v1931_v20, %s8328_s27  ;;  %v1932_v13 = vld [vmem:[#allocation2 + $0xf8] sm:$0xff] }
 0x24d   : > { %2005 = vrot.lane.b32.xlu1 %v9001_v46, %s8328_s27  ;;  %v1935_v46 = vld [vmem:[#allocation2 + $0x120] sm:$0xff] }
 0x24e   : > { %v9297_v0 = vpop.permute.xlu0 %1458 }
 0x24f   : > { %v9295_v30 = vpop.permute.xlu1 %1048  ;;  %13651 = vst [vmem:[#allocation109_spill] sm:$0xff] %v9297_v0 }
 0x250   : > { %13650 = vst [vmem:[#allocation108_spill] sm:$0xff] %v9295_v30  ;;  %2015 = vrot.lane.b32.xlu0 %v1933_v8, %s8328_s27  ;;  %v1936_v8 = vld [vmem:[#allocation2 + $0x128] sm:$0xff] }
 0x251   : > { %2009 = vrot.lane.b32.xlu1 %v1930_v9, %s8328_s27 }
 0x252   : > { %v9303_v4 = vpop.permute.xlu0 %1618 }
 0x253   : > { %v9301_v58 = vpop.permute.xlu1 %1080  ;;  %13653 = vst [vmem:[#allocation111_spill] sm:$0xff] %v9303_v4  ;;  %v13734_v4 = vld [vmem:[#allocation34_spill] sm:$0xff] }
 0x254   : > { %13652 = vst [vmem:[#allocation110_spill] sm:$0xff] %v9301_v58  ;;  %2019 = vrot.lane.b32.xlu0 %v1935_v46, %s8328_s27 }
 0x255   : > { %2013 = vrot.lane.b32.xlu1 %v1932_v13, %s8328_s27 }
 0x256   : > { %v9309_v35 = vpop.permute.xlu0 %1650 }
 0x257   : > { %v9307_v20 = vpop.permute.xlu1 %1240  ;;  %13655 = vst [vmem:[#allocation113_spill] sm:$0xff] %v9309_v35 }
 0x258   : > { %13654 = vst [vmem:[#allocation112_spill] sm:$0xff] %v9307_v20  ;;  %2023 = vrot.lane.b32.xlu0 %v8888_v36, %s8328_s27 }
 0x259   : > { %2017 = vrot.lane.b32.xlu1 %v8795_v53, %s8328_s27 }
 0x25a   : > { %v9317_v58 = vpop.permute.xlu0 %1242 }
 0x25b   : > { %v9315_v9 = vpop.permute.xlu1 %1272  ;;  %13657 = vst [vmem:[#allocation115_spill] sm:$0xff] %v9317_v58 }
 0x25c   : > { %13656 = vst [vmem:[#allocation114_spill] sm:$0xff] %v9315_v9  ;;  %2027 = vrot.lane.b32.xlu0 %v8828_v7, %s8328_s27 }
 0x25d   : > { %2021 = vrot.lane.b32.xlu1 %v1936_v8, %s8328_s27  ;;  %v1945_v8 = vld [vmem:[#allocation2 + $0x198] sm:$0xff] }
 0x25e   : > { %v9324_v46 = vpop.permute.xlu0 %1238 }
 0x25f   : > { %v9322_v13 = vpop.permute.xlu1 %1428  ;;  %13659 = vst [vmem:[#allocation117_spill] sm:$0xff] %v9324_v46  ;;  %v13755_v46 = vld [vmem:[#allocation52_spill] sm:$0xff] }
 0x260   : > { %13658 = vst [vmem:[#allocation116_spill] sm:$0xff] %v9322_v13  ;;  %2031 = vrot.lane.b32.xlu0 %v9051_v63, %s8328_s27  ;;  %v2306_v13 = vld [vmem:[#allocation2 + $0x82] sm:$0xff] }
 0x261   : > { %2025 = vrot.lane.b32.xlu1 %v8946_v18, %s8328_s27 }
 0x262   : > { %v9332_v36 = vpop.permute.xlu0 %1270 }
 0x263   : > { %v9330_v53 = vpop.permute.xlu1 %1460  ;;  %13661 = vst [vmem:[#allocation119_spill] sm:$0xff] %v9332_v36  ;;  %v2110_v36 = vld [vmem:[#allocation2 + $0x51] sm:$0xff] }
 0x264   : > { %13660 = vst [vmem:[#allocation118_spill] sm:$0xff] %v9330_v53  ;;  %2035 = vrot.lane.b32.xlu0 %v8977_v52, %s8328_s27  ;;  %v1946_v53 = vld [vmem:[#allocation2 + $0x1a0] sm:$0xff] }
 0x265   : > { %2029 = vrot.lane.b32.xlu1 %v8867_v25, %s8328_s27  ;;  %v2107_v25 = vld [vmem:[#allocation2 + $0x31] sm:$0xff] }
 0x266   : > { %v9340_v9 = vpop.permute.xlu0 %1794 }
 0x267   : > { %v9338_v7 = vpop.permute.xlu1 %1620 }
 0x268   : > { %13662 = vst [vmem:[#allocation120_spill] sm:$0xff] %v9338_v7  ;;  %2039 = vrot.lane.b32.xlu0 %v1945_v8, %s8328_s27 }
 0x269   : > { %2033 = vrot.lane.b32.xlu1 %v9101_v23, %s8328_s27  ;;  %v2109_v23 = vld [vmem:[#allocation2 + $0x49] sm:$0xff] }
 0x26a   : > { %v9347_v18 = vpop.permute.xlu0 %1798 }
 0x26b   : > { %v9345_v63 = vpop.permute.xlu1 %1652 }
 0x26c   : > { %13663 = vst [vmem:[#allocation121_spill] sm:$0xff] %v9345_v63  ;;  %2171 = vrot.lane.b32.xlu0 %v2107_v25, %s8329_s28  ;;  %v2108_v63 = vld [vmem:[#allocation2 + $0x39] sm:$0xff] }
 0x26d   : > { %2037 = vrot.lane.b32.xlu1 %v9011_v56, %s8328_s27  ;;  %v2111_v56 = vld [vmem:[#allocation2 + $0x61] sm:$0xff] }
 0x26e   : > { %v9354_v35 = vpop.permute.xlu0 %1802 }
 0x26f   : > { %v9352_v52 = vpop.permute.xlu1 %1796  ;;  %13664 = vst [vmem:[#allocation122_spill] sm:$0xff] %v9354_v35  ;;  %v13765_v35 = vld [vmem:[#allocation64_spill] sm:$0xff] }
 0x270   : > { %2175 = vrot.lane.b32.xlu0 %v2109_v23, %s8329_s28  ;;  %v2112_v23 = vld [vmem:[#allocation2 + $0x69] sm:$0xff] }
 0x271   : > { %2041 = vrot.lane.b32.xlu1 %v1946_v53, %s8328_s27 }
 0x272   : > { %v9360_v0 = vpop.permute.xlu0 %1806 }
 0x273   : > { %v9358_v8 = vpop.permute.xlu1 %1800  ;;  %13666 = vst [vmem:[#allocation124_spill] sm:$0xff] %v9360_v0  ;;  %v13741_v0 = vld [vmem:[#allocation16_spill] sm:$0xff] }
 0x274   : > { %13665 = vst [vmem:[#allocation123_spill] sm:$0xff] %v9358_v8  ;;  %2179 = vrot.lane.b32.xlu0 %v2111_v56, %s8329_s28 }
 0x275   : > { %2173 = vrot.lane.b32.xlu1 %v2108_v63, %s8329_s28  ;;  %v2115_v63 = vld [vmem:[#allocation2 + $0x91] sm:$0xff] }
 0x276   : > { %v9366_v29 = vpop.permute.xlu0 %1810 }
 0x277   : > { %v9364_v25 = vpop.permute.xlu1 %1804  ;;  %13668 = vst [vmem:[#allocation126_spill] sm:$0xff] %v9366_v29 }
 0x278   : > { %13667 = vst [vmem:[#allocation125_spill] sm:$0xff] %v9364_v25  ;;  %2183 = vrot.lane.b32.xlu0 %v8861_v22, %s8329_s28  ;;  %v8163_v25 = vld [vmem:[%s8439_s17 + $0x18] sm:$0xff] }
 0x279   : > { %2177 = vrot.lane.b32.xlu1 %v2110_v36, %s8329_s28  ;;  %v2116_v36 = vld [vmem:[#allocation2 + $0x99] sm:$0xff] }
 0x27a   : > { %v9373_v7 = vpop.permute.xlu0 %1814 }
 0x27b   : > { %v9371_v53 = vpop.permute.xlu1 %1808  ;;  %13670 = vst [vmem:[#allocation128_spill] sm:$0xff] %v9373_v7 }
 0x27c   : > { %13669 = vst [vmem:[#allocation127_spill] sm:$0xff] %v9371_v53  ;;  %2187 = vrot.lane.b32.xlu0 %v2115_v63, %s8329_s28  ;;  %v2304_v53 = vld [vmem:[#allocation2 + $0x6a] sm:$0xff] }
 0x27d   : > { %2181 = vrot.lane.b32.xlu1 %v2112_v23, %s8329_s28 }
 0x27e   : > { %v9379_v24 = vpop.permute.xlu0 %1818 }
 0x27f   : > { %v9377_v56 = vpop.permute.xlu1 %1812  ;;  %13672 = vst [vmem:[#allocation130_spill] sm:$0xff] %v9379_v24 }
 0x280   : > { %13671 = vst [vmem:[#allocation129_spill] sm:$0xff] %v9377_v56  ;;  %2191 = vrot.lane.b32.xlu0 %v9017_v26, %s8329_s28  ;;  %v2302_v56 = vld [vmem:[#allocation2 + $0x52] sm:$0xff] }
 0x281   : > { %2185 = vrot.lane.b32.xlu1 %v8894_v57, %s8329_s28  ;;  %v2121_v57 = vld [vmem:[#allocation2 + $0xd9] sm:$0xff] }
 0x282   : > { %v9387_v33 = vpop.permute.xlu0 %1822 }
 0x283   : > { %v9385_v22 = vpop.permute.xlu1 %1816  ;;  %13674 = vst [vmem:[#allocation132_spill] sm:$0xff] %v9387_v33 }
 0x284   : > { %13673 = vst [vmem:[#allocation131_spill] sm:$0xff] %v9385_v22  ;;  %2195 = vrot.lane.b32.xlu0 %v8958_v39, %s8329_s28 }
 0x285   : > { %2189 = vrot.lane.b32.xlu1 %v2116_v36, %s8329_s28  ;;  %v2123_v36 = vld [vmem:[#allocation2 + $0xf1] sm:$0xff] }
 0x286   : > { %v9394_v63 = vpop.permute.xlu0 %1826 }
 0x287   : > { %v9392_v23 = vpop.permute.xlu1 %1820  ;;  %13676 = vst [vmem:[#allocation134_spill] sm:$0xff] %v9394_v63 }
 0x288   : > { %13675 = vst [vmem:[#allocation133_spill] sm:$0xff] %v9392_v23  ;;  %2199 = vrot.lane.b32.xlu0 %v2121_v57, %s8329_s28  ;;  %v2122_v23 = vld [vmem:[#allocation2 + $0xe1] sm:$0xff] }
 0x289   : > { %2193 = vrot.lane.b32.xlu1 %v9045_v37, %s8329_s28  ;;  %v2125_v37 = vld [vmem:[#allocation2 + $0x109] sm:$0xff] }
 0x28a   : > { %v9401_v22 = vpop.permute.xlu0 %1830 }
 0x28b   : > { %v9399_v26 = vpop.permute.xlu1 %1824  ;;  %13678 = vst [vmem:[#allocation136_spill] sm:$0xff] %v9401_v22 }
 0x28c   : > { %13677 = vst [vmem:[#allocation135_spill] sm:$0xff] %v9399_v26  ;;  %2203 = vrot.lane.b32.xlu0 %v2123_v36, %s8329_s28  ;;  %v2124_v26 = vld [vmem:[#allocation2 + $0xf9] sm:$0xff] }
 0x28d   : > { %2197 = vrot.lane.b32.xlu1 %v8979_v11, %s8329_s28  ;;  %v2127_v11 = vld [vmem:[#allocation2 + $0x121] sm:$0xff] }
 0x28e   : > { %v9408_v63 = vpop.permute.xlu0 %1834 }
 0x28f   : > { %v9406_v39 = vpop.permute.xlu1 %1828  ;;  %13680 = vst [vmem:[#allocation138_spill] sm:$0xff] %v9408_v63 }
 0x290   : > { %13679 = vst [vmem:[#allocation137_spill] sm:$0xff] %v9406_v39  ;;  %2207 = vrot.lane.b32.xlu0 %v2125_v37, %s8329_s28  ;;  %v2126_v39 = vld [vmem:[#allocation2 + $0x111] sm:$0xff] }
 0x291   : > { %2201 = vrot.lane.b32.xlu1 %v2122_v23, %s8329_s28  ;;  %v2129_v23 = vld [vmem:[#allocation2 + $0x139] sm:$0xff] }
 0x292   : > { %v9414_v22 = vpop.permute.xlu0 %1838 }
 0x293   : > { %v9412_v57 = vpop.permute.xlu1 %1832  ;;  %13682 = vst [vmem:[#allocation140_spill] sm:$0xff] %v9414_v22 }
 0x294   : > { %13681 = vst [vmem:[#allocation139_spill] sm:$0xff] %v9412_v57  ;;  %2211 = vrot.lane.b32.xlu0 %v2127_v11, %s8329_s28  ;;  %v2128_v57 = vld [vmem:[#allocation2 + $0x129] sm:$0xff] }
 0x295   : > { %2205 = vrot.lane.b32.xlu1 %v2124_v26, %s8329_s28  ;;  %v2131_v26 = vld [vmem:[#allocation2 + $0x151] sm:$0xff] }
 0x296   : > { %v9420_v33 = vpop.permute.xlu0 %1842 }
 0x297   : > { %v9418_v36 = vpop.permute.xlu1 %1836  ;;  %13684 = vst [vmem:[#allocation142_spill] sm:$0xff] %v9420_v33  ;;  %v2300_v33 = vld [vmem:[#allocation2 + $0x3a] sm:$0xff] }
 0x298   : > { %13683 = vst [vmem:[#allocation141_spill] sm:$0xff] %v9418_v36  ;;  %2215 = vrot.lane.b32.xlu0 %v2129_v23, %s8329_s28  ;;  %v2130_v36 = vld [vmem:[#allocation2 + $0x141] sm:$0xff]  ;;  %v2132_v23 = vld [vmem:[#allocation2 + $0x159] sm:$0xff] }
 0x299   : > { %2209 = vrot.lane.b32.xlu1 %v2126_v39, %s8329_s28 }
 0x29a   : > { %v9426_v63 = vpop.permute.xlu0 %1846 }
 0x29b   : > { %v9424_v37 = vpop.permute.xlu1 %1840  ;;  %13686 = vst [vmem:[#allocation144_spill] sm:$0xff] %v9426_v63 }
 0x29c   : > { %13685 = vst [vmem:[#allocation143_spill] sm:$0xff] %v9424_v37  ;;  %2219 = vrot.lane.b32.xlu0 %v2131_v26, %s8329_s28  ;;  %v2137_v26 = vld [vmem:[#allocation2 + $0x199] sm:$0xff] }
 0x29d   : > { %2213 = vrot.lane.b32.xlu1 %v2128_v57, %s8329_s28 }
 0x29e   : > { %v9432_v22 = vpop.permute.xlu0 %1979 }
 0x29f   : > { %v9430_v11 = vpop.permute.xlu1 %1844 }
 0x2a0   : > { %13687 = vst [vmem:[#allocation145_spill] sm:$0xff] %v9430_v11  ;;  %2223 = vrot.lane.b32.xlu0 %v9027_v54, %s8329_s28 }
 0x2a1   : > { %2217 = vrot.lane.b32.xlu1 %v2130_v36, %s8329_s28 }
 0x2a2   : > { %v9439_v37 = vpop.permute.xlu0 %1983 }
 0x2a3   : > { %v9437_v39 = vpop.permute.xlu1 %1848 }
 0x2a4   : > { %13688 = vst [vmem:[#allocation146_spill] sm:$0xff] %v9437_v39  ;;  %2227 = vrot.lane.b32.xlu0 %v8999_v48, %s8329_s28  ;;  %v2138_v39 = vld [vmem:[#allocation2 + $0x1a1] sm:$0xff] }
 0x2a5   : > { %2221 = vrot.lane.b32.xlu1 %v2132_v23, %s8329_s28  ;;  %v2299_v23 = vld [vmem:[#allocation2 + $0x32] sm:$0xff] }
 0x2a6   : > { %v9446_v11 = vpop.permute.xlu0 %1987 }
 0x2a7   : > { %v9444_v57 = vpop.permute.xlu1 %1981 }
 0x2a8   : > { %2231 = vrot.lane.b32.xlu0 %v2137_v26, %s8329_s28 }
 0x2a9   : > { %2225 = vrot.lane.b32.xlu1 %v9057_v21, %s8329_s28  ;;  %v2301_v21 = vld [vmem:[#allocation2 + $0x4a] sm:$0xff] }
 0x2aa   : > { %v9453_v36 = vpop.permute.xlu0 %1991 }
 0x2ab   : > { %v9451_v54 = vpop.permute.xlu1 %1985 }
 0x2ac   : > { %2363 = vrot.lane.b32.xlu0 %v2299_v23, %s8330_s29 }
 0x2ad   : > { %2229 = vrot.lane.b32.xlu1 %v9033_v44, %s8329_s28  ;;  %v2303_v44 = vld [vmem:[#allocation2 + $0x62] sm:$0xff] }
 0x2ae   : > { %v9460_v63 = vpop.permute.xlu0 %1995 }
 0x2af   : > { %v9458_v48 = vpop.permute.xlu1 %1989  ;;  %13690 = vst [vmem:[#allocation148_spill] sm:$0xff] %v9460_v63  ;;  %v13753_v63 = vld [vmem:[#allocation20_spill] sm:$0xff] }
 0x2b0   : > { %13689 = vst [vmem:[#allocation147_spill] sm:$0xff] %v9458_v48  ;;  %2367 = vrot.lane.b32.xlu0 %v2301_v21, %s8330_s29 }
 0x2b1   : > { %2233 = vrot.lane.b32.xlu1 %v2138_v39, %s8329_s28  ;;  %v2305_v39 = vld [vmem:[#allocation2 + $0x7a] sm:$0xff] }
 0x2b2   : > { %v9466_v24 = vpop.permute.xlu0 %1999 }
 0x2b3   : > { %v9464_v26 = vpop.permute.xlu1 %1993  ;;  %13692 = vst [vmem:[#allocation150_spill] sm:$0xff] %v9466_v24 }
 0x2b4   : > { %13691 = vst [vmem:[#allocation149_spill] sm:$0xff] %v9464_v26  ;;  %2371 = vrot.lane.b32.xlu0 %v2303_v44, %s8330_s29 }
 0x2b5   : > { %2365 = vrot.lane.b32.xlu1 %v2300_v33, %s8330_s29  ;;  %v2307_v33 = vld [vmem:[#allocation2 + $0x92] sm:$0xff] }
 0x2b6   : > { %v9472_v7 = vpop.permute.xlu0 %2003 }
 0x2b7   : > { %v9470_v23 = vpop.permute.xlu1 %1997  ;;  %13694 = vst [vmem:[#allocation152_spill] sm:$0xff] %v9472_v7 }
 0x2b8   : > { %13693 = vst [vmem:[#allocation151_spill] sm:$0xff] %v9470_v23  ;;  %2375 = vrot.lane.b32.xlu0 %v2305_v39, %s8330_s29  ;;  %v2308_v39 = vld [vmem:[#allocation2 + $0x9a] sm:$0xff] }
 0x2b9   : > { %2369 = vrot.lane.b32.xlu1 %v2302_v56, %s8330_s29 }
 0x2ba   : > { %v9478_v27 = vpop.permute.xlu0 %2007 }
 0x2bb   : > { %v9476_v21 = vpop.permute.xlu1 %2001  ;;  %13696 = vst [vmem:[#allocation154_spill] sm:$0xff] %v9478_v27 }
 0x2bc   : > { %13695 = vst [vmem:[#allocation153_spill] sm:$0xff] %v9476_v21  ;;  %2379 = vrot.lane.b32.xlu0 %v2307_v33, %s8330_s29 }
 0x2bd   : > { %2373 = vrot.lane.b32.xlu1 %v2304_v53, %s8330_s29 }
 0x2be   : > { %v9484_v23 = vpop.permute.xlu0 %2011 }
 0x2bf   : > { %v9482_v44 = vpop.permute.xlu1 %2005  ;;  %13698 = vst [vmem:[#allocation156_spill] sm:$0xff] %v9484_v23 }
 0x2c0   : > { %13697 = vst [vmem:[#allocation155_spill] sm:$0xff] %v9482_v44  ;;  %2383 = vrot.lane.b32.xlu0 %v9095_v41, %s8330_s29 }
 0x2c1   : > { %2377 = vrot.lane.b32.xlu1 %v2306_v13, %s8330_s29  ;;  %v2313_v13 = vld [vmem:[#allocation2 + $0xda] sm:$0xff] }
 0x2c2   : > { %v9491_v21 = vpop.permute.xlu0 %2015 }
 0x2c3   : > { %v9489_v56 = vpop.permute.xlu1 %2009  ;;  %13700 = vst [vmem:[#allocation158_spill] sm:$0xff] %v9491_v21  ;;  %v2318_v21 = vld [vmem:[#allocation2 + $0x112] sm:$0xff] }
 0x2c4   : > { %13699 = vst [vmem:[#allocation157_spill] sm:$0xff] %v9489_v56  ;;  %2387 = vrot.lane.b32.xlu0 %v9083_v38, %s8330_s29  ;;  %v2312_v56 = vld [vmem:[#allocation2 + $0xca] sm:$0xff] }
 0x2c5   : > { %2381 = vrot.lane.b32.xlu1 %v2308_v39, %s8330_s29  ;;  %v2315_v39 = vld [vmem:[#allocation2 + $0xf2] sm:$0xff] }
 0x2c6   : > { %v9498_v33 = vpop.permute.xlu0 %2019 }
 0x2c7   : > { %v9496_v53 = vpop.permute.xlu1 %2013  ;;  %13702 = vst [vmem:[#allocation160_spill] sm:$0xff] %v9498_v33 }
 0x2c8   : > { %13701 = vst [vmem:[#allocation159_spill] sm:$0xff] %v9496_v53  ;;  %2391 = vrot.lane.b32.xlu0 %v2313_v13, %s8330_s29  ;;  %v2314_v53 = vld [vmem:[#allocation2 + $0xe2] sm:$0xff] }
 0x2c9   : > { %2385 = vrot.lane.b32.xlu1 %v9067_v6, %s8330_s29  ;;  %v2317_v6 = vld [vmem:[#allocation2 + $0x10a] sm:$0xff]  ;;  %v8158_v13 = vld [vmem:[%s13497_s7] sm:$0x3c]  }
 0x2ca   : > { %v9505_v23 = vpop.permute.xlu0 %2023 }
 0x2cb   : > { %v9503_v41 = vpop.permute.xlu1 %2017  ;;  %13704 = vst [vmem:[#allocation162_spill] sm:$0xff] %v9505_v23 }
 0x2cc   : > { %13703 = vst [vmem:[#allocation161_spill] sm:$0xff] %v9503_v41  ;;  %2395 = vrot.lane.b32.xlu0 %v2315_v39, %s8330_s29  ;;  %v2847_v41 = vrot.slane %v8158_v13, 2 }
 0x2cd   : > { %2389 = vrot.lane.b32.xlu1 %v2312_v56, %s8330_s29  ;;  %v2316_v56 = vld [vmem:[#allocation2 + $0xfa] sm:$0xff] }
 0x2ce   : > { %v9511_v33 = vpop.permute.xlu0 %2027  ;;  %8135 = vmatprep.subr.msk.bf16.mxu1 %vm2896_vm5, %v2847_v41 }
 0x2cf   : > { %v9509_v38 = vpop.permute.xlu1 %2021  ;;  %13706 = vst [vmem:[#allocation164_spill] sm:$0xff] %v9511_v33  ;;  %v2898_v33 = vsel %vm2896_vm5, %v2847_v41, 0  ;;  %v2323_v41 = vld [vmem:[#allocation2 + $0x152] sm:$0xff] }
 0x2d0   : > { %13705 = vst [vmem:[#allocation163_spill] sm:$0xff] %v9509_v38  ;;  %2399 = vrot.lane.b32.xlu0 %v2317_v6, %s8330_s29  ;;  %v2319_v38 = vld [vmem:[#allocation2 + $0x122] sm:$0xff]  ;;  %7932 = vmatpush3.bf16.msra.mxu1 %v2898_v33  ;;  %v2321_v6 = vld [vmem:[#allocation2 + $0x13a] sm:$0xff] }
 0x2d1   : > { %2393 = vrot.lane.b32.xlu1 %v2314_v53, %s8330_s29  ;;  %v2322_v33 = vld [vmem:[#allocation2 + $0x142] sm:$0xff] }
 0x2d2   : > { %v9520_v39 = vpop.permute.xlu0 %2031 }
 0x2d3   : > { %v9518_v23 = vpop.permute.xlu1 %2025  ;;  %13708 = vst [vmem:[#allocation166_spill] sm:$0xff] %v9520_v39  ;;  %v2320_v39 = vld [vmem:[#allocation2 + $0x12a] sm:$0xff] }
 0x2d4   : > { %13707 = vst [vmem:[#allocation165_spill] sm:$0xff] %v9518_v23  ;;  %2403 = vrot.lane.b32.xlu0 %v2319_v38, %s8330_s29 }
 0x2d5   : > { %2397 = vrot.lane.b32.xlu1 %v2316_v56, %s8330_s29 }
 0x2d6   : > { %v9526_v44 = vpop.permute.xlu0 %2035 }
 0x2d7   : > { %v9524_v53 = vpop.permute.xlu1 %2029  ;;  %13710 = vst [vmem:[#allocation168_spill] sm:$0xff] %v9526_v44 }
 0x2d8   : > { %13709 = vst [vmem:[#allocation167_spill] sm:$0xff] %v9524_v53  ;;  %2407 = vrot.lane.b32.xlu0 %v2321_v6, %s8330_s29  ;;  %v2324_v6 = vld [vmem:[#allocation2 + $0x15a] sm:$0xff] }
 0x2d9   : > { %2401 = vrot.lane.b32.xlu1 %v2318_v21, %s8330_s29 }
 0x2da   : > { %v9532_v56 = vpop.permute.xlu0 %2039 }
 0x2db   : > { %v9530_v13 = vpop.permute.xlu1 %2033  ;;  %13712 = vst [vmem:[#allocation170_spill] sm:$0xff] %v9532_v56 }
 0x2dc   : > { %13711 = vst [vmem:[#allocation169_spill] sm:$0xff] %v9530_v13  ;;  %2411 = vrot.lane.b32.xlu0 %v2323_v41, %s8330_s29  ;;  %v2329_v41 = vld [vmem:[#allocation2 + $0x19a] sm:$0xff] }
 0x2dd   : > { %2405 = vrot.lane.b32.xlu1 %v2320_v39, %s8330_s29 }
 0x2de   : > { %v9538_v53 = vpop.permute.xlu0 %2171 }
 0x2df   : > { %v9536_v38 = vpop.permute.xlu1 %2037 }
 0x2e0   : > { %13713 = vst [vmem:[#allocation171_spill] sm:$0xff] %v9536_v38  ;;  %2415 = vrot.lane.b32.xlu0 %v9107_v3, %s8330_s29  ;;  %v2326_v38 = vld [vmem:[#allocation2 + $0x172] sm:$0xff] }
 0x2e1   : > { %2409 = vrot.lane.b32.xlu1 %v2322_v33, %s8330_s29  ;;  %v9561_v33 = vld [vmem:[%s13495_s5] ss:$0 sm:$0xff] }
 0x2e2   : > { %v9545_v13 = vpop.permute.xlu0 %2175 }
 0x2e3   : > { %v9543_v21 = vpop.permute.xlu1 %2041 }
 0x2e4   : > { %13714 = vst [vmem:[#allocation172_spill] sm:$0xff] %v9543_v21  ;;  %2419 = vrot.lane.b32.xlu0 %v9221_v28, %s8330_s29  ;;  %v2330_v28 = vld [vmem:[#allocation2 + $0x1a2] sm:$0xff]  ;;  %v9570_v21 = vld [vmem:[%s13497_s7] sm:$0x3] }
 0x2e5   : > { %2413 = vrot.lane.b32.xlu1 %v2324_v6, %s8330_s29  ;;  %13716 = vst [vmem:[#allocation174_spill] sm:$0xff] %v9570_v21  ;;  %8136 = vmatprep.subr.msk.bf16.mxu1 %vm693_vm0, %v9570_v21 }
 0x2e6   : > { %v9552_v56 = vpop.permute.xlu0 %2179 }
 0x2e7   : > { %v9550_v39 = vpop.permute.xlu1 %2173 }
 0x2e8   : > { %2423 = vrot.lane.b32.xlu0 %v2329_v41, %s8330_s29 }
 0x2e9   : > { %2417 = vrot.lane.b32.xlu1 %v2326_v38, %s8330_s29 }
 0x2ea   : > { %v9563_v6 = vpop.permute.xlu0 %2183 }
 0x2eb   : > { %v9556_v3 = vpop.permute.xlu1 %2177  ;;  %13715 = vst [vmem:[#allocation173_spill] sm:$0xff] %v9563_v6  ;;  %v13760_v6 = vld [vmem:[#allocation10_spill] sm:$0xff] }
 0x2ec   : > { %2722 = vrot.lane.b32.xlu0 %v9561_v33, %s13507_s15 }
 0x2ed   : > { %2421 = vrot.lane.b32.xlu1 %v9234_v34, %s8330_s29  ;;  %v9584_v34 = vld [vmem:[%s13496_s6] ss:$0 sm:$0xff] }
 0x2ee   : > { %v9578_v41 = vpop.permute.xlu0 %2187 }
 0x2ef   : > { %v9574_v38 = vpop.permute.xlu1 %2181  ;;  %13718 = vst [vmem:[#allocation176_spill] sm:$0xff] %v9578_v41 }
 0x2f0   : > { %13717 = vst [vmem:[#allocation175_spill] sm:$0xff] %v9574_v38 }
 0x2f1   : > { %2425 = vrot.lane.b32.xlu1 %v2330_v28, %s8330_s29 }
 0x2f2   : > { %v9588_v23 = vpop.permute.xlu0 %2191 }
 0x2f3   : > { %v9586_v44 = vpop.permute.xlu1 %2185  ;;  %13720 = vst [vmem:[#allocation178_spill] sm:$0xff] %v9588_v23 }
 0x2f4   : > { %13719 = vst [vmem:[#allocation177_spill] sm:$0xff] %v9586_v44 }
 0x2f5   : > { %2757 = vrot.lane.b32.xlu1 %v9584_v34, %s13507_s15  ;;  %s9757_s15 = scalar_lea.vmem %s13503_s13, %s7810_s14  ;;  %s14353_s14 = smov 124  }
 0x2f6   : > { %v9594_v21 = vpop.permute.xlu0 %2195 }
 0x2f7   : > { %v9592_v27 = vpop.permute.xlu1 %2189  ;;  %13722 = vst [vmem:[#allocation180_spill] sm:$0xff] %v9594_v21 }
 0x2f8   : > { %13721 = vst [vmem:[#allocation179_spill] sm:$0xff] %v9592_v27  ;;  %v8161_v27 = vld [vmem:[%s8439_s17 + $0x10] sm:$0xff] }
 0x2f9   : > { %v2573_v21 = vmul.f32 %v8161_v27, %v9561_v33 }
 0x2fa   : > { %v9598_v28 = vpop.permute.xlu0 %2199 }
 0x2fb   : > { %v9596_v7 = vpop.permute.xlu1 %2193  ;;  %13724 = vst [vmem:[#allocation182_spill] sm:$0xff] %v9598_v28 }
 0x2fc   : > { %13723 = vst [vmem:[#allocation181_spill] sm:$0xff] %v9596_v7  ;;  %v8162_v7 = vld [vmem:[#allocation2 + $0x20] sm:$0xff] }
 0x2fd   : > { %v1117_v28 = vadd.f32 %v8162_v7, %v8853_v19  ;;  %v9627_v19 = vadd.f32 %v9584_v34, %v2573_v21  ;;  %v13736_v7 = vld [vmem:[#allocation3_spill] sm:$0xff] }
 0x2fe   : > { %v9602_v29 = vpop.permute.xlu0 %2203 }
 0x2ff   : > { %v9600_v62 = vpop.permute.xlu1 %2197  ;;  %13726 = vst [vmem:[#allocation184_spill] sm:$0xff] %v9602_v29  ;;  %v8164_v29 = vld [vmem:[#allocation2 + $0x18] sm:$0xff] }
 0x300   : > { %13725 = vst [vmem:[#allocation183_spill] sm:$0xff] %v9600_v62  ;;  %v2574_v62 = vmul.f32 %v8163_v25, %v9561_v33  ;;  %v13737_v25 = vld [vmem:[#allocation27_spill] sm:$0xff] }
 0x302   : > { %v9606_v12 = vpop.permute.xlu0 %2207  ;;  %v9630_v27 = vadd.f32 %v9584_v34, %v2574_v62  ;;  %v13743_v62 = vld [vmem:[#allocation11_spill] sm:$0xff] }
 0x303   : > { %v9604_v20 = vpop.permute.xlu1 %2201  ;;  %13728 = vst [vmem:[#allocation186_spill] sm:$0xff] %v9606_v12  ;;  %v890_v12 = vld [vmem:[#allocation2] sm:$0xff] }
 0x304   : > { %13727 = vst [vmem:[#allocation185_spill] sm:$0xff] %v9604_v20  ;;  %v1116_v20 = vadd.f32 %v8164_v29, %v8756_v40  ;;  %v1114_v40 = vadd.f32 %v13736_v7, %v890_v12  ;;  %v8165_v29 = vld [vmem:[#allocation2 + $0xe0] sm:$0xff] }
 0x305   : > { %v8167_v12 = vld [vmem:[%s8439_s17] sm:$0xff] }
 0x306   : > { %v9610_v44 = vpop.permute.xlu0 %2211  ;;  %v9645_v7 = vmul.f32 %v8167_v12, %v9561_v33 }
 0x307   : > { %v9608_v23 = vpop.permute.xlu1 %2205  ;;  %13730 = vst [vmem:[#allocation188_spill] sm:$0xff] %v9610_v44  ;;  %v891_v44 = vld [vmem:[#allocation2 + $0x8] sm:$0xff] }
 0x308   : > { %13729 = vst [vmem:[#allocation187_spill] sm:$0xff] %v9608_v23  ;;  %v13733_v23 = vld [vmem:[#allocation29_spill] sm:$0xff] }
 0x309   : > { %v1309_v58 = vadd.f32 %v13733_v23, %v1117_v28  ;;  %v13739_v28 = vld [vmem:[#allocation4_spill] sm:$0xff] }
 0x30a   : > { %v9620_v50 = vpop.permute.xlu0 %2215  ;;  %v1115_v26 = vadd.f32 %v13739_v28, %v891_v44  ;;  %v13745_v28 = vld [vmem:[#allocation36_spill] sm:$0xff]  ;;  %v13751_v44 = vld [vmem:[#allocation7_spill] sm:$0xff] }
 0x30b   : > { %v9612_v24 = vpop.permute.xlu1 %2209  ;;  %13732 = vst [vmem:[#allocation190_spill] sm:$0xff] %v9620_v50  ;;  %v1133_v50 = vadd.f32 %v8165_v29, %v13737_v25  ;;  %v1501_v21 = vadd.f32 %v13741_v0, %v1309_v58  ;;  %v8168_v29 = vld [vmem:[%s8439_s17 + $0x8] sm:$0xff]  ;;  %v8169_v58 = vld [vmem:[%s8439_s17 + $0x80] sm:$0xff] }
 0x30c   : > { %13731 = vst [vmem:[#allocation189_spill] sm:$0xff] %v9612_v24  ;;  %v1308_v24 = vadd.f32 %v13734_v4, %v1116_v20  ;;  %v8166_v4 = vld [vmem:[#allocation2 + $0xd8] sm:$0xff]  ;;  %v13740_v20 = vld [vmem:[#allocation19_spill] sm:$0xff]  ;;  %v9649_v25 = vmul.f32 %v8168_v29, %v9561_v33  ;;  %v13750_v29 = vld [vmem:[#allocation5_spill] sm:$0xff] }
 0x30d   : > { %v1325_v30 = vadd.f32 %v13742_v5, %v1133_v50  ;;  %v9656_v5 = vmul.f32 %v8169_v58, %v9561_v33  ;;  %v8170_v50 = vld [vmem:[%s8439_s17 + $0x88] sm:$0xff]  ;;  %v1693_v8 = vadd.f32 %v13753_v63, %v1501_v21  ;;  %v13762_v21 = vld [vmem:[#allocation13_spill] sm:$0xff] }
 0x30e   : > { %v9634_v23 = vpop.permute.xlu0 %2219  ;;  %v1500_v49 = vadd.f32 %v13743_v62, %v1308_v24  ;;  %v9660_v24 = vmul.f32 %v8170_v50, %v9561_v33  ;;  %v13754_v58 = vld [vmem:[#allocation18_spill] sm:$0xff]  ;;  %v1120_v33 = vadd.f32 %v8173_v61, %v13755_v46  ;;  %v8174_v50 = vld [vmem:[#allocation2 + $0x50] sm:$0xff]  ;;  %v13764_v61 = vld [vmem:[#allocation33_spill] sm:$0xff] }
 0x30f   : > { %v9624_v41 = vpop.permute.xlu1 %2213  ;;  %13738 = vst [vmem:[#allocation34_spill] sm:$0xff] %v9634_v23  ;;  %13746 = vst [vmem:[#allocation27_spill] sm:$0xff] %v9656_v5  ;;  %v8171_v23 = vld [vmem:[#allocation2 + $0x30] sm:$0xff]  ;;  %v1517_v5 = vadd.f32 %v13754_v58, %v1325_v30  ;;  %v13763_v58 = vld [vmem:[#allocation12_spill] sm:$0xff] }
 0x310   : > { %13735 = vst [vmem:[#allocation29_spill] sm:$0xff] %v9624_v41  ;;  %v1132_v41 = vadd.f32 %v8166_v4, %v13740_v20  ;;  %13747 = vst [vmem:[#allocation4_spill] sm:$0xff] %v9660_v24  ;;  %v13748_v20 = vld [vmem:[#allocation6_spill] sm:$0xff]  ;;  %v1118_v38 = vadd.f32 %v8171_v23, %v13751_v44  ;;  %v13756_v24 = vld [vmem:[#allocation59_spill] sm:$0xff] }
 0x311   : > { %v1306_v62 = vadd.f32 %v13748_v20, %v1114_v40  ;;  %v1121_v40 = vadd.f32 %v8174_v50, %v13756_v24  ;;  %v13757_v20 = vld [vmem:[#allocation15_spill] sm:$0xff]  ;;  %v8176_v44 = vld [vmem:[#allocation2 + $0xf8] sm:$0xff]  ;;  %v13766_v50 = vld [vmem:[#allocation69_spill] sm:$0xff] }
 0x312   : > { %v1324_v4 = vadd.f32 %v13745_v28, %v1132_v41  ;;  %v9663_v12 = vpop.permute.xlu0 %2223  ;;  %v8172_v41 = vld [vmem:[#allocation2 + $0x38] sm:$0xff] }
 0x313   : > { %v9641_v17 = vpop.permute.xlu1 %2217  ;;  %13749 = vst [vmem:[#allocation19_spill] sm:$0xff] %v9663_v12  ;;  %v13752_v28 = vld [vmem:[#allocation8_spill] sm:$0xff]  ;;  %v1692_v12 = vadd.f32 %v13757_v20, %v1500_v49  ;;  %v1313_v24 = vadd.f32 %v13765_v35, %v1121_v40  ;;  %v1312_v49 = vadd.f32 %v13766_v50, %v1120_v33 }
 0x314   : > { %13744 = vst [vmem:[#allocation3_spill] sm:$0xff] %v9641_v17  ;;  %v1307_v17 = vadd.f32 %v13750_v29, %v1115_v26  ;;  %v1119_v0 = vadd.f32 %v8172_v41, %v13752_v28  ;;  %v8175_v26 = vld [vmem:[#allocation2 + $0xf0] sm:$0xff]  ;;  %v13759_v29 = vld [vmem:[#allocation9_spill] sm:$0xff]  ;;  %v1135_v41 = vadd.f32 %v8176_v44, %v13760_v6  ;;  %v1516_v30 = vadd.f32 %v13762_v21, %v1324_v4  ;;  %v13770_v6 = vld [vmem:[#allocation28_spill] sm:$0xff] }
 0x315   : > { %v1134_v23 = vadd.f32 %v8175_v26, %v13759_v29  ;;  %v13761_v28 = vld [vmem:[#allocation21_spill] sm:$0xff]  ;;  %v1310_v44 = vadd.f32 %v13770_v6, %v1118_v38  ;;  %v13773_v21 = vld [vmem:[#allocation22_spill] sm:$0xff]  ;;  %v13775_v35 = vld [vmem:[#allocation32_spill] sm:$0xff] }
 0x316   : > { %v1498_v63 = vadd.f32 %v13761_v28, %v1306_v62  ;;  %v1311_v48 = vadd.f32 %v13763_v58, %v1119_v0  ;;  %v1499_v46 = vadd.f32 %v13764_v61, %v1307_v17  ;;  %v9683_v20 = vpop.permute.xlu0 %2227  ;;  %v13769_v26 = vld [vmem:[#allocation25_spill] sm:$0xff]  ;;  %v13771_v62 = vld [vmem:[#allocation30_spill] sm:$0xff]  ;;  %v9695_v17 = vadd.f32 %v13773_v21, %v1517_v5  ;;  %v13776_v33 = vld [vmem:[#allocation24_spill] sm:$0xff] }
 0x317   : > { %v9673_v47 = vpop.permute.xlu1 %2221  ;;  %13767 = vst [vmem:[#allocation31_spill] sm:$0xff] %v9683_v20  ;;  %v9691_v28 = vadd.f32 %v13771_v62, %v1134_v23  ;;  %v13772_v4 = vld [vmem:[#allocation37_spill] sm:$0xff]  ;;  %v1884_v40 = vadd.f32 %v13775_v35, %v1692_v12  ;;  %v9699_v58 = vadd.f32 %v13776_v33, %v1693_v8  ;;  %v13779_v50 = vld [vmem:[#allocation40_spill] sm:$0xff]  ;;  %v13780_v23 = vld [vmem:[#allocation43_spill] sm:$0xff] }
 0x318   : > { %13758 = vst [vmem:[#allocation16_spill] sm:$0xff] %v9673_v47  ;;  %v13768_v47 = vld [vmem:[#allocation14_spill] sm:$0xff]  ;;  %v1690_v29 = vadd.f32 %v13769_v26, %v1498_v63  ;;  %v1691_v0 = vadd.f32 %v13772_v4, %v1499_v46  ;;  %13774 = vst [vmem:[#allocation11_spill] sm:$0xff] %v9695_v17  ;;  %v8177_v63 = vld [vmem:[#allocation2 + $0x60] sm:$0xff] }
 0x319   : > { %v9686_v59 = vadd.f32 %v13768_v47, %v1135_v41  ;;  %v13778_v47 = vld [vmem:[#allocation38_spill] sm:$0xff]  ;;  %v1122_v38 = vadd.f32 %v8177_v63, %v13779_v50  ;;  %v13781_v62 = vld [vmem:[#allocation17_spill] sm:$0xff]  ;;  %v13784_v8 = vld [vmem:[#allocation51_spill] sm:$0xff] }
 0x31a   : > { %v1882_v41 = vadd.f32 %v13778_v47, %v1690_v29  ;;  %v8178_v26 = vld [vmem:[#allocation2 + $0x68] sm:$0xff]  ;;  %v9707_v46 = vadd.f32 %v13781_v62, %v1516_v30  ;;  %v13782_v5 = vld [vmem:[#allocation41_spill] sm:$0xff]  ;;  %v1505_v33 = vadd.f32 %v13784_v8, %v1313_v24  ;;  %v13785_v20 = vld [vmem:[#allocation44_spill] sm:$0xff]  ;;  %v9713_v17 = vpop.permute.xlu0 %2231 }
 0x31b   : > { %v9701_v61 = vpop.permute.xlu1 %2225  ;;  %v1123_v6 = vadd.f32 %v8178_v26, %v13780_v23  ;;  %v1883_v4 = vadd.f32 %v13782_v5, %v1691_v0  ;;  %v8179_v21 = vld [vmem:[#allocation2 + $0x128] sm:$0xff]  ;;  %v13783_v12 = vld [vmem:[#allocation45_spill] sm:$0xff]  ;;  %13786 = vst [vmem:[#allocation6_spill] sm:$0xff] %v9713_v17  ;;  %v13788_v50 = vld [vmem:[#allocation47_spill] sm:$0xff] }
 0x31c   : > { %13777 = vst [vmem:[#allocation36_spill] sm:$0xff] %v9701_v61  ;;  %v1139_v35 = vadd.f32 %v8179_v21, %v13783_v12  ;;  %v1504_v61 = vadd.f32 %v13785_v20, %v1312_v49  ;;  %v8180_v29 = vld [vmem:[#allocation2 + $0x120] sm:$0xff]  ;;  %v13787_v47 = vld [vmem:[#allocation42_spill] sm:$0xff]  ;;  %v13789_v30 = vld [vmem:[#allocation56_spill] sm:$0xff]  ;;  %v2075_v0 = vadd.f32 %v9432_v22, %v1882_v41  ;;  %v1125_v22 = vadd.f32 %v8934_v15, %v9183_v14 }
 0x31d   : > { %v9716_v63 = vadd.f32 %v8180_v29, %v13787_v47  ;;  %v9719_v26 = vadd.f32 %v13788_v50, %v1123_v6  ;;  %v1502_v23 = vadd.f32 %v13789_v30, %v1310_v44  ;;  %v13790_v62 = vld [vmem:[#allocation49_spill] sm:$0xff]  ;;  %v8181_v21 = vld [vmem:[#allocation2 + $0x108] sm:$0xff]  ;;  %v8182_v49 = vld [vmem:[#allocation2 + $0x110] sm:$0xff] }
 0x31e   : > { %v9724_v5 = vadd.f32 %v13790_v62, %v1139_v35  ;;  %v13791_v24 = vld [vmem:[#allocation54_spill] sm:$0xff]  ;;  %v13793_v17 = vld [vmem:[#allocation68_spill] sm:$0xff]  ;;  %v13795_v44 = vld [vmem:[#allocation65_spill] sm:$0xff]  ;;  %v2267_v41 = vadd.f32 %v9538_v53, %v2075_v0  ;;  %v1317_v14 = vadd.f32 %v9199_v10, %v1125_v22  ;;  %v2077_v53 = vadd.f32 %v9439_v37, %v1884_v40 }
 0x31f   : > { %v9727_v12 = vadd.f32 %v8181_v21, %v13791_v24  ;;  %v13792_v20 = vld [vmem:[#allocation62_spill] sm:$0xff]  ;;  %v1503_v29 = vadd.f32 %v13793_v17, %v1311_v48  ;;  %v9731_v47 = vpop.permute.xlu1 %2229  ;;  %v13794_v6 = vld [vmem:[#allocation60_spill] sm:$0xff]  ;;  %v1314_v30 = vadd.f32 %v13795_v44, %v1122_v38  ;;  %v13797_v21 = vld [vmem:[#allocation73_spill] sm:$0xff]  ;;  %v2364_v38 = vpop.permute.xlu0 %2363  ;;  %v2076_v40 = vadd.f32 %v9444_v57, %v1883_v4 }
 0x320   : > { %v1137_v8 = vadd.f32 %v8182_v49, %v13792_v20  ;;  %v1694_v50 = vadd.f32 %v13794_v6, %v1502_v23  ;;  %v13796_v35 = vld [vmem:[#allocation66_spill] sm:$0xff]  ;;  %v13798_v49 = vld [vmem:[#allocation48_spill] sm:$0xff]  ;;  %v13799_v48 = vld [vmem:[#allocation55_spill] sm:$0xff]  ;;  %v2459_v0 = vadd.f32 %v2364_v38, %v2267_v41  ;;  %v2269_v22 = vadd.f32 %v9545_v13, %v2077_v53 }
 0x321   : > { %v1695_v24 = vadd.f32 %v13797_v21, %v1503_v29  ;;  %v1696_v20 = vadd.f32 %v13798_v49, %v1504_v61  ;;  %v1697_v17 = vadd.f32 %v13799_v48, %v1505_v33  ;;  %v9747_v23 = vld [vmem:[%s13494_s4] ss:$0 sm:$0xff]  ;;  %v8183_v6 = vld [vmem:[#allocation2 + $0x90] sm:$0xff]  ;;  %v13800_v44 = vld [vmem:[#allocation74_spill] sm:$0xff]  ;;  %v9775_v49 = vadd.f32 %v9151_v42, %v1317_v14 }
 0x322   : > { %v9739_v62 = vadd.f32 %v13796_v35, %v1137_v8  ;;  %v1126_v15 = vadd.f32 %v8183_v6, %v13800_v44  ;;  %v8184_v61 = vld [vmem:[#allocation2 + $0x98] sm:$0xff]  ;;  %v1506_v35 = vadd.f32 %v9169_v43, %v1314_v30  ;;  %v1886_v37 = vadd.f32 %v9340_v9, %v1694_v50 }
 0x323   : > { %v1127_v33 = vadd.f32 %v8184_v61, %v9119_v60  ;;  %v8185_v8 = vld [vmem:[#allocation2 + $0x78] sm:$0xff]  ;;  %v9762_v10 = vpop.permute.xlu1 %2233  ;;  %v2498_v41 = vadd.f32 %v9747_v23, %v2459_v0  ;;  %v2368_v30 = vpop.permute.xlu0 %2367  ;;  %v2268_v57 = vadd.f32 %v9550_v39, %v2076_v40  ;;  %v2610_v42 = vadd.f32 %v9584_v34, %v9649_v25 }
 0x324   : > { %v1124_v29 = vadd.f32 %v8185_v8, %v9153_v1  ;;  %v1698_v60 = vadd.f32 %v9185_v2, %v1506_v35  ;;  %v1318_v1 = vadd.f32 %v9201_v55, %v1126_v15  ;;  %v2079_v9 = vadd.f32 %v9446_v11, %v1886_v37  ;;  %v13807_v8 = vld [vmem:[#allocation93_spill] sm:$0xff]  ;;  %v13810_v37 = vld [vmem:[#allocation123_spill] sm:$0xff] }
 0x325   : > { %v9769_v21 = vadd.f32 %v9135_v51, %v1127_v33  ;;  %2531 = vst.msk [vmem:[%s9757_s15] sm:$0xff] %vm2530_vm6, %v2498_v41  ;;  %v2461_v13 = vadd.f32 %v2368_v30, %v2269_v22  ;;  %v1888_v51 = vadd.f32 %v9347_v18, %v1696_v20  ;;  %v2078_v2 = vadd.f32 %v9451_v54, %v9699_v58  ;;  %v13811_v41 = vld [vmem:[#allocation148_spill] sm:$0xff] }
 0x326   : > { %v1316_v43 = vadd.f32 %v9217_v16, %v1124_v29  ;;  %v2609_v16 = vadd.f32 %v9584_v34, %v9645_v7  ;;  %v2271_v11 = vadd.f32 %v9552_v56, %v2079_v9  ;;  %v13801_v50 = vmax.f32 %v9627_v19, 0.0 }
 0x327   : > { %v2366_v55 = vpop.permute.xlu1 %2365  ;;  %v2500_v39 = vadd.f32 %v9747_v23, %v2461_v13  ;;  %v13802_v18 = vmax.f32 %v9630_v27, 0.0  ;;  %v1887_v58 = vadd.f32 %v9352_v52, %v1695_v24  ;;  %v2372_v48 = vpop.permute.xlu0 %2371  ;;  %v2642_v38 = vmax.f32 %v2610_v42, 0.0  ;;  %v13804_v52 = vld [vmem:[#allocation122_spill] sm:$0xff]  ;;  %v8186_v13 = vld [vmem:[#allocation2 + $0xc0] sm:$0xff]  ;;  %v13815_v42 = vld [vmem:[#allocation108_spill] sm:$0xff] }
 0x328   : > { %v2460_v4 = vadd.f32 %v2366_v55, %v2268_v57  ;;  %v1508_v54 = vadd.f32 %v9121_v32, %v1316_v43  ;;  %v2641_v7 = vmax.f32 %v2609_v16, 0.0  ;;  %v2081_v25 = vadd.f32 %v9453_v36, %v1888_v51  ;;  %v13803_v32 = vld [vmem:[#allocation61_spill] sm:$0xff]  ;;  %v13805_v36 = vld [vmem:[#allocation147_spill] sm:$0xff]  ;;  %v13813_v51 = vld [vmem:[#allocation94_spill] sm:$0xff] }
 0x329   : > { %v9794_v20 = vpack.c.bf16 %v13802_v18, %v13801_v50  ;;  %v2270_v56 = vadd.f32 %v9556_v3, %v2078_v2  ;;  %2533 = vst.msk [vmem:[%s9757_s15 + $0x10] sm:$0xff] %vm2530_vm6, %v2500_v39  ;;  %v2463_v6 = vadd.f32 %v2372_v48, %v2271_v11  ;;  %v1507_v27 = vadd.f32 %v9215_v45, %v9719_v26  ;;  %v13806_v3 = vld [vmem:[#allocation173_spill] sm:$0xff]  ;;  %v13812_v43 = vld [vmem:[#allocation175_spill] sm:$0xff]  ;;  %v13817_v39 = vld [vmem:[#allocation124_spill] sm:$0xff] }
 0x32a   : > { %v2499_v19 = vadd.f32 %v9747_v23, %v2460_v4  ;;  %v1128_v44 = vadd.f32 %v13803_v32, %v9275_v31  ;;  %v1890_v24 = vadd.f32 %v13804_v52, %v1698_v60  ;;  %v9808_v14 = vpack.c.bf16 %v2642_v38, %v2641_v7  ;;  %v13808_v26 = vld [vmem:[#allocation117_spill] sm:$0xff]  ;;  %v13809_v31 = vld [vmem:[#allocation79_spill] sm:$0xff] }
 0x32b   : > { %v2370_v15 = vpop.permute.xlu1 %2369  ;;  %v2080_v53 = vadd.f32 %v13805_v36, %v1887_v58  ;;  %v2273_v0 = vadd.f32 %v13806_v3, %v2081_v25  ;;  %v2502_v61 = vadd.f32 %v9747_v23, %v2463_v6  ;;  %v1699_v45 = vadd.f32 %v13807_v8, %v1507_v27  ;;  %v2376_v22 = vpop.permute.xlu0 %2375  ;;  %v13814_v55 = vld [vmem:[#allocation107_spill] sm:$0xff]  ;;  %v13818_v18 = vld [vmem:[#allocation149_spill] sm:$0xff]  ;;  %v13819_v58 = vld [vmem:[#allocation176_spill] sm:$0xff] }
 0x32c   : > { %2532 = vst.msk [vmem:[%s9757_s15 + $0x8] sm:$0xff] %vm2530_vm6, %v2499_v19  ;;  %v2462_v33 = vadd.f32 %v2370_v15, %v2270_v56  ;;  %v1320_v29 = vadd.f32 %v13808_v26, %v1128_v44  ;;  %v1700_v35 = vadd.f32 %v13809_v31, %v1508_v54  ;;  %v1889_v40 = vadd.f32 %v13810_v37, %v1697_v17  ;;  %v13816_v11 = vld [vmem:[#allocation71_spill] sm:$0xff]  ;;  %v13822_v19 = vld [vmem:[#allocation96_spill] sm:$0xff]  ;;  %v13823_v32 = vld [vmem:[#allocation125_spill] sm:$0xff] }
 0x32d   : > { %v2083_v60 = vadd.f32 %v13811_v41, %v1890_v24  ;;  %v2272_v30 = vadd.f32 %v13812_v43, %v2080_v53  ;;  %2535 = vst.msk [vmem:[%s9757_s15 + $0x20] sm:$0xff] %vm2530_vm6, %v2502_v61  ;;  %v2465_v9 = vadd.f32 %v2376_v22, %v2273_v0  ;;  %v1130_v2 = vadd.f32 %v8186_v13, %v13813_v51  ;;  %v13820_v25 = vld [vmem:[#allocation111_spill] sm:$0xff]  ;;  %v13824_v24 = vld [vmem:[#allocation150_spill] sm:$0xff]  ;;  %v13825_v36 = vld [vmem:[#allocation177_spill] sm:$0xff] }
 0x32e   : > { %v2501_v57 = vadd.f32 %v9747_v23, %v2462_v33  ;;  %v1510_v16 = vadd.f32 %v13814_v55, %v1318_v1  ;;  %v1129_v17 = vadd.f32 %v13816_v11, %v13815_v42  ;;  %v1892_v4 = vadd.f32 %v13817_v39, %v1700_v35  ;;  %v13821_v6 = vld [vmem:[#allocation115_spill] sm:$0xff]  ;;  %v8187_v61 = vld [vmem:[#allocation2 + $0xc8] sm:$0xff]  ;;  %v13826_v33 = vld [vmem:[#allocation97_spill] sm:$0xff] }
 0x32f   : > { %v2374_v50 = vpop.permute.xlu1 %2373  ;;  %v2082_v54 = vadd.f32 %v13818_v18, %v1889_v40  ;;  %v2275_v48 = vadd.f32 %v13819_v58, %v2083_v60  ;;  %v2504_v7 = vadd.f32 %v9747_v23, %v2465_v9  ;;  %v1322_v1 = vadd.f32 %v13821_v6, %v1130_v2  ;;  %v2380_v52 = vpop.permute.xlu0 %2379  ;;  %v13827_v26 = vld [vmem:[#allocation112_spill] sm:$0xff]  ;;  %v13828_v35 = vld [vmem:[#allocation126_spill] sm:$0xff]  ;;  %v13830_v22 = vld [vmem:[#allocation151_spill] sm:$0xff] }
 0x330   : > { %2534 = vst.msk [vmem:[%s9757_s15 + $0x18] sm:$0xff] %vm2530_vm6, %v2501_v57  ;;  %v2464_v38 = vadd.f32 %v2374_v50, %v2272_v30  ;;  %v1702_v56 = vadd.f32 %v13820_v25, %v1510_v16  ;;  %v1512_v27 = vadd.f32 %v13822_v19, %v1320_v29  ;;  %v1891_v44 = vadd.f32 %v13823_v32, %v1699_v45  ;;  %v13829_v45 = vld [vmem:[#allocation84_spill] sm:$0xff]  ;;  %v13831_v60 = vld [vmem:[#allocation178_spill] sm:$0xff]  ;;  %v13832_v57 = vld [vmem:[#allocation23_spill] sm:$0xff] }
 0x331   : > { %v2085_v15 = vadd.f32 %v13824_v24, %v1892_v4  ;;  %v2274_v53 = vadd.f32 %v13825_v36, %v2082_v54  ;;  %2537 = vst.msk [vmem:[%s9757_s15 + $0x30] sm:$0xff] %vm2530_vm6, %v2504_v7  ;;  %v2467_v3 = vadd.f32 %v2380_v52, %v2275_v48  ;;  %v1131_v8 = vadd.f32 %v8187_v61, %v13826_v33  ;;  %v13833_v51 = vld [vmem:[#allocation116_spill] sm:$0xff]  ;;  %v13835_v42 = vld [vmem:[#allocation127_spill] sm:$0xff]  ;;  %v13839_v7 = vld [vmem:[#allocation101_spill] sm:$0xff] }
 0x332   : > { %v2503_v0 = vadd.f32 %v9747_v23, %v2464_v38  ;;  %v1321_v31 = vadd.f32 %v13827_v26, %v1129_v17  ;;  %v1894_v29 = vadd.f32 %v13828_v35, %v1702_v56  ;;  %v1701_v37 = vadd.f32 %v13829_v45, %v9775_v49  ;;  %v13834_v55 = vld [vmem:[#allocation100_spill] sm:$0xff]  ;;  %v13837_v4 = vld [vmem:[#allocation179_spill] sm:$0xff]  ;;  %v13842_v19 = vld [vmem:[#allocation153_spill] sm:$0xff] }
 0x333   : > { %v2378_v40 = vpop.permute.xlu1 %2377  ;;  %v2084_v41 = vadd.f32 %v13830_v22, %v1891_v44  ;;  %v2277_v43 = vadd.f32 %v13831_v60, %v2085_v15  ;;  %v2506_v30 = vadd.f32 %v9747_v23, %v2467_v3  ;;  %v1514_v13 = vadd.f32 %v13832_v57, %v1322_v1  ;;  %v2384_v11 = vpop.permute.xlu0 %2383  ;;  %v13836_v17 = vld [vmem:[#allocation152_spill] sm:$0xff]  ;;  %v13838_v58 = vld [vmem:[#allocation99_spill] sm:$0xff]  ;;  %v13844_v15 = vld [vmem:[#allocation58_spill] sm:$0xff] }
 0x334   : > { %2536 = vst.msk [vmem:[%s9757_s15 + $0x28] sm:$0xff] %vm2530_vm6, %v2503_v0  ;;  %v2466_v9 = vadd.f32 %v2378_v40, %v2274_v53  ;;  %v1511_v2 = vadd.f32 %v13833_v51, %v9769_v21  ;;  %v1704_v16 = vadd.f32 %v13834_v55, %v1512_v27  ;;  %v1893_v49 = vadd.f32 %v13835_v42, %v1701_v37  ;;  %v13840_v21 = vld [vmem:[#allocation120_spill] sm:$0xff]  ;;  %v13846_v0 = vld [vmem:[#allocation26_spill] sm:$0xff]  ;;  %v13847_v33 = vld [vmem:[#allocation129_spill] sm:$0xff] }
 0x335   : > { %v2087_v39 = vadd.f32 %v13836_v17, %v1894_v29  ;;  %v2276_v50 = vadd.f32 %v13837_v4, %v2084_v41  ;;  %2539 = vst.msk [vmem:[%s9757_s15 + $0x40] sm:$0xff] %vm2530_vm6, %v2506_v30  ;;  %v2469_v18 = vadd.f32 %v2384_v11, %v2277_v43  ;;  %v1323_v48 = vadd.f32 %v13838_v58, %v1131_v8  ;;  %v13841_v56 = vld [vmem:[#allocation128_spill] sm:$0xff]  ;;  %v13849_v29 = vld [vmem:[#allocation181_spill] sm:$0xff]  ;;  %v13851_v41 = vld [vmem:[#allocation35_spill] sm:$0xff] }
 0x336   : > { %v2505_v54 = vadd.f32 %v9747_v23, %v2466_v9  ;;  %v1513_v38 = vadd.f32 %v13839_v7, %v1321_v31  ;;  %v1703_v25 = vadd.f32 %v13840_v21, %v1511_v2  ;;  %v1896_v6 = vadd.f32 %v13841_v56, %v1704_v16  ;;  %v13843_v32 = vld [vmem:[#allocation180_spill] sm:$0xff]  ;;  %v13848_v31 = vld [vmem:[#allocation154_spill] sm:$0xff]  ;;  %v13861_v7 = vld [vmem:[#allocation183_spill] sm:$0xff] }
 0x337   : > { %v2382_v1 = vpop.permute.xlu1 %2381  ;;  %v2086_v27 = vadd.f32 %v13842_v19, %v1893_v49  ;;  %v2279_v44 = vadd.f32 %v13843_v32, %v2087_v39  ;;  %v2508_v52 = vadd.f32 %v9747_v23, %v2469_v18  ;;  %v1518_v36 = vadd.f32 %v13844_v15, %v9691_v28  ;;  %v13845_v53 = vld [vmem:[#allocation72_spill] sm:$0xff]  ;;  %v2388_v26 = vpop.permute.xlu0 %2387  ;;  %v13850_v28 = vld [vmem:[#allocation53_spill] sm:$0xff]  ;;  %v13852_v60 = vld [vmem:[#allocation130_spill] sm:$0xff] }
 0x338   : > { %2538 = vst.msk [vmem:[%s9757_s15 + $0x38] sm:$0xff] %vm2530_vm6, %v2505_v54  ;;  %v2468_v24 = vadd.f32 %v2382_v1, %v2276_v50  ;;  %v1328_v3 = vadd.f32 %v13845_v53, %v9727_v12  ;;  %v1706_v61 = vadd.f32 %v13846_v0, %v1514_v13  ;;  %v1895_v8 = vadd.f32 %v13847_v33, %v1703_v25  ;;  %v13853_v30 = vld [vmem:[#allocation104_spill] sm:$0xff]  ;;  %v13854_v13 = vld [vmem:[#allocation155_spill] sm:$0xff]  ;;  %v13855_v2 = vld [vmem:[#allocation182_spill] sm:$0xff] }
 0x339   : > { %v2089_v35 = vadd.f32 %v13848_v31, %v1896_v6  ;;  %v2278_v45 = vadd.f32 %v13849_v29, %v2086_v27  ;;  %2541 = vst.msk [vmem:[%s9757_s15 + $0x50] sm:$0xff] %vm2530_vm6, %v2508_v52  ;;  %v2471_v37 = vadd.f32 %v2388_v26, %v2279_v44  ;;  %v1521_v22 = vadd.f32 %v13850_v28, %v9739_v62  ;;  %v13856_v49 = vld [vmem:[#allocation63_spill] sm:$0xff]  ;;  %v13858_v39 = vld [vmem:[#allocation46_spill] sm:$0xff]  ;;  %v13860_v58 = vld [vmem:[#allocation156_spill] sm:$0xff] }
 0x33a   : > { %v2507_v40 = vadd.f32 %v9747_v23, %v2468_v24  ;;  %v1515_v12 = vadd.f32 %v13851_v41, %v1323_v48  ;;  %v1898_v43 = vadd.f32 %v13852_v60, %v1706_v61  ;;  %v1705_v9 = vadd.f32 %v13853_v30, %v1513_v38  ;;  %v13857_v62 = vld [vmem:[#allocation67_spill] sm:$0xff]  ;;  %v13862_v56 = vld [vmem:[#allocation70_spill] sm:$0xff]  ;;  %v13865_v32 = vld [vmem:[#allocation57_spill] sm:$0xff] }
 0x33b   : > { %v2386_v57 = vpop.permute.xlu1 %2385  ;;  %v2088_v51 = vadd.f32 %v13854_v13, %v1895_v8  ;;  %v2281_v55 = vadd.f32 %v13855_v2, %v2089_v35  ;;  %v2510_v16 = vadd.f32 %v9747_v23, %v2471_v37  ;;  %v1710_v11 = vadd.f32 %v13856_v49, %v1518_v36  ;;  %v13859_v50 = vld [vmem:[#allocation131_spill] sm:$0xff]  ;;  %v2392_v54 = vpop.permute.xlu0 %2391  ;;  %v13866_v24 = vld [vmem:[#allocation157_spill] sm:$0xff]  ;;  %v13867_v36 = vld [vmem:[#allocation184_spill] sm:$0xff] }
 0x33c   : > { %2540 = vst.msk [vmem:[%s9757_s15 + $0x48] sm:$0xff] %vm2530_vm6, %v2507_v40  ;;  %v2470_v42 = vadd.f32 %v2386_v57, %v2278_v45  ;;  %v1330_v17 = vadd.f32 %v13857_v62, %v9716_v63  ;;  %v1520_v4 = vadd.f32 %v13858_v39, %v1328_v3  ;;  %v1897_v18 = vadd.f32 %v13859_v50, %v1705_v9  ;;  %v13863_v63 = vld [vmem:[#allocation132_spill] sm:$0xff]  ;;  %v13864_v19 = vld [vmem:[#allocation39_spill] sm:$0xff]  ;;  %v13870_v26 = vld [vmem:[#allocation133_spill] sm:$0xff] }
 0x33d   : > { %v2091_v48 = vadd.f32 %v13860_v58, %v1898_v43  ;;  %v2280_v38 = vadd.f32 %v13861_v7, %v2088_v51  ;;  %2543 = vst.msk [vmem:[%s9757_s15 + $0x60] sm:$0xff] %vm2530_vm6, %v2510_v16  ;;  %v2473_v21 = vadd.f32 %v2392_v54, %v2281_v55  ;;  %v1519_v6 = vadd.f32 %v13862_v56, %v9686_v59  ;;  %v8188_v59 = vld [vmem:[#allocation2 + $0x150] sm:$0xff]  ;;  %v13868_v61 = vld [vmem:[#allocation76_spill] sm:$0xff]  ;;  %v13871_v35 = vld [vmem:[#allocation50_spill] sm:$0xff] }
 0x33e   : > { %v2509_v25 = vadd.f32 %v9747_v23, %v2470_v42  ;;  %v1900_v1 = vadd.f32 %v13863_v63, %v9707_v46  ;;  %v1707_v27 = vadd.f32 %v13864_v19, %v1515_v12  ;;  %v9909_v44 = vadd.f32 %v13865_v32, %v1521_v22  ;;  %v13869_v46 = vld [vmem:[#allocation75_spill] sm:$0xff]  ;;  %v13872_v37 = vld [vmem:[#allocation158_spill] sm:$0xff]  ;;  %v13873_v28 = vld [vmem:[#allocation185_spill] sm:$0xff] }
 0x33f   : > { %v2390_v52 = vpop.permute.xlu1 %2389  ;;  %v2090_v15 = vadd.f32 %v13866_v24, %v1897_v18  ;;  %v2283_v53 = vadd.f32 %v13867_v36, %v2091_v48  ;;  %v2512_v3 = vadd.f32 %v9747_v23, %v2473_v21  ;;  %v1142_v33 = vadd.f32 %v8188_v59, %v13868_v61  ;;  %v2396_v45 = vpop.permute.xlu0 %2395  ;;  %v8189_v60 = vld [vmem:[#allocation2 + $0x158] sm:$0xff]  ;;  %v13874_v43 = vld [vmem:[#allocation77_spill] sm:$0xff]  ;;  %v13875_v57 = vld [vmem:[#allocation83_spill] sm:$0xff] }
 0x340   : > { %2542 = vst.msk [vmem:[%s9757_s15 + $0x58] sm:$0xff] %vm2530_vm6, %v2509_v25  ;;  %v2472_v0 = vadd.f32 %v2390_v52, %v2280_v38  ;;  %v1711_v8 = vadd.f32 %v13869_v46, %v1519_v6  ;;  %v1899_v31 = vadd.f32 %v13870_v26, %v1707_v27  ;;  %v1712_v29 = vadd.f32 %v13871_v35, %v1520_v4  ;;  %v8190_v9 = vld [vmem:[#allocation2 + $0x138] sm:$0xff]  ;;  %v13876_v51 = vld [vmem:[#allocation86_spill] sm:$0xff]  ;;  %v13878_v49 = vld [vmem:[#allocation159_spill] sm:$0xff] }
 0x341   : > { %v2093_v40 = vadd.f32 %v13872_v37, %v1900_v1  ;;  %v2282_v22 = vadd.f32 %v13873_v28, %v2090_v15  ;;  %2545 = vst.msk [vmem:[%s9757_s15 + $0x70] sm:$0xff] %vm2530_vm6, %v2512_v3  ;;  %v2475_v41 = vadd.f32 %v2396_v45, %v2283_v53  ;;  %v9926_v30 = vadd.f32 %v8189_v60, %v13874_v43  ;;  %v13877_v55 = vld [vmem:[#allocation134_spill] sm:$0xff]  ;;  %v13880_v54 = vld [vmem:[#allocation88_spill] sm:$0xff]  ;;  %v8191_v48 = vld [vmem:[#allocation2 + $0x140] sm:$0xff] }
 0x342   : > { %v2511_v12 = vadd.f32 %v9747_v23, %v2472_v0  ;;  %v1140_v13 = vadd.f32 %v8190_v9, %v13875_v57  ;;  %v1522_v2 = vadd.f32 %v13876_v51, %v1330_v17  ;;  %v1902_v16 = vadd.f32 %v13877_v55, %v1710_v11  ;;  %v13879_v39 = vld [vmem:[#allocation186_spill] sm:$0xff]  ;;  %v13881_v7 = vld [vmem:[#allocation87_spill] sm:$0xff]  ;;  %v13882_v21 = vld [vmem:[#allocation92_spill] sm:$0xff] }
 0x343   : > { %v2394_v42 = vpop.permute.xlu1 %2393  ;;  %v2092_v62 = vadd.f32 %v13878_v49, %v1899_v31  ;;  %v2285_v4 = vadd.f32 %v13879_v39, %v2093_v40  ;;  %v2514_v50 = vadd.f32 %v9747_v23, %v2475_v41  ;;  %v1141_v38 = vadd.f32 %v8191_v48, %v13881_v7  ;;  %v13883_v25 = vld [vmem:[#allocation11_spill] sm:$0xff]  ;;  %v2400_v6 = vpop.permute.xlu0 %2399  ;;  %v13885_v63 = vld [vmem:[#allocation160_spill] sm:$0xff]  ;;  %v13887_v24 = vld [vmem:[#allocation89_spill] sm:$0xff] }
 0x344   : > { %2544 = vst.msk [vmem:[%s9757_s15 + $0x68] sm:$0xff] %vm2530_vm6, %v2511_v12  ;;  %v2474_v18 = vadd.f32 %v2394_v42, %v2282_v22  ;;  %v1714_v58 = vadd.f32 %v13880_v54, %v1522_v2  ;;  %v1332_v17 = vadd.f32 %v13882_v21, %v1140_v13  ;;  %v13884_v56 = vld [vmem:[#allocation135_spill] sm:$0xff]  ;;  %v2095_v1 = vadd.f32 %v13885_v63, %v1902_v16  ;;  %v13888_v36 = vld [vmem:[#allocation136_spill] sm:$0xff]  ;;  %v13891_v26 = vld [vmem:[#allocation161_spill] sm:$0xff] }
 0x345   : > { %v1901_v11 = vadd.f32 %v13884_v56, %v13883_v25  ;;  %v13886_v19 = vld [vmem:[#allocation187_spill] sm:$0xff]  ;;  %2547 = vst.msk [vmem:[%s9757_s15 + $0x80] sm:$0xff] %vm2530_vm6, %v2514_v50  ;;  %v2477_v32 = vadd.f32 %v2400_v6, %v2285_v4  ;;  %v1333_v15 = vadd.f32 %v13887_v24, %v1141_v38  ;;  %v1904_v53 = vadd.f32 %v13888_v36, %v1712_v29  ;;  %v13890_v61 = vld [vmem:[#allocation4_spill] sm:$0xff]  ;;  %v13893_v28 = vld [vmem:[#allocation78_spill] sm:$0xff] }
 0x346   : > { %v2284_v27 = vadd.f32 %v13886_v19, %v2092_v62  ;;  %v2513_v52 = vadd.f32 %v9747_v23, %v2474_v18  ;;  %v13889_v0 = vld [vmem:[#allocation27_spill] sm:$0xff]  ;;  %v2626_v46 = vadd.f32 %v9584_v34, %v13890_v61  ;;  %v13892_v35 = vld [vmem:[#allocation188_spill] sm:$0xff]  ;;  %v1524_v22 = vadd.f32 %v13893_v28, %v1332_v17  ;;  %v13894_v29 = vld [vmem:[#allocation137_spill] sm:$0xff] }
 0x347   : > { %v2398_v3 = vpop.permute.xlu1 %2397  ;;  %v2625_v59 = vadd.f32 %v9584_v34, %v13889_v0  ;;  %v2094_v31 = vadd.f32 %v13891_v26, %v1901_v11  ;;  %v2287_v45 = vadd.f32 %v13892_v35, %v2095_v1  ;;  %v2516_v37 = vadd.f32 %v9747_v23, %v2477_v32  ;;  %v2404_v12 = vpop.permute.xlu0 %2403  ;;  %v13895_v9 = vld [vmem:[#allocation162_spill] sm:$0xff]  ;;  %v13896_v34 = vld [vmem:[#allocation189_spill] sm:$0xff]  ;;  %v13900_v18 = vld [vmem:[#allocation163_spill] sm:$0xff] }
 0x348   : > { %2546 = vst.msk [vmem:[%s9757_s15 + $0x78] sm:$0xff] %vm2530_vm6, %v2513_v52  ;;  %v2476_v40 = vadd.f32 %v2398_v3, %v2284_v27  ;;  %v1903_v41 = vadd.f32 %v13894_v29, %v1711_v8  ;;  %v2658_v43 = vmax.f32 %v2626_v46, 0.0  ;;  %v2097_v57 = vadd.f32 %v13895_v9, %v1904_v53  ;;  %v13897_v55 = vld [vmem:[#allocation90_spill] sm:$0xff]  ;;  %v13898_v49 = vld [vmem:[#allocation105_spill] sm:$0xff]  ;;  %v13903_v25 = vld [vmem:[#allocation119_spill] sm:$0xff] }
 0x349   : > { %v2657_v60 = vmax.f32 %v2625_v59, 0.0  ;;  %v2286_v13 = vadd.f32 %v13896_v34, %v2094_v31  ;;  %2549 = vst.msk [vmem:[%s9757_s15 + $0x90] sm:$0xff] %vm2530_vm6, %v2516_v37  ;;  %v2479_v51 = vadd.f32 %v2404_v12, %v2287_v45  ;;  %v1334_v16 = vadd.f32 %v13897_v55, %v1142_v33  ;;  %v8192_v42 = vld [vmem:[#allocation2 + $0x168] sm:$0xff]  ;;  %v13902_v33 = vld [vmem:[#allocation91_spill] sm:$0xff]  ;;  %v13904_v11 = vld [vmem:[#allocation81_spill] sm:$0xff] }
 0x34a   : > { %v2515_v2 = vadd.f32 %v9747_v23, %v2476_v40  ;;  %v1144_v62 = vadd.f32 %v8192_v42, %v13898_v49  ;;  %v13899_v39 = vld [vmem:[#allocation138_spill] sm:$0xff]  ;;  %v2096_v54 = vadd.f32 %v13900_v18, %v1903_v41  ;;  %v1523_v17 = vadd.f32 %v13902_v33, %v9724_v5  ;;  %v13906_v19 = vld [vmem:[#allocation164_spill] sm:$0xff]  ;;  %v13907_v32 = vld [vmem:[#allocation29_spill] sm:$0xff] }
 0x34b   : > { %v1906_v8 = vadd.f32 %v13899_v39, %v1714_v58  ;;  %v2402_v4 = vpop.permute.xlu1 %2401  ;;  %v9967_v50 = vpack.c.bf16 %v2658_v43, %v2657_v60  ;;  %v13901_v48 = vld [vmem:[#allocation190_spill] sm:$0xff]  ;;  %v2518_v38 = vadd.f32 %v9747_v23, %v2479_v51  ;;  %v1716_v6 = vadd.f32 %v13904_v11, %v1524_v22  ;;  %v13905_v58 = vld [vmem:[#allocation139_spill] sm:$0xff]  ;;  %v2408_v1 = vpop.permute.xlu0 %2407  ;;  %v13910_v59 = vld [vmem:[#allocation109_spill] sm:$0xff] }
 0x34c   : > { %v2289_v7 = vadd.f32 %v13901_v48, %v2097_v57  ;;  %2548 = vst.msk [vmem:[%s9757_s15 + $0x88] sm:$0xff] %vm2530_vm6, %v2515_v2  ;;  %v2478_v21 = vadd.f32 %v2402_v4, %v2286_v13  ;;  %v1336_v56 = vadd.f32 %v13903_v25, %v1144_v62  ;;  %v1905_v63 = vadd.f32 %v13905_v58, %v9909_v44  ;;  %v13908_v53 = vld [vmem:[#allocation82_spill] sm:$0xff]  ;;  %v13909_v3 = vld [vmem:[#allocation95_spill] sm:$0xff]  ;;  %v13911_v46 = vld [vmem:[#allocation140_spill] sm:$0xff] }
 0x34d   : > { %v2099_v27 = vadd.f32 %v13906_v19, %v1906_v8  ;;  %v2288_v52 = vadd.f32 %v13907_v32, %v2096_v54  ;;  %2551 = vst.msk [vmem:[%s9757_s15 + $0xa0] sm:$0xff] %vm2530_vm6, %v2518_v38  ;;  %v1525_v5 = vadd.f32 %v13908_v53, %v1333_v15  ;;  %v1715_v0 = vadd.f32 %v13909_v3, %v1523_v17  ;;  %v13912_v31 = vld [vmem:[#allocation165_spill] sm:$0xff]  ;;  %v13913_v45 = vld [vmem:[#allocation34_spill] sm:$0xff]  ;;  %v8193_v22 = vld [vmem:[#allocation2 + $0x170] sm:$0xff] }
 0x34e   : > { %v2481_v24 = vadd.f32 %v2408_v1, %v2289_v7  ;;  %v2517_v36 = vadd.f32 %v9747_v23, %v2478_v21  ;;  %v1526_v61 = vadd.f32 %v13910_v59, %v1334_v16  ;;  %v1908_v26 = vadd.f32 %v13911_v46, %v1716_v6  ;;  %v13914_v29 = vld [vmem:[#allocation110_spill] sm:$0xff]  ;;  %v13915_v41 = vld [vmem:[#allocation113_spill] sm:$0xff]  ;;  %v13919_v2 = vld [vmem:[#allocation3_spill] sm:$0xff] }
 0x34f   : > { %v2406_v44 = vpop.permute.xlu1 %2405  ;;  %v2098_v35 = vadd.f32 %v13912_v31, %v1905_v63  ;;  %v2291_v37 = vadd.f32 %v13913_v45, %v2099_v27  ;;  %v1145_v15 = vadd.f32 %v8193_v22, %v13914_v29  ;;  %v13916_v60 = vld [vmem:[#allocation98_spill] sm:$0xff]  ;;  %v13917_v9 = vld [vmem:[#allocation141_spill] sm:$0xff]  ;;  %v2412_v34 = vpop.permute.xlu0 %2411  ;;  %v13920_v49 = vld [vmem:[#allocation80_spill] sm:$0xff] }
 0x350   : > { %v2520_v40 = vadd.f32 %v9747_v23, %v2481_v24  ;;  %2550 = vst.msk [vmem:[%s9757_s15 + $0x98] sm:$0xff] %vm2530_vm6, %v2517_v36  ;;  %v2480_v28 = vadd.f32 %v2406_v44, %v2288_v52  ;;  %v1718_v12 = vadd.f32 %v13915_v41, %v1526_v61  ;;  %v1528_v43 = vadd.f32 %v13916_v60, %v1336_v56  ;;  %v13918_v13 = vld [vmem:[#allocation166_spill] sm:$0xff]  ;;  %v13923_v54 = vld [vmem:[#allocation85_spill] sm:$0xff]  ;;  %v13924_v38 = vld [vmem:[#allocation167_spill] sm:$0xff] }
 0x351   : > { %v1907_v57 = vadd.f32 %v13917_v9, %v1715_v0  ;;  %v2101_v51 = vadd.f32 %v13918_v13, %v1908_v26  ;;  %v2290_v55 = vadd.f32 %v13919_v2, %v2098_v35  ;;  %v2483_v16 = vadd.f32 %v2412_v34, %v2291_v37  ;;  %v13921_v39 = vld [vmem:[#allocation114_spill] sm:$0xff]  ;;  %v13925_v33 = vld [vmem:[#allocation19_spill] sm:$0xff]  ;;  %v13929_v27 = vld [vmem:[#allocation168_spill] sm:$0xff] }
 0x352   : > { %2553 = vst.msk [vmem:[%s9757_s15 + $0xb0] sm:$0xff] %vm2530_vm6, %v2520_v40  ;;  %v2519_v42 = vadd.f32 %v9747_v23, %v2480_v28  ;;  %v1335_v62 = vadd.f32 %v13920_v49, %v9926_v30  ;;  %v1337_v8 = vadd.f32 %v13921_v39, %v1145_v15  ;;  %v13922_v4 = vld [vmem:[#allocation142_spill] sm:$0xff]  ;;  %v1717_v48 = vadd.f32 %v13923_v54, %v1525_v5  ;;  %v13928_v63 = vld [vmem:[#allocation143_spill] sm:$0xff]  ;;  %v13930_v52 = vld [vmem:[#allocation16_spill] sm:$0xff] }
 0x353   : > { %v1910_v18 = vadd.f32 %v13922_v4, %v1718_v12  ;;  %v2410_v7 = vpop.permute.xlu1 %2409  ;;  %v2100_v21 = vadd.f32 %v13924_v38, %v1907_v57  ;;  %v2293_v17 = vadd.f32 %v13925_v33, %v2101_v51  ;;  %v2522_v25 = vadd.f32 %v9747_v23, %v2483_v16  ;;  %v13926_v11 = vld [vmem:[#allocation118_spill] sm:$0xff]  ;;  %v2416_v19 = vpop.permute.xlu0 %2415  ;;  %v13931_v5 = vld [vmem:[#allocation103_spill] sm:$0xff]  ;;  %v13932_v0 = vld [vmem:[#allocation121_spill] sm:$0xff] }
 0x354   : > { %2552 = vst.msk [vmem:[%s9757_s15 + $0xa8] sm:$0xff] %vm2530_vm6, %v2519_v42  ;;  %v2482_v56 = vadd.f32 %v2410_v7, %v2290_v55  ;;  %v1527_v6 = vadd.f32 %v13926_v11, %v1335_v62  ;;  %v13927_v30 = vld [vmem:[#allocation102_spill] sm:$0xff]  ;;  %v1909_v1 = vadd.f32 %v13928_v63, %v1717_v48  ;;  %v1529_v3 = vadd.f32 %v13931_v5, %v1337_v8  ;;  %v13933_v61 = vld [vmem:[#allocation144_spill] sm:$0xff]  ;;  %v13934_v44 = vld [vmem:[#allocation169_spill] sm:$0xff] }
 0x355   : > { %v1720_v58 = vadd.f32 %v13927_v30, %v1528_v43  ;;  %v2103_v32 = vadd.f32 %v13929_v27, %v1910_v18  ;;  %v2292_v24 = vadd.f32 %v13930_v52, %v2100_v21  ;;  %2555 = vst.msk [vmem:[%s9757_s15 + $0xc0] sm:$0xff] %vm2530_vm6, %v2522_v25  ;;  %v2485_v36 = vadd.f32 %v2416_v19, %v2293_v17  ;;  %v13935_v35 = vld [vmem:[#allocation31_spill] sm:$0xff]  ;;  %v13936_v28 = vld [vmem:[#allocation145_spill] sm:$0xff]  ;;  %v13937_v15 = vld [vmem:[#allocation170_spill] sm:$0xff] }
 0x356   : > { %v2521_v53 = vadd.f32 %v9747_v23, %v2482_v56  ;;  %v1719_v59 = vadd.f32 %v13932_v0, %v1527_v6  ;;  %v2102_v31 = vadd.f32 %v13934_v44, %v1909_v1  ;;  %v13938_v12 = vld [vmem:[#allocation36_spill] sm:$0xff]  ;;  %v13939_v57 = vld [vmem:[#allocation106_spill] sm:$0xff]  ;;  %v13940_v51 = vld [vmem:[#allocation171_spill] sm:$0xff] }
 0x357   : > { %v1912_v46 = vadd.f32 %v13933_v61, %v1720_v58  ;;  %v2414_v26 = vpop.permute.xlu1 %2413  ;;  %v2295_v45 = vadd.f32 %v13935_v35, %v2103_v32  ;;  %v2524_v37 = vadd.f32 %v9747_v23, %v2485_v36  ;;  %v2420_v29 = vpop.permute.xlu0 %2419  ;;  %v1721_v34 = vadd.f32 %v13939_v57, %v1529_v3  ;;  %v13941_v55 = vld [vmem:[#allocation6_spill] sm:$0xff]  ;;  %v13943_v7 = vld [vmem:[#allocation172_spill] sm:$0xff]  ;;  %v2690_v6 = vld [vmem:[%s9757_s15] sm:$0xff] }
 0x358   : > { %2554 = vst.msk [vmem:[%s9757_s15 + $0xb8] sm:$0xff] %vm2530_vm6, %v2521_v53  ;;  %v2484_v40 = vadd.f32 %v2414_v26, %v2292_v24  ;;  %v1911_v22 = vadd.f32 %v13936_v28, %v1719_v59  ;;  %v2294_v60 = vadd.f32 %v13938_v12, %v2102_v31  ;;  %v13942_v39 = vld [vmem:[#allocation146_spill] sm:$0xff]  ;;  %v2692_v63 = vld [vmem:[%s9757_s15 + $0x10] sm:$0xff]  ;;  %v2693_v1 = vld [vmem:[%s9757_s15 + $0x18] sm:$0xff] }
 0x359   : > { %v2105_v41 = vadd.f32 %v13937_v15, %v1912_v46  ;;  %2557 = vst.msk [vmem:[%s9757_s15 + $0xd0] sm:$0xff] %vm2530_vm6, %v2524_v37  ;;  %v2487_v43 = vadd.f32 %v2420_v29, %v2295_v45  ;;  %v1913_v8 = vadd.f32 %v13942_v39, %v1721_v34  ;;  %v2691_v30 = vld [vmem:[%s9757_s15 + $0x8] sm:$0xff]  ;;  %v2694_v52 = vld [vmem:[%s9757_s15 + $0x20] sm:$0xff]  ;;  %v2696_v37 = vld [vmem:[%s9757_s15 + $0x30] sm:$0xff] }
 0x35a   : > { %v2523_v9 = vadd.f32 %v9747_v23, %v2484_v40  ;;  %v2104_v2 = vadd.f32 %v13940_v51, %v1911_v22  ;;  %v2695_v24 = vld [vmem:[%s9757_s15 + $0x28] sm:$0xff]  ;;  %v2697_v40 = vld [vmem:[%s9757_s15 + $0x38] sm:$0xff] }
 0x35b   : > { %v2418_v13 = vpop.permute.xlu1 %2417  ;;  %v2297_v16 = vadd.f32 %v13941_v55, %v2105_v41  ;;  %v2526_v42 = vadd.f32 %v9747_v23, %v2487_v43  ;;  %v2424_v62 = vpop.permute.xlu0 %2423  ;;  %v2106_v38 = vadd.f32 %v13943_v7, %v1913_v8  ;;  %v3369_v3 = vld [vmem:[#allocation2 + $0x1] sm:$0xff] }
 0x35c   : > { %2556 = vst.msk [vmem:[%s9757_s15 + $0xc8] sm:$0xff] %vm2530_vm6, %v2523_v9  ;;  %v2486_v49 = vadd.f32 %v2418_v13, %v2294_v60  ;;  %v2296_v4 = vadd.f32 %v9731_v47, %v2104_v2  ;;  %3433 = vrot.lane.b32.xlu0 %v3369_v3, %s8323_s20  ;;  %v2698_v41 = vld [vmem:[%s9757_s15 + $0x40] sm:$0xff]  ;;  %v2699_v12 = vld [vmem:[%s9757_s15 + $0x48] sm:$0xff] }
 0x35d   : > { %2559 = vst.msk [vmem:[%s9757_s15 + $0xe0] sm:$0xff] %vm2530_vm6, %v2526_v42  ;;  %v2489_v18 = vadd.f32 %v2424_v62, %v2297_v16  ;;  %v2298_v17 = vadd.f32 %v9762_v10, %v2106_v38  ;;  %v13944_v34 = vld [vmem:[#allocation174_spill] sm:$0xff]  ;;  %v2702_v7 = vld [vmem:[%s9757_s15 + $0x60] sm:$0xff] }
 0x35e   : > { %v2525_v54 = vadd.f32 %v9747_v23, %v2486_v49  ;;  %v3110_v13 = vsel %vm693_vm0, %v13944_v34, 0  ;;  %v2703_v38 = vld [vmem:[%s9757_s15 + $0x68] sm:$0xff] }
 0x35f   : > { %v2422_v48 = vpop.permute.xlu1 %2421  ;;  %v2528_v21 = vadd.f32 %v9747_v23, %v2489_v18  ;;  %v10053_v47 = vpop.permute.xlu0 %2722  ;;  %v2701_v18 = vld [vmem:[%s9757_s15 + $0x58] sm:$0xff] }
 0x360   : > { %2558 = vst.msk [vmem:[%s9757_s15 + $0xd8] sm:$0xff] %vm2530_vm6, %v2525_v54  ;;  %v2488_v33 = vadd.f32 %v2422_v48, %v2296_v4  ;;  %v2725_v58 = vmul.f32 %v10053_v47, %v2690_v6  ;;  %v2726_v19 = vmul.f32 %v10053_v47, %v2691_v30  ;;  %v2727_v27 = vmul.f32 %v10053_v47, %v2692_v63  ;;  %v2700_v4 = vld [vmem:[%s9757_s15 + $0x50] sm:$0xff] }
 0x361   : > { %2561 = vst.msk [vmem:[%s9757_s15 + $0xf0] sm:$0xff] %vm2530_vm6, %v2528_v21  ;;  %v2728_v32 = vmul.f32 %v10053_v47, %v2693_v1  ;;  %v2729_v53 = vmul.f32 %v10053_v47, %v2694_v52  ;;  %v2730_v5 = vmul.f32 %v10053_v47, %v2695_v24  ;;  %v2731_v29 = vmul.f32 %v10053_v47, %v2696_v37  ;;  %v2706_v24 = vld [vmem:[%s9757_s15 + $0x80] sm:$0xff]  ;;  %v2708_v37 = vld [vmem:[%s9757_s15 + $0x90] sm:$0xff] }
 0x362   : > { %v2527_v25 = vadd.f32 %v9747_v23, %v2488_v33  ;;  %v2732_v15 = vmul.f32 %v10053_v47, %v2697_v40  ;;  %v2733_v9 = vmul.f32 %v10053_v47, %v2698_v41  ;;  %v2734_v57 = vmul.f32 %v10053_v47, %v2699_v12  ;;  %v2709_v40 = vld [vmem:[%s9757_s15 + $0x98] sm:$0xff] }
 0x363   : > { %v2426_v56 = vpop.permute.xlu1 %2425  ;;  %v2735_v54 = vmul.f32 %v10053_v47, %v2700_v4  ;;  %v2736_v48 = vmul.f32 %v10053_v47, %v2701_v18  ;;  %v2737_v21 = vmul.f32 %v10053_v47, %v2702_v7  ;;  %v2738_v33 = vmul.f32 %v10053_v47, %v2703_v38  ;;  %v2714_v4 = vld [vmem:[%s9757_s15 + $0xc0] sm:$0xff] }
 0x364   : > { %2560 = vst.msk [vmem:[%s9757_s15 + $0xe8] sm:$0xff] %vm2530_vm6, %v2527_v25  ;;  %v2490_v11 = vadd.f32 %v2426_v56, %v2298_v17  ;;  %v2749_v18 = vmul.f32 %v10053_v47, %v2714_v4 }
 0x366   : > { %v2529_v10 = vadd.f32 %v9747_v23, %v2490_v11 }
 0x367   : > { %v10069_v36 = vpop.permute.xlu1 %2757 }
 0x368   : > { %2562 = vst.msk [vmem:[%s9757_s15 + $0xf8] sm:$0xff] %vm2530_vm6, %v2529_v10  ;;  %v2760_v23 = vadd.f32 %v10069_v36, %v2725_v58  ;;  %v2761_v0 = vadd.f32 %v10069_v36, %v2726_v19  ;;  %v2762_v59 = vadd.f32 %v10069_v36, %v2727_v27  ;;  %v2763_v61 = vadd.f32 %v10069_v36, %v2728_v32  ;;  %v2704_v19 = vld [vmem:[%s9757_s15 + $0x70] sm:$0xff]  ;;  %v2705_v27 = vld [vmem:[%s9757_s15 + $0x78] sm:$0xff] }
 0x369   : > { %v2764_v46 = vadd.f32 %v10069_v36, %v2729_v53  ;;  %v2765_v26 = vadd.f32 %v10069_v36, %v2730_v5  ;;  %v2766_v51 = vadd.f32 %v10069_v36, %v2731_v29  ;;  %v2767_v2 = vadd.f32 %v10069_v36, %v2732_v15  ;;  %v2707_v53 = vld [vmem:[%s9757_s15 + $0x88] sm:$0xff]  ;;  %v2710_v29 = vld [vmem:[%s9757_s15 + $0xa0] sm:$0xff] }
 0x36a   : > { %v2792_v44 = vmax.f32 %v2760_v23, 0.0  ;;  %v2793_v31 = vmax.f32 %v2761_v0, 0.0  ;;  %v2794_v35 = vmax.f32 %v2762_v59, 0.0  ;;  %v2795_v45 = vmax.f32 %v2763_v61, 0.0  ;;  %v2711_v15 = vld [vmem:[%s9757_s15 + $0xa8] sm:$0xff] }
 0x36b   : > { %v2796_v28 = vmax.f32 %v2764_v46, 0.0  ;;  %v2797_v22 = vmax.f32 %v2765_v26, 0.0  ;;  %v2768_v16 = vadd.f32 %v10069_v36, %v2733_v9  ;;  %v2769_v42 = vadd.f32 %v10069_v36, %v2734_v57 }
 0x36c   : > { %v2824_v60 = vpack.c.bf16 %v2793_v31, %v2792_v44  ;;  %v2825_v43 = vpack.c.bf16 %v2795_v45, %v2794_v35  ;;  %v2798_v49 = vmax.f32 %v2766_v51, 0.0  ;;  %v2799_v62 = vmax.f32 %v2767_v2, 0.0  ;;  %v2713_v51 = vld [vmem:[%s9757_s15 + $0xb8] sm:$0xff] }
 0x36d   : > { %v2826_v55 = vpack.c.bf16 %v2797_v22, %v2796_v28  ;;  %v2800_v39 = vmax.f32 %v2768_v16, 0.0  ;;  %v2801_v8 = vmax.f32 %v2769_v42, 0.0  ;;  %v2770_v25 = vadd.f32 %v10069_v36, %v2735_v54  ;;  %v2715_v16 = vld [vmem:[%s9757_s15 + $0xc8] sm:$0xff] }
 0x36e   : > { %7933 = vmatprep.mubr.msk.bf16.mxu1 %vm2530_vm6, %v2824_v60  ;;  %v2827_v17 = vpack.c.bf16 %v2799_v62, %v2798_v49  ;;  %v2771_v56 = vadd.f32 %v10069_v36, %v2736_v48  ;;  %v2772_v6 = vadd.f32 %v10069_v36, %v2737_v21  ;;  %v2773_v30 = vadd.f32 %v10069_v36, %v2738_v33  ;;  %v2712_v62 = vld [vmem:[%s9757_s15 + $0xb0] sm:$0xff] }
 0x36f   : > { %7934 = vmatmul.mubr.msk.bf16.vlgmr.msra.gmra.mrb[16].mxu1 %vm2530_vm6, %v2825_v43  ;;  %v2828_v11 = vpack.c.bf16 %v2801_v8, %v2800_v39  ;;  %v2802_v58 = vmax.f32 %v2770_v25, 0.0  ;;  %v2739_v32 = vmul.f32 %v10053_v47, %v2704_v19  ;;  %v2740_v52 = vmul.f32 %v10053_v47, %v2705_v27  ;;  %v2717_v25 = vld [vmem:[%s9757_s15 + $0xd8] sm:$0xff]  ;;  %v2718_v19 = vld [vmem:[%s9757_s15 + $0xe0] sm:$0xff] }
 0x370   : > { %7966 = vmatpush3.bf16.msra.mxu1 %v3110_v13  ;;  %7937 = vmatprep.mubr.msk.bf16.mxu1 %vm2530_vm6, %v2826_v55  ;;  %v2803_v63 = vmax.f32 %v2771_v56, 0.0  ;;  %v2804_v1 = vmax.f32 %v2772_v6, 0.0  ;;  %v2805_v10 = vmax.f32 %v2773_v30, 0.0  ;;  %v2741_v5 = vmul.f32 %v10053_v47, %v2706_v24  ;;  %v2719_v56 = vld [vmem:[%s9757_s15 + $0xe8] sm:$0xff] }
 0x371   : > { %v2742_v3 = vmul.f32 %v10053_v47, %v2707_v53  ;;  %v2774_v0 = vadd.f32 %v10069_v36, %v2739_v32  ;;  %v2775_v59 = vadd.f32 %v10069_v36, %v2740_v52  ;;  %v2743_v28 = vmul.f32 %v10053_v47, %v2708_v37 }
 0x372   : > { %v2829_v23 = vpack.c.bf16 %v2803_v63, %v2802_v58  ;;  %v2830_v61 = vpack.c.bf16 %v2805_v10, %v2804_v1  ;;  %v2776_v46 = vadd.f32 %v10069_v36, %v2741_v5  ;;  %v2744_v22 = vmul.f32 %v10053_v47, %v2709_v40  ;;  %v2716_v1 = vld [vmem:[%s9757_s15 + $0xd0] sm:$0xff] }
 0x373   : > { %v2777_v26 = vadd.f32 %v10069_v36, %v2742_v3  ;;  %v2806_v44 = vmax.f32 %v2774_v0, 0.0  ;;  %v2807_v31 = vmax.f32 %v2775_v59, 0.0  ;;  %v2745_v41 = vmul.f32 %v10053_v47, %v2710_v29  ;;  %v2721_v3 = vld [vmem:[%s9757_s15 + $0xf8] sm:$0xff]  ;;  %v2720_v59 = vld [vmem:[%s9757_s15 + $0xf0] sm:$0xff]  ;;  %v10181_v29 = vld [vmem:[%s13495_s5] ss:$0 sm:$0xff] }
 0x374   : > { %v2808_v35 = vmax.f32 %v2776_v46, 0.0  ;;  %v2746_v12 = vmul.f32 %v10053_v47, %v2711_v15  ;;  %v2778_v43 = vadd.f32 %v10069_v36, %v2743_v28  ;;  %v2779_v9 = vadd.f32 %v10069_v36, %v2744_v22  ;;  %v8194_v22 = vld [vmem:[%s8439_s17 + $0x20] sm:$0xff]  ;;  %v8196_v15 = vld [vmem:[%s8439_s17 + $0x28] sm:$0xff] }
 0x375   : > { %v2809_v45 = vmax.f32 %v2777_v26, 0.0  ;;  %v2831_v60 = vpack.c.bf16 %v2807_v31, %v2806_v44  ;;  %v2780_v34 = vadd.f32 %v10069_v36, %v2745_v41  ;;  %v2747_v39 = vmul.f32 %v10053_v47, %v2712_v62  ;;  %v8201_v62 = vld [vmem:[%s8439_s17 + $0x48] sm:$0xff] }
 0x376   : > { %v2781_v13 = vadd.f32 %v10069_v36, %v2746_v12  ;;  %v2810_v2 = vmax.f32 %v2778_v43, 0.0  ;;  %v2811_v55 = vmax.f32 %v2779_v9, 0.0  ;;  %v2748_v8 = vmul.f32 %v10053_v47, %v2713_v51  ;;  %v8199_v51 = vld [vmem:[%s8439_s17 + $0x38] sm:$0xff] }
 0x377   : > { %7938 = vmatmul.mubr.msk.bf16.gmra.mrb[20].mxu1 %vm2530_vm6, %v2827_v17  ;;  %v2832_v57 = vpack.c.bf16 %v2809_v45, %v2808_v35  ;;  %v2812_v42 = vmax.f32 %v2780_v34, 0.0  ;;  %v2750_v54 = vmul.f32 %v10053_v47, %v2715_v16  ;;  %v2782_v7 = vadd.f32 %v10069_v36, %v2747_v39  ;;  %v8198_v34 = vld [vmem:[%s8439_s17 + $0x30] sm:$0xff] }
 0x378   : > { %7941 = vmatprep.mubr.msk.bf16.mxu1 %vm2530_vm6, %v2828_v11  ;;  %v2813_v49 = vmax.f32 %v2781_v13, 0.0  ;;  %v2833_v48 = vpack.c.bf16 %v2811_v55, %v2810_v2  ;;  %v2783_v38 = vadd.f32 %v10069_v36, %v2748_v8  ;;  %v2784_v33 = vadd.f32 %v10069_v36, %v2749_v18 }
 0x379   : > { %v2785_v17 = vadd.f32 %v10069_v36, %v2750_v54  ;;  %v2814_v11 = vmax.f32 %v2782_v7, 0.0  ;;  %v2752_v30 = vmul.f32 %v10053_v47, %v2717_v25  ;;  %v2754_v10 = vmul.f32 %v10053_v47, %v2719_v56 }
 0x37a   : > { %v2834_v21 = vpack.c.bf16 %v2813_v49, %v2812_v42  ;;  %v2815_v6 = vmax.f32 %v2783_v38, 0.0  ;;  %v2816_v58 = vmax.f32 %v2784_v33, 0.0  ;;  %v2751_v32 = vmul.f32 %v10053_v47, %v2716_v1  ;;  %v8200_v42 = vld [vmem:[%s8439_s17 + $0x40] sm:$0xff]  ;;  %v8202_v38 = vld [vmem:[%s8439_s17 + $0x50] sm:$0xff]  ;;  %v8203_v33 = vld [vmem:[%s8439_s17 + $0x58] sm:$0xff] }
 0x37b   : > { %v2817_v63 = vmax.f32 %v2785_v17, 0.0  ;;  %v2787_v52 = vadd.f32 %v10069_v36, %v2752_v30  ;;  %v2753_v53 = vmul.f32 %v10053_v47, %v2718_v19  ;;  %v2789_v5 = vadd.f32 %v10069_v36, %v2754_v10  ;;  %v8205_v30 = vld [vmem:[%s8439_s17 + $0x68] sm:$0xff] }
 0x37c   : > { %v2835_v27 = vpack.c.bf16 %v2815_v6, %v2814_v11  ;;  %v2756_v46 = vmul.f32 %v10053_v47, %v2721_v3  ;;  %v2755_v31 = vmul.f32 %v10053_v47, %v2720_v59  ;;  %v2575_v47 = vmul.f32 %v10181_v29, %v8194_v22  ;;  %v8204_v11 = vld [vmem:[%s8439_s17 + $0x60] sm:$0xff] }
 0x37d   : > { %v2836_v24 = vpack.c.bf16 %v2817_v63, %v2816_v58  ;;  %v2788_v0 = vadd.f32 %v10069_v36, %v2753_v53  ;;  %v2821_v26 = vmax.f32 %v2789_v5, 0.0  ;;  %v2576_v41 = vmul.f32 %v8196_v15, %v10181_v29  ;;  %v8207_v5 = vld [vmem:[%s8439_s17 + $0x78] sm:$0xff] }
 0x37e   : > { %v2791_v37 = vadd.f32 %v10069_v36, %v2756_v46  ;;  %v2790_v28 = vadd.f32 %v10069_v36, %v2755_v31  ;;  %v2577_v13 = vmul.f32 %v8198_v34, %v10181_v29  ;;  %v2578_v2 = vmul.f32 %v8199_v51, %v10181_v29 }
 0x37f   : > { %7942 = vmatmul.mubr.msk.bf16.gmra.mrb[24].mxu1 %vm2530_vm6, %v2829_v23  ;;  %v2786_v23 = vadd.f32 %v10069_v36, %v2751_v32  ;;  %v2820_v35 = vmax.f32 %v2788_v0, 0.0  ;;  %v10189_v36 = vld [vmem:[%s13496_s6] ss:$0 sm:$0xff]  ;;  %v2579_v49 = vmul.f32 %v8200_v42, %v10181_v29  ;;  %v2580_v39 = vmul.f32 %v8201_v62, %v10181_v29 }
 0x380   : > { %7945 = vmatprep.mubr.msk.bf16.mxu1 %vm2530_vm6, %v2830_v61  ;;  %v2819_v61 = vmax.f32 %v2787_v52, 0.0  ;;  %v2823_v12 = vmax.f32 %v2791_v37, 0.0  ;;  %v2613_v43 = vadd.f32 %v10189_v36, %v2575_v47  ;;  %v2614_v9 = vadd.f32 %v10189_v36, %v2576_v41  ;;  %v8209_v37 = vld [vmem:[%s8439_s17 + $0x98] sm:$0xff]  ;;  %v8211_v47 = vld [vmem:[%s8439_s17 + $0xa8] sm:$0xff] }
 0x381   : > { %v2818_v44 = vmax.f32 %v2786_v23, 0.0  ;;  %v2838_v40 = vpack.c.bf16 %v2821_v26, %v2820_v35  ;;  %v2615_v8 = vadd.f32 %v10189_v36, %v2577_v13  ;;  %v2616_v4 = vadd.f32 %v10189_v36, %v2578_v2  ;;  %v8208_v35 = vld [vmem:[%s8439_s17 + $0x90] sm:$0xff]  ;;  %v8213_v2 = vld [vmem:[%s8439_s17 + $0xb8] sm:$0xff] }
 0x382   : > { %v2645_v55 = vmax.f32 %v2613_v43, 0.0  ;;  %v2646_v16 = vmax.f32 %v2614_v9, 0.0  ;;  %v2617_v54 = vadd.f32 %v10189_v36, %v2579_v49  ;;  %v2582_v17 = vmul.f32 %v8203_v33, %v10181_v29  ;;  %v8212_v13 = vld [vmem:[%s8439_s17 + $0xb0] sm:$0xff]  ;;  %v8214_v49 = vld [vmem:[%s8439_s17 + $0xc0] sm:$0xff] }
 0x383   : > { %v2837_v45 = vpack.c.bf16 %v2819_v61, %v2818_v44  ;;  %v2648_v7 = vmax.f32 %v2616_v4, 0.0  ;;  %v2583_v6 = vmul.f32 %v8204_v11, %v10181_v29  ;;  %v2586_v3 = vmul.f32 %v8207_v5, %v10181_v29 }
 0x384   : > { %v2675_v18 = vpack.c.bf16 %v2646_v16, %v2645_v55  ;;  %v2649_v25 = vmax.f32 %v2617_v54, 0.0  ;;  %v2620_v1 = vadd.f32 %v10189_v36, %v2582_v17  ;;  %v2592_v15 = vmul.f32 %v8211_v47, %v10181_v29  ;;  %v8217_v17 = vld [vmem:[%s8439_s17 + $0xd8] sm:$0xff] }
 0x385   : > { %v2621_v19 = vadd.f32 %v10189_v36, %v2583_v6  ;;  %v2624_v46 = vadd.f32 %v10189_v36, %v2586_v3  ;;  %v2593_v51 = vmul.f32 %v8212_v13, %v10181_v29  ;;  %v2594_v55 = vmul.f32 %v8213_v2, %v10181_v29  ;;  %v8218_v6 = vld [vmem:[%s8439_s17 + $0xe0] sm:$0xff]  ;;  %v8221_v3 = vld [vmem:[%s8439_s17 + $0xf8] sm:$0xff] }
 0x386   : > { %v2652_v52 = vmax.f32 %v2620_v1, 0.0  ;;  %v2630_v9 = vadd.f32 %v10189_v36, %v2592_v15  ;;  %v2595_v62 = vmul.f32 %v8214_v49, %v10181_v29 }
 0x387   : > { %7946 = vmatmul.mubr.msk.bf16.gmra.mrb[28].mxu1 %vm2530_vm6, %v2831_v60  ;;  %v2822_v60 = vmax.f32 %v2790_v28, 0.0  ;;  %v2653_v23 = vmax.f32 %v2621_v19, 0.0  ;;  %v2656_v31 = vmax.f32 %v2624_v46, 0.0  ;;  %v8210_v28 = vld [vmem:[%s8439_s17 + $0xa0] sm:$0xff]  ;;  %v2632_v54 = vadd.f32 %v10189_v36, %v2594_v55 }
 0x388   : > { %7949 = vmatprep.mubr.msk.bf16.mxu1 %vm2530_vm6, %v2832_v57  ;;  %v2591_v22 = vmul.f32 %v8210_v28, %v10181_v29  ;;  %v2662_v42 = vmax.f32 %v2630_v9, 0.0 }
 0x389   : > { %v2839_v57 = vpack.c.bf16 %v2823_v12, %v2822_v60 }
 0x38a   : > { %v2629_v43 = vadd.f32 %v10189_v36, %v2591_v22 }
 0x38c   : > { %v2661_v16 = vmax.f32 %v2629_v43, 0.0 }
 0x38f   : > { %7950 = vmatmul.mubr.msk.bf16.gmra.mrb[32].mxu1 %vm2530_vm6, %v2833_v48  ;;  %v2647_v48 = vmax.f32 %v2615_v8, 0.0 }
 0x390   : > { %7953 = vmatprep.mubr.msk.bf16.mxu1 %vm2530_vm6, %v2834_v21  ;;  %v2581_v21 = vmul.f32 %v8202_v38, %v10181_v29  ;;  %v2664_v38 = vmax.f32 %v2632_v54, 0.0 }
 0x391   : > { %v2676_v58 = vpack.c.bf16 %v2648_v7, %v2647_v48 }
 0x392   : > { %v2619_v63 = vadd.f32 %v10189_v36, %v2581_v21  ;;  %v8216_v21 = vld [vmem:[%s8439_s17 + $0xd0] sm:$0xff] }
 0x393   : > { %v2597_v33 = vmul.f32 %v8216_v21, %v10181_v29 }
 0x394   : > { %v2651_v32 = vmax.f32 %v2619_v63, 0.0 }
 0x395   : > { %v2635_v1 = vadd.f32 %v10189_v36, %v2597_v33 }
 0x396   : > { %v2678_v59 = vpack.c.bf16 %v2652_v52, %v2651_v32 }
 0x397   : > { %7954 = vmatmul.mubr.msk.bf16.gmra.mrb[36].mxu1 %vm2530_vm6, %v2835_v27  ;;  %v2667_v52 = vmax.f32 %v2635_v1, 0.0 }
 0x398   : > { %7957 = vmatprep.mubr.msk.bf16.mxu1 %vm2530_vm6, %v2836_v24  ;;  %v8206_v24 = vld [vmem:[%s8439_s17 + $0x70] sm:$0xff] }
 0x399   : > { %v2585_v53 = vmul.f32 %v8206_v24, %v10181_v29 }
 0x39b   : > { %v2623_v61 = vadd.f32 %v10189_v36, %v2585_v53  ;;  %v8220_v53 = vld [vmem:[%s8439_s17 + $0xf0] sm:$0xff] }
 0x39c   : > { %v2601_v5 = vmul.f32 %v8220_v53, %v10181_v29 }
 0x39d   : > { %v2655_v44 = vmax.f32 %v2623_v61, 0.0 }
 0x39e   : > { %v2639_v46 = vadd.f32 %v10189_v36, %v2601_v5 }
 0x39f   : > { %7958 = vmatmul.mubr.msk.bf16.gmra.mrb[40].mxu1 %vm2530_vm6, %v2837_v45  ;;  %v2589_v45 = vmul.f32 %v8208_v35, %v10181_v29  ;;  %v2680_v41 = vpack.c.bf16 %v2656_v31, %v2655_v44 }
 0x3a0   : > { %7961 = vmatprep.mubr.msk.bf16.mxu1 %vm2530_vm6, %v2838_v40  ;;  %v2590_v40 = vmul.f32 %v8209_v37, %v10181_v29  ;;  %v2671_v31 = vmax.f32 %v2639_v46, 0.0  ;;  %v3561_v37 = vld [vmem:[#allocation2 + $0x2] sm:$0xff] }
 0x3a1   : > { %v2627_v12 = vadd.f32 %v10189_v36, %v2589_v45  ;;  %3625 = vrot.lane.b32.xlu0 %v3561_v37, %s8324_s21 }
 0x3a2   : > { %v2628_v60 = vadd.f32 %v10189_v36, %v2590_v40  ;;  %v3562_v40 = vld [vmem:[#allocation2 + $0xa] sm:$0xff] }
 0x3a4   : > { %v2660_v34 = vmax.f32 %v2628_v60, 0.0 }
 0x3a7   : > { %7962 = vmatmul.mubr.msk.bf16.gmra.mrb[44].mxu1 %vm2530_vm6, %v2839_v57  ;;  %v2659_v57 = vmax.f32 %v2627_v12, 0.0 }
 0x3a8   : > { %7967 = vmatprep.mubr.msk.bf16.mxu1 %vm644_vm2, %v9808_v14  ;;  %v2618_v14 = vadd.f32 %v10189_v36, %v2580_v39  ;;  %v8215_v39 = vld [vmem:[%s8439_s17 + $0xc8] sm:$0xff] }
 0x3a9   : > { %v2596_v8 = vmul.f32 %v8215_v39, %v10181_v29  ;;  %v2682_v4 = vpack.c.bf16 %v2660_v34, %v2659_v57 }
 0x3aa   : > { %v2650_v56 = vmax.f32 %v2618_v14, 0.0  ;;  %v2683_v14 = vpack.c.bf16 %v2662_v42, %v2661_v16 }
 0x3ab   : > { %v2634_v48 = vadd.f32 %v10189_v36, %v2596_v8 }
 0x3ac   : > { %v2677_v10 = vpack.c.bf16 %v2650_v56, %v2649_v25  ;;  %v2598_v25 = vmul.f32 %v8217_v17, %v10181_v29 }
 0x3ad   : > { %v2666_v11 = vmax.f32 %v2634_v48, 0.0 }
 0x3af   : > { %7968 = vmatmul.mubr.msk.bf16.vlgmr.msra.gmra.mrb[16].mxu1 %vm644_vm2, %v9794_v20  ;;  %v2584_v20 = vmul.f32 %v8205_v30, %v10181_v29  ;;  %v2599_v30 = vmul.f32 %v8218_v6, %v10181_v29 }
 0x3b0   : > { %7971 = vmatprep.mubr.msk.bf16.mxu1 %vm644_vm2, %v2675_v18  ;;  %v2631_v18 = vadd.f32 %v10189_v36, %v2593_v51 }
 0x3b1   : > { %v2622_v27 = vadd.f32 %v10189_v36, %v2584_v20  ;;  %v8219_v20 = vld [vmem:[%s8439_s17 + $0xe8] sm:$0xff] }
 0x3b2   : > { %v2663_v7 = vmax.f32 %v2631_v18, 0.0 }
 0x3b3   : > { %v2654_v0 = vmax.f32 %v2622_v27, 0.0  ;;  %v2637_v27 = vadd.f32 %v10189_v36, %v2599_v30 }
 0x3b4   : > { %v2684_v63 = vpack.c.bf16 %v2664_v38, %v2663_v7 }
 0x3b5   : > { %v2679_v26 = vpack.c.bf16 %v2654_v0, %v2653_v23  ;;  %v2602_v23 = vmul.f32 %v8221_v3, %v10181_v29  ;;  %v2669_v0 = vmax.f32 %v2637_v27, 0.0 }
 0x3b7   : > { %7972 = vmatmul.mubr.msk.bf16.gmra.mrb[20].mxu1 %vm644_vm2, %v2676_v58  ;;  %v2600_v58 = vmul.f32 %v8219_v20, %v10181_v29  ;;  %v3370_v29 = vld [vmem:[#allocation2 + $0x9] sm:$0xff] }
 0x3b8   : > { %7975 = vmatprep.mubr.msk.bf16.mxu1 %vm644_vm2, %v2677_v10  ;;  %v2636_v10 = vadd.f32 %v10189_v36, %v2598_v25  ;;  %3435 = vrot.lane.b32.xlu1 %v3370_v29, %s8323_s20 }
 0x3b9   : > { %v2638_v32 = vadd.f32 %v10189_v36, %v2600_v58 }
 0x3ba   : > { %v2668_v24 = vmax.f32 %v2636_v10, 0.0 }
 0x3bc   : > { %v2686_v61 = vpack.c.bf16 %v2668_v24, %v2667_v52  ;;  %3627 = vrot.lane.b32.xlu1 %v3562_v40, %s8324_s21 }
 0x3bf   : > { %7976 = vmatmul.mubr.msk.bf16.gmra.mrb[24].mxu1 %vm644_vm2, %v2678_v59  ;;  %v2670_v59 = vmax.f32 %v2638_v32, 0.0 }
 0x3c0   : > { %7979 = vmatprep.mubr.msk.bf16.mxu1 %vm644_vm2, %v2679_v26  ;;  %v2640_v26 = vadd.f32 %v10189_v36, %v2602_v23 }
 0x3c1   : > { %v2687_v44 = vpack.c.bf16 %v2670_v59, %v2669_v0 }
 0x3c2   : > { %v2672_v35 = vmax.f32 %v2640_v26, 0.0 }
 0x3c4   : > { %v2688_v45 = vpack.c.bf16 %v2672_v35, %v2671_v31 }
 0x3c7   : > { %7980 = vmatmul.mubr.msk.bf16.gmra.mrb[28].mxu1 %vm644_vm2, %v2680_v41 }
 0x3c8   : > { %7983 = vmatprep.mubr.msk.bf16.mxu1 %vm644_vm2, %v9967_v50  ;;  %v2633_v50 = vadd.f32 %v10189_v36, %v2595_v62 }
 0x3ca   : > { %v2665_v56 = vmax.f32 %v2633_v50, 0.0 }
 0x3cc   : > { %v2685_v19 = vpack.c.bf16 %v2666_v11, %v2665_v56 }
 0x3cf   : > { %7984 = vmatmul.mubr.msk.bf16.gmra.mrb[32].mxu1 %vm644_vm2, %v2682_v4 }
 0x3d0   : > { %7987 = vmatprep.mubr.msk.bf16.mxu1 %vm644_vm2, %v2683_v14 }
 0x3d7   : > { %7988 = vmatmul.mubr.msk.bf16.gmra.mrb[36].mxu1 %vm644_vm2, %v2684_v63 }
 0x3d8   : > { %7991 = vmatprep.mubr.msk.bf16.mxu1 %vm644_vm2, %v2685_v19 }
 0x3df   : > { %7992 = vmatmul.mubr.msk.bf16.gmra.mrb[40].mxu1 %vm644_vm2, %v2686_v61 }
 0x3e0   : > { %7995 = vmatprep.mubr.msk.bf16.mxu1 %vm644_vm2, %v2687_v44 }
 0x3e7   : > { %7996 = vmatmul.mubr.msk.bf16.gmra.mrb[44].mxu1 %vm644_vm2, %v2688_v45 }
 0x482   : > { %v7969_v36 = vpop.f32.mrb[16].mxu1 }
 0x483   : > { %3275 = vst.msk [vmem:[#allocation2 + $0x31] sm:$0xff] %vm442_vm1, %v7969_v36  ;;  %v3146_v28 = vpop.f32.mrb[17].mxu1 }
 0x484   : > { %3273 = vst.msk [vmem:[#allocation2 + $0x19] sm:$0xff] %vm442_vm1, %v3146_v28  ;;  %v7970_v22 = vpop.f32.mrb[18].mxu1 }
 0x485   : > { %3276 = vst.msk [vmem:[#allocation2 + $0x39] sm:$0xff] %vm442_vm1, %v7970_v22  ;;  %v3149_v47 = vpop.f32.mrb[19].mxu1 }
 0x486   : > { %3274 = vst.msk [vmem:[#allocation2 + $0x21] sm:$0xff] %vm442_vm1, %v3149_v47 }
 0x48a   : > { %v7973_v15 = vpop.f32.mrb[20].mxu1  ;;  %v3373_v41 = vld [vmem:[#allocation2 + $0x31] sm:$0xff] }
 0x48b   : > { %3279 = vst.msk [vmem:[#allocation2 + $0x61] sm:$0xff] %vm442_vm1, %v7973_v15  ;;  %3441 = vrot.lane.b32.xlu0 %v3373_v41, %s8323_s20  ;;  %v3162_v12 = vpop.f32.mrb[21].mxu1  ;;  %v3755_v57 = vld [vmem:[#allocation2 + $0x30] sm:$0xff]  ;;  %v3371_v42 = vld [vmem:[#allocation2 + $0x19] sm:$0xff] }
 0x48c   : > { %3277 = vst.msk [vmem:[#allocation2 + $0x49] sm:$0xff] %vm442_vm1, %v3162_v12  ;;  %v7974_v60 = vpop.f32.mrb[22].mxu1  ;;  %v3374_v43 = vld [vmem:[#allocation2 + $0x39] sm:$0xff] }
 0x48d   : > { %3280 = vst.msk [vmem:[#allocation2 + $0x69] sm:$0xff] %vm442_vm1, %v7974_v60  ;;  %3443 = vrot.lane.b32.xlu1 %v3374_v43, %s8323_s20  ;;  %v3165_v9 = vpop.f32.mrb[23].mxu1  ;;  %v10299_v34 = vld [vmem:[#allocation2 + $0x3a] sm:$0xff]  ;;  %v10318_v54 = vld [vmem:[#allocation2 + $0x22] sm:$0xff]  ;;  %v10322_v50 = vld [vmem:[#allocation2 + $0x32] sm:$0xff] }
 0x48e   : > { %3278 = vst.msk [vmem:[#allocation2 + $0x51] sm:$0xff] %vm442_vm1, %v3165_v9  ;;  %v3756_v55 = vld [vmem:[#allocation2 + $0x38] sm:$0xff]  ;;  %v3372_v4 = vld [vmem:[#allocation2 + $0x21] sm:$0xff]  ;;  %v10440_v9 = vpop.permute.xlu0 %3433 }
 0x48f   : > { %3821 = vrot.lane.b32.xlu0 %v3755_v57, %s8325_s22  ;;  %v3753_v62 = vld [vmem:[#allocation2 + $0x18] sm:$0xff]  ;;  %v3754_v38 = vld [vmem:[#allocation2 + $0x20] sm:$0xff]  ;;  %13945 = vst [vmem:[#allocation5_spill] sm:$0xff] %v10440_v9 }
 0x490   : > { %v10331_v33 = vld [vmem:[#allocation2 + $0x1a] sm:$0xff] }
 0x491   : > { %3635 = vrot.lane.b32.xlu1 %v10299_v34, %s8324_s21 }
 0x492   : > { %v7977_v13 = vpop.f32.mrb[24].mxu1  ;;  %v3377_v25 = vld [vmem:[#allocation2 + $0x61] sm:$0xff] }
 0x493   : > { %3283 = vst.msk [vmem:[#allocation2 + $0x91] sm:$0xff] %vm442_vm1, %v7977_v13  ;;  %4013 = vrot.lane.b32.xlu0 %v3373_v41, %s8326_s23  ;;  %v3178_v51 = vpop.f32.mrb[25].mxu1  ;;  %v3759_v20 = vld [vmem:[#allocation2 + $0x60] sm:$0xff]  ;;  %v3375_v32 = vld [vmem:[#allocation2 + $0x49] sm:$0xff]  ;;  %v10446_v13 = vpop.permute.xlu1 %3435 }
 0x494   : > { %3281 = vst.msk [vmem:[#allocation2 + $0x79] sm:$0xff] %vm442_vm1, %v3178_v51  ;;  %v7978_v2 = vpop.f32.mrb[26].mxu1  ;;  %v3378_v6 = vld [vmem:[#allocation2 + $0x69] sm:$0xff]  ;;  %13946 = vst [vmem:[#allocation7_spill] sm:$0xff] %v10446_v13 }
 0x495   : > { %3284 = vst.msk [vmem:[#allocation2 + $0x99] sm:$0xff] %vm442_vm1, %v7978_v2  ;;  %3823 = vrot.lane.b32.xlu1 %v3756_v55, %s8325_s22  ;;  %v3181_v16 = vpop.f32.mrb[27].mxu1  ;;  %v10343_v58 = vld [vmem:[#allocation2 + $0x6a] sm:$0xff]  ;;  %v10365_v0 = vld [vmem:[#allocation2 + $0x52] sm:$0xff]  ;;  %v10369_v59 = vld [vmem:[#allocation2 + $0x62] sm:$0xff]  ;;  %v10456_v55 = vpop.permute.xlu0 %3625 }
 0x496   : > { %3282 = vst.msk [vmem:[#allocation2 + $0x81] sm:$0xff] %vm442_vm1, %v3181_v16  ;;  %v3760_v19 = vld [vmem:[#allocation2 + $0x68] sm:$0xff]  ;;  %v3376_v3 = vld [vmem:[#allocation2 + $0x51] sm:$0xff]  ;;  %13947 = vst [vmem:[#allocation8_spill] sm:$0xff] %v10456_v55 }
 0x497   : > { %3437 = vrot.lane.b32.xlu0 %v3371_v42, %s8323_s20  ;;  %v10355_v24 = vld [vmem:[#allocation2 + $0x48] sm:$0xff]  ;;  %v10373_v61 = vld [vmem:[#allocation2 + $0x50] sm:$0xff] }
 0x498   : > { %v10377_v46 = vld [vmem:[#allocation2 + $0x4a] sm:$0xff] }
 0x499   : > { %4015 = vrot.lane.b32.xlu1 %v3374_v43, %s8326_s23 }
 0x49a   : > { %v7981_v49 = vpop.f32.mrb[28].mxu1  ;;  %v3381_v26 = vld [vmem:[#allocation2 + $0x91] sm:$0xff] }
 0x49b   : > { %3287 = vst.msk [vmem:[#allocation2 + $0xc1] sm:$0xff] %vm442_vm1, %v7981_v49  ;;  %3817 = vrot.lane.b32.xlu0 %v3753_v62, %s8325_s22  ;;  %v3194_v39 = vpop.f32.mrb[29].mxu1  ;;  %v10384_v31 = vld [vmem:[#allocation2 + $0x90] sm:$0xff]  ;;  %v3379_v29 = vld [vmem:[#allocation2 + $0x79] sm:$0xff] }
 0x49c   : > { %3285 = vst.msk [vmem:[#allocation2 + $0xa9] sm:$0xff] %vm442_vm1, %v3194_v39  ;;  %v7982_v8 = vpop.f32.mrb[30].mxu1  ;;  %v3382_v44 = vld [vmem:[#allocation2 + $0x99] sm:$0xff] }
 0x49d   : > { %3288 = vst.msk [vmem:[#allocation2 + $0xc9] sm:$0xff] %vm442_vm1, %v7982_v8  ;;  %3439 = vrot.lane.b32.xlu1 %v3372_v4, %s8323_s20  ;;  %v3197_v18 = vpop.f32.mrb[31].mxu1  ;;  %v10388_v35 = vld [vmem:[#allocation2 + $0x9a] sm:$0xff]  ;;  %v10405_v36 = vld [vmem:[#allocation2 + $0x82] sm:$0xff]  ;;  %v10409_v28 = vld [vmem:[#allocation2 + $0x92] sm:$0xff] }
 0x49e   : > { %3286 = vst.msk [vmem:[#allocation2 + $0xb1] sm:$0xff] %vm442_vm1, %v3197_v18  ;;  %v10393_v45 = vld [vmem:[#allocation2 + $0x98] sm:$0xff]  ;;  %v3380_v40 = vld [vmem:[#allocation2 + $0x81] sm:$0xff] }
 0x49f   : > { %4009 = vrot.lane.b32.xlu0 %v3371_v42, %s8326_s23  ;;  %v10399_v37 = vld [vmem:[#allocation2 + $0x78] sm:$0xff]  ;;  %v10413_v22 = vld [vmem:[#allocation2 + $0x80] sm:$0xff]  ;;  %v10462_v42 = vpop.permute.xlu1 %3627 }
 0x4a0   : > { %v10417_v47 = vld [vmem:[#allocation2 + $0x7a] sm:$0xff]  ;;  %13948 = vst [vmem:[#allocation20_spill] sm:$0xff] %v10462_v42 }
 0x4a1   : > { %3631 = vrot.lane.b32.xlu1 %v10318_v54, %s8324_s21 }
 0x4a2   : > { %v7985_v14 = vpop.f32.mrb[32].mxu1  ;;  %v10422_v15 = vld [vmem:[#allocation2 + $0xc1] sm:$0xff] }
 0x4a3   : > { %3291 = vst.msk [vmem:[#allocation2 + $0xf1] sm:$0xff] %vm442_vm1, %v7985_v14  ;;  %3633 = vrot.lane.b32.xlu0 %v10322_v50, %s8324_s21  ;;  %v3210_v48 = vpop.f32.mrb[33].mxu1  ;;  %v10430_v12 = vld [vmem:[#allocation2 + $0xc0] sm:$0xff]  ;;  %v10438_v43 = vld [vmem:[#allocation2 + $0xa9] sm:$0xff] }
 0x4a4   : > { %3289 = vst.msk [vmem:[#allocation2 + $0xd9] sm:$0xff] %vm442_vm1, %v3210_v48  ;;  %v7986_v7 = vpop.f32.mrb[34].mxu1  ;;  %v10426_v41 = vld [vmem:[#allocation2 + $0xc9] sm:$0xff] }
 0x4a5   : > { %3292 = vst.msk [vmem:[#allocation2 + $0xf9] sm:$0xff] %vm442_vm1, %v7986_v7  ;;  %3819 = vrot.lane.b32.xlu1 %v3754_v38, %s8325_s22  ;;  %v3213_v21 = vpop.f32.mrb[35].mxu1  ;;  %v10434_v60 = vld [vmem:[#allocation2 + $0xca] sm:$0xff]  ;;  %v10460_v16 = vld [vmem:[#allocation2 + $0xc2] sm:$0xff]  ;;  %v10466_v49 = vld [vmem:[#allocation2 + $0xb2] sm:$0xff] }
 0x4a6   : > { %3290 = vst.msk [vmem:[#allocation2 + $0xe1] sm:$0xff] %vm442_vm1, %v3213_v21  ;;  %v10444_v57 = vld [vmem:[#allocation2 + $0xc8] sm:$0xff]  ;;  %v10454_v2 = vld [vmem:[#allocation2 + $0xb1] sm:$0xff] }
 0x4a7   : > { %3629 = vrot.lane.b32.xlu0 %v10331_v33, %s8324_s21  ;;  %v10450_v51 = vld [vmem:[#allocation2 + $0xa8] sm:$0xff] }
 0x4a8   : > { %v10472_v39 = vld [vmem:[#allocation2 + $0xaa] sm:$0xff] }
 0x4a9   : > { %4011 = vrot.lane.b32.xlu1 %v3372_v4, %s8326_s23  ;;  %v10478_v4 = vld [vmem:[#allocation2 + $0xb0] sm:$0xff] }
 0x4aa   : > { %v7989_v17 = vpop.f32.mrb[36].mxu1  ;;  %v10484_v14 = vld [vmem:[#allocation2 + $0xf1] sm:$0xff] }
 0x4ab   : > { %3295 = vst.msk [vmem:[#allocation2 + $0x121] sm:$0xff] %vm442_vm1, %v7989_v17  ;;  %3449 = vrot.lane.b32.xlu0 %v3377_v25, %s8323_s20  ;;  %v3226_v56 = vpop.f32.mrb[37].mxu1  ;;  %v10496_v21 = vld [vmem:[#allocation2 + $0xf0] sm:$0xff] }
 0x4ac   : > { %3293 = vst.msk [vmem:[#allocation2 + $0x109] sm:$0xff] %vm442_vm1, %v3226_v56  ;;  %v7990_v11 = vpop.f32.mrb[38].mxu1  ;;  %v10490_v7 = vld [vmem:[#allocation2 + $0xf9] sm:$0xff]  ;;  %13954 = vst [vmem:[#allocation10_spill] sm:$0xff] %v10496_v21 }
 0x4ad   : > { %3296 = vst.msk [vmem:[#allocation2 + $0x129] sm:$0xff] %vm442_vm1, %v7990_v11  ;;  %3451 = vrot.lane.b32.xlu1 %v3378_v6, %s8323_s20  ;;  %v3229_v30 = vpop.f32.mrb[39].mxu1  ;;  %v10508_v11 = vld [vmem:[#allocation2 + $0xd9] sm:$0xff] }
 0x4ae   : > { %3294 = vst.msk [vmem:[#allocation2 + $0x111] sm:$0xff] %vm442_vm1, %v3229_v30  ;;  %v10514_v30 = vld [vmem:[#allocation2 + $0xf8] sm:$0xff] }
 0x4af   : > { %3829 = vrot.lane.b32.xlu0 %v3759_v20, %s8325_s22  ;;  %13958 = vst [vmem:[#allocation33_spill] sm:$0xff] %v10514_v30 }
 0x4b1   : > { %3643 = vrot.lane.b32.xlu1 %v10343_v58, %s8324_s21 }
 0x4b2   : > { %v7993_v63 = vpop.f32.mrb[40].mxu1 }
 0x4b3   : > { %3299 = vst.msk [vmem:[#allocation2 + $0x151] sm:$0xff] %vm442_vm1, %v7993_v63  ;;  %4021 = vrot.lane.b32.xlu0 %v3377_v25, %s8326_s23  ;;  %v3242_v1 = vpop.f32.mrb[41].mxu1  ;;  %v10502_v25 = vld [vmem:[#allocation2 + $0xfa] sm:$0xff] }
 0x4b4   : > { %3297 = vst.msk [vmem:[#allocation2 + $0x139] sm:$0xff] %vm442_vm1, %v3242_v1  ;;  %v7994_v10 = vpop.f32.mrb[42].mxu1  ;;  %v10520_v63 = vld [vmem:[#allocation2 + $0xd8] sm:$0xff] }
 0x4b5   : > { %3300 = vst.msk [vmem:[#allocation2 + $0x159] sm:$0xff] %vm442_vm1, %v7994_v10  ;;  %3831 = vrot.lane.b32.xlu1 %v3760_v19, %s8325_s22  ;;  %v3245_v27 = vpop.f32.mrb[43].mxu1  ;;  %13960 = vst [vmem:[#allocation69_spill] sm:$0xff] %v10520_v63  ;;  %v10526_v10 = vld [vmem:[#allocation2 + $0xe1] sm:$0xff] }
 0x4b6   : > { %3298 = vst.msk [vmem:[#allocation2 + $0x141] sm:$0xff] %vm442_vm1, %v3245_v27  ;;  %v10532_v27 = vld [vmem:[#allocation2 + $0xf2] sm:$0xff] }
 0x4b7   : > { %3445 = vrot.lane.b32.xlu0 %v3375_v32, %s8323_s20 }
 0x4b9   : > { %4023 = vrot.lane.b32.xlu1 %v3378_v6, %s8326_s23 }
 0x4ba   : > { %v7997_v52 = vpop.f32.mrb[44].mxu1  ;;  %v10628_v55 = vld [vmem:[#allocation2 + $0x151] sm:$0xff] }
 0x4bb   : > { %3303 = vst.msk [vmem:[#allocation2 + $0x181] sm:$0xff] %vm442_vm1, %v7997_v52  ;;  %3825 = vrot.lane.b32.xlu0 %v10355_v24, %s8325_s22  ;;  %v3258_v53 = vpop.f32.mrb[45].mxu1  ;;  %v10538_v52 = vld [vmem:[#allocation2 + $0xe2] sm:$0xff]  ;;  %v10652_v13 = vld [vmem:[#allocation2 + $0x139] sm:$0xff] }
 0x4bc   : > { %3301 = vst.msk [vmem:[#allocation2 + $0x169] sm:$0xff] %vm442_vm1, %v3258_v53  ;;  %v7998_v5 = vpop.f32.mrb[46].mxu1  ;;  %v10664_v9 = vld [vmem:[#allocation2 + $0x138] sm:$0xff] }
 0x4bd   : > { %3304 = vst.msk [vmem:[#allocation2 + $0x189] sm:$0xff] %vm442_vm1, %v7998_v5  ;;  %3447 = vrot.lane.b32.xlu1 %v3376_v3, %s8323_s20  ;;  %v3261_v23 = vpop.f32.mrb[47].mxu1  ;;  %v10544_v5 = vld [vmem:[#allocation2 + $0xda] sm:$0xff]  ;;  %13992 = vst [vmem:[#allocation122_spill] sm:$0xff] %v10664_v9 }
 0x4be   : > { %3302 = vst.msk [vmem:[#allocation2 + $0x171] sm:$0xff] %vm442_vm1, %v3261_v23  ;;  %v10550_v23 = vld [vmem:[#allocation2 + $0xe0] sm:$0xff] }
 0x4bf   : > { %4017 = vrot.lane.b32.xlu0 %v3375_v32, %s8326_s23  ;;  %13966 = vst [vmem:[#allocation22_spill] sm:$0xff] %v10550_v23 }
 0x4c1   : > { %3639 = vrot.lane.b32.xlu1 %v10365_v0, %s8324_s21 }
 0x4c3   : > { %3641 = vrot.lane.b32.xlu0 %v10369_v59, %s8324_s21 }
 0x4c5   : > { %3827 = vrot.lane.b32.xlu1 %v10373_v61, %s8325_s22 }
 0x4c7   : > { %3637 = vrot.lane.b32.xlu0 %v10377_v46, %s8324_s21 }
 0x4c9   : > { %4019 = vrot.lane.b32.xlu1 %v3376_v3, %s8326_s23 }
 0x4cb   : > { %3457 = vrot.lane.b32.xlu0 %v3381_v26, %s8323_s20 }
 0x4cd   : > { %3459 = vrot.lane.b32.xlu1 %v3382_v44, %s8323_s20 }
 0x4cf   : > { %3837 = vrot.lane.b32.xlu0 %v10384_v31, %s8325_s22 }
 0x4d1   : > { %3651 = vrot.lane.b32.xlu1 %v10388_v35, %s8324_s21 }
 0x4d3   : > { %4029 = vrot.lane.b32.xlu0 %v3381_v26, %s8326_s23 }
 0x4d5   : > { %3839 = vrot.lane.b32.xlu1 %v10393_v45, %s8325_s22 }
 0x4d7   : > { %3453 = vrot.lane.b32.xlu0 %v3379_v29, %s8323_s20 }
 0x4d9   : > { %4031 = vrot.lane.b32.xlu1 %v3382_v44, %s8326_s23  ;;  %v10556_v44 = vld [vmem:[#allocation2 + $0x121] sm:$0xff] }
 0x4db   : > { %3833 = vrot.lane.b32.xlu0 %v10399_v37, %s8325_s22 }
 0x4dd   : > { %3455 = vrot.lane.b32.xlu1 %v3380_v40, %s8323_s20 }
 0x4df   : > { %4025 = vrot.lane.b32.xlu0 %v3379_v29, %s8326_s23 }
 0x4e1   : > { %3647 = vrot.lane.b32.xlu1 %v10405_v36, %s8324_s21 }
 0x4e3   : > { %3649 = vrot.lane.b32.xlu0 %v10409_v28, %s8324_s21 }
 0x4e5   : > { %3835 = vrot.lane.b32.xlu1 %v10413_v22, %s8325_s22 }
 0x4e7   : > { %3645 = vrot.lane.b32.xlu0 %v10417_v47, %s8324_s21 }
 0x4e9   : > { %4027 = vrot.lane.b32.xlu1 %v3380_v40, %s8326_s23  ;;  %v10562_v40 = vld [vmem:[#allocation2 + $0x129] sm:$0xff] }
 0x4eb   : > { %3465 = vrot.lane.b32.xlu0 %v10422_v15, %s8323_s20 }
 0x4ed   : > { %3467 = vrot.lane.b32.xlu1 %v10426_v41, %s8323_s20 }
 0x4ef   : > { %3845 = vrot.lane.b32.xlu0 %v10430_v12, %s8325_s22 }
 0x4f1   : > { %3659 = vrot.lane.b32.xlu1 %v10434_v60, %s8324_s21 }
 0x4f3   : > { %3461 = vrot.lane.b32.xlu0 %v10438_v43, %s8323_s20 }
 0x4f5   : > { %3847 = vrot.lane.b32.xlu1 %v10444_v57, %s8325_s22 }
 0x4f7   : > { %3841 = vrot.lane.b32.xlu0 %v10450_v51, %s8325_s22 }
 0x4f9   : > { %3463 = vrot.lane.b32.xlu1 %v10454_v2, %s8323_s20 }
 0x4fb   : > { %3657 = vrot.lane.b32.xlu0 %v10460_v16, %s8324_s21 }
 0x4fd   : > { %v10468_v62 = vpop.permute.xlu0 %3441  ;;  %3655 = vrot.lane.b32.xlu1 %v10466_v49, %s8324_s21 }
 0x4fe   : > { %13949 = vst [vmem:[#allocation18_spill] sm:$0xff] %v10468_v62  ;;  %v10598_v62 = vld [vmem:[#allocation2 + $0x111] sm:$0xff] }
 0x4ff   : > { %v10474_v8 = vpop.permute.xlu1 %3443  ;;  %3653 = vrot.lane.b32.xlu0 %v10472_v39, %s8324_s21 }
 0x500   : > { %13950 = vst [vmem:[#allocation52_spill] sm:$0xff] %v10474_v8  ;;  %v10616_v8 = vld [vmem:[#allocation2 + $0x10a] sm:$0xff] }
 0x501   : > { %v10480_v18 = vpop.permute.xlu0 %3821  ;;  %3843 = vrot.lane.b32.xlu1 %v10478_v4, %s8325_s22 }
 0x502   : > { %13951 = vst [vmem:[#allocation59_spill] sm:$0xff] %v10480_v18  ;;  %v10592_v18 = vld [vmem:[#allocation2 + $0x108] sm:$0xff] }
 0x503   : > { %v10486_v48 = vpop.permute.xlu1 %3635  ;;  %3473 = vrot.lane.b32.xlu0 %v10484_v14, %s8323_s20  ;;  %13976 = vst [vmem:[#allocation44_spill] sm:$0xff] %v10592_v18 }
 0x504   : > { %13952 = vst [vmem:[#allocation15_spill] sm:$0xff] %v10486_v48  ;;  %v10586_v48 = vld [vmem:[#allocation2 + $0x128] sm:$0xff] }
 0x505   : > { %v10492_v38 = vpop.permute.xlu0 %4013  ;;  %3475 = vrot.lane.b32.xlu1 %v10490_v7, %s8323_s20  ;;  %13974 = vst [vmem:[#allocation45_spill] sm:$0xff] %v10586_v48 }
 0x506   : > { %13953 = vst [vmem:[#allocation9_spill] sm:$0xff] %v10492_v38 }
 0x507   : > { %v10498_v17 = vpop.permute.xlu1 %3823  ;;  %3853 = vrot.lane.b32.xlu0 %v10496_v21, %s8325_s22  ;;  %v10736_v21 = vld [vmem:[#allocation2 + $0x16a] sm:$0xff] }
 0x508   : > { %13955 = vst [vmem:[#allocation21_spill] sm:$0xff] %v10498_v17  ;;  %v10604_v17 = vld [vmem:[#allocation2 + $0x122] sm:$0xff] }
 0x509   : > { %v10504_v56 = vpop.permute.xlu0 %3437  ;;  %3667 = vrot.lane.b32.xlu1 %v10502_v25, %s8324_s21 }
 0x50a   : > { %13956 = vst [vmem:[#allocation13_spill] sm:$0xff] %v10504_v56  ;;  %v10646_v56 = vld [vmem:[#allocation2 + $0x15a] sm:$0xff] }
 0x50b   : > { %v10510_v6 = vpop.permute.xlu1 %4015  ;;  %3469 = vrot.lane.b32.xlu0 %v10508_v11, %s8323_s20 }
 0x50c   : > { %13957 = vst [vmem:[#allocation12_spill] sm:$0xff] %v10510_v6  ;;  %v10568_v6 = vld [vmem:[#allocation2 + $0x120] sm:$0xff] }
 0x50d   : > { %v10516_v20 = vpop.permute.xlu0 %3817  ;;  %3855 = vrot.lane.b32.xlu1 %v10514_v30, %s8325_s22  ;;  %13970 = vst [vmem:[#allocation40_spill] sm:$0xff] %v10568_v6  ;;  %v10712_v30 = vld [vmem:[#allocation2 + $0x169] sm:$0xff] }
 0x50e   : > { %13959 = vst [vmem:[#allocation64_spill] sm:$0xff] %v10516_v20  ;;  %v10610_v20 = vld [vmem:[#allocation2 + $0x112] sm:$0xff] }
 0x50f   : > { %v10522_v1 = vpop.permute.xlu1 %3439  ;;  %3849 = vrot.lane.b32.xlu0 %v10520_v63, %s8325_s22 }
 0x510   : > { %13961 = vst [vmem:[#allocation14_spill] sm:$0xff] %v10522_v1  ;;  %v10658_v1 = vld [vmem:[#allocation2 + $0x158] sm:$0xff] }
 0x511   : > { %v10528_v19 = vpop.permute.xlu0 %4009  ;;  %3471 = vrot.lane.b32.xlu1 %v10526_v10, %s8323_s20  ;;  %13990 = vst [vmem:[#allocation74_spill] sm:$0xff] %v10658_v1 }
 0x512   : > { %13962 = vst [vmem:[#allocation25_spill] sm:$0xff] %v10528_v19  ;;  %v10580_v19 = vld [vmem:[#allocation2 + $0x109] sm:$0xff] }
 0x513   : > { %v10534_v32 = vpop.permute.xlu1 %3631  ;;  %3665 = vrot.lane.b32.xlu0 %v10532_v27, %s8324_s21 }
 0x514   : > { %13963 = vst [vmem:[#allocation28_spill] sm:$0xff] %v10534_v32  ;;  %v10640_v32 = vld [vmem:[#allocation2 + $0x150] sm:$0xff] }
 0x515   : > { %v10540_v53 = vpop.permute.xlu0 %3633  ;;  %3663 = vrot.lane.b32.xlu1 %v10538_v52, %s8324_s21  ;;  %13986 = vst [vmem:[#allocation66_spill] sm:$0xff] %v10640_v32 }
 0x516   : > { %13964 = vst [vmem:[#allocation30_spill] sm:$0xff] %v10540_v53 }
 0x517   : > { %v10546_v3 = vpop.permute.xlu1 %3819  ;;  %3661 = vrot.lane.b32.xlu0 %v10544_v5, %s8324_s21 }
 0x518   : > { %13965 = vst [vmem:[#allocation37_spill] sm:$0xff] %v10546_v3  ;;  %v10574_v3 = vld [vmem:[#allocation2 + $0x12a] sm:$0xff] }
 0x519   : > { %v10552_v26 = vpop.permute.xlu0 %3629  ;;  %3851 = vrot.lane.b32.xlu1 %v10550_v23, %s8325_s22  ;;  %v10742_v23 = vld [vmem:[#allocation2 + $0x170] sm:$0xff] }
 0x51a   : > { %13967 = vst [vmem:[#allocation32_spill] sm:$0xff] %v10552_v26  ;;  %v10634_v26 = vld [vmem:[#allocation2 + $0x159] sm:$0xff] }
 0x51b   : > { %v10558_v29 = vpop.permute.xlu1 %4011  ;;  %3481 = vrot.lane.b32.xlu0 %v10556_v44, %s8323_s20 }
 0x51c   : > { %13968 = vst [vmem:[#allocation24_spill] sm:$0xff] %v10558_v29 }
 0x51d   : > { %v10564_v38 = vpop.permute.xlu0 %3449  ;;  %3483 = vrot.lane.b32.xlu1 %v10562_v40, %s8323_s20 }
 0x51e   : > { %13969 = vst [vmem:[#allocation38_spill] sm:$0xff] %v10564_v38 }
 0x51f   : > { %v10570_v53 = vpop.permute.xlu1 %3451  ;;  %3861 = vrot.lane.b32.xlu0 %v10568_v6, %s8325_s22  ;;  %v10694_v6 = vld [vmem:[#allocation2 + $0x140] sm:$0xff] }
 0x520   : > { %13971 = vst [vmem:[#allocation43_spill] sm:$0xff] %v10570_v53  ;;  %13998 = vst [vmem:[#allocation123_spill] sm:$0xff] %v10694_v6 }
 0x521   : > { %v10576_v29 = vpop.permute.xlu0 %3829  ;;  %3675 = vrot.lane.b32.xlu1 %v10574_v3, %s8324_s21 }
 0x522   : > { %13972 = vst [vmem:[#allocation17_spill] sm:$0xff] %v10576_v29 }
 0x523   : > { %v10582_v38 = vpop.permute.xlu1 %3643  ;;  %3477 = vrot.lane.b32.xlu0 %v10580_v19, %s8323_s20 }
 0x524   : > { %13973 = vst [vmem:[#allocation41_spill] sm:$0xff] %v10582_v38 }
 0x525   : > { %v10588_v53 = vpop.permute.xlu0 %4021  ;;  %3863 = vrot.lane.b32.xlu1 %v10586_v48, %s8325_s22  ;;  %v10676_v48 = vld [vmem:[#allocation2 + $0x152] sm:$0xff] }
 0x526   : > { %13975 = vst [vmem:[#allocation51_spill] sm:$0xff] %v10588_v53 }
 0x527   : > { %v10594_v29 = vpop.permute.xlu1 %3831  ;;  %3857 = vrot.lane.b32.xlu0 %v10592_v18, %s8325_s22  ;;  %v10706_v18 = vld [vmem:[#allocation2 + $0x188] sm:$0xff] }
 0x528   : > { %13977 = vst [vmem:[#allocation42_spill] sm:$0xff] %v10594_v29  ;;  %14002 = vst [vmem:[#allocation107_spill] sm:$0xff] %v10706_v18 }
 0x529   : > { %v10600_v38 = vpop.permute.xlu0 %3445  ;;  %3479 = vrot.lane.b32.xlu1 %v10598_v62, %s8323_s20 }
 0x52a   : > { %13978 = vst [vmem:[#allocation47_spill] sm:$0xff] %v10600_v38  ;;  %v10622_v38 = vld [vmem:[#allocation2 + $0x110] sm:$0xff] }
 0x52b   : > { %v10606_v53 = vpop.permute.xlu1 %4023  ;;  %3673 = vrot.lane.b32.xlu0 %v10604_v17, %s8324_s21  ;;  %13982 = vst [vmem:[#allocation62_spill] sm:$0xff] %v10622_v38 }
 0x52c   : > { %13979 = vst [vmem:[#allocation56_spill] sm:$0xff] %v10606_v53 }
 0x52d   : > { %v10612_v29 = vpop.permute.xlu0 %3825  ;;  %3671 = vrot.lane.b32.xlu1 %v10610_v20, %s8324_s21 }
 0x52e   : > { %13980 = vst [vmem:[#allocation49_spill] sm:$0xff] %v10612_v29 }
 0x52f   : > { %v10618_v42 = vpop.permute.xlu1 %3447  ;;  %3669 = vrot.lane.b32.xlu0 %v10616_v8, %s8324_s21 }
 0x530   : > { %13981 = vst [vmem:[#allocation54_spill] sm:$0xff] %v10618_v42 }
 0x531   : > { %v10624_v53 = vpop.permute.xlu0 %4017  ;;  %3859 = vrot.lane.b32.xlu1 %v10622_v38, %s8325_s22  ;;  %v10700_v38 = vld [vmem:[#allocation2 + $0x180] sm:$0xff] }
 0x532   : > { %13983 = vst [vmem:[#allocation68_spill] sm:$0xff] %v10624_v53  ;;  %14000 = vst [vmem:[#allocation175_spill] sm:$0xff] %v10700_v38 }
 0x533   : > { %v10630_v29 = vpop.permute.xlu1 %3639  ;;  %3489 = vrot.lane.b32.xlu0 %v10628_v55, %s8323_s20 }
 0x534   : > { %13984 = vst [vmem:[#allocation60_spill] sm:$0xff] %v10630_v29 }
 0x535   : > { %v10636_v42 = vpop.permute.xlu0 %3641  ;;  %3491 = vrot.lane.b32.xlu1 %v10634_v26, %s8323_s20 }
 0x536   : > { %13985 = vst [vmem:[#allocation65_spill] sm:$0xff] %v10636_v42 }
 0x537   : > { %v10642_v53 = vpop.permute.xlu1 %3827  ;;  %3869 = vrot.lane.b32.xlu0 %v10640_v32, %s8325_s22  ;;  %v10670_v32 = vld [vmem:[#allocation2 + $0x141] sm:$0xff] }
 0x538   : > { %13987 = vst [vmem:[#allocation73_spill] sm:$0xff] %v10642_v53 }
 0x539   : > { %v10648_v29 = vpop.permute.xlu0 %3637  ;;  %3683 = vrot.lane.b32.xlu1 %v10646_v56, %s8324_s21 }
 0x53a   : > { %13988 = vst [vmem:[#allocation48_spill] sm:$0xff] %v10648_v29 }
 0x53b   : > { %v10654_v42 = vpop.permute.xlu1 %4019  ;;  %3485 = vrot.lane.b32.xlu0 %v10652_v13, %s8323_s20 }
 0x53c   : > { %13989 = vst [vmem:[#allocation55_spill] sm:$0xff] %v10654_v42 }
 0x53d   : > { %v10660_v53 = vpop.permute.xlu0 %3457  ;;  %3871 = vrot.lane.b32.xlu1 %v10658_v1, %s8325_s22  ;;  %v10682_v1 = vld [vmem:[#allocation2 + $0x142] sm:$0xff] }
 0x53e   : > { %13991 = vst [vmem:[#allocation61_spill] sm:$0xff] %v10660_v53 }
 0x53f   : > { %v10666_v29 = vpop.permute.xlu1 %3459  ;;  %3865 = vrot.lane.b32.xlu0 %v10664_v9, %s8325_s22  ;;  %v10688_v9 = vld [vmem:[#allocation2 + $0x13a] sm:$0xff] }
 0x540   : > { %13993 = vst [vmem:[#allocation147_spill] sm:$0xff] %v10666_v29 }
 0x541   : > { %v10672_v42 = vpop.permute.xlu0 %3837  ;;  %3487 = vrot.lane.b32.xlu1 %v10670_v32, %s8323_s20 }
 0x542   : > { %13994 = vst [vmem:[#allocation173_spill] sm:$0xff] %v10672_v42 }
 0x543   : > { %v10678_v53 = vpop.permute.xlu1 %3651  ;;  %3681 = vrot.lane.b32.xlu0 %v10676_v48, %s8324_s21 }
 0x544   : > { %13995 = vst [vmem:[#allocation93_spill] sm:$0xff] %v10678_v53 }
 0x545   : > { %v10684_v29 = vpop.permute.xlu0 %4029  ;;  %3679 = vrot.lane.b32.xlu1 %v10682_v1, %s8324_s21 }
 0x546   : > { %13996 = vst [vmem:[#allocation117_spill] sm:$0xff] %v10684_v29 }
 0x547   : > { %v10690_v42 = vpop.permute.xlu1 %3839  ;;  %3677 = vrot.lane.b32.xlu0 %v10688_v9, %s8324_s21 }
 0x548   : > { %13997 = vst [vmem:[#allocation79_spill] sm:$0xff] %v10690_v42 }
 0x549   : > { %v10696_v53 = vpop.permute.xlu0 %3453  ;;  %3867 = vrot.lane.b32.xlu1 %v10694_v6, %s8325_s22  ;;  %v10718_v6 = vld [vmem:[#allocation2 + $0x171] sm:$0xff] }
 0x54a   : > { %13999 = vst [vmem:[#allocation148_spill] sm:$0xff] %v10696_v53 }
 0x54b   : > { %v10702_v29 = vpop.permute.xlu1 %4031  ;;  %3877 = vrot.lane.b32.xlu0 %v10700_v38, %s8325_s22  ;;  %v10724_v38 = vld [vmem:[#allocation2 + $0x168] sm:$0xff] }
 0x54c   : > { %14001 = vst [vmem:[#allocation94_spill] sm:$0xff] %v10702_v29  ;;  %14006 = vst [vmem:[#allocation149_spill] sm:$0xff] %v10724_v38 }
 0x54d   : > { %v10708_v42 = vpop.permute.xlu0 %3833  ;;  %3879 = vrot.lane.b32.xlu1 %v10706_v18, %s8325_s22  ;;  %v10730_v18 = vld [vmem:[#allocation2 + $0x172] sm:$0xff] }
 0x54e   : > { %14003 = vst [vmem:[#allocation108_spill] sm:$0xff] %v10708_v42 }
 0x54f   : > { %v10714_v53 = vpop.permute.xlu1 %3455  ;;  %3493 = vrot.lane.b32.xlu0 %v10712_v30, %s8323_s20 }
 0x550   : > { %14004 = vst [vmem:[#allocation71_spill] sm:$0xff] %v10714_v53 }
 0x551   : > { %v10720_v29 = vpop.permute.xlu0 %4025  ;;  %3495 = vrot.lane.b32.xlu1 %v10718_v6, %s8323_s20 }
 0x552   : > { %14005 = vst [vmem:[#allocation124_spill] sm:$0xff] %v10720_v29 }
 0x553   : > { %v10726_v42 = vpop.permute.xlu1 %3647  ;;  %3873 = vrot.lane.b32.xlu0 %v10724_v38, %s8325_s22 }
 0x554   : > { %14007 = vst [vmem:[#allocation176_spill] sm:$0xff] %v10726_v42 }
 0x555   : > { %v10732_v53 = vpop.permute.xlu0 %3649  ;;  %3687 = vrot.lane.b32.xlu1 %v10730_v18, %s8324_s21 }
 0x556   : > { %14008 = vst [vmem:[#allocation111_spill] sm:$0xff] %v10732_v53 }
 0x557   : > { %v10738_v29 = vpop.permute.xlu1 %3835  ;;  %3685 = vrot.lane.b32.xlu0 %v10736_v21, %s8324_s21 }
 0x558   : > { %14009 = vst [vmem:[#allocation115_spill] sm:$0xff] %v10738_v29 }
 0x559   : > { %v10744_v42 = vpop.permute.xlu0 %3645  ;;  %3875 = vrot.lane.b32.xlu1 %v10742_v23, %s8325_s22 }
 0x55a   : > { %14010 = vst [vmem:[#allocation96_spill] sm:$0xff] %v10744_v42 }
 0x55b   : > { %v10748_v38 = vpop.permute.xlu1 %4027  ;;  %4033 = vrot.lane.b32.xlu0 %v10438_v43, %s8326_s23 }
 0x55d   : > { %v10752_v53 = vpop.permute.xlu0 %3465  ;;  %4035 = vrot.lane.b32.xlu1 %v10454_v2, %s8326_s23 }
 0x55f   : > { %v10756_v29 = vpop.permute.xlu1 %3467  ;;  %4037 = vrot.lane.b32.xlu0 %v10422_v15, %s8326_s23 }
 0x561   : > { %v10760_v63 = vpop.permute.xlu0 %3845  ;;  %4039 = vrot.lane.b32.xlu1 %v10426_v41, %s8326_s23 }
 0x562   : > { %14011 = vst [vmem:[#allocation125_spill] sm:$0xff] %v10760_v63 }
 0x563   : > { %v10764_v42 = vpop.permute.xlu1 %3659  ;;  %4041 = vrot.lane.b32.xlu0 %v10508_v11, %s8326_s23 }
 0x565   : > { %v10768_v43 = vpop.permute.xlu0 %3461  ;;  %4043 = vrot.lane.b32.xlu1 %v10526_v10, %s8326_s23 }
 0x567   : > { %v10772_v2 = vpop.permute.xlu1 %3847  ;;  %4045 = vrot.lane.b32.xlu0 %v10484_v14, %s8326_s23 }
 0x569   : > { %v10776_v15 = vpop.permute.xlu0 %3841  ;;  %4047 = vrot.lane.b32.xlu1 %v10490_v7, %s8326_s23 }
 0x56b   : > { %v10780_v41 = vpop.permute.xlu1 %3463  ;;  %4049 = vrot.lane.b32.xlu0 %v10580_v19, %s8326_s23 }
 0x56d   : > { %v10784_v11 = vpop.permute.xlu0 %3657  ;;  %4051 = vrot.lane.b32.xlu1 %v10598_v62, %s8326_s23 }
 0x56f   : > { %v10788_v10 = vpop.permute.xlu1 %3655  ;;  %4053 = vrot.lane.b32.xlu0 %v10556_v44, %s8326_s23 }
 0x571   : > { %v10792_v14 = vpop.permute.xlu0 %3653  ;;  %4055 = vrot.lane.b32.xlu1 %v10562_v40, %s8326_s23 }
 0x573   : > { %v10796_v7 = vpop.permute.xlu1 %3843  ;;  %4057 = vrot.lane.b32.xlu0 %v10652_v13, %s8326_s23 }
 0x575   : > { %v10800_v19 = vpop.permute.xlu0 %3473  ;;  %4059 = vrot.lane.b32.xlu1 %v10670_v32, %s8326_s23 }
 0x576   : > { %14012 = vst [vmem:[#allocation150_spill] sm:$0xff] %v10800_v19  ;;  %v10820_v19 = vld [vmem:[#allocation2 + $0x181] sm:$0xff] }
 0x577   : > { %v10804_v62 = vpop.permute.xlu1 %3475  ;;  %4061 = vrot.lane.b32.xlu0 %v10628_v55, %s8326_s23  ;;  %v10826_v55 = vld [vmem:[#allocation2 + $0x189] sm:$0xff] }
 0x578   : > { %14013 = vst [vmem:[#allocation177_spill] sm:$0xff] %v10804_v62 }
 0x579   : > { %v10808_v44 = vpop.permute.xlu0 %3853  ;;  %4063 = vrot.lane.b32.xlu1 %v10634_v26, %s8326_s23 }
 0x57a   : > { %14014 = vst [vmem:[#allocation97_spill] sm:$0xff] %v10808_v44 }
 0x57b   : > { %v10812_v40 = vpop.permute.xlu1 %3667  ;;  %4065 = vrot.lane.b32.xlu0 %v10712_v30, %s8326_s23 }
 0x57c   : > { %14015 = vst [vmem:[#allocation112_spill] sm:$0xff] %v10812_v40 }
 0x57d   : > { %v10816_v63 = vpop.permute.xlu0 %3469  ;;  %4067 = vrot.lane.b32.xlu1 %v10718_v6, %s8326_s23 }
 0x57e   : > { %14016 = vst [vmem:[#allocation126_spill] sm:$0xff] %v10816_v63 }
 0x57f   : > { %v10822_v62 = vpop.permute.xlu1 %3855  ;;  %4069 = vrot.lane.b32.xlu0 %v10820_v19, %s8326_s23 }
 0x580   : > { %14017 = vst [vmem:[#allocation84_spill] sm:$0xff] %v10822_v62 }
 0x581   : > { %v10828_v26 = vpop.permute.xlu0 %3849  ;;  %4071 = vrot.lane.b32.xlu1 %v10826_v55, %s8326_s23 }
 0x582   : > { %14018 = vst [vmem:[#allocation151_spill] sm:$0xff] %v10828_v26 }
 0x583   : > { %v10832_v44 = vpop.permute.xlu1 %3471  ;;  %4201 = vrot.lane.b32.xlu0 %v10331_v33, %s8327_s24 }
 0x585   : > { %v10836_v40 = vpop.permute.xlu0 %3665  ;;  %4203 = vrot.lane.b32.xlu1 %v10318_v54, %s8327_s24 }
 0x586   : > { %14019 = vst [vmem:[#allocation178_spill] sm:$0xff] %v10836_v40  ;;  %v14175_v40 = vld [vmem:[#allocation48_spill] sm:$0xff] }
 0x587   : > { %v10840_v62 = vpop.permute.xlu1 %3663  ;;  %4205 = vrot.lane.b32.xlu0 %v10322_v50, %s8327_s24 }
 0x589   : > { %v10844_v63 = vpop.permute.xlu0 %3661  ;;  %4207 = vrot.lane.b32.xlu1 %v10299_v34, %s8327_s24 }
 0x58a   : > { %14020 = vst [vmem:[#allocation23_spill] sm:$0xff] %v10844_v63  ;;  %v14187_v63 = vld [vmem:[#allocation43_spill] sm:$0xff] }
 0x58b   : > { %v10848_v26 = vpop.permute.xlu1 %3851  ;;  %4209 = vrot.lane.b32.xlu0 %v10377_v46, %s8327_s24 }
 0x58c   : > { %14021 = vst [vmem:[#allocation116_spill] sm:$0xff] %v10848_v26 }
 0x58d   : > { %v10852_v33 = vpop.permute.xlu0 %3481  ;;  %4211 = vrot.lane.b32.xlu1 %v10365_v0, %s8327_s24 }
 0x58e   : > { %14022 = vst [vmem:[#allocation100_spill] sm:$0xff] %v10852_v33  ;;  %v14162_v33 = vld [vmem:[#allocation13_spill] sm:$0xff] }
 0x58f   : > { %v10856_v54 = vpop.permute.xlu1 %3483  ;;  %4213 = vrot.lane.b32.xlu0 %v10369_v59, %s8327_s24 }
 0x590   : > { %14023 = vst [vmem:[#allocation127_spill] sm:$0xff] %v10856_v54  ;;  %v8224_v54 = vld [vmem:[#allocation2 + $0x50] sm:$0xff] }
 0x591   : > { %v10860_v50 = vpop.permute.xlu0 %3861  ;;  %4215 = vrot.lane.b32.xlu1 %v10343_v58, %s8327_s24 }
 0x592   : > { %14024 = vst [vmem:[#allocation152_spill] sm:$0xff] %v10860_v50  ;;  %v4530_v50 = vld [vmem:[#allocation2 + $0x99] sm:$0xff] }
 0x593   : > { %v10864_v34 = vpop.permute.xlu1 %3675  ;;  %4217 = vrot.lane.b32.xlu0 %v10417_v47, %s8327_s24 }
 0x594   : > { %14025 = vst [vmem:[#allocation179_spill] sm:$0xff] %v10864_v34 }
 0x595   : > { %v10868_v46 = vpop.permute.xlu0 %3477  ;;  %4219 = vrot.lane.b32.xlu1 %v10405_v36, %s8327_s24 }
 0x596   : > { %14026 = vst [vmem:[#allocation99_spill] sm:$0xff] %v10868_v46 }
 0x597   : > { %v10872_v0 = vpop.permute.xlu1 %3863  ;;  %4221 = vrot.lane.b32.xlu0 %v10409_v28, %s8327_s24 }
 0x598   : > { %14027 = vst [vmem:[#allocation101_spill] sm:$0xff] %v10872_v0 }
 0x599   : > { %v10876_v59 = vpop.permute.xlu0 %3857  ;;  %4223 = vrot.lane.b32.xlu1 %v10388_v35, %s8327_s24 }
 0x59a   : > { %14028 = vst [vmem:[#allocation120_spill] sm:$0xff] %v10876_v59 }
 0x59b   : > { %v10880_v58 = vpop.permute.xlu1 %3479  ;;  %4225 = vrot.lane.b32.xlu0 %v10472_v39, %s8327_s24 }
 0x59c   : > { %14029 = vst [vmem:[#allocation128_spill] sm:$0xff] %v10880_v58 }
 0x59d   : > { %v10884_v47 = vpop.permute.xlu0 %3673  ;;  %4227 = vrot.lane.b32.xlu1 %v10466_v49, %s8327_s24 }
 0x59e   : > { %14030 = vst [vmem:[#allocation153_spill] sm:$0xff] %v10884_v47  ;;  %v4722_v47 = vld [vmem:[#allocation2 + $0x9a] sm:$0xff] }
 0x59f   : > { %v10888_v36 = vpop.permute.xlu1 %3671  ;;  %4229 = vrot.lane.b32.xlu0 %v10460_v16, %s8327_s24 }
 0x5a0   : > { %14031 = vst [vmem:[#allocation180_spill] sm:$0xff] %v10888_v36 }
 0x5a1   : > { %v10892_v28 = vpop.permute.xlu0 %3669  ;;  %4231 = vrot.lane.b32.xlu1 %v10434_v60, %s8327_s24 }
 0x5a2   : > { %14032 = vst [vmem:[#allocation58_spill] sm:$0xff] %v10892_v28 }
 0x5a3   : > { %v10896_v35 = vpop.permute.xlu1 %3859  ;;  %4233 = vrot.lane.b32.xlu0 %v10544_v5, %s8327_s24 }
 0x5a4   : > { %14033 = vst [vmem:[#allocation72_spill] sm:$0xff] %v10896_v35  ;;  %v4718_v35 = vld [vmem:[#allocation2 + $0x6a] sm:$0xff] }
 0x5a5   : > { %v10900_v39 = vpop.permute.xlu0 %3489  ;;  %4235 = vrot.lane.b32.xlu1 %v10538_v52, %s8327_s24 }
 0x5a6   : > { %14034 = vst [vmem:[#allocation26_spill] sm:$0xff] %v10900_v39 }
 0x5a7   : > { %v10904_v49 = vpop.permute.xlu1 %3491  ;;  %4237 = vrot.lane.b32.xlu0 %v10532_v27, %s8327_s24 }
 0x5a8   : > { %14035 = vst [vmem:[#allocation129_spill] sm:$0xff] %v10904_v49  ;;  %v4532_v49 = vld [vmem:[#allocation2 + $0xb1] sm:$0xff] }
 0x5a9   : > { %v10908_v16 = vpop.permute.xlu0 %3869  ;;  %4239 = vrot.lane.b32.xlu1 %v10502_v25, %s8327_s24 }
 0x5aa   : > { %14036 = vst [vmem:[#allocation154_spill] sm:$0xff] %v10908_v16 }
 0x5ab   : > { %v10912_v60 = vpop.permute.xlu1 %3683  ;;  %4241 = vrot.lane.b32.xlu0 %v10616_v8, %s8327_s24 }
 0x5ac   : > { %14037 = vst [vmem:[#allocation181_spill] sm:$0xff] %v10912_v60  ;;  %v4528_v60 = vld [vmem:[#allocation2 + $0x81] sm:$0xff] }
 0x5ad   : > { %v10916_v5 = vpop.permute.xlu0 %3485  ;;  %4243 = vrot.lane.b32.xlu1 %v10610_v20, %s8327_s24 }
 0x5ae   : > { %14038 = vst [vmem:[#allocation53_spill] sm:$0xff] %v10916_v5  ;;  %v4526_v5 = vld [vmem:[#allocation2 + $0x69] sm:$0xff] }
 0x5af   : > { %v10920_v52 = vpop.permute.xlu1 %3871  ;;  %4245 = vrot.lane.b32.xlu0 %v10604_v17, %s8327_s24 }
 0x5b0   : > { %14039 = vst [vmem:[#allocation35_spill] sm:$0xff] %v10920_v52 }
 0x5b1   : > { %v10924_v27 = vpop.permute.xlu0 %3865  ;;  %4247 = vrot.lane.b32.xlu1 %v10574_v3, %s8327_s24 }
 0x5b2   : > { %14040 = vst [vmem:[#allocation130_spill] sm:$0xff] %v10924_v27 }
 0x5b3   : > { %v10928_v25 = vpop.permute.xlu1 %3487  ;;  %4249 = vrot.lane.b32.xlu0 %v10688_v9, %s8327_s24 }
 0x5b4   : > { %14041 = vst [vmem:[#allocation104_spill] sm:$0xff] %v10928_v25 }
 0x5b5   : > { %v10932_v8 = vpop.permute.xlu0 %3681  ;;  %4251 = vrot.lane.b32.xlu1 %v10682_v1, %s8327_s24  ;;  %v10952_v1 = vld [vmem:[#allocation2 + $0x182] sm:$0xff] }
 0x5b6   : > { %14042 = vst [vmem:[#allocation155_spill] sm:$0xff] %v10932_v8 }
 0x5b7   : > { %v10936_v20 = vpop.permute.xlu1 %3679  ;;  %4253 = vrot.lane.b32.xlu0 %v10676_v48, %s8327_s24  ;;  %v10958_v48 = vld [vmem:[#allocation2 + $0x18a] sm:$0xff] }
 0x5b8   : > { %14043 = vst [vmem:[#allocation182_spill] sm:$0xff] %v10936_v20  ;;  %v14074_v20 = vld [vmem:[#allocation62_spill] sm:$0xff] }
 0x5b9   : > { %v10940_v17 = vpop.permute.xlu0 %3677  ;;  %4255 = vrot.lane.b32.xlu1 %v10646_v56, %s8327_s24 }
 0x5ba   : > { %14044 = vst [vmem:[#allocation63_spill] sm:$0xff] %v10940_v17 }
 0x5bb   : > { %v10944_v3 = vpop.permute.xlu1 %3867  ;;  %4257 = vrot.lane.b32.xlu0 %v10736_v21, %s8327_s24  ;;  %v4329_v21 = vld [vmem:[#allocation2 + $0x30] sm:$0xff] }
 0x5bc   : > { %14045 = vst [vmem:[#allocation67_spill] sm:$0xff] %v10944_v3 }
 0x5bd   : > { %v10948_v9 = vpop.permute.xlu0 %3877  ;;  %4259 = vrot.lane.b32.xlu1 %v10730_v18, %s8327_s24  ;;  %v4330_v18 = vld [vmem:[#allocation2 + $0x38] sm:$0xff] }
 0x5be   : > { %14046 = vst [vmem:[#allocation46_spill] sm:$0xff] %v10948_v9 }
 0x5bf   : > { %v10954_v52 = vpop.permute.xlu1 %3879  ;;  %4261 = vrot.lane.b32.xlu0 %v10952_v1, %s8327_s24 }
 0x5c0   : > { %14047 = vst [vmem:[#allocation131_spill] sm:$0xff] %v10954_v52 }
 0x5c1   : > { %v10960_v56 = vpop.permute.xlu0 %3493  ;;  %4263 = vrot.lane.b32.xlu1 %v10958_v48, %s8327_s24 }
 0x5c2   : > { %14048 = vst [vmem:[#allocation156_spill] sm:$0xff] %v10960_v56  ;;  %v4333_v56 = vld [vmem:[#allocation2 + $0x60] sm:$0xff] }
 0x5c3   : > { %4393 = vrot.lane.b32.xlu0 %v4329_v21, %s8328_s27  ;;  %v10965_v9 = vpop.permute.xlu1 %3495 }
 0x5c4   : > { %14049 = vst [vmem:[#allocation183_spill] sm:$0xff] %v10965_v9  ;;  %v4334_v9 = vld [vmem:[#allocation2 + $0x68] sm:$0xff] }
 0x5c5   : > { %v10967_v16 = vpop.permute.xlu0 %3873  ;;  %4395 = vrot.lane.b32.xlu1 %v4330_v18, %s8328_s27 }
 0x5c6   : > { %14050 = vst [vmem:[#allocation70_spill] sm:$0xff] %v10967_v16  ;;  %v14070_v16 = vld [vmem:[#allocation33_spill] sm:$0xff] }
 0x5c7   : > { %4397 = vrot.lane.b32.xlu0 %v10355_v24, %s8328_s27  ;;  %v10972_v52 = vpop.permute.xlu1 %3687 }
 0x5c8   : > { %14051 = vst [vmem:[#allocation132_spill] sm:$0xff] %v10972_v52  ;;  %v14066_v52 = vld [vmem:[#allocation22_spill] sm:$0xff] }
 0x5c9   : > { %v10974_v3 = vpop.permute.xlu0 %3685  ;;  %4399 = vrot.lane.b32.xlu1 %v10373_v61, %s8328_s27 }
 0x5ca   : > { %14052 = vst [vmem:[#allocation39_spill] sm:$0xff] %v10974_v3 }
 0x5cb   : > { %4401 = vrot.lane.b32.xlu0 %v4333_v56, %s8328_s27  ;;  %v10979_v21 = vpop.permute.xlu1 %3875 }
 0x5cc   : > { %14053 = vst [vmem:[#allocation57_spill] sm:$0xff] %v10979_v21 }
 0x5cd   : > { %v10981_v8 = vpop.permute.xlu0 %4033  ;;  %4403 = vrot.lane.b32.xlu1 %v4334_v9, %s8328_s27 }
 0x5ce   : > { %14054 = vst [vmem:[#allocation157_spill] sm:$0xff] %v10981_v8 }
 0x5cf   : > { %4405 = vrot.lane.b32.xlu0 %v10399_v37, %s8328_s27  ;;  %v10986_v24 = vpop.permute.xlu1 %4035 }
 0x5d0   : > { %14055 = vst [vmem:[#allocation184_spill] sm:$0xff] %v10986_v24 }
 0x5d1   : > { %v10988_v18 = vpop.permute.xlu0 %4037  ;;  %4407 = vrot.lane.b32.xlu1 %v10413_v22, %s8328_s27 }
 0x5d2   : > { %14056 = vst [vmem:[#allocation76_spill] sm:$0xff] %v10988_v18 }
 0x5d3   : > { %4409 = vrot.lane.b32.xlu0 %v10384_v31, %s8328_s27  ;;  %v10994_v61 = vpop.permute.xlu1 %4039 }
 0x5d4   : > { %14057 = vst [vmem:[#allocation75_spill] sm:$0xff] %v10994_v61  ;;  %v4720_v61 = vld [vmem:[#allocation2 + $0x82] sm:$0xff] }
 0x5d5   : > { %v10996_v56 = vpop.permute.xlu0 %4041  ;;  %4411 = vrot.lane.b32.xlu1 %v10393_v45, %s8328_s27  ;;  %v14063_v45 = vld [vmem:[#allocation69_spill] sm:$0xff] }
 0x5d6   : > { %14058 = vst [vmem:[#allocation133_spill] sm:$0xff] %v10996_v56 }
 0x5d7   : > { %4413 = vrot.lane.b32.xlu0 %v10450_v51, %s8328_s27  ;;  %v11002_v37 = vpop.permute.xlu1 %4043 }
 0x5d8   : > { %14059 = vst [vmem:[#allocation50_spill] sm:$0xff] %v11002_v37 }
 0x5d9   : > { %v11004_v9 = vpop.permute.xlu0 %4045  ;;  %4415 = vrot.lane.b32.xlu1 %v10478_v4, %s8328_s27  ;;  %v14067_v4 = vld [vmem:[#allocation10_spill] sm:$0xff] }
 0x5da   : > { %14060 = vst [vmem:[#allocation158_spill] sm:$0xff] %v11004_v9 }
 0x5db   : > { %4417 = vrot.lane.b32.xlu0 %v10430_v12, %s8328_s27  ;;  %v11010_v31 = vpop.permute.xlu1 %4047 }
 0x5dc   : > { %14061 = vst [vmem:[#allocation185_spill] sm:$0xff] %v11010_v31  ;;  %v4524_v31 = vld [vmem:[#allocation2 + $0x51] sm:$0xff] }
 0x5dd   : > { %v11012_v22 = vpop.permute.xlu0 %4049  ;;  %4419 = vrot.lane.b32.xlu1 %v10444_v57, %s8328_s27  ;;  %v14071_v57 = vld [vmem:[#allocation44_spill] sm:$0xff] }
 0x5de   : > { %14062 = vst [vmem:[#allocation77_spill] sm:$0xff] %v11012_v22  ;;  %v4522_v22 = vld [vmem:[#allocation2 + $0x39] sm:$0xff] }
 0x5df   : > { %4421 = vrot.lane.b32.xlu0 %v14063_v45, %s8328_s27  ;;  %v11018_v51 = vpop.permute.xlu1 %4051 }
 0x5e0   : > { %14064 = vst [vmem:[#allocation83_spill] sm:$0xff] %v11018_v51 }
 0x5e1   : > { %v11020_v21 = vpop.permute.xlu0 %4053  ;;  %4423 = vrot.lane.b32.xlu1 %v14066_v52, %s8328_s27  ;;  %v14075_v52 = vld [vmem:[#allocation40_spill] sm:$0xff] }
 0x5e2   : > { %14065 = vst [vmem:[#allocation86_spill] sm:$0xff] %v11020_v21  ;;  %v4360_v21 = vld [vmem:[#allocation2 + $0x1a0] sm:$0xff] }
 0x5e3   : > { %4425 = vrot.lane.b32.xlu0 %v14067_v4, %s8328_s27  ;;  %v11026_v12 = vpop.permute.xlu1 %4055 }
 0x5e4   : > { %14068 = vst [vmem:[#allocation134_spill] sm:$0xff] %v11026_v12 }
 0x5e5   : > { %v11028_v3 = vpop.permute.xlu0 %4057  ;;  %4427 = vrot.lane.b32.xlu1 %v14070_v16, %s8328_s27  ;;  %v14079_v16 = vld [vmem:[#allocation122_spill] sm:$0xff] }
 0x5e6   : > { %14069 = vst [vmem:[#allocation159_spill] sm:$0xff] %v11028_v3  ;;  %v14078_v3 = vld [vmem:[#allocation45_spill] sm:$0xff] }
 0x5e7   : > { %4429 = vrot.lane.b32.xlu0 %v14071_v57, %s8328_s27  ;;  %v11034_v45 = vpop.permute.xlu1 %4059 }
 0x5e8   : > { %14072 = vst [vmem:[#allocation186_spill] sm:$0xff] %v11034_v45 }
 0x5e9   : > { %v11036_v17 = vpop.permute.xlu0 %4061  ;;  %4431 = vrot.lane.b32.xlu1 %v14074_v20, %s8328_s27  ;;  %v14083_v20 = vld [vmem:[#allocation66_spill] sm:$0xff] }
 0x5ea   : > { %14073 = vst [vmem:[#allocation88_spill] sm:$0xff] %v11036_v17  ;;  %v14082_v17 = vld [vmem:[#allocation123_spill] sm:$0xff] }
 0x5eb   : > { %4433 = vrot.lane.b32.xlu0 %v14075_v52, %s8328_s27  ;;  %v11042_v4 = vpop.permute.xlu1 %4063 }
 0x5ec   : > { %14076 = vst [vmem:[#allocation87_spill] sm:$0xff] %v11042_v4 }
 0x5ed   : > { %v11044_v12 = vpop.permute.xlu0 %4065  ;;  %4435 = vrot.lane.b32.xlu1 %v14078_v3, %s8328_s27  ;;  %v14086_v3 = vld [vmem:[#allocation149_spill] sm:$0xff] }
 0x5ee   : > { %14077 = vst [vmem:[#allocation92_spill] sm:$0xff] %v11044_v12  ;;  %v14085_v12 = vld [vmem:[#allocation74_spill] sm:$0xff] }
 0x5ef   : > { %4437 = vrot.lane.b32.xlu0 %v14079_v16, %s8328_s27  ;;  %v11050_v57 = vpop.permute.xlu1 %4067 }
 0x5f0   : > { %14080 = vst [vmem:[#allocation11_spill] sm:$0xff] %v11050_v57 }
 0x5f1   : > { %v11052_v45 = vpop.permute.xlu0 %4069  ;;  %4439 = vrot.lane.b32.xlu1 %v14082_v17, %s8328_s27  ;;  %v14087_v17 = vld [vmem:[#allocation175_spill] sm:$0xff] }
 0x5f2   : > { %14081 = vst [vmem:[#allocation135_spill] sm:$0xff] %v11052_v45 }
 0x5f3   : > { %4441 = vrot.lane.b32.xlu0 %v14083_v20, %s8328_s27  ;;  %v11058_v52 = vpop.permute.xlu1 %4071 }
 0x5f4   : > { %14084 = vst [vmem:[#allocation160_spill] sm:$0xff] %v11058_v52  ;;  %v4359_v52 = vld [vmem:[#allocation2 + $0x198] sm:$0xff] }
 0x5f5   : > { %v11060_v4 = vpop.permute.xlu0 %4201  ;;  %4443 = vrot.lane.b32.xlu1 %v14085_v12, %s8328_s27  ;;  %v14088_v12 = vld [vmem:[#allocation107_spill] sm:$0xff] }
 0x5f7   : > { %4445 = vrot.lane.b32.xlu0 %v14086_v3, %s8328_s27  ;;  %v11066_v16 = vpop.permute.xlu1 %4203 }
 0x5f9   : > { %v11068_v57 = vpop.permute.xlu0 %4205  ;;  %4447 = vrot.lane.b32.xlu1 %v10742_v23, %s8328_s27  ;;  %v4521_v23 = vld [vmem:[#allocation2 + $0x31] sm:$0xff] }
 0x5fb   : > { %4449 = vrot.lane.b32.xlu0 %v14087_v17, %s8328_s27  ;;  %v11074_v20 = vpop.permute.xlu1 %4207 }
 0x5fd   : > { %v11076_v45 = vpop.permute.xlu0 %4209  ;;  %4451 = vrot.lane.b32.xlu1 %v14088_v12, %s8328_s27  ;;  %v4523_v12 = vld [vmem:[#allocation2 + $0x49] sm:$0xff] }
 0x5ff   : > { %4453 = vrot.lane.b32.xlu0 %v4359_v52, %s8328_s27  ;;  %v11081_v3 = vpop.permute.xlu1 %4211 }
 0x601   : > { %v11083_v51 = vpop.permute.xlu0 %4213  ;;  %4455 = vrot.lane.b32.xlu1 %v4360_v21, %s8328_s27  ;;  %v4525_v21 = vld [vmem:[#allocation2 + $0x61] sm:$0xff] }
 0x603   : > { %4585 = vrot.lane.b32.xlu0 %v4521_v23, %s8329_s28  ;;  %v11087_v17 = vpop.permute.xlu1 %4215 }
 0x604   : > { %14089 = vst [vmem:[#allocation187_spill] sm:$0xff] %v11087_v17 }
 0x605   : > { %v11089_v25 = vpop.permute.xlu0 %4217  ;;  %4587 = vrot.lane.b32.xlu1 %v4522_v22, %s8329_s28  ;;  %v4527_v22 = vld [vmem:[#allocation2 + $0x79] sm:$0xff] }
 0x606   : > { %14090 = vst [vmem:[#allocation89_spill] sm:$0xff] %v11089_v25  ;;  %v8230_v25 = vld [vmem:[#allocation2 + $0x68] sm:$0xff] }
 0x607   : > { %4589 = vrot.lane.b32.xlu0 %v4523_v12, %s8329_s28  ;;  %v11093_v52 = vpop.permute.xlu1 %4219 }
 0x608   : > { %14091 = vst [vmem:[#allocation136_spill] sm:$0xff] %v11093_v52 }
 0x609   : > { %v11095_v27 = vpop.permute.xlu0 %4221  ;;  %4591 = vrot.lane.b32.xlu1 %v4524_v31, %s8329_s28  ;;  %v4529_v31 = vld [vmem:[#allocation2 + $0x91] sm:$0xff] }
 0x60a   : > { %14092 = vst [vmem:[#allocation27_spill] sm:$0xff] %v11095_v27 }
 0x60b   : > { %4593 = vrot.lane.b32.xlu0 %v4525_v21, %s8329_s28  ;;  %v11099_v23 = vpop.permute.xlu1 %4223 }
 0x60c   : > { %14093 = vst [vmem:[#allocation4_spill] sm:$0xff] %v11099_v23  ;;  %v8222_v23 = vld [vmem:[#allocation2 + $0x20] sm:$0xff] }
 0x60d   : > { %v11101_v9 = vpop.permute.xlu0 %4225  ;;  %4595 = vrot.lane.b32.xlu1 %v4526_v5, %s8329_s28  ;;  %v4531_v5 = vld [vmem:[#allocation2 + $0xa9] sm:$0xff] }
 0x60e   : > { %14094 = vst [vmem:[#allocation161_spill] sm:$0xff] %v11101_v9 }
 0x60f   : > { %4597 = vrot.lane.b32.xlu0 %v4527_v22, %s8329_s28  ;;  %v11105_v12 = vpop.permute.xlu1 %4227 }
 0x610   : > { %14095 = vst [vmem:[#allocation188_spill] sm:$0xff] %v11105_v12 }
 0x611   : > { %v11107_v39 = vpop.permute.xlu0 %4229  ;;  %4599 = vrot.lane.b32.xlu1 %v4528_v60, %s8329_s28  ;;  %v4533_v60 = vld [vmem:[#allocation2 + $0xc1] sm:$0xff] }
 0x612   : > { %14096 = vst [vmem:[#allocation78_spill] sm:$0xff] %v11107_v39 }
 0x613   : > { %4601 = vrot.lane.b32.xlu0 %v4529_v31, %s8329_s28  ;;  %v11111_v21 = vpop.permute.xlu1 %4231 }
 0x614   : > { %14097 = vst [vmem:[#allocation137_spill] sm:$0xff] %v11111_v21  ;;  %v4534_v21 = vld [vmem:[#allocation2 + $0xc9] sm:$0xff] }
 0x615   : > { %v11113_v37 = vpop.permute.xlu0 %4233  ;;  %4603 = vrot.lane.b32.xlu1 %v4530_v50, %s8329_s28  ;;  %v4535_v50 = vld [vmem:[#allocation2 + $0xd9] sm:$0xff] }
 0x616   : > { %14098 = vst [vmem:[#allocation162_spill] sm:$0xff] %v11113_v37 }
 0x617   : > { %4605 = vrot.lane.b32.xlu0 %v4531_v5, %s8329_s28  ;;  %v11117_v22 = vpop.permute.xlu1 %4235 }
 0x618   : > { %14099 = vst [vmem:[#allocation189_spill] sm:$0xff] %v11117_v22  ;;  %v4536_v22 = vld [vmem:[#allocation2 + $0xe1] sm:$0xff] }
 0x619   : > { %v11119_v0 = vpop.permute.xlu0 %4237  ;;  %4607 = vrot.lane.b32.xlu1 %v4532_v49, %s8329_s28  ;;  %v4537_v49 = vld [vmem:[#allocation2 + $0xf1] sm:$0xff] }
 0x61a   : > { %14100 = vst [vmem:[#allocation90_spill] sm:$0xff] %v11119_v0 }
 0x61b   : > { %4609 = vrot.lane.b32.xlu0 %v4533_v60, %s8329_s28  ;;  %v11123_v31 = vpop.permute.xlu1 %4239 }
 0x61c   : > { %14101 = vst [vmem:[#allocation105_spill] sm:$0xff] %v11123_v31  ;;  %v4538_v31 = vld [vmem:[#allocation2 + $0xf9] sm:$0xff] }
 0x61d   : > { %v11125_v56 = vpop.permute.xlu0 %4241  ;;  %4611 = vrot.lane.b32.xlu1 %v4534_v21, %s8329_s28  ;;  %v4539_v21 = vld [vmem:[#allocation2 + $0x109] sm:$0xff] }
 0x61e   : > { %14102 = vst [vmem:[#allocation138_spill] sm:$0xff] %v11125_v56 }
 0x61f   : > { %4613 = vrot.lane.b32.xlu0 %v4535_v50, %s8329_s28  ;;  %v11129_v5 = vpop.permute.xlu1 %4243 }
 0x620   : > { %14103 = vst [vmem:[#allocation163_spill] sm:$0xff] %v11129_v5  ;;  %v4540_v5 = vld [vmem:[#allocation2 + $0x111] sm:$0xff] }
 0x621   : > { %v11131_v37 = vpop.permute.xlu0 %4245  ;;  %4615 = vrot.lane.b32.xlu1 %v4536_v22, %s8329_s28  ;;  %v4541_v22 = vld [vmem:[#allocation2 + $0x121] sm:$0xff] }
 0x622   : > { %14104 = vst [vmem:[#allocation190_spill] sm:$0xff] %v11131_v37 }
 0x623   : > { %4617 = vrot.lane.b32.xlu0 %v4537_v49, %s8329_s28  ;;  %v11135_v60 = vpop.permute.xlu1 %4247 }
 0x624   : > { %14105 = vst [vmem:[#allocation91_spill] sm:$0xff] %v11135_v60  ;;  %v4542_v60 = vld [vmem:[#allocation2 + $0x129] sm:$0xff] }
 0x625   : > { %v11137_v0 = vpop.permute.xlu0 %4249  ;;  %4619 = vrot.lane.b32.xlu1 %v4538_v31, %s8329_s28 }
 0x626   : > { %14106 = vst [vmem:[#allocation119_spill] sm:$0xff] %v11137_v0 }
 0x627   : > { %4621 = vrot.lane.b32.xlu0 %v4539_v21, %s8329_s28  ;;  %v11141_v50 = vpop.permute.xlu1 %4251 }
 0x628   : > { %14107 = vst [vmem:[#allocation81_spill] sm:$0xff] %v11141_v50  ;;  %v4716_v50 = vld [vmem:[#allocation2 + $0x52] sm:$0xff] }
 0x629   : > { %v11143_v56 = vpop.permute.xlu0 %4253  ;;  %4623 = vrot.lane.b32.xlu1 %v4540_v5, %s8329_s28  ;;  %v4545_v5 = vld [vmem:[#allocation2 + $0x151] sm:$0xff] }
 0x62a   : > { %14108 = vst [vmem:[#allocation139_spill] sm:$0xff] %v11143_v56 }
 0x62b   : > { %4625 = vrot.lane.b32.xlu0 %v4541_v22, %s8329_s28  ;;  %v11147_v49 = vpop.permute.xlu1 %4255 }
 0x62c   : > { %14109 = vst [vmem:[#allocation164_spill] sm:$0xff] %v11147_v49  ;;  %v4546_v49 = vld [vmem:[#allocation2 + $0x159] sm:$0xff] }
 0x62d   : > { %v11149_v37 = vpop.permute.xlu0 %4257  ;;  %4627 = vrot.lane.b32.xlu1 %v4542_v60, %s8329_s28 }
 0x62e   : > { %14110 = vst [vmem:[#allocation29_spill] sm:$0xff] %v11149_v37 }
 0x62f   : > { %4629 = vrot.lane.b32.xlu0 %v10652_v13, %s8329_s28  ;;  %v11154_v31 = vpop.permute.xlu1 %4259 }
 0x630   : > { %14111 = vst [vmem:[#allocation82_spill] sm:$0xff] %v11154_v31  ;;  %v4714_v31 = vld [vmem:[#allocation2 + $0x3a] sm:$0xff] }
 0x631   : > { %v11156_v21 = vpop.permute.xlu0 %4261  ;;  %4631 = vrot.lane.b32.xlu1 %v10670_v32, %s8329_s28 }
 0x632   : > { %14112 = vst [vmem:[#allocation95_spill] sm:$0xff] %v11156_v21 }
 0x633   : > { %4633 = vrot.lane.b32.xlu0 %v4545_v5, %s8329_s28  ;;  %v11161_v22 = vpop.permute.xlu1 %4263  ;;  %v4551_v5 = vld [vmem:[#allocation2 + $0x199] sm:$0xff] }
 0x634   : > { %14113 = vst [vmem:[#allocation109_spill] sm:$0xff] %v11161_v22 }
 0x635   : > { %v11163_v56 = vpop.permute.xlu0 %4393  ;;  %4635 = vrot.lane.b32.xlu1 %v4546_v49, %s8329_s28  ;;  %v4552_v49 = vld [vmem:[#allocation2 + $0x1a1] sm:$0xff] }
 0x637   : > { %4637 = vrot.lane.b32.xlu0 %v10712_v30, %s8329_s28  ;;  %v11168_v13 = vpop.permute.xlu1 %4395 }
 0x639   : > { %v11170_v60 = vpop.permute.xlu0 %4397  ;;  %4639 = vrot.lane.b32.xlu1 %v10718_v6, %s8329_s28  ;;  %v4713_v6 = vld [vmem:[#allocation2 + $0x32] sm:$0xff] }
 0x63b   : > { %4641 = vrot.lane.b32.xlu0 %v10820_v19, %s8329_s28  ;;  %v11176_v32 = vpop.permute.xlu1 %4399 }
 0x63d   : > { %v11178_v22 = vpop.permute.xlu0 %4401  ;;  %4643 = vrot.lane.b32.xlu1 %v10826_v55, %s8329_s28  ;;  %v4715_v55 = vld [vmem:[#allocation2 + $0x4a] sm:$0xff] }
 0x63f   : > { %4645 = vrot.lane.b32.xlu0 %v4551_v5, %s8329_s28  ;;  %v11183_v30 = vpop.permute.xlu1 %4403 }
 0x641   : > { %v11185_v21 = vpop.permute.xlu0 %4405  ;;  %4647 = vrot.lane.b32.xlu1 %v4552_v49, %s8329_s28  ;;  %v4717_v49 = vld [vmem:[#allocation2 + $0x62] sm:$0xff] }
 0x642   : > { %14114 = vst [vmem:[#allocation140_spill] sm:$0xff] %v11185_v21 }
 0x643   : > { %4777 = vrot.lane.b32.xlu0 %v4713_v6, %s8330_s29  ;;  %v11189_v19 = vpop.permute.xlu1 %4407 }
 0x644   : > { %14115 = vst [vmem:[#allocation165_spill] sm:$0xff] %v11189_v19  ;;  %v14180_v19 = vld [vmem:[#allocation15_spill] sm:$0xff] }
 0x645   : > { %v11191_v37 = vpop.permute.xlu0 %4409  ;;  %4779 = vrot.lane.b32.xlu1 %v4714_v31, %s8330_s29  ;;  %v4719_v31 = vld [vmem:[#allocation2 + $0x7a] sm:$0xff] }
 0x646   : > { %14116 = vst [vmem:[#allocation34_spill] sm:$0xff] %v11191_v37  ;;  %v8226_v37 = vld [vmem:[#allocation2 + $0x38] sm:$0xff] }
 0x647   : > { %4781 = vrot.lane.b32.xlu0 %v4715_v55, %s8330_s29  ;;  %v11195_v5 = vpop.permute.xlu1 %4411 }
 0x648   : > { %14117 = vst [vmem:[#allocation110_spill] sm:$0xff] %v11195_v5 }
 0x649   : > { %v11197_v0 = vpop.permute.xlu0 %4413  ;;  %4783 = vrot.lane.b32.xlu1 %v4716_v50, %s8330_s29  ;;  %v4721_v50 = vld [vmem:[#allocation2 + $0x92] sm:$0xff] }
 0x64a   : > { %14118 = vst [vmem:[#allocation113_spill] sm:$0xff] %v11197_v0 }
 0x64b   : > { %4785 = vrot.lane.b32.xlu0 %v4717_v49, %s8330_s29  ;;  %v11201_v6 = vpop.permute.xlu1 %4415 }
 0x64c   : > { %14119 = vst [vmem:[#allocation98_spill] sm:$0xff] %v11201_v6 }
 0x64d   : > { %v11203_v39 = vpop.permute.xlu0 %4417  ;;  %4787 = vrot.lane.b32.xlu1 %v4718_v35, %s8330_s29  ;;  %v4723_v35 = vld [vmem:[#allocation2 + $0xaa] sm:$0xff] }
 0x64e   : > { %14120 = vst [vmem:[#allocation141_spill] sm:$0xff] %v11203_v39 }
 0x64f   : > { %4789 = vrot.lane.b32.xlu0 %v4719_v31, %s8330_s29  ;;  %v11207_v55 = vpop.permute.xlu1 %4419 }
 0x650   : > { %14121 = vst [vmem:[#allocation166_spill] sm:$0xff] %v11207_v55  ;;  %v4724_v55 = vld [vmem:[#allocation2 + $0xb2] sm:$0xff] }
 0x651   : > { %v11209_v28 = vpop.permute.xlu0 %4421  ;;  %4791 = vrot.lane.b32.xlu1 %v4720_v61, %s8330_s29  ;;  %v4725_v61 = vld [vmem:[#allocation2 + $0xc2] sm:$0xff] }
 0x652   : > { %14122 = vst [vmem:[#allocation3_spill] sm:$0xff] %v11209_v28 }
 0x653   : > { %4793 = vrot.lane.b32.xlu0 %v4721_v50, %s8330_s29  ;;  %v11213_v49 = vpop.permute.xlu1 %4423 }
 0x654   : > { %14123 = vst [vmem:[#allocation80_spill] sm:$0xff] %v11213_v49  ;;  %v4726_v49 = vld [vmem:[#allocation2 + $0xca] sm:$0xff] }
 0x655   : > { %v11215_v12 = vpop.permute.xlu0 %4425  ;;  %4795 = vrot.lane.b32.xlu1 %v4722_v47, %s8330_s29  ;;  %v4727_v47 = vld [vmem:[#allocation2 + $0xda] sm:$0xff] }
 0x656   : > { %14124 = vst [vmem:[#allocation114_spill] sm:$0xff] %v11215_v12 }
 0x657   : > { %4797 = vrot.lane.b32.xlu0 %v4723_v35, %s8330_s29  ;;  %v11219_v31 = vpop.permute.xlu1 %4427 }
 0x658   : > { %14125 = vst [vmem:[#allocation142_spill] sm:$0xff] %v11219_v31  ;;  %v4728_v31 = vld [vmem:[#allocation2 + $0xe2] sm:$0xff] }
 0x659   : > { %v11221_v39 = vpop.permute.xlu0 %4429  ;;  %4799 = vrot.lane.b32.xlu1 %v4724_v55, %s8330_s29  ;;  %v4729_v55 = vld [vmem:[#allocation2 + $0xf2] sm:$0xff] }
 0x65a   : > { %14126 = vst [vmem:[#allocation85_spill] sm:$0xff] %v11221_v39 }
 0x65b   : > { %4801 = vrot.lane.b32.xlu0 %v4725_v61, %s8330_s29  ;;  %v11225_v50 = vpop.permute.xlu1 %4431 }
 0x65c   : > { %14127 = vst [vmem:[#allocation167_spill] sm:$0xff] %v11225_v50  ;;  %v4730_v50 = vld [vmem:[#allocation2 + $0xfa] sm:$0xff] }
 0x65d   : > { %v11227_v28 = vpop.permute.xlu0 %4433  ;;  %4803 = vrot.lane.b32.xlu1 %v4726_v49, %s8330_s29  ;;  %v4731_v49 = vld [vmem:[#allocation2 + $0x10a] sm:$0xff] }
 0x65e   : > { %14128 = vst [vmem:[#allocation19_spill] sm:$0xff] %v11227_v28 }
 0x65f   : > { %4805 = vrot.lane.b32.xlu0 %v4727_v47, %s8330_s29  ;;  %v11231_v35 = vpop.permute.xlu1 %4435 }
 0x660   : > { %14129 = vst [vmem:[#allocation118_spill] sm:$0xff] %v11231_v35  ;;  %v4732_v35 = vld [vmem:[#allocation2 + $0x112] sm:$0xff] }
 0x661   : > { %v11233_v12 = vpop.permute.xlu0 %4437  ;;  %4807 = vrot.lane.b32.xlu1 %v4728_v31, %s8330_s29  ;;  %v4733_v31 = vld [vmem:[#allocation2 + $0x122] sm:$0xff] }
 0x662   : > { %14130 = vst [vmem:[#allocation102_spill] sm:$0xff] %v11233_v12 }
 0x663   : > { %4809 = vrot.lane.b32.xlu0 %v4729_v55, %s8330_s29  ;;  %v11237_v61 = vpop.permute.xlu1 %4439 }
 0x664   : > { %14131 = vst [vmem:[#allocation143_spill] sm:$0xff] %v11237_v61  ;;  %v4734_v61 = vld [vmem:[#allocation2 + $0x12a] sm:$0xff] }
 0x665   : > { %v11239_v39 = vpop.permute.xlu0 %4441  ;;  %4811 = vrot.lane.b32.xlu1 %v4730_v50, %s8330_s29  ;;  %v4735_v50 = vld [vmem:[#allocation2 + $0x13a] sm:$0xff] }
 0x666   : > { %14132 = vst [vmem:[#allocation168_spill] sm:$0xff] %v11239_v39 }
 0x667   : > { %4813 = vrot.lane.b32.xlu0 %v4731_v49, %s8330_s29  ;;  %v11243_v47 = vpop.permute.xlu1 %4443 }
 0x668   : > { %14133 = vst [vmem:[#allocation16_spill] sm:$0xff] %v11243_v47  ;;  %v4736_v47 = vld [vmem:[#allocation2 + $0x142] sm:$0xff] }
 0x669   : > { %v11245_v28 = vpop.permute.xlu0 %4445  ;;  %4815 = vrot.lane.b32.xlu1 %v4732_v35, %s8330_s29  ;;  %v4737_v35 = vld [vmem:[#allocation2 + $0x152] sm:$0xff] }
 0x66a   : > { %14134 = vst [vmem:[#allocation103_spill] sm:$0xff] %v11245_v28 }
 0x66b   : > { %4817 = vrot.lane.b32.xlu0 %v4733_v31, %s8330_s29  ;;  %v11249_v55 = vpop.permute.xlu1 %4447 }
 0x66c   : > { %14135 = vst [vmem:[#allocation121_spill] sm:$0xff] %v11249_v55  ;;  %v4738_v55 = vld [vmem:[#allocation2 + $0x15a] sm:$0xff] }
 0x66d   : > { %v11251_v12 = vpop.permute.xlu0 %4449  ;;  %4819 = vrot.lane.b32.xlu1 %v4734_v61, %s8330_s29  ;;  %v4739_v61 = vld [vmem:[#allocation2 + $0x16a] sm:$0xff] }
 0x66e   : > { %14136 = vst [vmem:[#allocation144_spill] sm:$0xff] %v11251_v12 }
 0x66f   : > { %4821 = vrot.lane.b32.xlu0 %v4735_v50, %s8330_s29  ;;  %v11255_v49 = vpop.permute.xlu1 %4451 }
 0x670   : > { %14137 = vst [vmem:[#allocation169_spill] sm:$0xff] %v11255_v49  ;;  %v4740_v49 = vld [vmem:[#allocation2 + $0x172] sm:$0xff] }
 0x671   : > { %v11257_v39 = vpop.permute.xlu0 %4453  ;;  %4823 = vrot.lane.b32.xlu1 %v4736_v47, %s8330_s29 }
 0x672   : > { %14138 = vst [vmem:[#allocation31_spill] sm:$0xff] %v11257_v39 }
 0x673   : > { %4825 = vrot.lane.b32.xlu0 %v4737_v35, %s8330_s29  ;;  %v11261_v31 = vpop.permute.xlu1 %4455  ;;  %v4743_v35 = vld [vmem:[#allocation2 + $0x19a] sm:$0xff] }
 0x674   : > { %14139 = vst [vmem:[#allocation145_spill] sm:$0xff] %v11261_v31 }
 0x675   : > { %v11263_v28 = vpop.permute.xlu0 %4585  ;;  %4827 = vrot.lane.b32.xlu1 %v4738_v55, %s8330_s29  ;;  %v4744_v55 = vld [vmem:[#allocation2 + $0x1a2] sm:$0xff] }
 0x677   : > { %4829 = vrot.lane.b32.xlu0 %v4739_v61, %s8330_s29  ;;  %v11267_v50 = vpop.permute.xlu1 %4587 }
 0x679   : > { %v11269_v12 = vpop.permute.xlu0 %4589  ;;  %4831 = vrot.lane.b32.xlu1 %v4740_v49, %s8330_s29 }
 0x67b   : > { %4833 = vrot.lane.b32.xlu0 %v10952_v1, %s8330_s29  ;;  %v11274_v47 = vpop.permute.xlu1 %4591 }
 0x67d   : > { %v11276_v31 = vpop.permute.xlu0 %4593  ;;  %4835 = vrot.lane.b32.xlu1 %v10958_v48, %s8330_s29 }
 0x67f   : > { %4837 = vrot.lane.b32.xlu0 %v4743_v35, %s8330_s29  ;;  %v11281_v61 = vpop.permute.xlu1 %4595 }
 0x680   : > { %14140 = vst [vmem:[#allocation170_spill] sm:$0xff] %v11281_v61  ;;  %v14195_v61 = vld [vmem:[#allocation49_spill] sm:$0xff] }
 0x681   : > { %v11283_v39 = vpop.permute.xlu0 %4597  ;;  %4839 = vrot.lane.b32.xlu1 %v4744_v55, %s8330_s29 }
 0x682   : > { %14141 = vst [vmem:[#allocation36_spill] sm:$0xff] %v11283_v39 }
 0x683   : > { %v11286_v49 = vpop.permute.xlu1 %4599 }
 0x684   : > { %14142 = vst [vmem:[#allocation106_spill] sm:$0xff] %v11286_v49  ;;  %v8225_v49 = vld [vmem:[#allocation2 + $0x48] sm:$0xff] }
 0x685   : > { %v11288_v1 = vpop.permute.xlu0 %4601 }
 0x686   : > { %14143 = vst [vmem:[#allocation171_spill] sm:$0xff] %v11288_v1  ;;  %v14163_v1 = vld [vmem:[#allocation28_spill] sm:$0xff] }
 0x687   : > { %v11290_v18 = vpop.permute.xlu1 %4603 }
 0x688   : > { %14144 = vst [vmem:[#allocation6_spill] sm:$0xff] %v11290_v18 }
 0x689   : > { %v11292_v36 = vpop.permute.xlu0 %4605 }
 0x68a   : > { %14145 = vst [vmem:[#allocation146_spill] sm:$0xff] %v11292_v36 }
 0x68b   : > { %v11294_v59 = vpop.permute.xlu1 %4607 }
 0x68c   : > { %14146 = vst [vmem:[#allocation172_spill] sm:$0xff] %v11294_v59  ;;  %v3305_v59 = vld [vmem:[#allocation2] sm:$0xff] }
 0x68d   : > { %v11296_v48 = vpop.permute.xlu0 %4609 }
 0x68e   : > { %14147 = vst [vmem:[#allocation174_spill] sm:$0xff] %v11296_v48  ;;  %v3306_v48 = vld [vmem:[#allocation2 + $0x8] sm:$0xff] }
 0x68f   : > { %v11298_v6 = vpop.permute.xlu1 %4611 }
 0x690   : > { %14148 = vst [vmem:[#allocation69_spill] sm:$0xff] %v11298_v6  ;;  %v14158_v6 = vld [vmem:[#allocation5_spill] sm:$0xff] }
 0x691   : > { %v11300_v35 = vpop.permute.xlu0 %4613 }
 0x692   : > { %14149 = vst [vmem:[#allocation22_spill] sm:$0xff] %v11300_v35  ;;  %v3529_v35 = vadd.f32 %v14158_v6, %v3305_v59  ;;  %v14167_v59 = vld [vmem:[#allocation8_spill] sm:$0xff] }
 0x693   : > { %v11302_v9 = vpop.permute.xlu1 %4615 }
 0x694   : > { %14150 = vst [vmem:[#allocation10_spill] sm:$0xff] %v11302_v9  ;;  %v14159_v9 = vld [vmem:[#allocation14_spill] sm:$0xff]  ;;  %v3721_v6 = vadd.f32 %v14167_v59, %v3529_v35  ;;  %v14176_v35 = vld [vmem:[#allocation71_spill] sm:$0xff] }
 0x695   : > { %v11304_v24 = vpop.permute.xlu0 %4617  ;;  %v3532_v8 = vadd.f32 %v8222_v23, %v14159_v9  ;;  %v14168_v9 = vld [vmem:[#allocation47_spill] sm:$0xff] }
 0x696   : > { %14151 = vst [vmem:[#allocation33_spill] sm:$0xff] %v11304_v24  ;;  %v3535_v23 = vadd.f32 %v8225_v49, %v14168_v9  ;;  %v8228_v49 = vld [vmem:[#allocation2 + $0x30] sm:$0xff]  ;;  %v14178_v9 = vld [vmem:[#allocation18_spill] sm:$0xff] }
 0x697   : > { %v11306_v55 = vpop.permute.xlu1 %4619 }
 0x698   : > { %14152 = vst [vmem:[#allocation44_spill] sm:$0xff] %v11306_v55  ;;  %v14161_v55 = vld [vmem:[#allocation7_spill] sm:$0xff] }
 0x699   : > { %v11308_v58 = vpop.permute.xlu0 %4621  ;;  %v3530_v34 = vadd.f32 %v14161_v55, %v3306_v48  ;;  %v14170_v48 = vld [vmem:[#allocation20_spill] sm:$0xff] }
 0x69a   : > { %14153 = vst [vmem:[#allocation62_spill] sm:$0xff] %v11308_v58  ;;  %v8223_v58 = vld [vmem:[#allocation2 + $0x18] sm:$0xff] }
 0x69b   : > { %v11310_v46 = vpop.permute.xlu1 %4623  ;;  %v3722_v55 = vadd.f32 %v14170_v48, %v3530_v34  ;;  %v14179_v34 = vld [vmem:[#allocation59_spill] sm:$0xff] }
 0x69c   : > { %14154 = vst [vmem:[#allocation40_spill] sm:$0xff] %v11310_v46  ;;  %v3531_v46 = vadd.f32 %v8223_v58, %v14162_v33  ;;  %v14171_v33 = vld [vmem:[#allocation52_spill] sm:$0xff] }
 0x69d   : > { %v11312_v18 = vpop.permute.xlu0 %4625  ;;  %v3534_v58 = vadd.f32 %v8226_v37, %v14171_v33  ;;  %v14181_v33 = vld [vmem:[#allocation25_spill] sm:$0xff] }
 0x69e   : > { %14155 = vst [vmem:[#allocation45_spill] sm:$0xff] %v11312_v18  ;;  %v3724_v18 = vadd.f32 %v14163_v1, %v3532_v8  ;;  %v14172_v8 = vld [vmem:[#allocation60_spill] sm:$0xff] }
 0x69f   : > { %v11314_v36 = vpop.permute.xlu1 %4627  ;;  %v3726_v37 = vadd.f32 %v14180_v19, %v3534_v58  ;;  %v14190_v58 = vld [vmem:[#allocation17_spill] sm:$0xff] }
 0x6a0   : > { %14156 = vst [vmem:[#allocation122_spill] sm:$0xff] %v11314_v36  ;;  %v14165_v36 = vld [vmem:[#allocation32_spill] sm:$0xff] }
 0x6a1   : > { %v11316_v0 = vpop.permute.xlu0 %4629  ;;  %v3723_v27 = vadd.f32 %v14165_v36, %v3531_v46  ;;  %v14174_v46 = vld [vmem:[#allocation21_spill] sm:$0xff] }
 0x6a2   : > { %14157 = vst [vmem:[#allocation123_spill] sm:$0xff] %v11316_v0  ;;  %v14166_v0 = vld [vmem:[#allocation54_spill] sm:$0xff]  ;;  %v3916_v36 = vadd.f32 %v14174_v46, %v3724_v18 }
 0x6a3   : > { %v11320_v24 = vpop.permute.xlu1 %4631  ;;  %v3536_v26 = vadd.f32 %v8224_v54, %v14166_v0  ;;  %v3727_v54 = vadd.f32 %v14175_v40, %v3535_v23  ;;  %v8227_v0 = vld [vmem:[#allocation2 + $0x80] sm:$0xff]  ;;  %v3915_v48 = vadd.f32 %v14179_v34, %v3723_v27  ;;  %v14185_v40 = vld [vmem:[#allocation30_spill] sm:$0xff]  ;;  %v14189_v34 = vld [vmem:[#allocation24_spill] sm:$0xff] }
 0x6a4   : > { %14160 = vst [vmem:[#allocation66_spill] sm:$0xff] %v11320_v24  ;;  %v3540_v59 = vadd.f32 %v8227_v0, %v14176_v35  ;;  %v8229_v0 = vld [vmem:[#allocation2 + $0x60] sm:$0xff]  ;;  %v14186_v35 = vld [vmem:[#allocation38_spill] sm:$0xff] }
 0x6a5   : > { %v11325_v5 = vpop.permute.xlu0 %4633  ;;  %v3728_v1 = vadd.f32 %v14172_v8, %v3536_v26  ;;  %v14182_v8 = vld [vmem:[#allocation37_spill] sm:$0xff] }
 0x6a6   : > { %14164 = vst [vmem:[#allocation74_spill] sm:$0xff] %v11325_v5  ;;  %v14173_v5 = vld [vmem:[#allocation64_spill] sm:$0xff] }
 0x6a7   : > { %v11331_v24 = vpop.permute.xlu1 %4635  ;;  %v3913_v52 = vadd.f32 %v14173_v5, %v3721_v6  ;;  %v3914_v5 = vadd.f32 %v14182_v8, %v3722_v55  ;;  %v14183_v6 = vld [vmem:[#allocation176_spill] sm:$0xff] }
 0x6a8   : > { %14169 = vst [vmem:[#allocation149_spill] sm:$0xff] %v11331_v24  ;;  %v3533_v24 = vadd.f32 %v8228_v49, %v14178_v9  ;;  %v3732_v18 = vadd.f32 %v14183_v6, %v3540_v59  ;;  %v3538_v49 = vadd.f32 %v8230_v25, %v14187_v63  ;;  %v14188_v9 = vld [vmem:[#allocation42_spill] sm:$0xff]  ;;  %v14191_v55 = vld [vmem:[#allocation148_spill] sm:$0xff]  ;;  %v14197_v63 = vld [vmem:[#allocation9_spill] sm:$0xff] }
 0x6a9   : > { %v11340_v39 = vpop.permute.xlu0 %4637  ;;  %v4105_v26 = vadd.f32 %v14181_v33, %v3913_v52  ;;  %v3920_v27 = vadd.f32 %v14188_v9, %v3728_v1  ;;  %v4106_v19 = vadd.f32 %v14189_v34, %v3914_v5  ;;  %v3919_v52 = vadd.f32 %v14190_v58, %v3727_v54  ;;  %v8231_v33 = vld [vmem:[#allocation2 + $0x78] sm:$0xff]  ;;  %v14198_v1 = vld [vmem:[#allocation73_spill] sm:$0xff]  ;;  %v14199_v34 = vld [vmem:[#allocation147_spill] sm:$0xff] }
 0x6aa   : > { %14177 = vst [vmem:[#allocation175_spill] sm:$0xff] %v11340_v39  ;;  %v3725_v23 = vadd.f32 %v14185_v40, %v3533_v24  ;;  %v3537_v39 = vadd.f32 %v8229_v0, %v14186_v35  ;;  %v3539_v8 = vadd.f32 %v8231_v33, %v14191_v55  ;;  %v14192_v59 = vld [vmem:[#allocation12_spill] sm:$0xff]  ;;  %v14194_v24 = vld [vmem:[#allocation41_spill] sm:$0xff]  ;;  %v4107_v25 = vadd.f32 %v14197_v63, %v3915_v48  ;;  %v14200_v58 = vld [vmem:[#allocation79_spill] sm:$0xff] }
 0x6ab   : > { %v11348_v46 = vpop.permute.xlu1 %4639  ;;  %v4108_v6 = vadd.f32 %v14192_v59, %v3916_v36  ;;  %v3730_v40 = vadd.f32 %v14194_v24, %v3538_v49  ;;  %v14196_v35 = vld [vmem:[#allocation65_spill] sm:$0xff]  ;;  %v3918_v9 = vadd.f32 %v14198_v1, %v3726_v37  ;;  %v8232_v5 = vld [vmem:[#allocation2 + $0x98] sm:$0xff]  ;;  %v3924_v17 = vadd.f32 %v14200_v58, %v3732_v18  ;;  %v14205_v48 = vld [vmem:[#allocation55_spill] sm:$0xff] }
 0x6ac   : > { %14184 = vst [vmem:[#allocation107_spill] sm:$0xff] %v11348_v46  ;;  %v3917_v0 = vadd.f32 %v14195_v61, %v3725_v23  ;;  %v3729_v21 = vadd.f32 %v14196_v35, %v3537_v39  ;;  %v3542_v54 = vadd.f32 %v8232_v5, %v14199_v34  ;;  %v14201_v33 = vld [vmem:[#allocation96_spill] sm:$0xff]  ;;  %v4297_v61 = vadd.f32 %v11060_v4, %v4105_v26  ;;  %v8233_v35 = vld [vmem:[#allocation2 + $0x90] sm:$0xff]  ;;  %v14206_v63 = vld [vmem:[#allocation61_spill] sm:$0xff] }
 0x6ad   : > { %v11358_v46 = vpop.permute.xlu0 %4641  ;;  %v3731_v55 = vadd.f32 %v14201_v33, %v3539_v8  ;;  %v14202_v59 = vld [vmem:[#allocation68_spill] sm:$0xff]  ;;  %v4110_v37 = vadd.f32 %v14205_v48, %v3918_v9  ;;  %v3541_v1 = vadd.f32 %v8233_v35, %v14206_v63  ;;  %v14207_v5 = vld [vmem:[#allocation93_spill] sm:$0xff]  ;;  %v14208_v34 = vld [vmem:[#allocation51_spill] sm:$0xff]  ;;  %v4298_v4 = vadd.f32 %v11066_v16, %v4106_v19 }
 0x6ae   : > { %14193 = vst [vmem:[#allocation5_spill] sm:$0xff] %v11358_v46  ;;  %v4109_v46 = vadd.f32 %v14202_v59, %v3917_v0  ;;  %v14203_v49 = vld [vmem:[#allocation108_spill] sm:$0xff]  ;;  %v3734_v18 = vadd.f32 %v14207_v5, %v3542_v54  ;;  %v4111_v8 = vadd.f32 %v14208_v34, %v3919_v52  ;;  %v4489_v26 = vadd.f32 %v11163_v56, %v4297_v61  ;;  %v8234_v48 = vld [vmem:[#allocation2 + $0xb0] sm:$0xff]  ;;  %v14213_v35 = vld [vmem:[#allocation94_spill] sm:$0xff] }
 0x6af   : > { %v11368_v36 = vpop.permute.xlu1 %4643  ;;  %v3921_v24 = vadd.f32 %v14203_v49, %v3729_v21  ;;  %v14204_v39 = vld [vmem:[#allocation56_spill] sm:$0xff]  ;;  %v14210_v21 = vld [vmem:[#allocation115_spill] sm:$0xff]  ;;  %v14212_v49 = vld [vmem:[#allocation173_spill] sm:$0xff]  ;;  %v3544_v54 = vadd.f32 %v8234_v48, %v10780_v41  ;;  %v11392_v52 = vadd.f32 %v14213_v35, %v3924_v17  ;;  %v4490_v16 = vadd.f32 %v11168_v13, %v4298_v4 }
 0x6b0   : > { %v11374_v23 = vadd.f32 %v14204_v39, %v3920_v27  ;;  %v14209_v33 = vld [vmem:[#allocation124_spill] sm:$0xff]  ;;  %v3922_v59 = vadd.f32 %v14210_v21, %v3730_v40  ;;  %v14211_v27 = vld [vmem:[#allocation111_spill] sm:$0xff]  ;;  %v3923_v39 = vadd.f32 %v14212_v49, %v3731_v55  ;;  %v4299_v40 = vadd.f32 %v11068_v57, %v4107_v25  ;;  %v8235_v19 = vld [vmem:[#allocation2 + $0xc0] sm:$0xff] }
 0x6b1   : > { %v11380_v58 = vpop.permute.xlu0 %4645  ;;  %v11383_v0 = vadd.f32 %v14209_v33, %v3921_v24  ;;  %v3733_v9 = vadd.f32 %v14211_v27, %v3541_v1  ;;  %v4681_v56 = vadd.f32 %v11263_v28, %v4489_v26  ;;  %v3545_v55 = vadd.f32 %v8235_v19, %v10752_v53  ;;  %v8236_v61 = vld [vmem:[#allocation2 + $0xc8] sm:$0xff]  ;;  %v14214_v34 = vld [vmem:[#allocation117_spill] sm:$0xff] }
 0x6b2   : > { %v11397_v24 = vadd.f32 %v10748_v38, %v3922_v59  ;;  %v3546_v41 = vadd.f32 %v8236_v61, %v10756_v29  ;;  %v8237_v1 = vld [vmem:[#allocation2 + $0xa8] sm:$0xff]  ;;  %v3736_v5 = vadd.f32 %v10788_v10, %v3544_v54  ;;  %v11409_v38 = vld [vmem:[%s13498_s8] ss:$0 sm:$0xff]  ;;  %v4300_v13 = vadd.f32 %v11074_v20, %v4108_v6  ;;  %v8240_v54 = vld [vmem:[#allocation2 + $0xd8] sm:$0xff] }
 0x6b3   : > { %v11394_v63 = vpop.permute.xlu1 %4647  ;;  %v3543_v17 = vadd.f32 %v8237_v1, %v10768_v43  ;;  %v4491_v28 = vadd.f32 %v11170_v60, %v4299_v40  ;;  %v4682_v53 = vadd.f32 %v11267_v50, %v4490_v16  ;;  %v4301_v10 = vadd.f32 %v11076_v45, %v4109_v46  ;;  %v14215_v27 = vld [vmem:[#allocation125_spill] sm:$0xff]  ;;  %v14221_v1 = vld [vmem:[#allocation150_spill] sm:$0xff] }
 0x6b4   : > { %v11415_v29 = vadd.f32 %v10764_v42, %v3546_v41  ;;  %v11420_v33 = vadd.f32 %v14214_v34, %v3923_v39  ;;  %v4492_v59 = vadd.f32 %v11176_v32, %v4300_v13  ;;  %v11426_v50 = vadd.f32 %v10776_v15, %v3733_v9  ;;  %v8241_v41 = vld [vmem:[#allocation2 + $0xf0] sm:$0xff] }
 0x6b5   : > { %v4778_v57 = vpop.permute.xlu0 %4777  ;;  %v3735_v43 = vadd.f32 %v10792_v14, %v3543_v17  ;;  %v4683_v20 = vadd.f32 %v11269_v12, %v4491_v28  ;;  %v3737_v42 = vadd.f32 %v10784_v11, %v3545_v55  ;;  %v11430_v14 = vadd.f32 %v10772_v2, %v3736_v5  ;;  %v8238_v11 = vld [vmem:[#allocation2 + $0xe0] sm:$0xff]  ;;  %v14222_v5 = vld [vmem:[#allocation112_spill] sm:$0xff] }
 0x6b6   : > { %v4873_v25 = vadd.f32 %v4778_v57, %v4681_v56  ;;  %v4302_v45 = vadd.f32 %v11081_v3, %v4110_v37  ;;  %v4493_v4 = vadd.f32 %v11178_v22, %v4301_v10  ;;  %v4684_v32 = vadd.f32 %v11274_v47, %v4492_v59  ;;  %v14226_v10 = vld [vmem:[#allocation36_spill] sm:$0xff] }
 0x6b7   : > { %v4780_v21 = vpop.permute.xlu1 %4779  ;;  %v11438_v15 = vadd.f32 %v10796_v7, %v3734_v18  ;;  %v3548_v2 = vadd.f32 %v8238_v11, %v10832_v44  ;;  %v11442_v9 = vadd.f32 %v14215_v27, %v3735_v43  ;;  %v4303_v3 = vadd.f32 %v11083_v51, %v4111_v8  ;;  %v8239_v7 = vld [vmem:[#allocation2 + $0xf8] sm:$0xff]  ;;  %v14216_v18 = vld [vmem:[#allocation177_spill] sm:$0xff]  ;;  %v14217_v44 = vld [vmem:[#allocation126_spill] sm:$0xff] }
 0x6b8   : > { %v4912_v60 = vadd.f32 %v11409_v38, %v4873_v25  ;;  %v4874_v6 = vadd.f32 %v4780_v21, %v4682_v53  ;;  %v4494_v47 = vadd.f32 %v11183_v30, %v4302_v45  ;;  %v4685_v37 = vadd.f32 %v11276_v31, %v4493_v4  ;;  %v14218_v51 = vld [vmem:[#allocation187_spill] sm:$0xff]  ;;  %v14219_v30 = vld [vmem:[#allocation140_spill] sm:$0xff]  ;;  %v14220_v31 = vld [vmem:[#allocation170_spill] sm:$0xff] }
 0x6b9   : > { %v4782_v46 = vpop.permute.xlu0 %4781  ;;  %v3550_v48 = vadd.f32 %v8239_v7, %v14216_v18  ;;  %v3547_v35 = vadd.f32 %v8240_v54, %v14217_v44  ;;  %v3740_v40 = vadd.f32 %v10840_v62, %v3548_v2  ;;  %v4304_v8 = vadd.f32 %v14218_v51, %v11374_v23  ;;  %v14223_v62 = vld [vmem:[#allocation23_spill] sm:$0xff]  ;;  %v14224_v23 = vld [vmem:[#allocation89_spill] sm:$0xff]  ;;  %v14232_v2 = vld [vmem:[#allocation106_spill] sm:$0xff] }
 0x6ba   : > { %v4913_v12 = vadd.f32 %v11409_v38, %v4874_v6  ;;  %v4875_v26 = vadd.f32 %v4782_v46, %v4683_v20  ;;  %4976 = vrot.lane.b32.xlu0 %v4912_v60, %s8332_s26  ;;  %v4495_v56 = vadd.f32 %v14219_v30, %v4303_v3  ;;  %v4686_v19 = vadd.f32 %v14220_v31, %v4494_v47  ;;  %v14225_v25 = vld [vmem:[#allocation165_spill] sm:$0xff]  ;;  %v14227_v20 = vld [vmem:[#allocation151_spill] sm:$0xff]  ;;  %v14228_v6 = vld [vmem:[#allocation178_spill] sm:$0xff] }
 0x6bb   : > { %v4784_v22 = vpop.permute.xlu1 %4783  ;;  %v3549_v17 = vadd.f32 %v8241_v41, %v14221_v1  ;;  %v11460_v57 = vadd.f32 %v14222_v5, %v3550_v48  ;;  %v3739_v13 = vadd.f32 %v14223_v62, %v3547_v35  ;;  %v4305_v28 = vadd.f32 %v14224_v23, %v11383_v0  ;;  %v14229_v46 = vld [vmem:[#allocation84_spill] sm:$0xff]  ;;  %v14235_v7 = vld [vmem:[#allocation97_spill] sm:$0xff]  ;;  %v14237_v44 = vld [vmem:[#allocation110_spill] sm:$0xff] }
 0x6bc   : > { %v4914_v49 = vadd.f32 %v11409_v38, %v4875_v26  ;;  %v4876_v39 = vadd.f32 %v4784_v22, %v4684_v32  ;;  %4978 = vrot.lane.b32.xlu1 %v4913_v12, %s8332_s26  ;;  %v4496_v43 = vadd.f32 %v14225_v25, %v4304_v8  ;;  %v4687_v34 = vadd.f32 %v14226_v10, %v4495_v56  ;;  %v14230_v0 = vld [vmem:[#allocation136_spill] sm:$0xff]  ;;  %v14231_v26 = vld [vmem:[#allocation34_spill] sm:$0xff]  ;;  %v14240_v31 = vld [vmem:[#allocation179_spill] sm:$0xff] }
 0x6bd   : > { %v4786_v16 = vpop.permute.xlu0 %4785  ;;  %v11470_v60 = vadd.f32 %v14227_v20, %v3737_v42  ;;  %v3741_v45 = vadd.f32 %v14228_v6, %v3549_v17  ;;  %v11474_v4 = vadd.f32 %v14229_v46, %v3740_v40  ;;  %v4306_v32 = vadd.f32 %v14230_v0, %v11397_v24  ;;  %v14233_v42 = vld [vmem:[#allocation116_spill] sm:$0xff]  ;;  %v14236_v24 = vld [vmem:[#allocation27_spill] sm:$0xff]  ;;  %v14243_v17 = vld [vmem:[#allocation113_spill] sm:$0xff] }
 0x6be   : > { %v4915_v55 = vadd.f32 %v11409_v38, %v4876_v39  ;;  %v4877_v61 = vadd.f32 %v4786_v16, %v4685_v37  ;;  %4980 = vrot.lane.b32.xlu0 %v4914_v49, %s8332_s26  ;;  %v4497_v11 = vadd.f32 %v14231_v26, %v4305_v28  ;;  %v4688_v27 = vadd.f32 %v14232_v2, %v4496_v43  ;;  %v8242_v37 = vld [vmem:[#allocation2 + $0x128] sm:$0xff]  ;;  %v14234_v49 = vld [vmem:[#allocation127_spill] sm:$0xff]  ;;  %v14239_v30 = vld [vmem:[#allocation100_spill] sm:$0xff] }
 0x6bf   : > { %v4788_v53 = vpop.permute.xlu1 %4787  ;;  %v11484_v47 = vadd.f32 %v14233_v42, %v11415_v29  ;;  %v3554_v39 = vadd.f32 %v8242_v37, %v14234_v49  ;;  %v11488_v18 = vadd.f32 %v14235_v7, %v3739_v13  ;;  %v4307_v48 = vadd.f32 %v14236_v24, %v11420_v33  ;;  %v14238_v40 = vld [vmem:[#allocation171_spill] sm:$0xff]  ;;  %v8243_v29 = vld [vmem:[#allocation2 + $0x120] sm:$0xff]  ;;  %v14242_v33 = vld [vmem:[#allocation4_spill] sm:$0xff] }
 0x6c0   : > { %v4916_v21 = vadd.f32 %v11409_v38, %v4877_v61  ;;  %v4878_v59 = vadd.f32 %v4788_v53, %v4686_v19  ;;  %4982 = vrot.lane.b32.xlu1 %v4915_v55, %s8332_s26  ;;  %v4498_v35 = vadd.f32 %v14237_v44, %v4306_v32  ;;  %v4689_v51 = vadd.f32 %v14238_v40, %v4497_v11  ;;  %v14241_v55 = vld [vmem:[#allocation157_spill] sm:$0xff]  ;;  %v14244_v62 = vld [vmem:[#allocation6_spill] sm:$0xff]  ;;  %v14245_v25 = vld [vmem:[#allocation99_spill] sm:$0xff] }
 0x6c1   : > { %v4790_v12 = vpop.permute.xlu0 %4789  ;;  %v3553_v56 = vadd.f32 %v8243_v29, %v14239_v30  ;;  %v11498_v19 = vadd.f32 %v14240_v31, %v3554_v39  ;;  %v4117_v61 = vadd.f32 %v14241_v55, %v11426_v50  ;;  %v4308_v41 = vadd.f32 %v14242_v33, %v11392_v52  ;;  %v8244_v53 = vld [vmem:[#allocation2 + $0x108] sm:$0xff]  ;;  %v8245_v10 = vld [vmem:[#allocation2 + $0x110] sm:$0xff]  ;;  %v14247_v50 = vld [vmem:[#allocation184_spill] sm:$0xff] }
 0x6c2   : > { %v4917_v3 = vadd.f32 %v11409_v38, %v4878_v59  ;;  %v4879_v22 = vadd.f32 %v4790_v12, %v4687_v34  ;;  %4984 = vrot.lane.b32.xlu0 %v4916_v21, %s8332_s26  ;;  %v4499_v5 = vadd.f32 %v14243_v17, %v4307_v48  ;;  %v4690_v13 = vadd.f32 %v14244_v62, %v4498_v35  ;;  %v14246_v34 = vld [vmem:[#allocation128_spill] sm:$0xff]  ;;  %v14248_v52 = vld [vmem:[#allocation161_spill] sm:$0xff]  ;;  %v14249_v46 = vld [vmem:[#allocation98_spill] sm:$0xff] }
 0x6c3   : > { %v4792_v54 = vpop.permute.xlu1 %4791  ;;  %v3551_v43 = vadd.f32 %v8244_v53, %v14245_v25  ;;  %v3552_v21 = vadd.f32 %v8245_v10, %v14246_v34  ;;  %v4118_v59 = vadd.f32 %v14247_v50, %v11438_v15  ;;  %v4309_v20 = vadd.f32 %v14248_v52, %v4117_v61  ;;  %v14250_v32 = vld [vmem:[#allocation146_spill] sm:$0xff]  ;;  %v14251_v2 = vld [vmem:[#allocation120_spill] sm:$0xff]  ;;  %v14255_v7 = vld [vmem:[#allocation141_spill] sm:$0xff] }
 0x6c4   : > { %v4918_v8 = vadd.f32 %v11409_v38, %v4879_v22  ;;  %v4880_v16 = vadd.f32 %v4792_v54, %v4688_v27  ;;  %4986 = vrot.lane.b32.xlu1 %v4917_v3, %s8332_s26  ;;  %v4500_v0 = vadd.f32 %v14249_v46, %v4308_v41  ;;  %v4691_v12 = vadd.f32 %v14250_v32, %v4499_v5  ;;  %v14252_v3 = vld [vmem:[#allocation180_spill] sm:$0xff]  ;;  %v14257_v40 = vld [vmem:[#allocation153_spill] sm:$0xff]  ;;  %v14261_v55 = vld [vmem:[#allocation166_spill] sm:$0xff] }
 0x6c5   : > { %v4794_v1 = vpop.permute.xlu0 %4793  ;;  %v11518_v27 = vadd.f32 %v14251_v2, %v3741_v45  ;;  %v3744_v22 = vadd.f32 %v14252_v3, %v3552_v21  ;;  %v14253_v42 = vld [vmem:[#allocation76_spill] sm:$0xff]  ;;  %v4501_v24 = vadd.f32 %v14255_v7, %v4309_v20  ;;  %v3745_v45 = vadd.f32 %v14257_v40, %v3553_v56  ;;  %v14262_v33 = vld [vmem:[#allocation174_spill] sm:$0xff]  ;;  %v14264_v62 = vld [vmem:[#allocation133_spill] sm:$0xff] }
 0x6c6   : > { %v4919_v23 = vadd.f32 %v11409_v38, %v4880_v16  ;;  %v4881_v28 = vadd.f32 %v4794_v1, %v4689_v51  ;;  %4988 = vrot.lane.b32.xlu0 %v4918_v8, %s8332_s26  ;;  %v4119_v15 = vadd.f32 %v14253_v42, %v11442_v9  ;;  %v14254_v37 = vld [vmem:[#allocation188_spill] sm:$0xff]  ;;  %v14258_v51 = vld [vmem:[#allocation58_spill] sm:$0xff]  ;;  %v14259_v16 = vld [vmem:[#allocation75_spill] sm:$0xff] }
 0x6c7   : > { %v4796_v6 = vpop.permute.xlu1 %4795  ;;  %v4310_v49 = vadd.f32 %v14254_v37, %v4118_v59  ;;  %v14256_v48 = vld [vmem:[#allocation172_spill] sm:$0xff]  ;;  %v3743_v8 = vadd.f32 %v14258_v51, %v3551_v43  ;;  %v4120_v29 = vadd.f32 %v14259_v16, %v11430_v14  ;;  %v14260_v9 = vld [vmem:[#allocation78_spill] sm:$0xff]  ;;  %v4693_v41 = vadd.f32 %v14262_v33, %v4501_v24  ;;  %v14267_v43 = vld [vmem:[#allocation3_spill] sm:$0xff] }
 0x6c8   : > { %v4920_v26 = vadd.f32 %v11409_v38, %v4881_v28  ;;  %v4882_v11 = vadd.f32 %v4796_v6, %v4690_v13  ;;  %4990 = vrot.lane.b32.xlu1 %v4919_v23, %s8332_s26  ;;  %v4692_v54 = vadd.f32 %v14256_v48, %v4500_v0  ;;  %v4311_v30 = vadd.f32 %v14260_v9, %v4119_v15  ;;  %v14263_v5 = vld [vmem:[#allocation72_spill] sm:$0xff]  ;;  %v14265_v23 = vld [vmem:[#allocation101_spill] sm:$0xff]  ;;  %v14272_v32 = vld [vmem:[#allocation162_spill] sm:$0xff] }
 0x6c9   : > { %v4798_v39 = vpop.permute.xlu0 %4797  ;;  %v4502_v61 = vadd.f32 %v14261_v55, %v4310_v49  ;;  %v3934_v56 = vadd.f32 %v14263_v5, %v11460_v57  ;;  %v4121_v13 = vadd.f32 %v14264_v62, %v11470_v60  ;;  %v11542_v14 = vadd.f32 %v14265_v23, %v3744_v22  ;;  %v14266_v28 = vld [vmem:[#allocation137_spill] sm:$0xff]  ;;  %v8246_v52 = vld [vmem:[#allocation2 + $0x158] sm:$0xff]  ;;  %v14270_v60 = vld [vmem:[#allocation50_spill] sm:$0xff] }
 0x6ca   : > { %v4921_v44 = vadd.f32 %v11409_v38, %v4882_v11  ;;  %v4883_v35 = vadd.f32 %v4798_v39, %v4691_v12  ;;  %4992 = vrot.lane.b32.xlu0 %v4920_v26, %s8332_s26  ;;  %v4312_v53 = vadd.f32 %v14266_v28, %v4120_v29  ;;  %v4503_v10 = vadd.f32 %v14267_v43, %v4311_v30  ;;  %v14268_v34 = vld [vmem:[#allocation69_spill] sm:$0xff]  ;;  %v14271_v46 = vld [vmem:[#allocation152_spill] sm:$0xff]  ;;  %v14274_v3 = vld [vmem:[#allocation22_spill] sm:$0xff] }
 0x6cb   : > { %v4800_v31 = vpop.permute.xlu1 %4799  ;;  %v4694_v21 = vadd.f32 %v14268_v34, %v4502_v61  ;;  %v14269_v57 = vld [vmem:[#allocation129_spill] sm:$0xff]  ;;  %v4122_v6 = vadd.f32 %v14270_v60, %v11484_v47  ;;  %v3935_v0 = vadd.f32 %v14271_v46, %v3743_v8  ;;  %v4313_v12 = vadd.f32 %v14272_v32, %v4121_v13  ;;  %v14273_v11 = vld [vmem:[#allocation80_spill] sm:$0xff]  ;;  %v8247_v37 = vld [vmem:[#allocation2 + $0x150] sm:$0xff] }
 0x6cc   : > { %v4922_v1 = vadd.f32 %v11409_v38, %v4883_v35  ;;  %v4884_v17 = vadd.f32 %v4800_v31, %v4692_v54  ;;  %4994 = vrot.lane.b32.xlu1 %v4921_v44, %s8332_s26  ;;  %v3558_v20 = vadd.f32 %v8246_v52, %v14269_v57  ;;  %v4504_v2 = vadd.f32 %v14273_v11, %v4312_v53  ;;  %v14275_v49 = vld [vmem:[#allocation26_spill] sm:$0xff]  ;;  %v14276_v7 = vld [vmem:[#allocation181_spill] sm:$0xff]  ;;  %v8248_v30 = vld [vmem:[#allocation2 + $0x138] sm:$0xff] }
 0x6cd   : > { %v4802_v25 = vpop.permute.xlu0 %4801  ;;  %v4695_v22 = vadd.f32 %v14274_v3, %v4503_v10  ;;  %v11559_v39 = vadd.f32 %v8247_v37, %v14275_v49  ;;  %v14277_v24 = vld [vmem:[#allocation158_spill] sm:$0xff]  ;;  %v14278_v54 = vld [vmem:[#allocation189_spill] sm:$0xff]  ;;  %v14287_v10 = vld [vmem:[#allocation104_spill] sm:$0xff] }
 0x6ce   : > { %v4923_v50 = vadd.f32 %v11409_v38, %v4884_v17  ;;  %v4885_v59 = vadd.f32 %v4802_v25, %v4693_v41  ;;  %4996 = vrot.lane.b32.xlu0 %v4922_v1, %s8332_s26  ;;  %v11562_v47 = vadd.f32 %v14276_v7, %v3558_v20  ;;  %v4123_v48 = vadd.f32 %v14277_v24, %v11488_v18  ;;  %v14279_v40 = vld [vmem:[#allocation114_spill] sm:$0xff]  ;;  %v14281_v31 = vld [vmem:[#allocation53_spill] sm:$0xff] }
 0x6cf   : > { %v4804_v26 = vpop.permute.xlu1 %4803  ;;  %v4314_v44 = vadd.f32 %v14278_v54, %v4122_v6  ;;  %v4505_v51 = vadd.f32 %v14279_v40, %v4313_v12  ;;  %v14280_v8 = vld [vmem:[#allocation10_spill] sm:$0xff]  ;;  %v3555_v55 = vadd.f32 %v8248_v30, %v14281_v31  ;;  %v14283_v41 = vld [vmem:[#allocation185_spill] sm:$0xff]  ;;  %v14291_v6 = vld [vmem:[#allocation44_spill] sm:$0xff] }
 0x6d0   : > { %v4924_v42 = vadd.f32 %v11409_v38, %v4885_v59  ;;  %v4886_v15 = vadd.f32 %v4804_v26, %v4694_v21  ;;  %4998 = vrot.lane.b32.xlu1 %v4923_v50, %s8332_s26  ;;  %v4696_v16 = vadd.f32 %v14280_v8, %v4504_v2  ;;  %v14282_v61 = vld [vmem:[#allocation130_spill] sm:$0xff]  ;;  %v4124_v18 = vadd.f32 %v14283_v41, %v11474_v4  ;;  %v14286_v23 = vld [vmem:[#allocation33_spill] sm:$0xff] }
 0x6d1   : > { %v4806_v35 = vpop.permute.xlu0 %4805  ;;  %v3937_v33 = vadd.f32 %v14282_v61, %v3745_v45  ;;  %v14284_v1 = vld [vmem:[#allocation90_spill] sm:$0xff]  ;;  %v4697_v28 = vadd.f32 %v14286_v23, %v4505_v51  ;;  %v8249_v43 = vld [vmem:[#allocation2 + $0x140] sm:$0xff]  ;;  %v14298_v51 = vld [vmem:[#allocation19_spill] sm:$0xff] }
 0x6d2   : > { %v4925_v29 = vadd.f32 %v11409_v38, %v4886_v15  ;;  %v4887_v9 = vadd.f32 %v4806_v35, %v4695_v22  ;;  %5000 = vrot.lane.b32.xlu0 %v4924_v42, %s8332_s26  ;;  %v4315_v17 = vadd.f32 %v14284_v1, %v4123_v48  ;;  %v14285_v62 = vld [vmem:[#allocation142_spill] sm:$0xff]  ;;  %v3556_v34 = vadd.f32 %v8249_v43, %v14287_v10  ;;  %v14288_v45 = vld [vmem:[#allocation77_spill] sm:$0xff]  ;;  %v14294_v15 = vld [vmem:[#allocation167_spill] sm:$0xff] }
 0x6d3   : > { %v4808_v5 = vpop.permute.xlu1 %4807  ;;  %v4506_v13 = vadd.f32 %v14285_v62, %v4314_v44  ;;  %v4125_v21 = vadd.f32 %v14288_v45, %v11518_v27  ;;  %v14289_v50 = vld [vmem:[#allocation105_spill] sm:$0xff]  ;;  %v8160_v60 = vld [vmem:[%s13501_s11 + $0x8] ss:$0 sps:$4 sm:$0x33]   ;;  %v14292_v27 = vld [vmem:[#allocation83_spill] sm:$0xff] }
 0x6d4   : > { %v4926_v53 = vadd.f32 %v11409_v38, %v4887_v9  ;;  %v4888_v25 = vadd.f32 %v4808_v5, %v4696_v16  ;;  %5002 = vrot.lane.b32.xlu1 %v4925_v29, %s8332_s26  ;;  %v4316_v4 = vadd.f32 %v14289_v50, %v4124_v18  ;;  %v14290_v59 = vld [vmem:[#allocation85_spill] sm:$0xff]  ;;  %v4126_v26 = vadd.f32 %v14292_v27, %v3934_v56  ;;  %v14293_v11 = vld [vmem:[#allocation138_spill] sm:$0xff]  ;;  %v14297_v35 = vld [vmem:[#allocation163_spill] sm:$0xff] }
 0x6d5   : > { %v4507_v52 = vadd.f32 %v14290_v59, %v4315_v17  ;;  %v4810_v57 = vpop.permute.xlu0 %4809  ;;  %v8159_v20 = vld [vmem:[%s13501_s11] sm:$0xfc]   ;;  %v4698_v46 = vadd.f32 %v14291_v6, %v4506_v13  ;;  %v4317_v2 = vadd.f32 %v14293_v11, %v4125_v21  ;;  %v5395_v42 = vrot.slane %v8160_v60, 2  ;;  %v14295_v49 = vld [vmem:[#allocation62_spill] sm:$0xff]  ;;  %v14299_v29 = vld [vmem:[#allocation40_spill] sm:$0xff] }
 0x6d6   : > { %v4927_v32 = vadd.f32 %v11409_v38, %v4888_v25  ;;  %v4889_v12 = vadd.f32 %v4810_v57, %v4697_v28  ;;  %5004 = vrot.lane.b32.xlu0 %v4926_v53, %s8332_s26  ;;  %v5394_v22 = vrot.slane %v8159_v20, 2  ;;  %v4508_v37 = vadd.f32 %v14294_v15, %v4316_v4  ;;  %v14296_v54 = vld [vmem:[#allocation86_spill] sm:$0xff]  ;;  %v14301_v18 = vld [vmem:[#allocation63_spill] sm:$0xff]  ;;  %v14305_v53 = vld [vmem:[#allocation45_spill] sm:$0xff] }
 0x6d7   : > { %v4812_v3 = vpop.permute.xlu1 %4811  ;;  %v4699_v7 = vadd.f32 %v14295_v49, %v4507_v52  ;;  %v4127_v44 = vadd.f32 %v14296_v54, %v3935_v0  ;;  %v4318_v40 = vadd.f32 %v14297_v35, %v4126_v26  ;;  %v4509_v56 = vadd.f32 %v14298_v51, %v4317_v2  ;;  %v14300_v61 = vld [vmem:[#allocation182_spill] sm:$0xff]  ;;  %v14309_v4 = vld [vmem:[#allocation91_spill] sm:$0xff]  ;;  %v14320_v51 = vld [vmem:[#allocation88_spill] sm:$0xff] }
 0x6d8   : > { %v4928_v24 = vadd.f32 %v11409_v38, %v4889_v12  ;;  %v4890_v48 = vadd.f32 %v4812_v3, %v4698_v46  ;;  %5006 = vrot.lane.b32.xlu1 %v4927_v32, %s8332_s26  ;;  %v5396_v16 = vsel %vm5393_vm7, %v5394_v22, %v5395_v42  ;;  %v4700_v9 = vadd.f32 %v14299_v29, %v4508_v37  ;;  %v14302_v0 = vld [vmem:[#allocation134_spill] sm:$0xff]  ;;  %v14314_v11 = vld [vmem:[#allocation35_spill] sm:$0xff] }
 0x6d9   : > { %v4814_v8 = vpop.permute.xlu0 %4813  ;;  %7999 = vmatprep.subr.bf16.mxu0 %v5396_v16  ;;  %v3748_v41 = vadd.f32 %v14300_v61, %v3556_v34  ;;  %v3747_v1 = vadd.f32 %v14301_v18, %v3555_v55  ;;  %v4128_v17 = vadd.f32 %v14302_v0, %v11542_v14  ;;  %v14303_v5 = vld [vmem:[#allocation190_spill] sm:$0xff]  ;;  %v4701_v25 = vadd.f32 %v14305_v53, %v4509_v56  ;;  %v14306_v34 = vld [vmem:[#allocation155_spill] sm:$0xff] }
 0x6da   : > { %v4929_v30 = vadd.f32 %v11409_v38, %v4890_v48  ;;  %v4891_v31 = vadd.f32 %v4814_v8, %v4699_v7  ;;  %5008 = vrot.lane.b32.xlu0 %v4928_v24, %s8332_s26  ;;  %v4319_v62 = vadd.f32 %v14303_v5, %v4127_v44  ;;  %8000 = vmatpush3.bf16.msra.mxu0 %v5396_v16  ;;  %v14304_v23 = vld [vmem:[#allocation118_spill] sm:$0xff]  ;;  %v14307_v55 = vld [vmem:[#allocation67_spill] sm:$0xff]  ;;  %v14318_v48 = vld [vmem:[#allocation156_spill] sm:$0xff] }
 0x6db   : > { %v4816_v13 = vpop.permute.xlu1 %4815  ;;  %v4510_v28 = vadd.f32 %v14304_v23, %v4318_v40  ;;  %v3749_v45 = vadd.f32 %v14306_v34, %v11559_v39  ;;  %v3938_v21 = vadd.f32 %v14307_v55, %v11498_v19  ;;  %v14308_v14 = vld [vmem:[#allocation159_spill] sm:$0xff]  ;;  %v4320_v59 = vadd.f32 %v14309_v4, %v4128_v17  ;;  %v14310_v57 = vld [vmem:[#allocation102_spill] sm:$0xff]  ;;  %v14321_v8 = vld [vmem:[#allocation81_spill] sm:$0xff] }
 0x6dc   : > { %v4930_v43 = vadd.f32 %v11409_v38, %v4891_v31  ;;  %v4892_v10 = vadd.f32 %v4816_v13, %v4700_v9  ;;  %5010 = vrot.lane.b32.xlu1 %v4929_v30, %s8332_s26  ;;  %v4129_v50 = vadd.f32 %v14308_v14, %v3937_v33  ;;  %v4511_v20 = vadd.f32 %v14310_v57, %v4319_v62  ;;  %v14311_v60 = vld [vmem:[#allocation122_spill] sm:$0xff]  ;;  %v14315_v2 = vld [vmem:[#allocation119_spill] sm:$0xff]  ;;  %v14322_v9 = vld [vmem:[#allocation168_spill] sm:$0xff] }
 0x6dd   : > { %v4818_v52 = vpop.permute.xlu0 %4817  ;;  %v4702_v6 = vadd.f32 %v14311_v60, %v4510_v28  ;;  %v14312_v12 = vld [vmem:[#allocation186_spill] sm:$0xff]  ;;  %v3940_v19 = vadd.f32 %v14314_v11, %v3748_v41  ;;  %v14316_v22 = vld [vmem:[#allocation143_spill] sm:$0xff]  ;;  %v14330_v14 = vld [vmem:[#allocation132_spill] sm:$0xff] }
 0x6de   : > { %v4931_v46 = vadd.f32 %v11409_v38, %v4892_v10  ;;  %v4893_v32 = vadd.f32 %v4818_v52, %v4701_v25  ;;  %5012 = vrot.lane.b32.xlu0 %v4930_v43, %s8332_s26  ;;  %v4130_v27 = vadd.f32 %v14312_v12, %v3938_v21  ;;  %v14313_v39 = vld [vmem:[#allocation154_spill] sm:$0xff]  ;;  %v4321_v33 = vadd.f32 %v14315_v2, %v4129_v50  ;;  %v14317_v15 = vld [vmem:[#allocation123_spill] sm:$0xff]  ;;  %v14328_v25 = vld [vmem:[#allocation16_spill] sm:$0xff] }
 0x6df   : > { %v3939_v26 = vadd.f32 %v14313_v39, %v3747_v1  ;;  %v4820_v3 = vpop.permute.xlu1 %4819  ;;  %v4512_v42 = vadd.f32 %v14316_v22, %v4320_v59  ;;  %v4703_v37 = vadd.f32 %v14317_v15, %v4511_v20  ;;  %v8250_v24 = vld [vmem:[#allocation2 + $0x168] sm:$0xff]  ;;  %v8251_v44 = vld [vmem:[#allocation2 + $0x170] sm:$0xff]  ;;  %v14332_v59 = vld [vmem:[#allocation92_spill] sm:$0xff] }
 0x6e0   : > { %v4932_v49 = vadd.f32 %v11409_v38, %v4893_v32  ;;  %v4894_v7 = vadd.f32 %v4820_v3, %v4702_v6  ;;  %5014 = vrot.lane.b32.xlu1 %v4931_v46, %s8332_s26  ;;  %v3559_v54 = vadd.f32 %v8250_v24, %v14318_v48  ;;  %v14319_v35 = vld [vmem:[#allocation183_spill] sm:$0xff]  ;;  %v4322_v16 = vadd.f32 %v14321_v8, %v4130_v27  ;;  %v14323_v31 = vld [vmem:[#allocation66_spill] sm:$0xff]  ;;  %v14333_v57 = vld [vmem:[#allocation164_spill] sm:$0xff] }
 0x6e1   : > { %v3560_v40 = vadd.f32 %v8251_v44, %v14319_v35  ;;  %v4131_v56 = vadd.f32 %v14320_v51, %v3939_v26  ;;  %v4822_v29 = vpop.permute.xlu0 %4821  ;;  %v4513_v30 = vadd.f32 %v14322_v9, %v4321_v33  ;;  %v4704_v61 = vadd.f32 %v14323_v31, %v4512_v42  ;;  %v14324_v1 = vld [vmem:[#allocation70_spill] sm:$0xff]  ;;  %v14325_v17 = vld [vmem:[#allocation39_spill] sm:$0xff]  ;;  %v14335_v32 = vld [vmem:[#allocation149_spill] sm:$0xff] }
 0x6e2   : > { %v4933_v41 = vadd.f32 %v11409_v38, %v4894_v7  ;;  %v4895_v18 = vadd.f32 %v4822_v29, %v4703_v37  ;;  %5016 = vrot.lane.b32.xlu0 %v4932_v49, %s8332_s26  ;;  %v3941_v0 = vadd.f32 %v14324_v1, %v3749_v45  ;;  %v3751_v5 = vadd.f32 %v14325_v17, %v3559_v54  ;;  %v14326_v62 = vld [vmem:[#allocation87_spill] sm:$0xff]  ;;  %v14329_v10 = vld [vmem:[#allocation74_spill] sm:$0xff]  ;;  %v14331_v45 = vld [vmem:[#allocation57_spill] sm:$0xff] }
 0x6e3   : > { %v4132_v13 = vadd.f32 %v14326_v62, %v3940_v19  ;;  %v14327_v23 = vld [vmem:[#allocation139_spill] sm:$0xff]  ;;  %v4824_v53 = vpop.permute.xlu1 %4823  ;;  %v4514_v43 = vadd.f32 %v14328_v25, %v4322_v16  ;;  %v4705_v34 = vadd.f32 %v14329_v10, %v4513_v30  ;;  %v3752_v50 = vadd.f32 %v14330_v14, %v3560_v40  ;;  %v14337_v19 = vld [vmem:[#allocation46_spill] sm:$0xff]  ;;  %v14338_v33 = vld [vmem:[#allocation29_spill] sm:$0xff] }
 0x6e4   : > { %v4323_v28 = vadd.f32 %v14327_v23, %v4131_v56  ;;  %v4934_v55 = vadd.f32 %v11409_v38, %v4895_v18  ;;  %v4896_v21 = vadd.f32 %v4824_v53, %v4704_v61  ;;  %5018 = vrot.lane.b32.xlu1 %v4933_v41, %s8332_s26  ;;  %v3942_v4 = vadd.f32 %v14331_v45, %v11562_v47  ;;  %v14334_v6 = vld [vmem:[#allocation103_spill] sm:$0xff]  ;;  %v14339_v22 = vld [vmem:[#allocation121_spill] sm:$0xff]  ;;  %v14343_v35 = vld [vmem:[#allocation82_spill] sm:$0xff] }
 0x6e5   : > { %v4133_v52 = vadd.f32 %v14332_v59, %v3941_v0  ;;  %v4324_v20 = vadd.f32 %v14333_v57, %v4132_v13  ;;  %v4826_v60 = vpop.permute.xlu0 %4825  ;;  %v4706_v12 = vadd.f32 %v14335_v32, %v4514_v43  ;;  %v14336_v26 = vld [vmem:[#allocation11_spill] sm:$0xff]  ;;  %v3943_v2 = vadd.f32 %v14337_v19, %v3751_v5  ;;  %v14344_v56 = vld [vmem:[#allocation144_spill] sm:$0xff]  ;;  %v14348_v0 = vld [vmem:[#allocation169_spill] sm:$0xff] }
 0x6e6   : > { %v4515_v46 = vadd.f32 %v14334_v6, %v4323_v28  ;;  %v4935_v27 = vadd.f32 %v11409_v38, %v4896_v21  ;;  %v4897_v39 = vadd.f32 %v4826_v60, %v4705_v34  ;;  %5020 = vrot.lane.b32.xlu0 %v4934_v55, %s8332_s26  ;;  %v4134_v11 = vadd.f32 %v14336_v26, %v3942_v4  ;;  %v14340_v15 = vld [vmem:[#allocation175_spill] sm:$0xff]  ;;  %v14346_v31 = vld [vmem:[#allocation160_spill] sm:$0xff]  ;;  %v14349_v5 = vld [vmem:[#allocation5_spill] sm:$0xff] }
 0x6e7   : > { %v4325_v47 = vadd.f32 %v14338_v33, %v4133_v52  ;;  %v4828_v3 = vpop.permute.xlu1 %4827  ;;  %v4516_v42 = vadd.f32 %v14339_v22, %v4324_v20  ;;  %v14341_v24 = vld [vmem:[#allocation135_spill] sm:$0xff]  ;;  %v14350_v28 = vld [vmem:[#allocation109_spill] sm:$0xff]  ;;  %v8253_v26 = vld [vmem:[%s8439_s17 + $0x18] sm:$0xff] }
 0x6e8   : > { %v4707_v37 = vadd.f32 %v14340_v15, %v4515_v46  ;;  %v4936_v49 = vadd.f32 %v11409_v38, %v4897_v39  ;;  %v4898_v7 = vadd.f32 %v4828_v3, %v4706_v12  ;;  %5022 = vrot.lane.b32.xlu1 %v4935_v27, %s8332_s26  ;;  %v4135_v48 = vadd.f32 %v14341_v24, %v3943_v2  ;;  %v14342_v54 = vld [vmem:[#allocation131_spill] sm:$0xff]  ;;  %v11704_v12 = vld [vmem:[%s13499_s9] ss:$0 sm:$0xff]  ;;  %v8255_v3 = vld [vmem:[%s8439_s17 + $0x8] sm:$0xff] }
 0x6e9   : > { %v3944_v44 = vadd.f32 %v14342_v54, %v3752_v50  ;;  %v4326_v40 = vadd.f32 %v14343_v35, %v4134_v11  ;;  %v4830_v51 = vpop.permute.xlu0 %4829  ;;  %v4517_v8 = vadd.f32 %v14344_v56, %v4325_v47  ;;  %v14345_v16 = vld [vmem:[#allocation107_spill] sm:$0xff]  ;;  %v14352_v50 = vld [vmem:[#allocation145_spill] sm:$0xff]  ;;  %v5116_v11 = vmul.f32 %v8253_v26, %v11704_v12 }
 0x6ea   : > { %v4708_v29 = vadd.f32 %v14345_v16, %v4516_v42  ;;  %v4937_v9 = vadd.f32 %v11409_v38, %v4898_v7  ;;  %v4899_v30 = vadd.f32 %v4830_v51, %v4707_v37  ;;  %5024 = vrot.lane.b32.xlu0 %v4936_v49, %s8332_s26  ;;  %v14347_v41 = vld [vmem:[#allocation95_spill] sm:$0xff]  ;;  %v11710_v27 = vld [vmem:[%s13500_s10] ss:$0 sm:$0xff]  ;;  %v5114_v22 = vmul.f32 %v8255_v3, %v11704_v12 }
 0x6eb   : > { %v4136_v61 = vadd.f32 %v14346_v31, %v3944_v44  ;;  %v4327_v18 = vadd.f32 %v14347_v41, %v4135_v48  ;;  %v4832_v1 = vpop.permute.xlu1 %4831  ;;  %v4518_v17 = vadd.f32 %v14348_v0, %v4326_v40  ;;  %v4709_v62 = vadd.f32 %v14349_v5, %v4517_v8  ;;  %v14351_v43 = vld [vmem:[#allocation31_spill] sm:$0xff]  ;;  %v8254_v33 = vld [vmem:[%s8439_s17] sm:$0xff]  ;;  %v8257_v5 = vld [vmem:[%s8439_s17 + $0x88] sm:$0xff] }
 0x6ec   : > { %v4938_v13 = vadd.f32 %v11409_v38, %v4899_v30  ;;  %v4900_v23 = vadd.f32 %v4832_v1, %v4708_v29  ;;  %5026 = vrot.lane.b32.xlu1 %v4937_v9, %s8332_s26  ;;  %v5154_v2 = vadd.f32 %v11710_v27, %v5116_v11  ;;  %v5113_v47 = vmul.f32 %v8254_v33, %v11704_v12  ;;  %v8256_v0 = vld [vmem:[%s8439_s17 + $0x80] sm:$0xff] }
 0x6ed   : > { %v4328_v53 = vadd.f32 %v14350_v28, %v4136_v61  ;;  %v4834_v25 = vpop.permute.xlu0 %4833  ;;  %v4519_v10 = vadd.f32 %v14351_v43, %v4327_v18  ;;  %v4710_v34 = vadd.f32 %v11368_v36, %v4518_v17  ;;  %v5152_v24 = vadd.f32 %v11710_v27, %v5114_v22 }
 0x6ee   : > { %v4939_v55 = vadd.f32 %v11409_v38, %v4900_v23  ;;  %v4901_v21 = vadd.f32 %v4834_v25, %v4709_v62  ;;  %5028 = vrot.lane.b32.xlu0 %v4938_v13, %s8332_s26  ;;  %v5186_v15 = vmax.f32 %v5154_v2, 0.0  ;;  %v5151_v7 = vadd.f32 %v11710_v27, %v5113_v47 }
 0x6ef   : > { %v4836_v14 = vpop.permute.xlu1 %4835  ;;  %v4520_v45 = vadd.f32 %v14352_v50, %v4328_v53  ;;  %v4711_v4 = vadd.f32 %v11380_v58, %v4519_v10  ;;  %v11695_v58 = vld [vmem:[%s13501_s11] sm:$0x3]  ;;  %v5184_v35 = vmax.f32 %v5152_v24, 0.0  ;;  %v5129_v17 = vmul.f32 %v8256_v0, %v11704_v12 }
 0x6f0   : > { %v4940_v59 = vadd.f32 %v11409_v38, %v4901_v21  ;;  %v4902_v52 = vadd.f32 %v4836_v14, %v4710_v34  ;;  %5030 = vrot.lane.b32.xlu1 %v4939_v55, %s8332_s26  ;;  %8137 = vmatprep.subr.msk.bf16.mxu0 %vm693_vm0, %v11695_v58  ;;  %v5183_v44 = vmax.f32 %v5151_v7, 0.0  ;;  %v5130_v62 = vmul.f32 %v8257_v5, %v11704_v12 }
 0x6f1   : > { %v4838_v57 = vpop.permute.xlu0 %4837  ;;  %v4712_v20 = vadd.f32 %v11394_v63, %v4520_v45  ;;  %v5167_v53 = vadd.f32 %v11710_v27, %v5129_v17 }
 0x6f2   : > { %v4941_v36 = vadd.f32 %v11409_v38, %v4902_v52  ;;  %v4903_v60 = vadd.f32 %v4838_v57, %v4711_v4  ;;  %5032 = vrot.lane.b32.xlu0 %v4940_v59, %s8332_s26  ;;  %v11736_v51 = vpack.c.bf16 %v5184_v35, %v5183_v44  ;;  %v5168_v25 = vadd.f32 %v11710_v27, %v5130_v62 }
 0x6f3   : > { %v4840_v6 = vpop.permute.xlu1 %4839  ;;  %v5199_v10 = vmax.f32 %v5167_v53, 0.0  ;;  %v5657_v62 = vsel %vm693_vm0, %v11695_v58, 0 }
 0x6f4   : > { %v4942_v46 = vadd.f32 %v11409_v38, %v4903_v60  ;;  %v4904_v32 = vadd.f32 %v4840_v6, %v4712_v20  ;;  %5034 = vrot.lane.b32.xlu1 %v4941_v36, %s8332_s26  ;;  %v5200_v34 = vmax.f32 %v5168_v25, 0.0 }
 0x6f6   : > { %v4943_v63 = vadd.f32 %v11409_v38, %v4904_v32  ;;  %5036 = vrot.lane.b32.xlu0 %v4942_v46, %s8332_s26  ;;  %v8252_v38 = vld [vmem:[%s8439_s17 + $0x10] sm:$0xff]  ;;  %v11776_v21 = vpack.c.bf16 %v5200_v34, %v5199_v10 }
 0x6f7   : > { %v5115_v39 = vmul.f32 %v8252_v38, %v11704_v12 }
 0x6f8   : > { %5038 = vrot.lane.b32.xlu1 %v4943_v63, %s8332_s26 }
 0x6f9   : > { %v5153_v19 = vadd.f32 %v11710_v27, %v5115_v39 }
 0x6fa   : > { %5264 = vrot.lane.b32.xlu0 %v11704_v12, %s14353_s14 }
 0x6fb   : > { %v5185_v42 = vmax.f32 %v5153_v19, 0.0 }
 0x6fc   : > { %5299 = vrot.lane.b32.xlu1 %v11710_v27, %s14353_s14 }
 0x6fd   : > { %v11732_v48 = vpack.c.bf16 %v5186_v15, %v5185_v42 }
 0x72c   : > { %v4977_v37 = vpop.permute.xlu0 %4976 }
 0x72d   : > { %5073 = vst.msk [vmem:[%s9757_s15] sm:$0xff] %vm5072_vm8, %v4977_v37 }
 0x72e   : > { %v4979_v49 = vpop.permute.xlu1 %4978 }
 0x72f   : > { %5074 = vst.msk [vmem:[%s9757_s15 + $0x8] sm:$0xff] %vm5072_vm8, %v4979_v49 }
 0x730   : > { %v4981_v54 = vpop.permute.xlu0 %4980 }
 0x731   : > { %5075 = vst.msk [vmem:[%s9757_s15 + $0x10] sm:$0xff] %vm5072_vm8, %v4981_v54 }
 0x732   : > { %v4983_v40 = vpop.permute.xlu1 %4982 }
 0x733   : > { %5076 = vst.msk [vmem:[%s9757_s15 + $0x18] sm:$0xff] %vm5072_vm8, %v4983_v40 }
 0x734   : > { %v4985_v56 = vpop.permute.xlu0 %4984  ;;  %v5232_v32 = vld [vmem:[%s9757_s15] sm:$0xff] }
 0x735   : > { %5077 = vst.msk [vmem:[%s9757_s15 + $0x20] sm:$0xff] %vm5072_vm8, %v4985_v56 }
 0x736   : > { %v4987_v8 = vpop.permute.xlu1 %4986  ;;  %v5233_v38 = vld [vmem:[%s9757_s15 + $0x8] sm:$0xff] }
 0x737   : > { %5078 = vst.msk [vmem:[%s9757_s15 + $0x28] sm:$0xff] %vm5072_vm8, %v4987_v8 }
 0x738   : > { %v4989_v16 = vpop.permute.xlu0 %4988  ;;  %v5234_v39 = vld [vmem:[%s9757_s15 + $0x10] sm:$0xff] }
 0x739   : > { %5079 = vst.msk [vmem:[%s9757_s15 + $0x30] sm:$0xff] %vm5072_vm8, %v4989_v16 }
 0x73a   : > { %v4991_v29 = vpop.permute.xlu1 %4990  ;;  %v5235_v26 = vld [vmem:[%s9757_s15 + $0x18] sm:$0xff] }
 0x73b   : > { %5080 = vst.msk [vmem:[%s9757_s15 + $0x38] sm:$0xff] %vm5072_vm8, %v4991_v29 }
 0x73c   : > { %v4993_v9 = vpop.permute.xlu0 %4992  ;;  %v5236_v47 = vld [vmem:[%s9757_s15 + $0x20] sm:$0xff] }
 0x73d   : > { %5081 = vst.msk [vmem:[%s9757_s15 + $0x40] sm:$0xff] %vm5072_vm8, %v4993_v9 }
 0x73e   : > { %v4995_v30 = vpop.permute.xlu1 %4994  ;;  %v5237_v3 = vld [vmem:[%s9757_s15 + $0x28] sm:$0xff] }
 0x73f   : > { %5082 = vst.msk [vmem:[%s9757_s15 + $0x48] sm:$0xff] %vm5072_vm8, %v4995_v30 }
 0x740   : > { %v4997_v31 = vpop.permute.xlu0 %4996  ;;  %v5238_v54 = vld [vmem:[%s9757_s15 + $0x30] sm:$0xff] }
 0x741   : > { %5083 = vst.msk [vmem:[%s9757_s15 + $0x50] sm:$0xff] %vm5072_vm8, %v4997_v31 }
 0x742   : > { %v4999_v61 = vpop.permute.xlu1 %4998  ;;  %v5239_v44 = vld [vmem:[%s9757_s15 + $0x38] sm:$0xff] }
 0x743   : > { %5084 = vst.msk [vmem:[%s9757_s15 + $0x58] sm:$0xff] %vm5072_vm8, %v4999_v61 }
 0x744   : > { %v5001_v41 = vpop.permute.xlu0 %5000 }
 0x745   : > { %5085 = vst.msk [vmem:[%s9757_s15 + $0x60] sm:$0xff] %vm5072_vm8, %v5001_v41  ;;  %v5240_v41 = vld [vmem:[%s9757_s15 + $0x40] sm:$0xff] }
 0x746   : > { %v5003_v18 = vpop.permute.xlu1 %5002 }
 0x747   : > { %5086 = vst.msk [vmem:[%s9757_s15 + $0x68] sm:$0xff] %vm5072_vm8, %v5003_v18  ;;  %v5241_v18 = vld [vmem:[%s9757_s15 + $0x48] sm:$0xff] }
 0x748   : > { %v5005_v1 = vpop.permute.xlu0 %5004 }
 0x749   : > { %5087 = vst.msk [vmem:[%s9757_s15 + $0x70] sm:$0xff] %vm5072_vm8, %v5005_v1 }
 0x74a   : > { %v5007_v13 = vpop.permute.xlu1 %5006  ;;  %v5243_v58 = vld [vmem:[%s9757_s15 + $0x58] sm:$0xff] }
 0x74b   : > { %5088 = vst.msk [vmem:[%s9757_s15 + $0x78] sm:$0xff] %vm5072_vm8, %v5007_v13 }
 0x74c   : > { %v5009_v23 = vpop.permute.xlu0 %5008 }
 0x74d   : > { %5089 = vst.msk [vmem:[%s9757_s15 + $0x80] sm:$0xff] %vm5072_vm8, %v5009_v23 }
 0x74e   : > { %v5011_v28 = vpop.permute.xlu1 %5010 }
 0x74f   : > { %5090 = vst.msk [vmem:[%s9757_s15 + $0x88] sm:$0xff] %vm5072_vm8, %v5011_v28 }
 0x750   : > { %v5013_v43 = vpop.permute.xlu0 %5012 }
 0x751   : > { %5091 = vst.msk [vmem:[%s9757_s15 + $0x90] sm:$0xff] %vm5072_vm8, %v5013_v43  ;;  %v5242_v43 = vld [vmem:[%s9757_s15 + $0x50] sm:$0xff] }
 0x752   : > { %v5015_v55 = vpop.permute.xlu1 %5014 }
 0x753   : > { %5092 = vst.msk [vmem:[%s9757_s15 + $0x98] sm:$0xff] %vm5072_vm8, %v5015_v55 }
 0x754   : > { %v5017_v14 = vpop.permute.xlu0 %5016 }
 0x755   : > { %5093 = vst.msk [vmem:[%s9757_s15 + $0xa0] sm:$0xff] %vm5072_vm8, %v5017_v14 }
 0x756   : > { %v5019_v50 = vpop.permute.xlu1 %5018 }
 0x757   : > { %5094 = vst.msk [vmem:[%s9757_s15 + $0xa8] sm:$0xff] %vm5072_vm8, %v5019_v50  ;;  %v5244_v50 = vld [vmem:[%s9757_s15 + $0x60] sm:$0xff] }
 0x758   : > { %v5021_v45 = vpop.permute.xlu0 %5020 }
 0x759   : > { %5095 = vst.msk [vmem:[%s9757_s15 + $0xb0] sm:$0xff] %vm5072_vm8, %v5021_v45  ;;  %v5245_v45 = vld [vmem:[%s9757_s15 + $0x68] sm:$0xff] }
 0x75a   : > { %v5023_v4 = vpop.permute.xlu1 %5022 }
 0x75b   : > { %5096 = vst.msk [vmem:[%s9757_s15 + $0xb8] sm:$0xff] %vm5072_vm8, %v5023_v4 }
 0x75c   : > { %v5025_v59 = vpop.permute.xlu0 %5024 }
 0x75d   : > { %5097 = vst.msk [vmem:[%s9757_s15 + $0xc0] sm:$0xff] %vm5072_vm8, %v5025_v59 }
 0x75e   : > { %v5027_v52 = vpop.permute.xlu1 %5026 }
 0x75f   : > { %5098 = vst.msk [vmem:[%s9757_s15 + $0xc8] sm:$0xff] %vm5072_vm8, %v5027_v52 }
 0x760   : > { %v5029_v57 = vpop.permute.xlu0 %5028 }
 0x761   : > { %5099 = vst.msk [vmem:[%s9757_s15 + $0xd0] sm:$0xff] %vm5072_vm8, %v5029_v57 }
 0x762   : > { %v5031_v20 = vpop.permute.xlu1 %5030 }
 0x763   : > { %5100 = vst.msk [vmem:[%s9757_s15 + $0xd8] sm:$0xff] %vm5072_vm8, %v5031_v20 }
 0x764   : > { %v5033_v36 = vpop.permute.xlu0 %5032 }
 0x765   : > { %5101 = vst.msk [vmem:[%s9757_s15 + $0xe0] sm:$0xff] %vm5072_vm8, %v5033_v36 }
 0x766   : > { %v5035_v60 = vpop.permute.xlu1 %5034 }
 0x767   : > { %5102 = vst.msk [vmem:[%s9757_s15 + $0xe8] sm:$0xff] %vm5072_vm8, %v5035_v60 }
 0x768   : > { %v5037_v6 = vpop.permute.xlu0 %5036 }
 0x769   : > { %5103 = vst.msk [vmem:[%s9757_s15 + $0xf0] sm:$0xff] %vm5072_vm8, %v5037_v6 }
 0x76a   : > { %v5039_v46 = vpop.permute.xlu1 %5038 }
 0x76b   : > { %5104 = vst.msk [vmem:[%s9757_s15 + $0xf8] sm:$0xff] %vm5072_vm8, %v5039_v46 }
 0x76c   : > { %v11805_v63 = vpop.permute.xlu0 %5264 }
 0x76d   : > { %v5267_v11 = vmul.f32 %v11805_v63, %v5232_v32  ;;  %v5268_v19 = vmul.f32 %v11805_v63, %v5233_v38  ;;  %v5269_v2 = vmul.f32 %v11805_v63, %v5234_v39  ;;  %v5270_v33 = vmul.f32 %v11805_v63, %v5235_v26  ;;  %v5246_v38 = vld [vmem:[%s9757_s15 + $0x70] sm:$0xff]  ;;  %v5247_v39 = vld [vmem:[%s9757_s15 + $0x78] sm:$0xff] }
 0x76e   : > { %v11816_v22 = vpop.permute.xlu1 %5299  ;;  %v5271_v42 = vmul.f32 %v11805_v63, %v5236_v47  ;;  %v5272_v15 = vmul.f32 %v11805_v63, %v5237_v3  ;;  %v5273_v56 = vmul.f32 %v11805_v63, %v5238_v54  ;;  %v5274_v8 = vmul.f32 %v11805_v63, %v5239_v44  ;;  %v5249_v47 = vld [vmem:[%s9757_s15 + $0x88] sm:$0xff] }
 0x76f   : > { %v5302_v37 = vadd.f32 %v11816_v22, %v5267_v11  ;;  %v5303_v49 = vadd.f32 %v11816_v22, %v5268_v19  ;;  %v5304_v7 = vadd.f32 %v11816_v22, %v5269_v2  ;;  %v5305_v24 = vadd.f32 %v11816_v22, %v5270_v33  ;;  %v5248_v33 = vld [vmem:[%s9757_s15 + $0x80] sm:$0xff] }
 0x770   : > { %v5306_v35 = vadd.f32 %v11816_v22, %v5271_v42  ;;  %v5307_v40 = vadd.f32 %v11816_v22, %v5272_v15  ;;  %v5275_v17 = vmul.f32 %v11805_v63, %v5240_v41  ;;  %v5276_v5 = vmul.f32 %v11805_v63, %v5241_v18 }
 0x771   : > { %v5334_v16 = vmax.f32 %v5302_v37, 0.0  ;;  %v5335_v29 = vmax.f32 %v5303_v49, 0.0  ;;  %v5336_v9 = vmax.f32 %v5304_v7, 0.0  ;;  %v5337_v30 = vmax.f32 %v5305_v24, 0.0 }
 0x772   : > { %v5338_v31 = vmax.f32 %v5306_v35, 0.0  ;;  %v5339_v61 = vmax.f32 %v5307_v40, 0.0  ;;  %v5308_v13 = vadd.f32 %v11816_v22, %v5273_v56  ;;  %v5309_v23 = vadd.f32 %v11816_v22, %v5274_v8  ;;  %v5250_v40 = vld [vmem:[%s9757_s15 + $0x90] sm:$0xff]  ;;  %v5251_v56 = vld [vmem:[%s9757_s15 + $0x98] sm:$0xff] }
 0x773   : > { %v5366_v1 = vpack.c.bf16 %v5335_v29, %v5334_v16  ;;  %v5367_v0 = vpack.c.bf16 %v5337_v30, %v5336_v9  ;;  %v5310_v53 = vadd.f32 %v11816_v22, %v5275_v17  ;;  %v5311_v25 = vadd.f32 %v11816_v22, %v5276_v5  ;;  %v5252_v30 = vld [vmem:[%s9757_s15 + $0xa0] sm:$0xff] }
 0x774   : > { %v5368_v28 = vpack.c.bf16 %v5339_v61, %v5338_v31  ;;  %v5340_v10 = vmax.f32 %v5308_v13, 0.0  ;;  %v5341_v34 = vmax.f32 %v5309_v23, 0.0  ;;  %v5277_v55 = vmul.f32 %v11805_v63, %v5242_v43  ;;  %v5253_v31 = vld [vmem:[%s9757_s15 + $0xa8] sm:$0xff] }
 0x775   : > { %8001 = vmatprep.mubr.msk.bf16.mxu0 %vm5398_vm9, %v5366_v1  ;;  %v5278_v14 = vmul.f32 %v11805_v63, %v5243_v58  ;;  %v5342_v4 = vmax.f32 %v5310_v53, 0.0  ;;  %v5343_v59 = vmax.f32 %v5311_v25, 0.0  ;;  %v5279_v52 = vmul.f32 %v11805_v63, %v5244_v50  ;;  %v5255_v53 = vld [vmem:[%s9757_s15 + $0xb8] sm:$0xff] }
 0x776   : > { %8002 = vmatmul.mubr.msk.bf16.vlgmr.msra.gmra.mrb[16].mxu0 %vm5398_vm9, %v5367_v0  ;;  %v5280_v57 = vmul.f32 %v11805_v63, %v5245_v45  ;;  %v5369_v20 = vpack.c.bf16 %v5341_v34, %v5340_v10  ;;  %v5312_v36 = vadd.f32 %v11816_v22, %v5277_v55  ;;  %v5281_v19 = vmul.f32 %v11805_v63, %v5246_v38  ;;  %v5256_v34 = vld [vmem:[%s9757_s15 + $0xc0] sm:$0xff]  ;;  %v5257_v55 = vld [vmem:[%s9757_s15 + $0xc8] sm:$0xff] }
 0x777   : > { %8034 = vmatpush3.bf16.msra.mxu0 %v5657_v62  ;;  %8005 = vmatprep.mubr.msk.bf16.mxu0 %vm5398_vm9, %v5368_v28  ;;  %v5313_v60 = vadd.f32 %v11816_v22, %v5278_v14  ;;  %v5370_v6 = vpack.c.bf16 %v5343_v59, %v5342_v4  ;;  %v5314_v46 = vadd.f32 %v11816_v22, %v5279_v52  ;;  %v5254_v28 = vld [vmem:[%s9757_s15 + $0xb0] sm:$0xff] }
 0x778   : > { %v5315_v32 = vadd.f32 %v11816_v22, %v5280_v57  ;;  %v5344_v26 = vmax.f32 %v5312_v36, 0.0  ;;  %v5282_v2 = vmul.f32 %v11805_v63, %v5247_v39  ;;  %v5283_v15 = vmul.f32 %v11805_v63, %v5248_v33 }
 0x779   : > { %v5345_v11 = vmax.f32 %v5313_v60, 0.0  ;;  %v5346_v3 = vmax.f32 %v5314_v46, 0.0  ;;  %v5284_v37 = vmul.f32 %v11805_v63, %v5249_v47  ;;  %v5316_v7 = vadd.f32 %v11816_v22, %v5281_v19  ;;  %v5258_v46 = vld [vmem:[%s9757_s15 + $0xd0] sm:$0xff]  ;;  %v5260_v19 = vld [vmem:[%s9757_s15 + $0xe0] sm:$0xff] }
 0x77a   : > { %v5347_v42 = vmax.f32 %v5315_v32, 0.0  ;;  %v5317_v24 = vadd.f32 %v11816_v22, %v5282_v2  ;;  %v5318_v44 = vadd.f32 %v11816_v22, %v5283_v15  ;;  %v5285_v29 = vmul.f32 %v11805_v63, %v5250_v40  ;;  %v5259_v32 = vld [vmem:[%s9757_s15 + $0xd8] sm:$0xff] }
 0x77b   : > { %v5371_v49 = vpack.c.bf16 %v5345_v11, %v5344_v26  ;;  %v5319_v35 = vadd.f32 %v11816_v22, %v5284_v37  ;;  %v5348_v8 = vmax.f32 %v5316_v7, 0.0  ;;  %v5286_v9 = vmul.f32 %v11805_v63, %v5251_v56 }
 0x77c   : > { %v5372_v54 = vpack.c.bf16 %v5347_v42, %v5346_v3  ;;  %v5349_v16 = vmax.f32 %v5317_v24, 0.0  ;;  %v5350_v61 = vmax.f32 %v5318_v44, 0.0  ;;  %v5287_v18 = vmul.f32 %v11805_v63, %v5252_v30  ;;  %v5263_v24 = vld [vmem:[%s9757_s15 + $0xf8] sm:$0xff]  ;;  %v5262_v44 = vld [vmem:[%s9757_s15 + $0xf0] sm:$0xff] }
 0x77d   : > { %v5351_v41 = vmax.f32 %v5319_v35, 0.0  ;;  %v5288_v1 = vmul.f32 %v11805_v63, %v5253_v31  ;;  %v5320_v17 = vadd.f32 %v11816_v22, %v5285_v29  ;;  %v5321_v5 = vadd.f32 %v11816_v22, %v5286_v9 }
 0x77e   : > { %8006 = vmatmul.mubr.msk.bf16.gmra.mrb[20].mxu0 %vm5398_vm9, %v5369_v20  ;;  %v5373_v0 = vpack.c.bf16 %v5349_v16, %v5348_v8  ;;  %v5322_v13 = vadd.f32 %v11816_v22, %v5287_v18  ;;  %v5289_v58 = vmul.f32 %v11805_v63, %v5254_v28  ;;  %v5290_v10 = vmul.f32 %v11805_v63, %v5255_v53  ;;  %v8261_v28 = vld [vmem:[%s8439_s17 + $0x38] sm:$0xff] }
 0x77f   : > { %8009 = vmatprep.mubr.msk.bf16.mxu0 %vm5398_vm9, %v5370_v6  ;;  %v5374_v62 = vpack.c.bf16 %v5351_v41, %v5350_v61  ;;  %v5323_v23 = vadd.f32 %v11816_v22, %v5288_v1  ;;  %v5352_v25 = vmax.f32 %v5320_v17, 0.0  ;;  %v5353_v43 = vmax.f32 %v5321_v5, 0.0  ;;  %v5261_v6 = vld [vmem:[%s9757_s15 + $0xe8] sm:$0xff]  ;;  %v8258_v41 = vld [vmem:[%s8439_s17 + $0x20] sm:$0xff] }
 0x780   : > { %v5354_v14 = vmax.f32 %v5322_v13, 0.0  ;;  %v5291_v45 = vmul.f32 %v11805_v63, %v5256_v34  ;;  %v5292_v4 = vmul.f32 %v11805_v63, %v5257_v55  ;;  %v5324_v52 = vadd.f32 %v11816_v22, %v5289_v58  ;;  %v8259_v1 = vld [vmem:[%s8439_s17 + $0x28] sm:$0xff]  ;;  %v8262_v58 = vld [vmem:[%s8439_s17 + $0x40] sm:$0xff] }
 0x781   : > { %v5355_v50 = vmax.f32 %v5323_v23, 0.0  ;;  %v5375_v59 = vpack.c.bf16 %v5353_v43, %v5352_v25  ;;  %v5325_v57 = vadd.f32 %v11816_v22, %v5290_v10  ;;  %v5293_v26 = vmul.f32 %v11805_v63, %v5258_v46  ;;  %v8263_v34 = vld [vmem:[%s8439_s17 + $0x48] sm:$0xff] }
 0x782   : > { %v5326_v36 = vadd.f32 %v11816_v22, %v5291_v45  ;;  %v5327_v60 = vadd.f32 %v11816_v22, %v5292_v4  ;;  %v5356_v38 = vmax.f32 %v5324_v52, 0.0  ;;  %v5294_v11 = vmul.f32 %v11805_v63, %v5259_v32  ;;  %v8266_v32 = vld [vmem:[%s8439_s17 + $0x60] sm:$0xff] }
 0x783   : > { %v5376_v20 = vpack.c.bf16 %v5355_v50, %v5354_v14  ;;  %v5357_v39 = vmax.f32 %v5325_v57, 0.0  ;;  %v5296_v47 = vmul.f32 %v11805_v63, %v5261_v6  ;;  %v5295_v3 = vmul.f32 %v11805_v63, %v5260_v19  ;;  %v8264_v57 = vld [vmem:[%s8439_s17 + $0x50] sm:$0xff] }
 0x784   : > { %v5358_v2 = vmax.f32 %v5326_v36, 0.0  ;;  %v5359_v33 = vmax.f32 %v5327_v60, 0.0  ;;  %v5328_v15 = vadd.f32 %v11816_v22, %v5293_v26  ;;  %v5329_v37 = vadd.f32 %v11816_v22, %v5294_v11  ;;  %v8265_v36 = vld [vmem:[%s8439_s17 + $0x58] sm:$0xff] }
 0x785   : > { %v5377_v42 = vpack.c.bf16 %v5357_v39, %v5356_v38  ;;  %v5331_v7 = vadd.f32 %v11816_v22, %v5296_v47  ;;  %v5298_v56 = vmul.f32 %v11805_v63, %v5263_v24  ;;  %v5297_v16 = vmul.f32 %v11805_v63, %v5262_v44  ;;  %v8267_v39 = vld [vmem:[%s8439_s17 + $0x68] sm:$0xff] }
 0x786   : > { %8010 = vmatmul.mubr.msk.bf16.gmra.mrb[24].mxu0 %vm5398_vm9, %v5371_v49  ;;  %v5378_v49 = vpack.c.bf16 %v5359_v33, %v5358_v2  ;;  %v5360_v35 = vmax.f32 %v5328_v15, 0.0  ;;  %v5361_v40 = vmax.f32 %v5329_v37, 0.0  ;;  %v5117_v18 = vmul.f32 %v8258_v41, %v11704_v12  ;;  %v8268_v15 = vld [vmem:[%s8439_s17 + $0x70] sm:$0xff] }
 0x787   : > { %8013 = vmatprep.mubr.msk.bf16.mxu0 %vm5398_vm9, %v5372_v54  ;;  %v5330_v54 = vadd.f32 %v11816_v22, %v5295_v3  ;;  %v5363_v8 = vmax.f32 %v5331_v7, 0.0  ;;  %v5333_v30 = vadd.f32 %v11816_v22, %v5298_v56  ;;  %v5332_v61 = vadd.f32 %v11816_v22, %v5297_v16  ;;  %v8260_v22 = vld [vmem:[%s8439_s17 + $0x30] sm:$0xff] }
 0x788   : > { %v5379_v9 = vpack.c.bf16 %v5361_v40, %v5360_v35  ;;  %v5118_v63 = vmul.f32 %v8259_v1, %v11704_v12  ;;  %v5155_v5 = vadd.f32 %v11710_v27, %v5117_v18  ;;  %v5119_v23 = vmul.f32 %v8260_v22, %v11704_v12  ;;  %v8273_v18 = vld [vmem:[%s8439_s17 + $0xa8] sm:$0xff] }
 0x789   : > { %v5362_v29 = vmax.f32 %v5330_v54, 0.0  ;;  %v5364_v17 = vmax.f32 %v5332_v61, 0.0  ;;  %v5120_v53 = vmul.f32 %v8261_v28, %v11704_v12  ;;  %v5121_v10 = vmul.f32 %v8262_v58, %v11704_v12  ;;  %v8272_v61 = vld [vmem:[%s8439_s17 + $0xa0] sm:$0xff] }
 0x78a   : > { %v5187_v25 = vmax.f32 %v5155_v5, 0.0  ;;  %v5122_v55 = vmul.f32 %v8263_v34, %v11704_v12  ;;  %v5157_v14 = vadd.f32 %v11710_v27, %v5119_v23  ;;  %v5124_v60 = vmul.f32 %v8265_v36, %v11704_v12  ;;  %v8274_v23 = vld [vmem:[%s8439_s17 + $0xb0] sm:$0xff] }
 0x78b   : > { %v5380_v31 = vpack.c.bf16 %v5363_v8, %v5362_v29  ;;  %v5158_v50 = vadd.f32 %v11710_v27, %v5120_v53  ;;  %v5159_v4 = vadd.f32 %v11710_v27, %v5121_v10  ;;  %v5125_v38 = vmul.f32 %v8266_v32, %v11704_v12  ;;  %v8270_v29 = vld [vmem:[%s8439_s17 + $0x90] sm:$0xff]  ;;  %v8275_v53 = vld [vmem:[%s8439_s17 + $0xb8] sm:$0xff]  ;;  %v8276_v10 = vld [vmem:[%s8439_s17 + $0xc0] sm:$0xff] }
 0x78c   : > { %v5162_v19 = vadd.f32 %v11710_v27, %v5124_v60  ;;  %v5127_v37 = vmul.f32 %v8268_v15, %v11704_v12  ;;  %v5133_v41 = vmul.f32 %v8272_v61, %v11704_v12  ;;  %v5134_v1 = vmul.f32 %v8273_v18, %v11704_v12  ;;  %v8279_v60 = vld [vmem:[%s8439_s17 + $0xd8] sm:$0xff]  ;;  %v6109_v61 = vld [vmem:[#allocation2 + $0xa] sm:$0xff] }
 0x78d   : > { %v5190_v52 = vmax.f32 %v5158_v50, 0.0  ;;  %v5191_v6 = vmax.f32 %v5159_v4, 0.0  ;;  %v5163_v33 = vadd.f32 %v11710_v27, %v5125_v38  ;;  %v5135_v28 = vmul.f32 %v8274_v23, %v11704_v12  ;;  %v8280_v38 = vld [vmem:[%s8439_s17 + $0xe0] sm:$0xff] }
 0x78e   : > { %8014 = vmatmul.mubr.msk.bf16.gmra.mrb[28].mxu0 %vm5398_vm9, %v5373_v0  ;;  %v5365_v0 = vmax.f32 %v5333_v30, 0.0  ;;  %v5165_v35 = vadd.f32 %v11710_v27, %v5127_v37  ;;  %v8271_v30 = vld [vmem:[%s8439_s17 + $0x98] sm:$0xff]  ;;  %v5171_v5 = vadd.f32 %v11710_v27, %v5133_v41  ;;  %v5137_v34 = vmul.f32 %v8276_v10, %v11704_v12  ;;  %v8282_v37 = vld [vmem:[%s8439_s17 + $0xf0] sm:$0xff] }
 0x78f   : > { %8017 = vmatprep.mubr.msk.bf16.mxu0 %vm5398_vm9, %v5374_v62  ;;  %v5156_v62 = vadd.f32 %v11710_v27, %v5118_v63  ;;  %v5195_v24 = vmax.f32 %v5163_v33, 0.0 }
 0x790   : > { %v5381_v13 = vpack.c.bf16 %v5365_v0, %v5364_v17  ;;  %v5197_v8 = vmax.f32 %v5165_v35, 0.0 }
 0x791   : > { %v5188_v43 = vmax.f32 %v5156_v62, 0.0  ;;  %v5172_v62 = vadd.f32 %v11710_v27, %v5134_v1 }
 0x793   : > { %v5217_v45 = vpack.c.bf16 %v5188_v43, %v5187_v25  ;;  %v5136_v25 = vmul.f32 %v8275_v53, %v11704_v12  ;;  %v5203_v43 = vmax.f32 %v5171_v5, 0.0  ;;  %v5204_v58 = vmax.f32 %v5172_v62, 0.0 }
 0x795   : > { %v5174_v4 = vadd.f32 %v11710_v27, %v5136_v25 }
 0x796   : > { %8018 = vmatmul.mubr.msk.bf16.gmra.mrb[32].mxu0 %vm5398_vm9, %v5375_v59  ;;  %v5189_v59 = vmax.f32 %v5157_v14, 0.0 }
 0x797   : > { %8021 = vmatprep.mubr.msk.bf16.mxu0 %vm5398_vm9, %v5376_v20  ;;  %v5123_v20 = vmul.f32 %v8264_v57, %v11704_v12  ;;  %v5206_v57 = vmax.f32 %v5174_v4, 0.0 }
 0x798   : > { %v5218_v26 = vpack.c.bf16 %v5190_v52, %v5189_v59 }
 0x799   : > { %v5161_v11 = vadd.f32 %v11710_v27, %v5123_v20  ;;  %v8278_v20 = vld [vmem:[%s8439_s17 + $0xd0] sm:$0xff] }
 0x79a   : > { %v5139_v36 = vmul.f32 %v8278_v20, %v11704_v12 }
 0x79b   : > { %v5193_v3 = vmax.f32 %v5161_v11, 0.0 }
 0x79e   : > { %8022 = vmatmul.mubr.msk.bf16.gmra.mrb[36].mxu0 %vm5398_vm9, %v5377_v42  ;;  %v5194_v42 = vmax.f32 %v5162_v19, 0.0  ;;  %v5177_v19 = vadd.f32 %v11710_v27, %v5139_v36 }
 0x79f   : > { %8025 = vmatprep.mubr.msk.bf16.mxu0 %vm5398_vm9, %v5378_v49  ;;  %v8269_v49 = vld [vmem:[%s8439_s17 + $0x78] sm:$0xff] }
 0x7a0   : > { %v5128_v7 = vmul.f32 %v8269_v49, %v11704_v12  ;;  %v5220_v44 = vpack.c.bf16 %v5194_v42, %v5193_v3  ;;  %v5209_v42 = vmax.f32 %v5177_v19, 0.0  ;;  %v5143_v49 = vmul.f32 %v8282_v37, %v11704_v12 }
 0x7a2   : > { %v5166_v40 = vadd.f32 %v11710_v27, %v5128_v7  ;;  %v8283_v7 = vld [vmem:[%s8439_s17 + $0xf8] sm:$0xff] }
 0x7a4   : > { %v5198_v16 = vmax.f32 %v5166_v40, 0.0  ;;  %v5181_v40 = vadd.f32 %v11710_v27, %v5143_v49 }
 0x7a6   : > { %8026 = vmatmul.mubr.msk.bf16.gmra.mrb[40].mxu0 %vm5398_vm9, %v5379_v9  ;;  %v5131_v9 = vmul.f32 %v8270_v29, %v11704_v12  ;;  %v5222_v63 = vpack.c.bf16 %v5198_v16, %v5197_v8  ;;  %v5213_v16 = vmax.f32 %v5181_v40, 0.0 }
 0x7a7   : > { %8029 = vmatprep.mubr.msk.bf16.mxu0 %vm5398_vm9, %v5380_v31  ;;  %v5132_v31 = vmul.f32 %v8271_v30, %v11704_v12  ;;  %v5917_v30 = vld [vmem:[#allocation2 + $0x9] sm:$0xff] }
 0x7a8   : > { %v5169_v0 = vadd.f32 %v11710_v27, %v5131_v9  ;;  %5982 = vrot.lane.b32.xlu1 %v5917_v30, %s8323_s20 }
 0x7a9   : > { %v5170_v17 = vadd.f32 %v11710_v27, %v5132_v31  ;;  %v6108_v31 = vld [vmem:[#allocation2 + $0x2] sm:$0xff] }
 0x7ab   : > { %v5202_v22 = vmax.f32 %v5170_v17, 0.0 }
 0x7ac   : > { %6174 = vrot.lane.b32.xlu1 %v6109_v61, %s8324_s21 }
 0x7ae   : > { %8030 = vmatmul.mubr.msk.bf16.gmra.mrb[44].mxu0 %vm5398_vm9, %v5381_v13  ;;  %v5201_v13 = vmax.f32 %v5169_v0, 0.0 }
 0x7af   : > { %8035 = vmatprep.mubr.msk.bf16.mxu0 %vm644_vm2, %v11736_v51  ;;  %v5160_v51 = vadd.f32 %v11710_v27, %v5122_v55  ;;  %v8277_v55 = vld [vmem:[%s8439_s17 + $0xc8] sm:$0xff] }
 0x7b0   : > { %v5138_v14 = vmul.f32 %v8277_v55, %v11704_v12  ;;  %v5224_v50 = vpack.c.bf16 %v5202_v22, %v5201_v13 }
 0x7b1   : > { %v5192_v46 = vmax.f32 %v5160_v51, 0.0  ;;  %v5225_v51 = vpack.c.bf16 %v5204_v58, %v5203_v43 }
 0x7b2   : > { %v5176_v59 = vadd.f32 %v11710_v27, %v5138_v14 }
 0x7b3   : > { %v5219_v2 = vpack.c.bf16 %v5192_v46, %v5191_v6  ;;  %v5140_v6 = vmul.f32 %v8279_v60, %v11704_v12 }
 0x7b4   : > { %v5208_v32 = vmax.f32 %v5176_v59, 0.0 }
 0x7b6   : > { %8036 = vmatmul.mubr.msk.bf16.vlgmr.msra.gmra.mrb[16].mxu0 %vm644_vm2, %v11732_v48  ;;  %v5126_v48 = vmul.f32 %v8267_v39, %v11704_v12  ;;  %v5141_v39 = vmul.f32 %v8280_v38, %v11704_v12 }
 0x7b7   : > { %8039 = vmatprep.mubr.msk.bf16.mxu0 %vm644_vm2, %v5217_v45  ;;  %v5173_v45 = vadd.f32 %v11710_v27, %v5135_v28 }
 0x7b8   : > { %v5164_v47 = vadd.f32 %v11710_v27, %v5126_v48  ;;  %v8281_v48 = vld [vmem:[%s8439_s17 + $0xe8] sm:$0xff] }
 0x7b9   : > { %v5205_v52 = vmax.f32 %v5173_v45, 0.0 }
 0x7ba   : > { %v5196_v54 = vmax.f32 %v5164_v47, 0.0  ;;  %v5179_v47 = vadd.f32 %v11710_v27, %v5141_v39 }
 0x7bb   : > { %v5226_v11 = vpack.c.bf16 %v5206_v57, %v5205_v52 }
 0x7bc   : > { %v5221_v56 = vpack.c.bf16 %v5196_v54, %v5195_v24  ;;  %v5144_v24 = vmul.f32 %v8283_v7, %v11704_v12  ;;  %v5211_v54 = vmax.f32 %v5179_v47, 0.0 }
 0x7be   : > { %8040 = vmatmul.mubr.msk.bf16.gmra.mrb[20].mxu0 %vm644_vm2, %v5218_v26  ;;  %v5142_v26 = vmul.f32 %v8281_v48, %v11704_v12  ;;  %v5916_v12 = vld [vmem:[#allocation2 + $0x1] sm:$0xff] }
 0x7bf   : > { %8043 = vmatprep.mubr.msk.bf16.mxu0 %vm644_vm2, %v5219_v2  ;;  %v5178_v2 = vadd.f32 %v11710_v27, %v5140_v6  ;;  %5980 = vrot.lane.b32.xlu0 %v5916_v12, %s8323_s20 }
 0x7c0   : > { %v5180_v3 = vadd.f32 %v11710_v27, %v5142_v26 }
 0x7c1   : > { %v5210_v15 = vmax.f32 %v5178_v2, 0.0 }
 0x7c3   : > { %v5228_v35 = vpack.c.bf16 %v5210_v15, %v5209_v42  ;;  %6172 = vrot.lane.b32.xlu0 %v6108_v31, %s8324_s21 }
 0x7c6   : > { %8044 = vmatmul.mubr.msk.bf16.gmra.mrb[24].mxu0 %vm644_vm2, %v5220_v44  ;;  %v5212_v44 = vmax.f32 %v5180_v3, 0.0 }
 0x7c7   : > { %8047 = vmatprep.mubr.msk.bf16.mxu0 %vm644_vm2, %v5221_v56  ;;  %v5182_v56 = vadd.f32 %v11710_v27, %v5144_v24 }
 0x7c8   : > { %v5229_v8 = vpack.c.bf16 %v5212_v44, %v5211_v54 }
 0x7c9   : > { %v5214_v29 = vmax.f32 %v5182_v56, 0.0 }
 0x7cb   : > { %v5230_v9 = vpack.c.bf16 %v5214_v29, %v5213_v16 }
 0x7ce   : > { %8048 = vmatmul.mubr.msk.bf16.gmra.mrb[28].mxu0 %vm644_vm2, %v5222_v63 }
 0x7cf   : > { %8051 = vmatprep.mubr.msk.bf16.mxu0 %vm644_vm2, %v11776_v21  ;;  %v5175_v21 = vadd.f32 %v11710_v27, %v5137_v34 }
 0x7d1   : > { %v5207_v46 = vmax.f32 %v5175_v21, 0.0 }
 0x7d3   : > { %v5227_v33 = vpack.c.bf16 %v5208_v32, %v5207_v46 }
 0x7d6   : > { %8052 = vmatmul.mubr.msk.bf16.gmra.mrb[32].mxu0 %vm644_vm2, %v5224_v50 }
 0x7d7   : > { %8055 = vmatprep.mubr.msk.bf16.mxu0 %vm644_vm2, %v5225_v51 }
 0x7de   : > { %8056 = vmatmul.mubr.msk.bf16.gmra.mrb[36].mxu0 %vm644_vm2, %v5226_v11 }
 0x7df   : > { %8059 = vmatprep.mubr.msk.bf16.mxu0 %vm644_vm2, %v5227_v33 }
 0x7e6   : > { %8060 = vmatmul.mubr.msk.bf16.gmra.mrb[40].mxu0 %vm644_vm2, %v5228_v35 }
 0x7e7   : > { %8063 = vmatprep.mubr.msk.bf16.mxu0 %vm644_vm2, %v5229_v8 }
 0x7ee   : > { %8064 = vmatmul.mubr.msk.bf16.gmra.mrb[44].mxu0 %vm644_vm2, %v5230_v9 }
 0x889   : > { %v8037_v27 = vpop.f32.mrb[16].mxu0 }
 0x88a   : > { %5822 = vst.msk [vmem:[#allocation2 + $0x31] sm:$0xff] %vm442_vm1, %v8037_v27  ;;  %v5693_v41 = vpop.f32.mrb[17].mxu0 }
 0x88b   : > { %5820 = vst.msk [vmem:[#allocation2 + $0x19] sm:$0xff] %vm442_vm1, %v5693_v41  ;;  %v8038_v18 = vpop.f32.mrb[18].mxu0 }
 0x88c   : > { %5823 = vst.msk [vmem:[#allocation2 + $0x39] sm:$0xff] %vm442_vm1, %v8038_v18  ;;  %v5696_v1 = vpop.f32.mrb[19].mxu0 }
 0x88d   : > { %5821 = vst.msk [vmem:[#allocation2 + $0x21] sm:$0xff] %vm442_vm1, %v5696_v1 }
 0x891   : > { %v8041_v63 = vpop.f32.mrb[20].mxu0  ;;  %v12027_v0 = vld [vmem:[#allocation2 + $0x31] sm:$0xff] }
 0x892   : > { %5826 = vst.msk [vmem:[#allocation2 + $0x61] sm:$0xff] %vm442_vm1, %v8041_v63  ;;  %5988 = vrot.lane.b32.xlu0 %v12027_v0, %s8323_s20  ;;  %v5709_v17 = vpop.f32.mrb[21].mxu0  ;;  %v6302_v22 = vld [vmem:[#allocation2 + $0x30] sm:$0xff]  ;;  %v12044_v53 = vld [vmem:[#allocation2 + $0x19] sm:$0xff] }
 0x893   : > { %5824 = vst.msk [vmem:[#allocation2 + $0x49] sm:$0xff] %vm442_vm1, %v5709_v17  ;;  %v8042_v5 = vpop.f32.mrb[22].mxu0  ;;  %v12033_v62 = vld [vmem:[#allocation2 + $0x39] sm:$0xff] }
 0x894   : > { %5827 = vst.msk [vmem:[#allocation2 + $0x69] sm:$0xff] %vm442_vm1, %v8042_v5  ;;  %5990 = vrot.lane.b32.xlu1 %v12033_v62, %s8323_s20  ;;  %v5712_v13 = vpop.f32.mrb[23].mxu0  ;;  %v12040_v23 = vld [vmem:[#allocation2 + $0x3a] sm:$0xff]  ;;  %v12058_v50 = vld [vmem:[#allocation2 + $0x32] sm:$0xff]  ;;  %v12064_v51 = vld [vmem:[#allocation2 + $0x22] sm:$0xff] }
 0x895   : > { %5825 = vst.msk [vmem:[#allocation2 + $0x51] sm:$0xff] %vm442_vm1, %v5712_v13  ;;  %v6303_v58 = vld [vmem:[#allocation2 + $0x38] sm:$0xff]  ;;  %v12054_v55 = vld [vmem:[#allocation2 + $0x21] sm:$0xff] }
 0x896   : > { %6368 = vrot.lane.b32.xlu0 %v6302_v22, %s8325_s22  ;;  %v6300_v34 = vld [vmem:[#allocation2 + $0x18] sm:$0xff]  ;;  %v6301_v52 = vld [vmem:[#allocation2 + $0x20] sm:$0xff] }
 0x897   : > { %v12070_v59 = vld [vmem:[#allocation2 + $0x1a] sm:$0xff] }
 0x898   : > { %6182 = vrot.lane.b32.xlu1 %v12040_v23, %s8324_s21 }
 0x899   : > { %v8045_v28 = vpop.f32.mrb[24].mxu0  ;;  %v12075_v20 = vld [vmem:[#allocation2 + $0x61] sm:$0xff] }
 0x89a   : > { %5830 = vst.msk [vmem:[#allocation2 + $0x91] sm:$0xff] %vm442_vm1, %v8045_v28  ;;  %5984 = vrot.lane.b32.xlu0 %v12044_v53, %s8323_s20  ;;  %v5725_v25 = vpop.f32.mrb[25].mxu0  ;;  %v6306_v32 = vld [vmem:[#allocation2 + $0x60] sm:$0xff]  ;;  %v12092_v48 = vld [vmem:[#allocation2 + $0x49] sm:$0xff] }
 0x89b   : > { %5828 = vst.msk [vmem:[#allocation2 + $0x79] sm:$0xff] %vm442_vm1, %v5725_v25  ;;  %v8046_v43 = vpop.f32.mrb[26].mxu0  ;;  %v12081_v6 = vld [vmem:[#allocation2 + $0x69] sm:$0xff] }
 0x89c   : > { %5831 = vst.msk [vmem:[#allocation2 + $0x99] sm:$0xff] %vm442_vm1, %v8046_v43  ;;  %6370 = vrot.lane.b32.xlu1 %v6303_v58, %s8325_s22  ;;  %v5728_v10 = vpop.f32.mrb[27].mxu0  ;;  %v12088_v38 = vld [vmem:[#allocation2 + $0x6a] sm:$0xff]  ;;  %v12106_v42 = vld [vmem:[#allocation2 + $0x62] sm:$0xff]  ;;  %v12112_v49 = vld [vmem:[#allocation2 + $0x52] sm:$0xff] }
 0x89d   : > { %5829 = vst.msk [vmem:[#allocation2 + $0x81] sm:$0xff] %vm442_vm1, %v5728_v10  ;;  %v6307_v19 = vld [vmem:[#allocation2 + $0x68] sm:$0xff]  ;;  %v12102_v47 = vld [vmem:[#allocation2 + $0x51] sm:$0xff] }
 0x89e   : > { %6364 = vrot.lane.b32.xlu0 %v6300_v34, %s8325_s22  ;;  %v6304_v33 = vld [vmem:[#allocation2 + $0x48] sm:$0xff]  ;;  %v6305_v54 = vld [vmem:[#allocation2 + $0x50] sm:$0xff] }
 0x89f   : > { %v12118_v24 = vld [vmem:[#allocation2 + $0x4a] sm:$0xff] }
 0x8a0   : > { %5986 = vrot.lane.b32.xlu1 %v12054_v55, %s8323_s20 }
 0x8a1   : > { %v8049_v14 = vpop.f32.mrb[28].mxu0  ;;  %v12123_v35 = vld [vmem:[#allocation2 + $0x91] sm:$0xff] }
 0x8a2   : > { %5834 = vst.msk [vmem:[#allocation2 + $0xc1] sm:$0xff] %vm442_vm1, %v8049_v14  ;;  %6180 = vrot.lane.b32.xlu0 %v12058_v50, %s8324_s21  ;;  %v5741_v45 = vpop.f32.mrb[29].mxu0  ;;  %v6310_v29 = vld [vmem:[#allocation2 + $0x90] sm:$0xff]  ;;  %v12140_v12 = vld [vmem:[#allocation2 + $0x79] sm:$0xff] }
 0x8a3   : > { %5832 = vst.msk [vmem:[#allocation2 + $0xa9] sm:$0xff] %vm442_vm1, %v5741_v45  ;;  %v8050_v4 = vpop.f32.mrb[30].mxu0  ;;  %v12129_v8 = vld [vmem:[#allocation2 + $0x99] sm:$0xff] }
 0x8a4   : > { %5835 = vst.msk [vmem:[#allocation2 + $0xc9] sm:$0xff] %vm442_vm1, %v8050_v4  ;;  %6178 = vrot.lane.b32.xlu1 %v12064_v51, %s8324_s21  ;;  %v5744_v21 = vpop.f32.mrb[31].mxu0  ;;  %v12136_v9 = vld [vmem:[#allocation2 + $0x9a] sm:$0xff]  ;;  %v12153_v27 = vld [vmem:[#allocation2 + $0x92] sm:$0xff]  ;;  %v12157_v41 = vld [vmem:[#allocation2 + $0x82] sm:$0xff] }
 0x8a5   : > { %5833 = vst.msk [vmem:[#allocation2 + $0xb1] sm:$0xff] %vm442_vm1, %v5744_v21  ;;  %v6311_v30 = vld [vmem:[#allocation2 + $0x98] sm:$0xff]  ;;  %v12149_v61 = vld [vmem:[#allocation2 + $0x81] sm:$0xff] }
 0x8a6   : > { %6176 = vrot.lane.b32.xlu0 %v12070_v59, %s8324_s21  ;;  %v12145_v31 = vld [vmem:[#allocation2 + $0x78] sm:$0xff]  ;;  %v12165_v1 = vld [vmem:[#allocation2 + $0x80] sm:$0xff] }
 0x8a7   : > { %14354 = vst [vmem:[#allocation14_spill] sm:$0xff] %v12145_v31  ;;  %v12161_v18 = vld [vmem:[#allocation2 + $0x7a] sm:$0xff]  ;;  %14355 = vst [vmem:[#allocation7_spill] sm:$0xff] %v12165_v1 }
 0x8a8   : > { %6366 = vrot.lane.b32.xlu1 %v6301_v52, %s8325_s22 }
 0x8a9   : > { %v8053_v57 = vpop.f32.mrb[32].mxu0  ;;  %v12169_v63 = vld [vmem:[#allocation2 + $0xc1] sm:$0xff] }
 0x8aa   : > { %5838 = vst.msk [vmem:[#allocation2 + $0xf1] sm:$0xff] %vm442_vm1, %v8053_v57  ;;  %5996 = vrot.lane.b32.xlu0 %v12075_v20, %s8323_s20  ;;  %v5757_v36 = vpop.f32.mrb[33].mxu0  ;;  %v6314_v5 = vld [vmem:[#allocation2 + $0xc0] sm:$0xff]  ;;  %v12182_v22 = vld [vmem:[#allocation2 + $0xa9] sm:$0xff]  ;;  %v12227_v57 = vpop.permute.xlu0 %5980 }
 0x8ab   : > { %5836 = vst.msk [vmem:[#allocation2 + $0xd9] sm:$0xff] %vm442_vm1, %v5757_v36  ;;  %v8054_v60 = vpop.f32.mrb[34].mxu0  ;;  %v12173_v17 = vld [vmem:[#allocation2 + $0xc9] sm:$0xff]  ;;  %14359 = vst [vmem:[#allocation54_spill] sm:$0xff] %v12227_v57 }
 0x8ac   : > { %5839 = vst.msk [vmem:[#allocation2 + $0xf9] sm:$0xff] %vm442_vm1, %v8054_v60  ;;  %5998 = vrot.lane.b32.xlu1 %v12081_v6, %s8323_s20  ;;  %v5760_v46 = vpop.f32.mrb[35].mxu0  ;;  %v12178_v13 = vld [vmem:[#allocation2 + $0xca] sm:$0xff]  ;;  %v12195_v58 = vld [vmem:[#allocation2 + $0xc2] sm:$0xff]  ;;  %v12199_v10 = vld [vmem:[#allocation2 + $0xb2] sm:$0xff] }
 0x8ad   : > { %5837 = vst.msk [vmem:[#allocation2 + $0xe1] sm:$0xff] %vm442_vm1, %v5760_v46  ;;  %v6315_v28 = vld [vmem:[#allocation2 + $0xc8] sm:$0xff]  ;;  %v12191_v43 = vld [vmem:[#allocation2 + $0xb1] sm:$0xff]  ;;  %v12237_v46 = vpop.permute.xlu1 %5982 }
 0x8ae   : > { %6376 = vrot.lane.b32.xlu0 %v6306_v32, %s8325_s22  ;;  %v12187_v25 = vld [vmem:[#allocation2 + $0xa8] sm:$0xff]  ;;  %v12207_v14 = vld [vmem:[#allocation2 + $0xb0] sm:$0xff]  ;;  %14361 = vst [vmem:[#allocation47_spill] sm:$0xff] %v12237_v46 }
 0x8af   : > { %14356 = vst [vmem:[#allocation13_spill] sm:$0xff] %v12187_v25  ;;  %v12203_v34 = vld [vmem:[#allocation2 + $0xaa] sm:$0xff]  ;;  %14357 = vst [vmem:[#allocation28_spill] sm:$0xff] %v12207_v14 }
 0x8b0   : > { %6190 = vrot.lane.b32.xlu1 %v12088_v38, %s8324_s21 }
 0x8b1   : > { %v8057_v39 = vpop.f32.mrb[36].mxu0  ;;  %v12211_v45 = vld [vmem:[#allocation2 + $0xf1] sm:$0xff] }
 0x8b2   : > { %5842 = vst.msk [vmem:[#allocation2 + $0x121] sm:$0xff] %vm442_vm1, %v8057_v39  ;;  %5992 = vrot.lane.b32.xlu0 %v12092_v48, %s8323_s20  ;;  %v5773_v26 = vpop.f32.mrb[37].mxu0  ;;  %v12219_v21 = vld [vmem:[#allocation2 + $0xf0] sm:$0xff]  ;;  %v12229_v36 = vld [vmem:[#allocation2 + $0xd9] sm:$0xff]  ;;  %v12243_v39 = vpop.permute.xlu0 %6172 }
 0x8b3   : > { %5840 = vst.msk [vmem:[#allocation2 + $0x109] sm:$0xff] %vm442_vm1, %v5773_v26  ;;  %v8058_v11 = vpop.f32.mrb[38].mxu0  ;;  %v12215_v4 = vld [vmem:[#allocation2 + $0xf9] sm:$0xff]  ;;  %14358 = vst [vmem:[#allocation32_spill] sm:$0xff] %v12219_v21 }
 0x8b4   : > { %5843 = vst.msk [vmem:[#allocation2 + $0x129] sm:$0xff] %vm442_vm1, %v8058_v11  ;;  %6378 = vrot.lane.b32.xlu1 %v6307_v19, %s8325_s22  ;;  %v5776_v2 = vpop.f32.mrb[39].mxu0  ;;  %v12223_v52 = vld [vmem:[#allocation2 + $0xfa] sm:$0xff]  ;;  %14363 = vst [vmem:[#allocation52_spill] sm:$0xff] %v12243_v39  ;;  %v12249_v11 = vld [vmem:[#allocation2 + $0xf2] sm:$0xff]  ;;  %v12251_v19 = vpop.permute.xlu1 %6174 }
 0x8b5   : > { %5841 = vst.msk [vmem:[#allocation2 + $0x111] sm:$0xff] %vm442_vm1, %v5776_v2  ;;  %v12233_v60 = vld [vmem:[#allocation2 + $0xf8] sm:$0xff]  ;;  %v12245_v26 = vld [vmem:[#allocation2 + $0xe1] sm:$0xff]  ;;  %14364 = vst [vmem:[#allocation60_spill] sm:$0xff] %v12251_v19 }
 0x8b6   : > { %6372 = vrot.lane.b32.xlu0 %v6304_v33, %s8325_s22  ;;  %14360 = vst [vmem:[#allocation8_spill] sm:$0xff] %v12233_v60  ;;  %v12239_v32 = vld [vmem:[#allocation2 + $0xd8] sm:$0xff]  ;;  %v12255_v2 = vld [vmem:[#allocation2 + $0xe2] sm:$0xff] }
 0x8b7   : > { %14362 = vst [vmem:[#allocation20_spill] sm:$0xff] %v12239_v32 }
 0x8b8   : > { %5994 = vrot.lane.b32.xlu1 %v12102_v47, %s8323_s20 }
 0x8b9   : > { %v8061_v3 = vpop.f32.mrb[40].mxu0 }
 0x8ba   : > { %5846 = vst.msk [vmem:[#allocation2 + $0x151] sm:$0xff] %vm442_vm1, %v8061_v3  ;;  %6188 = vrot.lane.b32.xlu0 %v12106_v42, %s8324_s21  ;;  %v5789_v15 = vpop.f32.mrb[41].mxu0  ;;  %v12261_v3 = vld [vmem:[#allocation2 + $0xda] sm:$0xff] }
 0x8bb   : > { %5844 = vst.msk [vmem:[#allocation2 + $0x139] sm:$0xff] %vm442_vm1, %v5789_v15  ;;  %v8062_v37 = vpop.f32.mrb[42].mxu0 }
 0x8bc   : > { %5847 = vst.msk [vmem:[#allocation2 + $0x159] sm:$0xff] %vm442_vm1, %v8062_v37  ;;  %6186 = vrot.lane.b32.xlu1 %v12112_v49, %s8324_s21  ;;  %v5792_v7 = vpop.f32.mrb[43].mxu0  ;;  %v12267_v37 = vld [vmem:[#allocation2 + $0xe0] sm:$0xff] }
 0x8bd   : > { %5845 = vst.msk [vmem:[#allocation2 + $0x141] sm:$0xff] %vm442_vm1, %v5792_v7  ;;  %14367 = vst [vmem:[#allocation48_spill] sm:$0xff] %v12267_v37 }
 0x8be   : > { %6184 = vrot.lane.b32.xlu0 %v12118_v24, %s8324_s21 }
 0x8c0   : > { %6374 = vrot.lane.b32.xlu1 %v6305_v54, %s8325_s22  ;;  %v12273_v54 = vld [vmem:[#allocation2 + $0x121] sm:$0xff] }
 0x8c1   : > { %v8065_v44 = vpop.f32.mrb[44].mxu0 }
 0x8c2   : > { %5850 = vst.msk [vmem:[#allocation2 + $0x181] sm:$0xff] %vm442_vm1, %v8065_v44  ;;  %6004 = vrot.lane.b32.xlu0 %v12123_v35, %s8323_s20  ;;  %v5805_v40 = vpop.f32.mrb[45].mxu0 }
 0x8c3   : > { %5848 = vst.msk [vmem:[#allocation2 + $0x169] sm:$0xff] %vm442_vm1, %v5805_v40  ;;  %v8066_v56 = vpop.f32.mrb[46].mxu0  ;;  %v12279_v40 = vld [vmem:[#allocation2 + $0x129] sm:$0xff] }
 0x8c4   : > { %5851 = vst.msk [vmem:[#allocation2 + $0x189] sm:$0xff] %vm442_vm1, %v8066_v56  ;;  %6006 = vrot.lane.b32.xlu1 %v12129_v8, %s8323_s20  ;;  %v5808_v16 = vpop.f32.mrb[47].mxu0 }
 0x8c5   : > { %5849 = vst.msk [vmem:[#allocation2 + $0x171] sm:$0xff] %vm442_vm1, %v5808_v16  ;;  %v12285_v16 = vld [vmem:[#allocation2 + $0x120] sm:$0xff] }
 0x8c6   : > { %6384 = vrot.lane.b32.xlu0 %v6310_v29, %s8325_s22  ;;  %14371 = vst [vmem:[#allocation15_spill] sm:$0xff] %v12285_v16 }
 0x8c8   : > { %6198 = vrot.lane.b32.xlu1 %v12136_v9, %s8324_s21 }
 0x8ca   : > { %6000 = vrot.lane.b32.xlu0 %v12140_v12, %s8323_s20 }
 0x8cc   : > { %6386 = vrot.lane.b32.xlu1 %v6311_v30, %s8325_s22  ;;  %v12291_v30 = vld [vmem:[#allocation2 + $0x12a] sm:$0xff] }
 0x8ce   : > { %6380 = vrot.lane.b32.xlu0 %v12145_v31, %s8325_s22 }
 0x8d0   : > { %6002 = vrot.lane.b32.xlu1 %v12149_v61, %s8323_s20 }
 0x8d2   : > { %6196 = vrot.lane.b32.xlu0 %v12153_v27, %s8324_s21 }
 0x8d4   : > { %6194 = vrot.lane.b32.xlu1 %v12157_v41, %s8324_s21 }
 0x8d6   : > { %6192 = vrot.lane.b32.xlu0 %v12161_v18, %s8324_s21 }
 0x8d8   : > { %6382 = vrot.lane.b32.xlu1 %v12165_v1, %s8325_s22 }
 0x8da   : > { %6012 = vrot.lane.b32.xlu0 %v12169_v63, %s8323_s20 }
 0x8dc   : > { %6014 = vrot.lane.b32.xlu1 %v12173_v17, %s8323_s20 }
 0x8de   : > { %6392 = vrot.lane.b32.xlu0 %v6314_v5, %s8325_s22 }
 0x8e0   : > { %6206 = vrot.lane.b32.xlu1 %v12178_v13, %s8324_s21 }
 0x8e2   : > { %6008 = vrot.lane.b32.xlu0 %v12182_v22, %s8323_s20 }
 0x8e4   : > { %6394 = vrot.lane.b32.xlu1 %v6315_v28, %s8325_s22  ;;  %v12297_v28 = vld [vmem:[#allocation2 + $0x109] sm:$0xff] }
 0x8e6   : > { %6388 = vrot.lane.b32.xlu0 %v12187_v25, %s8325_s22  ;;  %v12423_v25 = vld [vmem:[#allocation2 + $0x171] sm:$0xff] }
 0x8e8   : > { %6010 = vrot.lane.b32.xlu1 %v12191_v43, %s8323_s20 }
 0x8ea   : > { %6204 = vrot.lane.b32.xlu0 %v12195_v58, %s8324_s21 }
 0x8ec   : > { %6202 = vrot.lane.b32.xlu1 %v12199_v10, %s8324_s21 }
 0x8ee   : > { %6200 = vrot.lane.b32.xlu0 %v12203_v34, %s8324_s21 }
 0x8f0   : > { %6390 = vrot.lane.b32.xlu1 %v12207_v14, %s8325_s22 }
 0x8f2   : > { %6020 = vrot.lane.b32.xlu0 %v12211_v45, %s8323_s20 }
 0x8f4   : > { %6022 = vrot.lane.b32.xlu1 %v12215_v4, %s8323_s20 }
 0x8f6   : > { %6400 = vrot.lane.b32.xlu0 %v12219_v21, %s8325_s22 }
 0x8f8   : > { %6214 = vrot.lane.b32.xlu1 %v12223_v52, %s8324_s21 }
 0x8fa   : > { %6016 = vrot.lane.b32.xlu0 %v12229_v36, %s8323_s20 }
 0x8fc   : > { %6402 = vrot.lane.b32.xlu1 %v12233_v60, %s8325_s22  ;;  %v12375_v60 = vld [vmem:[#allocation2 + $0x158] sm:$0xff] }
 0x8fd   : > { %14392 = vst [vmem:[#allocation108_spill] sm:$0xff] %v12375_v60 }
 0x8fe   : > { %6396 = vrot.lane.b32.xlu0 %v12239_v32, %s8325_s22 }
 0x900   : > { %6018 = vrot.lane.b32.xlu1 %v12245_v26, %s8323_s20 }
 0x902   : > { %6212 = vrot.lane.b32.xlu0 %v12249_v11, %s8324_s21 }
 0x904   : > { %v12257_v33 = vpop.permute.xlu0 %5988  ;;  %6210 = vrot.lane.b32.xlu1 %v12255_v2, %s8324_s21 }
 0x905   : > { %14365 = vst [vmem:[#allocation64_spill] sm:$0xff] %v12257_v33  ;;  %v12315_v33 = vld [vmem:[#allocation2 + $0x111] sm:$0xff] }
 0x906   : > { %6208 = vrot.lane.b32.xlu0 %v12261_v3, %s8324_s21  ;;  %v12265_v15 = vpop.permute.xlu1 %5990 }
 0x907   : > { %14366 = vst [vmem:[#allocation21_spill] sm:$0xff] %v12265_v15  ;;  %v12321_v15 = vld [vmem:[#allocation2 + $0x122] sm:$0xff] }
 0x908   : > { %v12269_v7 = vpop.permute.xlu0 %6368  ;;  %6398 = vrot.lane.b32.xlu1 %v12267_v37, %s8325_s22 }
 0x909   : > { %14368 = vst [vmem:[#allocation71_spill] sm:$0xff] %v12269_v7 }
 0x90a   : > { %6028 = vrot.lane.b32.xlu0 %v12273_v54, %s8323_s20  ;;  %v12277_v44 = vpop.permute.xlu1 %6182 }
 0x90b   : > { %14369 = vst [vmem:[#allocation18_spill] sm:$0xff] %v12277_v44  ;;  %v12303_v44 = vld [vmem:[#allocation2 + $0x128] sm:$0xff] }
 0x90c   : > { %v12281_v56 = vpop.permute.xlu0 %5984  ;;  %6030 = vrot.lane.b32.xlu1 %v12279_v40, %s8323_s20  ;;  %14375 = vst [vmem:[#allocation30_spill] sm:$0xff] %v12303_v44 }
 0x90d   : > { %14370 = vst [vmem:[#allocation59_spill] sm:$0xff] %v12281_v56  ;;  %v12327_v56 = vld [vmem:[#allocation2 + $0x112] sm:$0xff] }
 0x90e   : > { %6408 = vrot.lane.b32.xlu0 %v12285_v16, %s8325_s22  ;;  %v12289_v29 = vpop.permute.xlu1 %6370 }
 0x90f   : > { %14372 = vst [vmem:[#allocation25_spill] sm:$0xff] %v12289_v29  ;;  %v12309_v29 = vld [vmem:[#allocation2 + $0x108] sm:$0xff] }
 0x910   : > { %v12293_v5 = vpop.permute.xlu0 %6364  ;;  %6222 = vrot.lane.b32.xlu1 %v12291_v30, %s8324_s21  ;;  %14377 = vst [vmem:[#allocation43_spill] sm:$0xff] %v12309_v29 }
 0x911   : > { %14373 = vst [vmem:[#allocation37_spill] sm:$0xff] %v12293_v5 }
 0x912   : > { %6024 = vrot.lane.b32.xlu0 %v12297_v28, %s8323_s20  ;;  %v12301_v7 = vpop.permute.xlu1 %5986 }
 0x913   : > { %14374 = vst [vmem:[#allocation176_spill] sm:$0xff] %v12301_v7  ;;  %v12339_v7 = vld [vmem:[#allocation2 + $0x110] sm:$0xff] }
 0x914   : > { %v12305_v19 = vpop.permute.xlu0 %6180  ;;  %6410 = vrot.lane.b32.xlu1 %v12303_v44, %s8325_s22  ;;  %14383 = vst [vmem:[#allocation41_spill] sm:$0xff] %v12339_v7  ;;  %v12351_v44 = vld [vmem:[#allocation2 + $0x159] sm:$0xff] }
 0x915   : > { %14376 = vst [vmem:[#allocation38_spill] sm:$0xff] %v12305_v19 }
 0x916   : > { %6404 = vrot.lane.b32.xlu0 %v12309_v29, %s8325_s22  ;;  %v12313_v5 = vpop.permute.xlu1 %6178 }
 0x917   : > { %14378 = vst [vmem:[#allocation42_spill] sm:$0xff] %v12313_v5  ;;  %v12333_v5 = vld [vmem:[#allocation2 + $0x10a] sm:$0xff] }
 0x918   : > { %v12317_v39 = vpop.permute.xlu0 %6176  ;;  %6026 = vrot.lane.b32.xlu1 %v12315_v33, %s8323_s20 }
 0x919   : > { %14379 = vst [vmem:[#allocation24_spill] sm:$0xff] %v12317_v39 }
 0x91a   : > { %6220 = vrot.lane.b32.xlu0 %v12321_v15, %s8324_s21  ;;  %v12325_v19 = vpop.permute.xlu1 %6366 }
 0x91b   : > { %14380 = vst [vmem:[#allocation17_spill] sm:$0xff] %v12325_v19  ;;  %v12345_v19 = vld [vmem:[#allocation2 + $0x151] sm:$0xff] }
 0x91c   : > { %v12329_v46 = vpop.permute.xlu0 %5996  ;;  %6218 = vrot.lane.b32.xlu1 %v12327_v56, %s8324_s21 }
 0x91d   : > { %14381 = vst [vmem:[#allocation148_spill] sm:$0xff] %v12329_v46 }
 0x91e   : > { %6216 = vrot.lane.b32.xlu0 %v12333_v5, %s8324_s21  ;;  %v12337_v39 = vpop.permute.xlu1 %5998 }
 0x91f   : > { %14382 = vst [vmem:[#allocation12_spill] sm:$0xff] %v12337_v39  ;;  %v12357_v39 = vld [vmem:[#allocation2 + $0x150] sm:$0xff] }
 0x920   : > { %v12341_v57 = vpop.permute.xlu0 %6376  ;;  %6406 = vrot.lane.b32.xlu1 %v12339_v7, %s8325_s22  ;;  %14387 = vst [vmem:[#allocation73_spill] sm:$0xff] %v12357_v39  ;;  %v12363_v7 = vld [vmem:[#allocation2 + $0x15a] sm:$0xff] }
 0x921   : > { %14384 = vst [vmem:[#allocation49_spill] sm:$0xff] %v12341_v57  ;;  %14389 = vst [vmem:[#allocation79_spill] sm:$0xff] %v12363_v7 }
 0x922   : > { %6036 = vrot.lane.b32.xlu0 %v12345_v19, %s8323_s20  ;;  %v12349_v46 = vpop.permute.xlu1 %6190 }
 0x923   : > { %14385 = vst [vmem:[#allocation65_spill] sm:$0xff] %v12349_v46  ;;  %v12369_v46 = vld [vmem:[#allocation2 + $0x139] sm:$0xff] }
 0x924   : > { %v12353_v16 = vpop.permute.xlu0 %5992  ;;  %6038 = vrot.lane.b32.xlu1 %v12351_v44, %s8323_s20 }
 0x925   : > { %14386 = vst [vmem:[#allocation9_spill] sm:$0xff] %v12353_v16 }
 0x926   : > { %6416 = vrot.lane.b32.xlu0 %v12357_v39, %s8325_s22  ;;  %v12361_v57 = vpop.permute.xlu1 %6378  ;;  %v12387_v39 = vld [vmem:[#allocation2 + $0x141] sm:$0xff] }
 0x927   : > { %14388 = vst [vmem:[#allocation147_spill] sm:$0xff] %v12361_v57  ;;  %v12381_v57 = vld [vmem:[#allocation2 + $0x138] sm:$0xff] }
 0x928   : > { %v12365_v29 = vpop.permute.xlu0 %6372  ;;  %6230 = vrot.lane.b32.xlu1 %v12363_v7, %s8324_s21  ;;  %14394 = vst [vmem:[#allocation55_spill] sm:$0xff] %v12381_v57  ;;  %v12447_v7 = vld [vmem:[#allocation2 + $0x170] sm:$0xff] }
 0x929   : > { %14390 = vst [vmem:[#allocation96_spill] sm:$0xff] %v12365_v29 }
 0x92a   : > { %6032 = vrot.lane.b32.xlu0 %v12369_v46, %s8323_s20  ;;  %v12373_v16 = vpop.permute.xlu1 %5994 }
 0x92b   : > { %14391 = vst [vmem:[#allocation68_spill] sm:$0xff] %v12373_v16  ;;  %v12393_v16 = vld [vmem:[#allocation2 + $0x152] sm:$0xff] }
 0x92c   : > { %v12377_v21 = vpop.permute.xlu0 %6188  ;;  %6418 = vrot.lane.b32.xlu1 %v12375_v60, %s8325_s22  ;;  %14397 = vst [vmem:[#allocation51_spill] sm:$0xff] %v12393_v16  ;;  %v12399_v60 = vld [vmem:[#allocation2 + $0x142] sm:$0xff] }
 0x92d   : > { %14393 = vst [vmem:[#allocation56_spill] sm:$0xff] %v12377_v21 }
 0x92e   : > { %6412 = vrot.lane.b32.xlu0 %v12381_v57, %s8325_s22  ;;  %v12385_v29 = vpop.permute.xlu1 %6186  ;;  %v12411_v57 = vld [vmem:[#allocation2 + $0x140] sm:$0xff] }
 0x92f   : > { %14395 = vst [vmem:[#allocation61_spill] sm:$0xff] %v12385_v29  ;;  %v12405_v29 = vld [vmem:[#allocation2 + $0x13a] sm:$0xff]  ;;  %14401 = vst [vmem:[#allocation173_spill] sm:$0xff] %v12411_v57 }
 0x930   : > { %v12389_v37 = vpop.permute.xlu0 %6184  ;;  %6034 = vrot.lane.b32.xlu1 %v12387_v39, %s8323_s20 }
 0x931   : > { %14396 = vst [vmem:[#allocation93_spill] sm:$0xff] %v12389_v37 }
 0x932   : > { %6228 = vrot.lane.b32.xlu0 %v12393_v16, %s8324_s21  ;;  %v12397_v21 = vpop.permute.xlu1 %6374 }
 0x933   : > { %14398 = vst [vmem:[#allocation124_spill] sm:$0xff] %v12397_v21  ;;  %v12417_v21 = vld [vmem:[#allocation2 + $0x169] sm:$0xff] }
 0x934   : > { %v12401_v32 = vpop.permute.xlu0 %6004  ;;  %6226 = vrot.lane.b32.xlu1 %v12399_v60, %s8324_s21 }
 0x935   : > { %14399 = vst [vmem:[#allocation115_spill] sm:$0xff] %v12401_v32 }
 0x936   : > { %6224 = vrot.lane.b32.xlu0 %v12405_v29, %s8324_s21  ;;  %v12409_v37 = vpop.permute.xlu1 %6006 }
 0x937   : > { %14400 = vst [vmem:[#allocation111_spill] sm:$0xff] %v12409_v37  ;;  %v12429_v37 = vld [vmem:[#allocation2 + $0x168] sm:$0xff] }
 0x938   : > { %v12413_v14 = vpop.permute.xlu0 %6384  ;;  %6414 = vrot.lane.b32.xlu1 %v12411_v57, %s8325_s22  ;;  %14405 = vst [vmem:[#allocation177_spill] sm:$0xff] %v12429_v37  ;;  %v12435_v57 = vld [vmem:[#allocation2 + $0x172] sm:$0xff] }
 0x939   : > { %14402 = vst [vmem:[#allocation94_spill] sm:$0xff] %v12413_v14  ;;  %14407 = vst [vmem:[#allocation187_spill] sm:$0xff] %v12435_v57 }
 0x93a   : > { %6040 = vrot.lane.b32.xlu0 %v12417_v21, %s8323_s20  ;;  %v12421_v32 = vpop.permute.xlu1 %6198 }
 0x93b   : > { %14403 = vst [vmem:[#allocation117_spill] sm:$0xff] %v12421_v32  ;;  %v12441_v32 = vld [vmem:[#allocation2 + $0x16a] sm:$0xff] }
 0x93c   : > { %v12425_v1 = vpop.permute.xlu0 %6000  ;;  %6042 = vrot.lane.b32.xlu1 %v12423_v25, %s8323_s20 }
 0x93d   : > { %14404 = vst [vmem:[#allocation125_spill] sm:$0xff] %v12425_v1 }
 0x93e   : > { %6420 = vrot.lane.b32.xlu0 %v12429_v37, %s8325_s22  ;;  %v12433_v14 = vpop.permute.xlu1 %6386  ;;  %v12459_v37 = vld [vmem:[#allocation2 + $0x188] sm:$0xff] }
 0x93f   : > { %14406 = vst [vmem:[#allocation126_spill] sm:$0xff] %v12433_v14  ;;  %v12453_v14 = vld [vmem:[#allocation2 + $0x180] sm:$0xff] }
 0x940   : > { %v12437_v31 = vpop.permute.xlu0 %6380  ;;  %6234 = vrot.lane.b32.xlu1 %v12435_v57, %s8324_s21  ;;  %14411 = vst [vmem:[#allocation112_spill] sm:$0xff] %v12453_v14 }
 0x941   : > { %14408 = vst [vmem:[#allocation140_spill] sm:$0xff] %v12437_v31 }
 0x942   : > { %6232 = vrot.lane.b32.xlu0 %v12441_v32, %s8324_s21  ;;  %v12445_v1 = vpop.permute.xlu1 %6002  ;;  %s8333_s21 = smov 16  }
 0x943   : > { %14409 = vst [vmem:[#allocation170_spill] sm:$0xff] %v12445_v1 }
 0x944   : > { %v12449_v16 = vpop.permute.xlu0 %6196  ;;  %6422 = vrot.lane.b32.xlu1 %v12447_v7, %s8325_s22 }
 0x945   : > { %14410 = vst [vmem:[#allocation150_spill] sm:$0xff] %v12449_v16 }
 0x946   : > { %6424 = vrot.lane.b32.xlu0 %v12453_v14, %s8325_s22  ;;  %v12457_v31 = vpop.permute.xlu1 %6194 }
 0x947   : > { %14412 = vst [vmem:[#allocation23_spill] sm:$0xff] %v12457_v31 }
 0x948   : > { %v12461_v57 = vpop.permute.xlu0 %6192  ;;  %6426 = vrot.lane.b32.xlu1 %v12459_v37, %s8325_s22 }
 0x94a   : > { %6556 = vrot.lane.b32.xlu0 %v12044_v53, %s8326_s23  ;;  %v12467_v16 = vpop.permute.xlu1 %6382 }
 0x94b   : > { %14413 = vst [vmem:[#allocation89_spill] sm:$0xff] %v12467_v16 }
 0x94c   : > { %v12469_v1 = vpop.permute.xlu0 %6012  ;;  %6558 = vrot.lane.b32.xlu1 %v12054_v55, %s8326_s23 }
 0x94e   : > { %6560 = vrot.lane.b32.xlu0 %v12027_v0, %s8326_s23  ;;  %v12475_v31 = vpop.permute.xlu1 %6014 }
 0x950   : > { %v12477_v14 = vpop.permute.xlu0 %6392  ;;  %6562 = vrot.lane.b32.xlu1 %v12033_v62, %s8326_s23 }
 0x951   : > { %14414 = vst [vmem:[#allocation165_spill] sm:$0xff] %v12477_v14 }
 0x952   : > { %6564 = vrot.lane.b32.xlu0 %v12092_v48, %s8326_s23  ;;  %v12483_v53 = vpop.permute.xlu1 %6206 }
 0x954   : > { %v12485_v16 = vpop.permute.xlu0 %6008  ;;  %6566 = vrot.lane.b32.xlu1 %v12102_v47, %s8326_s23 }
 0x956   : > { %6568 = vrot.lane.b32.xlu0 %v12075_v20, %s8326_s23  ;;  %v12491_v0 = vpop.permute.xlu1 %6394 }
 0x957   : > { %14415 = vst [vmem:[#allocation36_spill] sm:$0xff] %v12491_v0 }
 0x958   : > { %v12493_v55 = vpop.permute.xlu0 %6388  ;;  %6570 = vrot.lane.b32.xlu1 %v12081_v6, %s8326_s23 }
 0x95a   : > { %6572 = vrot.lane.b32.xlu0 %v12140_v12, %s8326_s23  ;;  %v12499_v62 = vpop.permute.xlu1 %6010 }
 0x95c   : > { %v12501_v48 = vpop.permute.xlu0 %6204  ;;  %6574 = vrot.lane.b32.xlu1 %v12149_v61, %s8326_s23 }
 0x95e   : > { %6576 = vrot.lane.b32.xlu0 %v12123_v35, %s8326_s23  ;;  %v12507_v20 = vpop.permute.xlu1 %6202 }
 0x960   : > { %v12509_v47 = vpop.permute.xlu0 %6200  ;;  %6578 = vrot.lane.b32.xlu1 %v12129_v8, %s8326_s23 }
 0x962   : > { %6580 = vrot.lane.b32.xlu0 %v12182_v22, %s8326_s23  ;;  %v12515_v6 = vpop.permute.xlu1 %6390 }
 0x964   : > { %v12517_v12 = vpop.permute.xlu0 %6020  ;;  %6582 = vrot.lane.b32.xlu1 %v12191_v43, %s8326_s23 }
 0x965   : > { %14416 = vst [vmem:[#allocation151_spill] sm:$0xff] %v12517_v12 }
 0x966   : > { %6584 = vrot.lane.b32.xlu0 %v12169_v63, %s8326_s23  ;;  %v12523_v35 = vpop.permute.xlu1 %6022 }
 0x967   : > { %14417 = vst [vmem:[#allocation178_spill] sm:$0xff] %v12523_v35  ;;  %v14597_v35 = vld [vmem:[#allocation25_spill] sm:$0xff] }
 0x968   : > { %v12525_v61 = vpop.permute.xlu0 %6400  ;;  %6586 = vrot.lane.b32.xlu1 %v12173_v17, %s8326_s23 }
 0x969   : > { %14418 = vst [vmem:[#allocation84_spill] sm:$0xff] %v12525_v61 }
 0x96a   : > { %6588 = vrot.lane.b32.xlu0 %v12229_v36, %s8326_s23  ;;  %v12531_v8 = vpop.permute.xlu1 %6214 }
 0x96b   : > { %14419 = vst [vmem:[#allocation136_spill] sm:$0xff] %v12531_v8  ;;  %v14586_v8 = vld [vmem:[#allocation21_spill] sm:$0xff] }
 0x96c   : > { %v12533_v22 = vpop.permute.xlu0 %6016  ;;  %6590 = vrot.lane.b32.xlu1 %v12245_v26, %s8326_s23 }
 0x96d   : > { %14420 = vst [vmem:[#allocation34_spill] sm:$0xff] %v12533_v22 }
 0x96e   : > { %6592 = vrot.lane.b32.xlu0 %v12211_v45, %s8326_s23  ;;  %v12539_v63 = vpop.permute.xlu1 %6402 }
 0x96f   : > { %14421 = vst [vmem:[#allocation106_spill] sm:$0xff] %v12539_v63  ;;  %v7261_v63 = vld [vmem:[#allocation2 + $0x3a] sm:$0xff] }
 0x970   : > { %v12541_v43 = vpop.permute.xlu0 %6396  ;;  %6594 = vrot.lane.b32.xlu1 %v12215_v4, %s8326_s23 }
 0x971   : > { %14422 = vst [vmem:[#allocation116_spill] sm:$0xff] %v12541_v43 }
 0x972   : > { %6596 = vrot.lane.b32.xlu0 %v12297_v28, %s8326_s23  ;;  %v12547_v17 = vpop.permute.xlu1 %6018 }
 0x973   : > { %14423 = vst [vmem:[#allocation127_spill] sm:$0xff] %v12547_v17  ;;  %v8284_v17 = vld [vmem:[#allocation2 + $0x20] sm:$0xff] }
 0x974   : > { %v12549_v36 = vpop.permute.xlu0 %6212  ;;  %6598 = vrot.lane.b32.xlu1 %v12315_v33, %s8326_s23 }
 0x975   : > { %14424 = vst [vmem:[#allocation97_spill] sm:$0xff] %v12549_v36  ;;  %v7267_v36 = vld [vmem:[#allocation2 + $0x82] sm:$0xff] }
 0x976   : > { %6600 = vrot.lane.b32.xlu0 %v12273_v54, %s8326_s23  ;;  %v12555_v45 = vpop.permute.xlu1 %6210 }
 0x977   : > { %14425 = vst [vmem:[#allocation27_spill] sm:$0xff] %v12555_v45 }
 0x978   : > { %v12557_v26 = vpop.permute.xlu0 %6208  ;;  %6602 = vrot.lane.b32.xlu1 %v12279_v40, %s8326_s23 }
 0x979   : > { %14426 = vst [vmem:[#allocation110_spill] sm:$0xff] %v12557_v26 }
 0x97a   : > { %6604 = vrot.lane.b32.xlu0 %v12369_v46, %s8326_s23  ;;  %v12563_v4 = vpop.permute.xlu1 %6398 }
 0x97b   : > { %14427 = vst [vmem:[#allocation171_spill] sm:$0xff] %v12563_v4  ;;  %v7263_v4 = vld [vmem:[#allocation2 + $0x52] sm:$0xff] }
 0x97c   : > { %v12565_v28 = vpop.permute.xlu0 %6028  ;;  %6606 = vrot.lane.b32.xlu1 %v12387_v39, %s8326_s23  ;;  %v12585_v39 = vld [vmem:[#allocation2 + $0x181] sm:$0xff] }
 0x97d   : > { %14428 = vst [vmem:[#allocation100_spill] sm:$0xff] %v12565_v28  ;;  %v7075_v28 = vld [vmem:[#allocation2 + $0x81] sm:$0xff] }
 0x97e   : > { %6608 = vrot.lane.b32.xlu0 %v12345_v19, %s8326_s23  ;;  %v12571_v33 = vpop.permute.xlu1 %6030 }
 0x97f   : > { %14429 = vst [vmem:[#allocation179_spill] sm:$0xff] %v12571_v33 }
 0x980   : > { %v12573_v54 = vpop.permute.xlu0 %6408  ;;  %6610 = vrot.lane.b32.xlu1 %v12351_v44, %s8326_s23 }
 0x981   : > { %14430 = vst [vmem:[#allocation157_spill] sm:$0xff] %v12573_v54  ;;  %v12591_v54 = vld [vmem:[#allocation2 + $0x189] sm:$0xff] }
 0x982   : > { %6612 = vrot.lane.b32.xlu0 %v12417_v21, %s8326_s23  ;;  %v12579_v46 = vpop.permute.xlu1 %6222 }
 0x983   : > { %14431 = vst [vmem:[#allocation4_spill] sm:$0xff] %v12579_v46 }
 0x984   : > { %v12581_v40 = vpop.permute.xlu0 %6024  ;;  %6614 = vrot.lane.b32.xlu1 %v12423_v25, %s8326_s23 }
 0x985   : > { %14432 = vst [vmem:[#allocation113_spill] sm:$0xff] %v12581_v40 }
 0x986   : > { %6616 = vrot.lane.b32.xlu0 %v12585_v39, %s8326_s23  ;;  %v12589_v19 = vpop.permute.xlu1 %6410 }
 0x987   : > { %14433 = vst [vmem:[#allocation6_spill] sm:$0xff] %v12589_v19 }
 0x988   : > { %v12593_v44 = vpop.permute.xlu0 %6404  ;;  %6618 = vrot.lane.b32.xlu1 %v12591_v54, %s8326_s23 }
 0x989   : > { %14434 = vst [vmem:[#allocation99_spill] sm:$0xff] %v12593_v44 }
 0x98a   : > { %6748 = vrot.lane.b32.xlu0 %v12070_v59, %s8327_s24  ;;  %v12599_v21 = vpop.permute.xlu1 %6026 }
 0x98b   : > { %14435 = vst [vmem:[#allocation128_spill] sm:$0xff] %v12599_v21 }
 0x98c   : > { %v12601_v25 = vpop.permute.xlu0 %6220  ;;  %6750 = vrot.lane.b32.xlu1 %v12064_v51, %s8327_s24 }
 0x98d   : > { %14436 = vst [vmem:[#allocation184_spill] sm:$0xff] %v12601_v25 }
 0x98e   : > { %6752 = vrot.lane.b32.xlu0 %v12058_v50, %s8327_s24  ;;  %v12607_v19 = vpop.permute.xlu1 %6218 }
 0x98f   : > { %14437 = vst [vmem:[#allocation161_spill] sm:$0xff] %v12607_v19 }
 0x990   : > { %v12609_v40 = vpop.permute.xlu0 %6216  ;;  %6754 = vrot.lane.b32.xlu1 %v12040_v23, %s8327_s24 }
 0x991   : > { %14438 = vst [vmem:[#allocation98_spill] sm:$0xff] %v12609_v40 }
 0x992   : > { %6756 = vrot.lane.b32.xlu0 %v12118_v24, %s8327_s24  ;;  %v12615_v59 = vpop.permute.xlu1 %6406 }
 0x993   : > { %14439 = vst [vmem:[#allocation146_spill] sm:$0xff] %v12615_v59 }
 0x994   : > { %v12617_v44 = vpop.permute.xlu0 %6036  ;;  %6758 = vrot.lane.b32.xlu1 %v12112_v49, %s8327_s24 }
 0x995   : > { %14440 = vst [vmem:[#allocation120_spill] sm:$0xff] %v12617_v44  ;;  %v14478_v44 = vld [vmem:[#allocation28_spill] sm:$0xff] }
 0x996   : > { %6760 = vrot.lane.b32.xlu0 %v12106_v42, %s8327_s24  ;;  %v12623_v50 = vpop.permute.xlu1 %6038 }
 0x997   : > { %14441 = vst [vmem:[#allocation180_spill] sm:$0xff] %v12623_v50  ;;  %v6889_v50 = vld [vmem:[#allocation2 + $0xc8] sm:$0xff] }
 0x998   : > { %v12625_v51 = vpop.permute.xlu0 %6416  ;;  %6762 = vrot.lane.b32.xlu1 %v12088_v38, %s8327_s24 }
 0x999   : > { %14442 = vst [vmem:[#allocation76_spill] sm:$0xff] %v12625_v51 }
 0x99a   : > { %6764 = vrot.lane.b32.xlu0 %v12161_v18, %s8327_s24  ;;  %v12631_v23 = vpop.permute.xlu1 %6230 }
 0x99b   : > { %14443 = vst [vmem:[#allocation188_spill] sm:$0xff] %v12631_v23 }
 0x99c   : > { %v12633_v24 = vpop.permute.xlu0 %6032  ;;  %6766 = vrot.lane.b32.xlu1 %v12157_v41, %s8327_s24 }
 0x99d   : > { %14444 = vst [vmem:[#allocation141_spill] sm:$0xff] %v12633_v24 }
 0x99e   : > { %6768 = vrot.lane.b32.xlu0 %v12153_v27, %s8327_s24  ;;  %v12639_v42 = vpop.permute.xlu1 %6418 }
 0x99f   : > { %14445 = vst [vmem:[#allocation172_spill] sm:$0xff] %v12639_v42 }
 0x9a0   : > { %v12641_v49 = vpop.permute.xlu0 %6412  ;;  %6770 = vrot.lane.b32.xlu1 %v12136_v9, %s8327_s24 }
 0x9a1   : > { %14446 = vst [vmem:[#allocation153_spill] sm:$0xff] %v12641_v49  ;;  %v6885_v49 = vld [vmem:[#allocation2 + $0x98] sm:$0xff] }
 0x9a2   : > { %6772 = vrot.lane.b32.xlu0 %v12203_v34, %s8327_s24  ;;  %v12647_v38 = vpop.permute.xlu1 %6034 }
 0x9a3   : > { %14447 = vst [vmem:[#allocation58_spill] sm:$0xff] %v12647_v38  ;;  %v14472_v38 = vld [vmem:[#allocation7_spill] sm:$0xff] }
 0x9a4   : > { %v12649_v18 = vpop.permute.xlu0 %6228  ;;  %6774 = vrot.lane.b32.xlu1 %v12199_v10, %s8327_s24 }
 0x9a5   : > { %14448 = vst [vmem:[#allocation75_spill] sm:$0xff] %v12649_v18  ;;  %v6880_v18 = vld [vmem:[#allocation2 + $0x60] sm:$0xff] }
 0x9a6   : > { %6776 = vrot.lane.b32.xlu0 %v12195_v58, %s8327_s24  ;;  %v12655_v27 = vpop.permute.xlu1 %6226 }
 0x9a7   : > { %14449 = vst [vmem:[#allocation78_spill] sm:$0xff] %v12655_v27 }
 0x9a8   : > { %v12657_v41 = vpop.permute.xlu0 %6224  ;;  %6778 = vrot.lane.b32.xlu1 %v12178_v13, %s8327_s24 }
 0x9a9   : > { %14450 = vst [vmem:[#allocation166_spill] sm:$0xff] %v12657_v41 }
 0x9aa   : > { %6780 = vrot.lane.b32.xlu0 %v12261_v3, %s8327_s24  ;;  %v12663_v9 = vpop.permute.xlu1 %6414 }
 0x9ab   : > { %14451 = vst [vmem:[#allocation174_spill] sm:$0xff] %v12663_v9  ;;  %v6881_v9 = vld [vmem:[#allocation2 + $0x68] sm:$0xff] }
 0x9ac   : > { %v12665_v34 = vpop.permute.xlu0 %6040  ;;  %6782 = vrot.lane.b32.xlu1 %v12255_v2, %s8327_s24 }
 0x9ad   : > { %14452 = vst [vmem:[#allocation72_spill] sm:$0xff] %v12665_v34  ;;  %v6879_v34 = vld [vmem:[#allocation2 + $0x50] sm:$0xff] }
 0x9ae   : > { %6784 = vrot.lane.b32.xlu0 %v12249_v11, %s8327_s24  ;;  %v12671_v58 = vpop.permute.xlu1 %6042 }
 0x9af   : > { %14453 = vst [vmem:[#allocation133_spill] sm:$0xff] %v12671_v58  ;;  %v6878_v58 = vld [vmem:[#allocation2 + $0x48] sm:$0xff] }
 0x9b0   : > { %v12673_v10 = vpop.permute.xlu0 %6420  ;;  %6786 = vrot.lane.b32.xlu1 %v12223_v52, %s8327_s24 }
 0x9b1   : > { %14454 = vst [vmem:[#allocation101_spill] sm:$0xff] %v12673_v10 }
 0x9b2   : > { %6788 = vrot.lane.b32.xlu0 %v12333_v5, %s8327_s24  ;;  %v12679_v13 = vpop.permute.xlu1 %6234 }
 0x9b3   : > { %14455 = vst [vmem:[#allocation137_spill] sm:$0xff] %v12679_v13 }
 0x9b4   : > { %v12681_v3 = vpop.permute.xlu0 %6232  ;;  %6790 = vrot.lane.b32.xlu1 %v12327_v56, %s8327_s24  ;;  %v14460_v56 = vld [vmem:[#allocation51_spill] sm:$0xff] }
 0x9b5   : > { %14456 = vst [vmem:[#allocation3_spill] sm:$0xff] %v12681_v3 }
 0x9b6   : > { %6792 = vrot.lane.b32.xlu0 %v12321_v15, %s8327_s24  ;;  %v12687_v11 = vpop.permute.xlu1 %6422 }
 0x9b7   : > { %14457 = vst [vmem:[#allocation69_spill] sm:$0xff] %v12687_v11  ;;  %v12723_v11 = vld [vmem:[#allocation2 + $0x18a] sm:$0xff] }
 0x9b8   : > { %v12689_v2 = vpop.permute.xlu0 %6424  ;;  %6794 = vrot.lane.b32.xlu1 %v12291_v30, %s8327_s24 }
 0x9b9   : > { %14458 = vst [vmem:[#allocation129_spill] sm:$0xff] %v12689_v2  ;;  %v14461_v2 = vld [vmem:[#allocation79_spill] sm:$0xff] }
 0x9ba   : > { %6796 = vrot.lane.b32.xlu0 %v12405_v29, %s8327_s24  ;;  %v12695_v52 = vpop.permute.xlu1 %6426 }
 0x9bb   : > { %14459 = vst [vmem:[#allocation50_spill] sm:$0xff] %v12695_v52  ;;  %v14462_v52 = vld [vmem:[#allocation187_spill] sm:$0xff] }
 0x9bc   : > { %v12697_v5 = vpop.permute.xlu0 %6556  ;;  %6798 = vrot.lane.b32.xlu1 %v12399_v60, %s8327_s24  ;;  %v12717_v60 = vld [vmem:[#allocation2 + $0x182] sm:$0xff] }
 0x9be   : > { %6800 = vrot.lane.b32.xlu0 %v14460_v56, %s8327_s24  ;;  %v12703_v15 = vpop.permute.xlu1 %6558 }
 0x9c0   : > { %v12705_v13 = vpop.permute.xlu0 %6560  ;;  %6802 = vrot.lane.b32.xlu1 %v14461_v2, %s8327_s24 }
 0x9c2   : > { %6804 = vrot.lane.b32.xlu0 %v12441_v32, %s8327_s24  ;;  %v12711_v29 = vpop.permute.xlu1 %6562  ;;  %v6876_v32 = vld [vmem:[#allocation2 + $0x30] sm:$0xff] }
 0x9c4   : > { %v12713_v30 = vpop.permute.xlu0 %6564  ;;  %6806 = vrot.lane.b32.xlu1 %v14462_v52, %s8327_s24  ;;  %v6877_v52 = vld [vmem:[#allocation2 + $0x38] sm:$0xff] }
 0x9c6   : > { %6808 = vrot.lane.b32.xlu0 %v12717_v60, %s8327_s24  ;;  %v12721_v56 = vpop.permute.xlu1 %6566 }
 0x9c8   : > { %v12725_v2 = vpop.permute.xlu0 %6568  ;;  %6810 = vrot.lane.b32.xlu1 %v12723_v11, %s8327_s24 }
 0x9ca   : > { %6940 = vrot.lane.b32.xlu0 %v6876_v32, %s8328_s27  ;;  %v12730_v3 = vpop.permute.xlu1 %6570 }
 0x9cb   : > { %14463 = vst [vmem:[#allocation152_spill] sm:$0xff] %v12730_v3  ;;  %v14612_v3 = vld [vmem:[#allocation111_spill] sm:$0xff] }
 0x9cc   : > { %v12732_v10 = vpop.permute.xlu0 %6572  ;;  %6942 = vrot.lane.b32.xlu1 %v6877_v52, %s8328_s27  ;;  %v14469_v52 = vld [vmem:[#allocation14_spill] sm:$0xff] }
 0x9cd   : > { %14464 = vst [vmem:[#allocation162_spill] sm:$0xff] %v12732_v10  ;;  %v14595_v10 = vld [vmem:[#allocation38_spill] sm:$0xff] }
 0x9ce   : > { %6944 = vrot.lane.b32.xlu0 %v6878_v58, %s8328_s27  ;;  %v12736_v42 = vpop.permute.xlu1 %6574 }
 0x9cf   : > { %14465 = vst [vmem:[#allocation80_spill] sm:$0xff] %v12736_v42 }
 0x9d0   : > { %v12738_v51 = vpop.permute.xlu0 %6576  ;;  %6946 = vrot.lane.b32.xlu1 %v6879_v34, %s8328_s27  ;;  %v6884_v34 = vld [vmem:[#allocation2 + $0x90] sm:$0xff] }
 0x9d1   : > { %14466 = vst [vmem:[#allocation22_spill] sm:$0xff] %v12738_v51 }
 0x9d2   : > { %6948 = vrot.lane.b32.xlu0 %v6880_v18, %s8328_s27  ;;  %v12742_v32 = vpop.permute.xlu1 %6578 }
 0x9d3   : > { %14467 = vst [vmem:[#allocation26_spill] sm:$0xff] %v12742_v32 }
 0x9d4   : > { %v12744_v27 = vpop.permute.xlu0 %6580  ;;  %6950 = vrot.lane.b32.xlu1 %v6881_v9, %s8328_s27  ;;  %v14475_v9 = vld [vmem:[#allocation13_spill] sm:$0xff] }
 0x9d5   : > { %14468 = vst [vmem:[#allocation181_spill] sm:$0xff] %v12744_v27  ;;  %v7265_v27 = vld [vmem:[#allocation2 + $0x6a] sm:$0xff] }
 0x9d6   : > { %6952 = vrot.lane.b32.xlu0 %v14469_v52, %s8328_s27  ;;  %v12749_v58 = vpop.permute.xlu1 %6582 }
 0x9d7   : > { %14470 = vst [vmem:[#allocation158_spill] sm:$0xff] %v12749_v58 }
 0x9d8   : > { %v12751_v41 = vpop.permute.xlu0 %6584  ;;  %6954 = vrot.lane.b32.xlu1 %v14472_v38, %s8328_s27  ;;  %v6888_v38 = vld [vmem:[#allocation2 + $0xc0] sm:$0xff] }
 0x9d9   : > { %14471 = vst [vmem:[#allocation189_spill] sm:$0xff] %v12751_v41  ;;  %v7077_v41 = vld [vmem:[#allocation2 + $0x99] sm:$0xff] }
 0x9da   : > { %6956 = vrot.lane.b32.xlu0 %v6884_v34, %s8328_s27  ;;  %v12756_v18 = vpop.permute.xlu1 %6586 }
 0x9db   : > { %14473 = vst [vmem:[#allocation114_spill] sm:$0xff] %v12756_v18  ;;  %v7073_v18 = vld [vmem:[#allocation2 + $0x69] sm:$0xff] }
 0x9dc   : > { %v12758_v24 = vpop.permute.xlu0 %6588  ;;  %6958 = vrot.lane.b32.xlu1 %v6885_v49, %s8328_s27  ;;  %v14481_v49 = vld [vmem:[#allocation20_spill] sm:$0xff] }
 0x9dd   : > { %14474 = vst [vmem:[#allocation10_spill] sm:$0xff] %v12758_v24  ;;  %v7071_v24 = vld [vmem:[#allocation2 + $0x51] sm:$0xff] }
 0x9de   : > { %6960 = vrot.lane.b32.xlu0 %v14475_v9, %s8328_s27  ;;  %v12763_v52 = vpop.permute.xlu1 %6590 }
 0x9df   : > { %14476 = vst [vmem:[#allocation53_spill] sm:$0xff] %v12763_v52  ;;  %v7069_v52 = vld [vmem:[#allocation2 + $0x39] sm:$0xff] }
 0x9e0   : > { %v12765_v23 = vpop.permute.xlu0 %6592  ;;  %6962 = vrot.lane.b32.xlu1 %v14478_v44, %s8328_s27  ;;  %v14485_v44 = vld [vmem:[#allocation32_spill] sm:$0xff] }
 0x9e1   : > { %14477 = vst [vmem:[#allocation130_spill] sm:$0xff] %v12765_v23  ;;  %v14484_v23 = vld [vmem:[#allocation48_spill] sm:$0xff] }
 0x9e2   : > { %6964 = vrot.lane.b32.xlu0 %v6888_v38, %s8328_s27  ;;  %v12770_v34 = vpop.permute.xlu1 %6594 }
 0x9e3   : > { %14479 = vst [vmem:[#allocation185_spill] sm:$0xff] %v12770_v34 }
 0x9e4   : > { %v12772_v59 = vpop.permute.xlu0 %6596  ;;  %6966 = vrot.lane.b32.xlu1 %v6889_v50, %s8328_s27  ;;  %v14489_v50 = vld [vmem:[#allocation43_spill] sm:$0xff] }
 0x9e5   : > { %14480 = vst [vmem:[#allocation90_spill] sm:$0xff] %v12772_v59  ;;  %v14488_v59 = vld [vmem:[#allocation8_spill] sm:$0xff] }
 0x9e6   : > { %6968 = vrot.lane.b32.xlu0 %v14481_v49, %s8328_s27  ;;  %v12777_v9 = vpop.permute.xlu1 %6598 }
 0x9e7   : > { %14482 = vst [vmem:[#allocation142_spill] sm:$0xff] %v12777_v9 }
 0x9e8   : > { %v12779_v40 = vpop.permute.xlu0 %6600  ;;  %6970 = vrot.lane.b32.xlu1 %v14484_v23, %s8328_s27  ;;  %v14493_v23 = vld [vmem:[#allocation15_spill] sm:$0xff] }
 0x9e9   : > { %14483 = vst [vmem:[#allocation33_spill] sm:$0xff] %v12779_v40  ;;  %v14492_v40 = vld [vmem:[#allocation41_spill] sm:$0xff] }
 0x9ea   : > { %6972 = vrot.lane.b32.xlu0 %v14485_v44, %s8328_s27  ;;  %v12785_v38 = vpop.permute.xlu1 %6602 }
 0x9eb   : > { %14486 = vst [vmem:[#allocation104_spill] sm:$0xff] %v12785_v38 }
 0x9ec   : > { %v12787_v34 = vpop.permute.xlu0 %6604  ;;  %6974 = vrot.lane.b32.xlu1 %v14488_v59, %s8328_s27  ;;  %v14497_v59 = vld [vmem:[#allocation55_spill] sm:$0xff] }
 0x9ed   : > { %14487 = vst [vmem:[#allocation77_spill] sm:$0xff] %v12787_v34  ;;  %v14496_v34 = vld [vmem:[#allocation30_spill] sm:$0xff] }
 0x9ee   : > { %6976 = vrot.lane.b32.xlu0 %v14489_v50, %s8328_s27  ;;  %v12793_v49 = vpop.permute.xlu1 %6606 }
 0x9ef   : > { %14490 = vst [vmem:[#allocation105_spill] sm:$0xff] %v12793_v49 }
 0x9f0   : > { %v12795_v9 = vpop.permute.xlu0 %6608  ;;  %6978 = vrot.lane.b32.xlu1 %v14492_v40, %s8328_s27  ;;  %v14501_v40 = vld [vmem:[#allocation73_spill] sm:$0xff] }
 0x9f1   : > { %14491 = vst [vmem:[#allocation85_spill] sm:$0xff] %v12795_v9  ;;  %v14500_v9 = vld [vmem:[#allocation173_spill] sm:$0xff] }
 0x9f2   : > { %6980 = vrot.lane.b32.xlu0 %v14493_v23, %s8328_s27  ;;  %v12801_v44 = vpop.permute.xlu1 %6610 }
 0x9f3   : > { %14494 = vst [vmem:[#allocation44_spill] sm:$0xff] %v12801_v44 }
 0x9f4   : > { %v12803_v38 = vpop.permute.xlu0 %6612  ;;  %6982 = vrot.lane.b32.xlu1 %v14496_v34, %s8328_s27  ;;  %v14504_v34 = vld [vmem:[#allocation177_spill] sm:$0xff] }
 0x9f5   : > { %14495 = vst [vmem:[#allocation83_spill] sm:$0xff] %v12803_v38  ;;  %v14503_v38 = vld [vmem:[#allocation108_spill] sm:$0xff] }
 0x9f6   : > { %6984 = vrot.lane.b32.xlu0 %v14497_v59, %s8328_s27  ;;  %v12809_v50 = vpop.permute.xlu1 %6614 }
 0x9f7   : > { %14498 = vst [vmem:[#allocation138_spill] sm:$0xff] %v12809_v50 }
 0x9f8   : > { %v12811_v49 = vpop.permute.xlu0 %6616  ;;  %6986 = vrot.lane.b32.xlu1 %v14500_v9, %s8328_s27  ;;  %v14505_v9 = vld [vmem:[#allocation112_spill] sm:$0xff] }
 0x9f9   : > { %14499 = vst [vmem:[#allocation167_spill] sm:$0xff] %v12811_v49 }
 0x9fa   : > { %6988 = vrot.lane.b32.xlu0 %v14501_v40, %s8328_s27  ;;  %v12817_v23 = vpop.permute.xlu1 %6618 }
 0x9fb   : > { %14502 = vst [vmem:[#allocation62_spill] sm:$0xff] %v12817_v23  ;;  %v6906_v23 = vld [vmem:[#allocation2 + $0x198] sm:$0xff] }
 0x9fc   : > { %v12819_v44 = vpop.permute.xlu0 %6748  ;;  %6990 = vrot.lane.b32.xlu1 %v14503_v38, %s8328_s27  ;;  %v6907_v38 = vld [vmem:[#allocation2 + $0x1a0] sm:$0xff] }
 0x9fe   : > { %6992 = vrot.lane.b32.xlu0 %v14504_v34, %s8328_s27  ;;  %v12825_v59 = vpop.permute.xlu1 %6750 }
 0xa00   : > { %v12827_v50 = vpop.permute.xlu0 %6752  ;;  %6994 = vrot.lane.b32.xlu1 %v12447_v7, %s8328_s27  ;;  %v7068_v7 = vld [vmem:[#allocation2 + $0x31] sm:$0xff] }
 0xa02   : > { %6996 = vrot.lane.b32.xlu0 %v14505_v9, %s8328_s27  ;;  %v12833_v40 = vpop.permute.xlu1 %6754 }
 0xa04   : > { %v12835_v49 = vpop.permute.xlu0 %6756  ;;  %6998 = vrot.lane.b32.xlu1 %v12459_v37, %s8328_s27  ;;  %v7070_v37 = vld [vmem:[#allocation2 + $0x49] sm:$0xff] }
 0xa06   : > { %7000 = vrot.lane.b32.xlu0 %v6906_v23, %s8328_s27  ;;  %v12840_v34 = vpop.permute.xlu1 %6758 }
 0xa08   : > { %v12842_v25 = vpop.permute.xlu0 %6760  ;;  %7002 = vrot.lane.b32.xlu1 %v6907_v38, %s8328_s27  ;;  %v7072_v38 = vld [vmem:[#allocation2 + $0x61] sm:$0xff] }
 0xa09   : > { %14506 = vst [vmem:[#allocation86_spill] sm:$0xff] %v12842_v25 }
 0xa0a   : > { %7132 = vrot.lane.b32.xlu0 %v7068_v7, %s8329_s28  ;;  %v12846_v9 = vpop.permute.xlu1 %6762 }
 0xa0b   : > { %14507 = vst [vmem:[#allocation163_spill] sm:$0xff] %v12846_v9  ;;  %v14592_v9 = vld [vmem:[#allocation18_spill] sm:$0xff] }
 0xa0c   : > { %v12848_v19 = vpop.permute.xlu0 %6764  ;;  %7134 = vrot.lane.b32.xlu1 %v7069_v52, %s8329_s28  ;;  %v7074_v52 = vld [vmem:[#allocation2 + $0x79] sm:$0xff] }
 0xa0d   : > { %14508 = vst [vmem:[#allocation19_spill] sm:$0xff] %v12848_v19  ;;  %v14584_v19 = vld [vmem:[#allocation42_spill] sm:$0xff] }
 0xa0e   : > { %7136 = vrot.lane.b32.xlu0 %v7070_v37, %s8329_s28  ;;  %v12852_v23 = vpop.permute.xlu1 %6766 }
 0xa0f   : > { %14509 = vst [vmem:[#allocation40_spill] sm:$0xff] %v12852_v23 }
 0xa10   : > { %v12854_v21 = vpop.permute.xlu0 %6768  ;;  %7138 = vrot.lane.b32.xlu1 %v7071_v24, %s8329_s28  ;;  %v7076_v24 = vld [vmem:[#allocation2 + $0x91] sm:$0xff] }
 0xa11   : > { %14510 = vst [vmem:[#allocation182_spill] sm:$0xff] %v12854_v21 }
 0xa12   : > { %7140 = vrot.lane.b32.xlu0 %v7072_v38, %s8329_s28  ;;  %v12858_v7 = vpop.permute.xlu1 %6770 }
 0xa13   : > { %14511 = vst [vmem:[#allocation63_spill] sm:$0xff] %v12858_v7 }
 0xa14   : > { %v12860_v46 = vpop.permute.xlu0 %6772  ;;  %7142 = vrot.lane.b32.xlu1 %v7073_v18, %s8329_s28  ;;  %v7078_v18 = vld [vmem:[#allocation2 + $0xa9] sm:$0xff] }
 0xa15   : > { %14512 = vst [vmem:[#allocation134_spill] sm:$0xff] %v12860_v46 }
 0xa16   : > { %7144 = vrot.lane.b32.xlu0 %v7074_v52, %s8329_s28  ;;  %v12864_v37 = vpop.permute.xlu1 %6774 }
 0xa17   : > { %14513 = vst [vmem:[#allocation190_spill] sm:$0xff] %v12864_v37  ;;  %v7079_v37 = vld [vmem:[#allocation2 + $0xb1] sm:$0xff] }
 0xa18   : > { %v12866_v61 = vpop.permute.xlu0 %6776  ;;  %7146 = vrot.lane.b32.xlu1 %v7075_v28, %s8329_s28  ;;  %v7080_v28 = vld [vmem:[#allocation2 + $0xc1] sm:$0xff] }
 0xa19   : > { %14514 = vst [vmem:[#allocation118_spill] sm:$0xff] %v12866_v61 }
 0xa1a   : > { %7148 = vrot.lane.b32.xlu0 %v7076_v24, %s8329_s28  ;;  %v12870_v38 = vpop.permute.xlu1 %6778 }
 0xa1b   : > { %14515 = vst [vmem:[#allocation45_spill] sm:$0xff] %v12870_v38  ;;  %v7081_v38 = vld [vmem:[#allocation2 + $0xc9] sm:$0xff] }
 0xa1c   : > { %v12872_v33 = vpop.permute.xlu0 %6780  ;;  %7150 = vrot.lane.b32.xlu1 %v7077_v41, %s8329_s28  ;;  %v7082_v41 = vld [vmem:[#allocation2 + $0xd9] sm:$0xff] }
 0xa1d   : > { %14516 = vst [vmem:[#allocation155_spill] sm:$0xff] %v12872_v33 }
 0xa1e   : > { %7152 = vrot.lane.b32.xlu0 %v7078_v18, %s8329_s28  ;;  %v12876_v52 = vpop.permute.xlu1 %6782 }
 0xa1f   : > { %14517 = vst [vmem:[#allocation67_spill] sm:$0xff] %v12876_v52  ;;  %v7083_v52 = vld [vmem:[#allocation2 + $0xe1] sm:$0xff] }
 0xa20   : > { %v12878_v46 = vpop.permute.xlu0 %6784  ;;  %7154 = vrot.lane.b32.xlu1 %v7079_v37, %s8329_s28  ;;  %v7084_v37 = vld [vmem:[#allocation2 + $0xf1] sm:$0xff] }
 0xa21   : > { %14518 = vst [vmem:[#allocation159_spill] sm:$0xff] %v12878_v46 }
 0xa22   : > { %7156 = vrot.lane.b32.xlu0 %v7080_v28, %s8329_s28  ;;  %v12882_v24 = vpop.permute.xlu1 %6786 }
 0xa23   : > { %14519 = vst [vmem:[#allocation91_spill] sm:$0xff] %v12882_v24  ;;  %v7085_v24 = vld [vmem:[#allocation2 + $0xf9] sm:$0xff] }
 0xa24   : > { %v12884_v61 = vpop.permute.xlu0 %6788  ;;  %7158 = vrot.lane.b32.xlu1 %v7081_v38, %s8329_s28  ;;  %v7086_v38 = vld [vmem:[#allocation2 + $0x109] sm:$0xff] }
 0xa25   : > { %14520 = vst [vmem:[#allocation102_spill] sm:$0xff] %v12884_v61 }
 0xa26   : > { %7160 = vrot.lane.b32.xlu0 %v7082_v41, %s8329_s28  ;;  %v12888_v18 = vpop.permute.xlu1 %6790 }
 0xa27   : > { %14521 = vst [vmem:[#allocation122_spill] sm:$0xff] %v12888_v18  ;;  %v7087_v18 = vld [vmem:[#allocation2 + $0x111] sm:$0xff] }
 0xa28   : > { %v12890_v33 = vpop.permute.xlu0 %6792  ;;  %7162 = vrot.lane.b32.xlu1 %v7083_v52, %s8329_s28  ;;  %v7088_v52 = vld [vmem:[#allocation2 + $0x121] sm:$0xff] }
 0xa29   : > { %14522 = vst [vmem:[#allocation186_spill] sm:$0xff] %v12890_v33 }
 0xa2a   : > { %7164 = vrot.lane.b32.xlu0 %v7084_v37, %s8329_s28  ;;  %v12894_v28 = vpop.permute.xlu1 %6794 }
 0xa2b   : > { %14523 = vst [vmem:[#allocation154_spill] sm:$0xff] %v12894_v28  ;;  %v7089_v28 = vld [vmem:[#allocation2 + $0x129] sm:$0xff] }
 0xa2c   : > { %v12896_v46 = vpop.permute.xlu0 %6796  ;;  %7166 = vrot.lane.b32.xlu1 %v7085_v24, %s8329_s28  ;;  %v7090_v24 = vld [vmem:[#allocation2 + $0x139] sm:$0xff] }
 0xa2d   : > { %14524 = vst [vmem:[#allocation35_spill] sm:$0xff] %v12896_v46 }
 0xa2e   : > { %7168 = vrot.lane.b32.xlu0 %v7086_v38, %s8329_s28  ;;  %v12900_v41 = vpop.permute.xlu1 %6798 }
 0xa2f   : > { %14525 = vst [vmem:[#allocation119_spill] sm:$0xff] %v12900_v41  ;;  %v7091_v41 = vld [vmem:[#allocation2 + $0x141] sm:$0xff] }
 0xa30   : > { %v12902_v61 = vpop.permute.xlu0 %6800  ;;  %7170 = vrot.lane.b32.xlu1 %v7087_v18, %s8329_s28  ;;  %v7092_v18 = vld [vmem:[#allocation2 + $0x151] sm:$0xff] }
 0xa31   : > { %14526 = vst [vmem:[#allocation143_spill] sm:$0xff] %v12902_v61 }
 0xa32   : > { %7172 = vrot.lane.b32.xlu0 %v7088_v52, %s8329_s28  ;;  %v12906_v37 = vpop.permute.xlu1 %6802 }
 0xa33   : > { %14527 = vst [vmem:[#allocation123_spill] sm:$0xff] %v12906_v37  ;;  %v7093_v37 = vld [vmem:[#allocation2 + $0x159] sm:$0xff] }
 0xa34   : > { %v12908_v33 = vpop.permute.xlu0 %6804  ;;  %7174 = vrot.lane.b32.xlu1 %v7089_v28, %s8329_s28  ;;  %v7094_v28 = vld [vmem:[#allocation2 + $0x169] sm:$0xff] }
 0xa35   : > { %14528 = vst [vmem:[#allocation156_spill] sm:$0xff] %v12908_v33 }
 0xa36   : > { %7176 = vrot.lane.b32.xlu0 %v7090_v24, %s8329_s28  ;;  %v12912_v38 = vpop.permute.xlu1 %6806 }
 0xa37   : > { %14529 = vst [vmem:[#allocation183_spill] sm:$0xff] %v12912_v38  ;;  %v7095_v38 = vld [vmem:[#allocation2 + $0x171] sm:$0xff] }
 0xa38   : > { %v12914_v46 = vpop.permute.xlu0 %6808  ;;  %7178 = vrot.lane.b32.xlu1 %v7091_v41, %s8329_s28 }
 0xa39   : > { %14530 = vst [vmem:[#allocation88_spill] sm:$0xff] %v12914_v46 }
 0xa3a   : > { %7180 = vrot.lane.b32.xlu0 %v7092_v18, %s8329_s28  ;;  %v12918_v52 = vpop.permute.xlu1 %6810  ;;  %v7098_v18 = vld [vmem:[#allocation2 + $0x199] sm:$0xff] }
 0xa3b   : > { %14531 = vst [vmem:[#allocation81_spill] sm:$0xff] %v12918_v52 }
 0xa3c   : > { %v12920_v61 = vpop.permute.xlu0 %6940  ;;  %7182 = vrot.lane.b32.xlu1 %v7093_v37, %s8329_s28  ;;  %v7099_v37 = vld [vmem:[#allocation2 + $0x1a1] sm:$0xff] }
 0xa3e   : > { %7184 = vrot.lane.b32.xlu0 %v7094_v28, %s8329_s28  ;;  %v12924_v24 = vpop.permute.xlu1 %6942 }
 0xa40   : > { %v12926_v33 = vpop.permute.xlu0 %6944  ;;  %7186 = vrot.lane.b32.xlu1 %v7095_v38, %s8329_s28  ;;  %v7260_v38 = vld [vmem:[#allocation2 + $0x32] sm:$0xff] }
 0xa42   : > { %7188 = vrot.lane.b32.xlu0 %v12585_v39, %s8329_s28  ;;  %v12931_v41 = vpop.permute.xlu1 %6946 }
 0xa44   : > { %v12933_v52 = vpop.permute.xlu0 %6948  ;;  %7190 = vrot.lane.b32.xlu1 %v12591_v54, %s8329_s28  ;;  %v7262_v54 = vld [vmem:[#allocation2 + $0x4a] sm:$0xff] }
 0xa46   : > { %7192 = vrot.lane.b32.xlu0 %v7098_v18, %s8329_s28  ;;  %v12938_v28 = vpop.permute.xlu1 %6950 }
 0xa47   : > { %14532 = vst [vmem:[#allocation168_spill] sm:$0xff] %v12938_v28 }
 0xa48   : > { %v12940_v46 = vpop.permute.xlu0 %6952  ;;  %7194 = vrot.lane.b32.xlu1 %v7099_v37, %s8329_s28  ;;  %v7264_v37 = vld [vmem:[#allocation2 + $0x62] sm:$0xff] }
 0xa49   : > { %14533 = vst [vmem:[#allocation66_spill] sm:$0xff] %v12940_v46 }
 0xa4a   : > { %7324 = vrot.lane.b32.xlu0 %v7260_v38, %s8330_s29  ;;  %v12944_v39 = vpop.permute.xlu1 %6954 }
 0xa4b   : > { %14534 = vst [vmem:[#allocation70_spill] sm:$0xff] %v12944_v39  ;;  %v14583_v39 = vld [vmem:[#allocation59_spill] sm:$0xff] }
 0xa4c   : > { %v12946_v58 = vpop.permute.xlu0 %6956  ;;  %7326 = vrot.lane.b32.xlu1 %v7261_v63, %s8330_s29  ;;  %v7266_v63 = vld [vmem:[#allocation2 + $0x7a] sm:$0xff] }
 0xa4d   : > { %14535 = vst [vmem:[#allocation39_spill] sm:$0xff] %v12946_v58 }
 0xa4e   : > { %7328 = vrot.lane.b32.xlu0 %v7262_v54, %s8330_s29  ;;  %v12950_v18 = vpop.permute.xlu1 %6958 }
 0xa4f   : > { %14536 = vst [vmem:[#allocation87_spill] sm:$0xff] %v12950_v18 }
 0xa50   : > { %v12952_v7 = vpop.permute.xlu0 %6960  ;;  %7330 = vrot.lane.b32.xlu1 %v7263_v4, %s8330_s29  ;;  %v7268_v4 = vld [vmem:[#allocation2 + $0x92] sm:$0xff] }
 0xa51   : > { %14537 = vst [vmem:[#allocation139_spill] sm:$0xff] %v12952_v7 }
 0xa52   : > { %7332 = vrot.lane.b32.xlu0 %v7264_v37, %s8330_s29  ;;  %v12956_v38 = vpop.permute.xlu1 %6962 }
 0xa53   : > { %14538 = vst [vmem:[#allocation16_spill] sm:$0xff] %v12956_v38  ;;  %v7269_v38 = vld [vmem:[#allocation2 + $0x9a] sm:$0xff] }
 0xa54   : > { %v12958_v26 = vpop.permute.xlu0 %6964  ;;  %7334 = vrot.lane.b32.xlu1 %v7265_v27, %s8330_s29  ;;  %v7270_v27 = vld [vmem:[#allocation2 + $0xaa] sm:$0xff] }
 0xa55   : > { %14539 = vst [vmem:[#allocation74_spill] sm:$0xff] %v12958_v26 }
 0xa56   : > { %7336 = vrot.lane.b32.xlu0 %v7266_v63, %s8330_s29  ;;  %v12962_v54 = vpop.permute.xlu1 %6966 }
 0xa57   : > { %14540 = vst [vmem:[#allocation132_spill] sm:$0xff] %v12962_v54  ;;  %v7271_v54 = vld [vmem:[#allocation2 + $0xb2] sm:$0xff] }
 0xa58   : > { %v12964_v18 = vpop.permute.xlu0 %6968  ;;  %7338 = vrot.lane.b32.xlu1 %v7267_v36, %s8330_s29  ;;  %v7272_v36 = vld [vmem:[#allocation2 + $0xc2] sm:$0xff] }
 0xa59   : > { %14541 = vst [vmem:[#allocation57_spill] sm:$0xff] %v12964_v18 }
 0xa5a   : > { %7340 = vrot.lane.b32.xlu0 %v7268_v4, %s8330_s29  ;;  %v12968_v37 = vpop.permute.xlu1 %6970 }
 0xa5b   : > { %14542 = vst [vmem:[#allocation92_spill] sm:$0xff] %v12968_v37  ;;  %v7273_v37 = vld [vmem:[#allocation2 + $0xca] sm:$0xff] }
 0xa5c   : > { %v12970_v7 = vpop.permute.xlu0 %6972  ;;  %7342 = vrot.lane.b32.xlu1 %v7269_v38, %s8330_s29  ;;  %v7274_v38 = vld [vmem:[#allocation2 + $0xda] sm:$0xff] }
 0xa5d   : > { %14543 = vst [vmem:[#allocation164_spill] sm:$0xff] %v12970_v7 }
 0xa5e   : > { %7344 = vrot.lane.b32.xlu0 %v7270_v27, %s8330_s29  ;;  %v12974_v63 = vpop.permute.xlu1 %6974 }
 0xa5f   : > { %14544 = vst [vmem:[#allocation103_spill] sm:$0xff] %v12974_v63  ;;  %v7275_v63 = vld [vmem:[#allocation2 + $0xe2] sm:$0xff] }
 0xa60   : > { %v12976_v26 = vpop.permute.xlu0 %6976  ;;  %7346 = vrot.lane.b32.xlu1 %v7271_v54, %s8330_s29  ;;  %v7276_v54 = vld [vmem:[#allocation2 + $0xf2] sm:$0xff] }
 0xa61   : > { %14545 = vst [vmem:[#allocation149_spill] sm:$0xff] %v12976_v26 }
 0xa62   : > { %7348 = vrot.lane.b32.xlu0 %v7272_v36, %s8330_s29  ;;  %v12980_v4 = vpop.permute.xlu1 %6978 }
 0xa63   : > { %14546 = vst [vmem:[#allocation11_spill] sm:$0xff] %v12980_v4  ;;  %v7277_v4 = vld [vmem:[#allocation2 + $0xfa] sm:$0xff] }
 0xa64   : > { %v12982_v18 = vpop.permute.xlu0 %6980  ;;  %7350 = vrot.lane.b32.xlu1 %v7273_v37, %s8330_s29  ;;  %v7278_v37 = vld [vmem:[#allocation2 + $0x10a] sm:$0xff] }
 0xa65   : > { %14547 = vst [vmem:[#allocation46_spill] sm:$0xff] %v12982_v18 }
 0xa66   : > { %7352 = vrot.lane.b32.xlu0 %v7274_v38, %s8330_s29  ;;  %v12986_v27 = vpop.permute.xlu1 %6982 }
 0xa67   : > { %14548 = vst [vmem:[#allocation29_spill] sm:$0xff] %v12986_v27  ;;  %v7279_v27 = vld [vmem:[#allocation2 + $0x112] sm:$0xff] }
 0xa68   : > { %v12988_v7 = vpop.permute.xlu0 %6984  ;;  %7354 = vrot.lane.b32.xlu1 %v7275_v63, %s8330_s29  ;;  %v7280_v63 = vld [vmem:[#allocation2 + $0x122] sm:$0xff] }
 0xa69   : > { %14549 = vst [vmem:[#allocation121_spill] sm:$0xff] %v12988_v7 }
 0xa6a   : > { %7356 = vrot.lane.b32.xlu0 %v7276_v54, %s8330_s29  ;;  %v12992_v36 = vpop.permute.xlu1 %6986 }
 0xa6b   : > { %14550 = vst [vmem:[#allocation175_spill] sm:$0xff] %v12992_v36  ;;  %v7281_v36 = vld [vmem:[#allocation2 + $0x12a] sm:$0xff] }
 0xa6c   : > { %v12994_v26 = vpop.permute.xlu0 %6988  ;;  %7358 = vrot.lane.b32.xlu1 %v7277_v4, %s8330_s29  ;;  %v7282_v4 = vld [vmem:[#allocation2 + $0x13a] sm:$0xff] }
 0xa6d   : > { %14551 = vst [vmem:[#allocation135_spill] sm:$0xff] %v12994_v26 }
 0xa6e   : > { %7360 = vrot.lane.b32.xlu0 %v7278_v37, %s8330_s29  ;;  %v12998_v38 = vpop.permute.xlu1 %6990 }
 0xa6f   : > { %14552 = vst [vmem:[#allocation131_spill] sm:$0xff] %v12998_v38  ;;  %v7283_v38 = vld [vmem:[#allocation2 + $0x142] sm:$0xff] }
 0xa70   : > { %v13000_v18 = vpop.permute.xlu0 %6992  ;;  %7362 = vrot.lane.b32.xlu1 %v7279_v27, %s8330_s29  ;;  %v7284_v27 = vld [vmem:[#allocation2 + $0x152] sm:$0xff] }
 0xa71   : > { %14553 = vst [vmem:[#allocation82_spill] sm:$0xff] %v13000_v18 }
 0xa72   : > { %7364 = vrot.lane.b32.xlu0 %v7280_v63, %s8330_s29  ;;  %v13004_v54 = vpop.permute.xlu1 %6994 }
 0xa73   : > { %14554 = vst [vmem:[#allocation144_spill] sm:$0xff] %v13004_v54  ;;  %v7285_v54 = vld [vmem:[#allocation2 + $0x15a] sm:$0xff] }
 0xa74   : > { %v13006_v7 = vpop.permute.xlu0 %6996  ;;  %7366 = vrot.lane.b32.xlu1 %v7281_v36, %s8330_s29  ;;  %v7286_v36 = vld [vmem:[#allocation2 + $0x16a] sm:$0xff] }
 0xa75   : > { %14555 = vst [vmem:[#allocation107_spill] sm:$0xff] %v13006_v7 }
 0xa76   : > { %7368 = vrot.lane.b32.xlu0 %v7282_v4, %s8330_s29  ;;  %v13010_v37 = vpop.permute.xlu1 %6998 }
 0xa77   : > { %14556 = vst [vmem:[#allocation160_spill] sm:$0xff] %v13010_v37  ;;  %v7287_v37 = vld [vmem:[#allocation2 + $0x172] sm:$0xff] }
 0xa78   : > { %v13012_v26 = vpop.permute.xlu0 %7000  ;;  %7370 = vrot.lane.b32.xlu1 %v7283_v38, %s8330_s29 }
 0xa79   : > { %14557 = vst [vmem:[#allocation95_spill] sm:$0xff] %v13012_v26 }
 0xa7a   : > { %7372 = vrot.lane.b32.xlu0 %v7284_v27, %s8330_s29  ;;  %v13016_v63 = vpop.permute.xlu1 %7002  ;;  %v7290_v27 = vld [vmem:[#allocation2 + $0x19a] sm:$0xff] }
 0xa7b   : > { %14558 = vst [vmem:[#allocation169_spill] sm:$0xff] %v13016_v63 }
 0xa7c   : > { %v13018_v18 = vpop.permute.xlu0 %7132  ;;  %7374 = vrot.lane.b32.xlu1 %v7285_v54, %s8330_s29  ;;  %v7291_v54 = vld [vmem:[#allocation2 + $0x1a2] sm:$0xff] }
 0xa7e   : > { %7376 = vrot.lane.b32.xlu0 %v7286_v36, %s8330_s29  ;;  %v13022_v4 = vpop.permute.xlu1 %7134 }
 0xa80   : > { %v13024_v7 = vpop.permute.xlu0 %7136  ;;  %7378 = vrot.lane.b32.xlu1 %v7287_v37, %s8330_s29 }
 0xa82   : > { %7380 = vrot.lane.b32.xlu0 %v12717_v60, %s8330_s29  ;;  %v13029_v38 = vpop.permute.xlu1 %7138 }
 0xa84   : > { %v13031_v63 = vpop.permute.xlu0 %7140  ;;  %7382 = vrot.lane.b32.xlu1 %v12723_v11, %s8330_s29 }
 0xa85   : > { %14559 = vst [vmem:[#allocation5_spill] sm:$0xff] %v13031_v63  ;;  %v8291_v63 = vld [vmem:[#allocation2 + $0x80] sm:$0xff] }
 0xa86   : > { %7384 = vrot.lane.b32.xlu0 %v7290_v27, %s8330_s29  ;;  %v13036_v36 = vpop.permute.xlu1 %7142 }
 0xa87   : > { %14560 = vst [vmem:[#allocation109_spill] sm:$0xff] %v13036_v36 }
 0xa88   : > { %v13038_v26 = vpop.permute.xlu0 %7144  ;;  %7386 = vrot.lane.b32.xlu1 %v7291_v54, %s8330_s29 }
 0xa89   : > { %14561 = vst [vmem:[#allocation31_spill] sm:$0xff] %v13038_v26 }
 0xa8a   : > { %v13041_v37 = vpop.permute.xlu1 %7146 }
 0xa8b   : > { %14562 = vst [vmem:[#allocation145_spill] sm:$0xff] %v13041_v37 }
 0xa8c   : > { %v13043_v60 = vpop.permute.xlu0 %7148 }
 0xa8d   : > { %14563 = vst [vmem:[#allocation51_spill] sm:$0xff] %v13043_v60 }
 0xa8e   : > { %v13045_v21 = vpop.permute.xlu1 %7150 }
 0xa8f   : > { %14564 = vst [vmem:[#allocation79_spill] sm:$0xff] %v13045_v21 }
 0xa90   : > { %v13047_v32 = vpop.permute.xlu0 %7152 }
 0xa91   : > { %14565 = vst [vmem:[#allocation187_spill] sm:$0xff] %v13047_v32 }
 0xa92   : > { %v13049_v45 = vpop.permute.xlu1 %7154 }
 0xa93   : > { %14566 = vst [vmem:[#allocation14_spill] sm:$0xff] %v13049_v45 }
 0xa94   : > { %v13051_v11 = vpop.permute.xlu0 %7156 }
 0xa95   : > { %14567 = vst [vmem:[#allocation7_spill] sm:$0xff] %v13051_v11  ;;  %v5852_v11 = vld [vmem:[#allocation2] sm:$0xff] }
 0xa96   : > { %v13053_v43 = vpop.permute.xlu1 %7158 }
 0xa97   : > { %14568 = vst [vmem:[#allocation13_spill] sm:$0xff] %v13053_v43  ;;  %v5853_v43 = vld [vmem:[#allocation2 + $0x8] sm:$0xff] }
 0xa98   : > { %v13055_v27 = vpop.permute.xlu0 %7160 }
 0xa99   : > { %14569 = vst [vmem:[#allocation28_spill] sm:$0xff] %v13055_v27  ;;  %v14579_v27 = vld [vmem:[#allocation54_spill] sm:$0xff] }
 0xa9a   : > { %v13057_v58 = vpop.permute.xlu1 %7162 }
 0xa9b   : > { %14570 = vst [vmem:[#allocation20_spill] sm:$0xff] %v13057_v58  ;;  %v6076_v58 = vadd.f32 %v14579_v27, %v5852_v11  ;;  %v8287_v11 = vld [vmem:[#allocation2 + $0x30] sm:$0xff]  ;;  %v14588_v27 = vld [vmem:[#allocation64_spill] sm:$0xff] }
 0xa9c   : > { %v13059_v23 = vpop.permute.xlu0 %7164  ;;  %v6080_v46 = vadd.f32 %v8287_v11, %v14588_v27 }
 0xa9d   : > { %14571 = vst [vmem:[#allocation48_spill] sm:$0xff] %v13059_v23  ;;  %v14580_v23 = vld [vmem:[#allocation176_spill] sm:$0xff] }
 0xa9e   : > { %v13061_v54 = vpop.permute.xlu1 %7166  ;;  %v6079_v22 = vadd.f32 %v8284_v17, %v14580_v23  ;;  %v14589_v17 = vld [vmem:[#allocation24_spill] sm:$0xff] }
 0xa9f   : > { %14572 = vst [vmem:[#allocation32_spill] sm:$0xff] %v13061_v54 }
 0xaa0   : > { %v13063_v37 = vpop.permute.xlu0 %7168 }
 0xaa1   : > { %14573 = vst [vmem:[#allocation8_spill] sm:$0xff] %v13063_v37  ;;  %v14582_v37 = vld [vmem:[#allocation47_spill] sm:$0xff] }
 0xaa2   : > { %v13065_v60 = vpop.permute.xlu1 %7170  ;;  %v6077_v26 = vadd.f32 %v14582_v37, %v5853_v43  ;;  %v14591_v43 = vld [vmem:[#allocation60_spill] sm:$0xff] }
 0xaa3   : > { %14574 = vst [vmem:[#allocation43_spill] sm:$0xff] %v13065_v60  ;;  %v8285_v60 = vld [vmem:[#allocation2 + $0x18] sm:$0xff] }
 0xaa4   : > { %v13067_v21 = vpop.permute.xlu0 %7172  ;;  %v6269_v37 = vadd.f32 %v14591_v43, %v6077_v26  ;;  %v14600_v26 = vld [vmem:[#allocation12_spill] sm:$0xff] }
 0xaa5   : > { %14575 = vst [vmem:[#allocation41_spill] sm:$0xff] %v13067_v21  ;;  %v6078_v21 = vadd.f32 %v8285_v60, %v14583_v39  ;;  %v8288_v60 = vld [vmem:[#allocation2 + $0x50] sm:$0xff] }
 0xaa6   : > { %v13069_v32 = vpop.permute.xlu1 %7174 }
 0xaa7   : > { %14576 = vst [vmem:[#allocation15_spill] sm:$0xff] %v13069_v32  ;;  %v6271_v32 = vadd.f32 %v14584_v19, %v6079_v22  ;;  %v6270_v23 = vadd.f32 %v14589_v17, %v6078_v21  ;;  %v14593_v22 = vld [vmem:[#allocation68_spill] sm:$0xff]  ;;  %v14599_v21 = vld [vmem:[#allocation17_spill] sm:$0xff] }
 0xaa8   : > { %v13071_v45 = vpop.permute.xlu0 %7176  ;;  %v6083_v19 = vadd.f32 %v8288_v60, %v14593_v22  ;;  %v6461_v17 = vadd.f32 %v14599_v21, %v6269_v37  ;;  %v14602_v60 = vld [vmem:[#allocation170_spill] sm:$0xff]  ;;  %v14607_v37 = vld [vmem:[#allocation65_spill] sm:$0xff] }
 0xaa9   : > { %14577 = vst [vmem:[#allocation30_spill] sm:$0xff] %v13071_v45  ;;  %v8286_v45 = vld [vmem:[#allocation2 + $0x38] sm:$0xff]  ;;  %v6463_v11 = vadd.f32 %v14597_v35, %v6271_v32  ;;  %v6087_v22 = vadd.f32 %v8291_v63, %v14602_v60  ;;  %v14606_v32 = vld [vmem:[#allocation71_spill] sm:$0xff] }
 0xaaa   : > { %v13073_v51 = vpop.permute.xlu1 %7178  ;;  %v6081_v12 = vadd.f32 %v8286_v45, %v14586_v8  ;;  %v6272_v8 = vadd.f32 %v14595_v10, %v6080_v46  ;;  %v8289_v45 = vld [vmem:[#allocation2 + $0x48] sm:$0xff]  ;;  %v14604_v10 = vld [vmem:[#allocation93_spill] sm:$0xff]  ;;  %v14610_v60 = vld [vmem:[#allocation56_spill] sm:$0xff] }
 0xaab   : > { %14578 = vst [vmem:[#allocation55_spill] sm:$0xff] %v13073_v51  ;;  %v14587_v51 = vld [vmem:[#allocation52_spill] sm:$0xff] }
 0xaac   : > { %v13077_v54 = vpop.permute.xlu0 %7180  ;;  %v6268_v36 = vadd.f32 %v14587_v51, %v6076_v58  ;;  %v6273_v39 = vadd.f32 %v14592_v9, %v6081_v12  ;;  %v14596_v51 = vld [vmem:[#allocation9_spill] sm:$0xff] }
 0xaad   : > { %14581 = vst [vmem:[#allocation173_spill] sm:$0xff] %v13077_v54  ;;  %v6082_v58 = vadd.f32 %v8289_v45, %v14596_v51  ;;  %v14601_v12 = vld [vmem:[#allocation61_spill] sm:$0xff]  ;;  %v8293_v45 = vld [vmem:[#allocation2 + $0x78] sm:$0xff] }
 0xaae   : > { %v13082_v42 = vpop.permute.xlu1 %7182  ;;  %v6275_v9 = vadd.f32 %v14601_v12, %v6083_v19  ;;  %v14605_v51 = vld [vmem:[#allocation125_spill] sm:$0xff]  ;;  %v14609_v19 = vld [vmem:[#allocation23_spill] sm:$0xff] }
 0xaaf   : > { %14585 = vst [vmem:[#allocation73_spill] sm:$0xff] %v13082_v42  ;;  %v14594_v42 = vld [vmem:[#allocation37_spill] sm:$0xff]  ;;  %v6274_v28 = vadd.f32 %v14604_v10, %v6082_v58  ;;  %v6086_v35 = vadd.f32 %v8293_v45, %v14605_v51  ;;  %v6279_v12 = vadd.f32 %v14609_v19, %v6087_v22  ;;  %v8295_v10 = vld [vmem:[#allocation2 + $0x98] sm:$0xff] }
 0xab0   : > { %v13088_v54 = vpop.permute.xlu0 %7184  ;;  %v6460_v14 = vadd.f32 %v14594_v42, %v6268_v36  ;;  %v8292_v42 = vld [vmem:[#allocation2 + $0x60] sm:$0xff]  ;;  %v14603_v36 = vld [vmem:[#allocation148_spill] sm:$0xff]  ;;  %v6089_v45 = vadd.f32 %v8295_v10, %v14612_v3 }
 0xab1   : > { %14590 = vst [vmem:[#allocation108_spill] sm:$0xff] %v13088_v54  ;;  %v8290_v54 = vld [vmem:[#allocation2 + $0x68] sm:$0xff]  ;;  %v6084_v46 = vadd.f32 %v8292_v42, %v14603_v36  ;;  %v8294_v42 = vld [vmem:[#allocation2 + $0x90] sm:$0xff]  ;;  %v14618_v3 = vld [vmem:[#allocation49_spill] sm:$0xff] }
 0xab2   : > { %v13097_v27 = vpop.permute.xlu1 %7186  ;;  %v6085_v43 = vadd.f32 %v8290_v54, %v14600_v26  ;;  %v14608_v54 = vld [vmem:[#allocation96_spill] sm:$0xff]  ;;  %v6652_v63 = vadd.f32 %v12697_v5, %v6460_v14  ;;  %v14611_v36 = vld [vmem:[#allocation115_spill] sm:$0xff]  ;;  %v14615_v5 = vld [vmem:[#allocation117_spill] sm:$0xff] }
 0xab3   : > { %14598 = vst [vmem:[#allocation177_spill] sm:$0xff] %v13097_v27  ;;  %v6462_v27 = vadd.f32 %v14606_v32, %v6270_v23  ;;  %v6464_v26 = vadd.f32 %v14608_v54, %v6272_v8  ;;  %v6276_v0 = vadd.f32 %v14610_v60, %v6084_v46  ;;  %v6088_v58 = vadd.f32 %v8294_v42, %v14611_v36  ;;  %v14613_v32 = vld [vmem:[#allocation124_spill] sm:$0xff]  ;;  %v14617_v60 = vld [vmem:[#allocation150_spill] sm:$0xff] }
 0xab4   : > { %v13107_v25 = vpop.permute.xlu0 %7188  ;;  %v6277_v21 = vadd.f32 %v14607_v37, %v6085_v43  ;;  %v6278_v23 = vadd.f32 %v12461_v57, %v6086_v35  ;;  %v6465_v43 = vadd.f32 %v14613_v32, %v6273_v39  ;;  %v6653_v8 = vadd.f32 %v12703_v15, %v6461_v17  ;;  %v14614_v37 = vld [vmem:[#allocation147_spill] sm:$0xff]  ;;  %v14616_v54 = vld [vmem:[#allocation140_spill] sm:$0xff]  ;;  %v14619_v39 = vld [vmem:[#allocation126_spill] sm:$0xff] }
 0xab5   : > { %v6467_v22 = vadd.f32 %v14614_v37, %v6275_v9  ;;  %v6844_v14 = vadd.f32 %v12819_v44, %v6652_v63  ;;  %v6281_v46 = vadd.f32 %v14615_v5, %v6089_v45  ;;  %v13125_v19 = vadd.f32 %v14616_v54, %v6276_v0  ;;  %v14620_v17 = vld [vmem:[#allocation89_spill] sm:$0xff]  ;;  %v14621_v45 = vld [vmem:[#allocation94_spill] sm:$0xff] }
 0xab6   : > { %v13117_v51 = vpop.permute.xlu1 %7190  ;;  %v6280_v42 = vadd.f32 %v14617_v60, %v6088_v58  ;;  %v6466_v36 = vadd.f32 %v14618_v3, %v6274_v28  ;;  %v6654_v35 = vadd.f32 %v12705_v13, %v6462_v27  ;;  %v13133_v10 = vadd.f32 %v14619_v39, %v6279_v12  ;;  %v8296_v0 = vld [vmem:[#allocation2 + $0xc0] sm:$0xff]  ;;  %v8297_v58 = vld [vmem:[#allocation2 + $0xc8] sm:$0xff]  ;;  %v14623_v3 = vld [vmem:[#allocation36_spill] sm:$0xff] }
 0xab7   : > { %v6845_v15 = vadd.f32 %v12825_v59, %v6653_v8  ;;  %v7036_v44 = vadd.f32 %v12920_v61, %v6844_v14  ;;  %v13138_v9 = vadd.f32 %v14620_v17, %v6277_v21  ;;  %v6092_v63 = vadd.f32 %v8296_v0, %v12469_v1  ;;  %v8298_v1 = vld [vmem:[#allocation2 + $0xa8] sm:$0xff]  ;;  %v8300_v0 = vld [vmem:[#allocation2 + $0xf8] sm:$0xff] }
 0xab8   : > { %v13129_v57 = vpop.permute.xlu0 %7192  ;;  %v6093_v28 = vadd.f32 %v8297_v58, %v12475_v31  ;;  %v13143_v32 = vadd.f32 %v14621_v45, %v6278_v23  ;;  %v6655_v27 = vadd.f32 %v12711_v29, %v6463_v11  ;;  %v6846_v59 = vadd.f32 %v12827_v50, %v6654_v35  ;;  %v8299_v31 = vld [vmem:[#allocation2 + $0xb0] sm:$0xff]  ;;  %v13160_v29 = vld [vmem:[%s13502_s12] ss:$0 sm:$0xff] }
 0xab9   : > { %v7037_v61 = vadd.f32 %v12924_v24, %v6845_v15  ;;  %v7228_v21 = vadd.f32 %v13018_v18, %v7036_v44  ;;  %v6090_v8 = vadd.f32 %v8298_v1, %v12485_v16  ;;  %v6091_v23 = vadd.f32 %v8299_v31, %v12499_v62  ;;  %v14629_v58 = vld [vmem:[#allocation165_spill] sm:$0xff]  ;;  %v14630_v45 = vld [vmem:[#allocation163_spill] sm:$0xff] }
 0xaba   : > { %v13145_v13 = vpop.permute.xlu1 %7194  ;;  %v13152_v12 = vadd.f32 %v12483_v53, %v6093_v28  ;;  %v6656_v37 = vadd.f32 %v12713_v30, %v6464_v26  ;;  %v6847_v24 = vadd.f32 %v12833_v40, %v6655_v27  ;;  %v7038_v18 = vadd.f32 %v12926_v33, %v6846_v59  ;;  %v14632_v1 = vld [vmem:[#allocation109_spill] sm:$0xff] }
 0xabb   : > { %v7229_v53 = vadd.f32 %v13022_v4, %v7037_v61  ;;  %v13166_v16 = vadd.f32 %v12493_v55, %v6280_v42  ;;  %v6283_v62 = vadd.f32 %v12507_v20, %v6091_v23  ;;  %v6657_v30 = vadd.f32 %v12721_v56, %v6465_v43  ;;  %v14631_v61 = vld [vmem:[#allocation66_spill] sm:$0xff] }
 0xabc   : > { %v7325_v50 = vpop.permute.xlu0 %7324  ;;  %v6848_v26 = vadd.f32 %v12835_v49, %v6656_v37  ;;  %v7039_v5 = vadd.f32 %v12931_v41, %v6847_v24  ;;  %v7230_v54 = vadd.f32 %v13024_v7, %v7038_v18  ;;  %v6284_v4 = vadd.f32 %v12501_v48, %v6092_v63  ;;  %v14622_v48 = vld [vmem:[#allocation152_spill] sm:$0xff]  ;;  %v8301_v37 = vld [vmem:[#allocation2 + $0xf0] sm:$0xff] }
 0xabd   : > { %v7420_v11 = vadd.f32 %v7325_v50, %v7228_v21  ;;  %v6282_v60 = vadd.f32 %v12509_v47, %v6090_v8  ;;  %v6658_v55 = vadd.f32 %v12725_v2, %v6466_v36  ;;  %v6849_v20 = vadd.f32 %v12840_v34, %v6657_v30  ;;  %v14624_v34 = vld [vmem:[#allocation86_spill] sm:$0xff]  ;;  %v14633_v50 = vld [vmem:[#allocation151_spill] sm:$0xff]  ;;  %v14634_v18 = vld [vmem:[#allocation136_spill] sm:$0xff] }
 0xabe   : > { %v7327_v14 = vpop.permute.xlu1 %7326  ;;  %v7040_v56 = vadd.f32 %v12933_v52, %v6848_v26  ;;  %v7231_v49 = vadd.f32 %v13029_v38, %v7039_v5  ;;  %v13183_v7 = vadd.f32 %v12515_v6, %v6281_v46  ;;  %v6659_v47 = vadd.f32 %v14622_v48, %v6467_v22  ;;  %v14625_v52 = vld [vmem:[#allocation168_spill] sm:$0xff]  ;;  %v14626_v38 = vld [vmem:[#allocation5_spill] sm:$0xff]  ;;  %v14627_v6 = vld [vmem:[#allocation178_spill] sm:$0xff] }
 0xabf   : > { %v7459_v40 = vadd.f32 %v13160_v29, %v7420_v11  ;;  %v7421_v33 = vadd.f32 %v7327_v14, %v7229_v53  ;;  %v13187_v2 = vadd.f32 %v14623_v3, %v6283_v62  ;;  %v6850_v36 = vadd.f32 %v14624_v34, %v6658_v55  ;;  %v14628_v22 = vld [vmem:[#allocation162_spill] sm:$0xff]  ;;  %v14635_v53 = vld [vmem:[#allocation80_spill] sm:$0xff]  ;;  %v14636_v62 = vld [vmem:[#allocation19_spill] sm:$0xff] }
 0xac0   : > { %v7329_v42 = vpop.permute.xlu0 %7328  ;;  %v7041_v39 = vadd.f32 %v14625_v52, %v6849_v20  ;;  %v7232_v15 = vadd.f32 %v14626_v38, %v7040_v56  ;;  %v6097_v46 = vadd.f32 %v8300_v0, %v14627_v6  ;;  %v6660_v63 = vadd.f32 %v14628_v22, %v13125_v19  ;;  %v14637_v14 = vld [vmem:[#allocation70_spill] sm:$0xff]  ;;  %v8302_v55 = vld [vmem:[#allocation2 + $0xd8] sm:$0xff]  ;;  %v8303_v56 = vld [vmem:[#allocation2 + $0xe0] sm:$0xff] }
 0xac1   : > { %v7460_v41 = vadd.f32 %v13160_v29, %v7421_v33  ;;  %v7422_v43 = vadd.f32 %v7329_v42, %v7230_v54  ;;  %7523 = vrot.lane.b32.xlu0 %v7459_v40, %s8333_s21  ;;  %v13198_v28 = vadd.f32 %v14629_v58, %v6282_v60  ;;  %v6851_v27 = vadd.f32 %v14630_v45, %v6659_v47  ;;  %v14638_v54 = vld [vmem:[#allocation31_spill] sm:$0xff]  ;;  %v14639_v20 = vld [vmem:[#allocation34_spill] sm:$0xff]  ;;  %v14642_v48 = vld [vmem:[#allocation40_spill] sm:$0xff] }
 0xac2   : > { %v7331_v35 = vpop.permute.xlu1 %7330  ;;  %v7042_v21 = vadd.f32 %v14631_v61, %v6850_v36  ;;  %v7233_v8 = vadd.f32 %v14632_v1, %v7041_v39  ;;  %v6096_v24 = vadd.f32 %v8301_v37, %v14633_v50  ;;  %v13207_v19 = vadd.f32 %v14634_v18, %v6097_v46  ;;  %v14643_v34 = vld [vmem:[#allocation39_spill] sm:$0xff]  ;;  %v14647_v6 = vld [vmem:[#allocation26_spill] sm:$0xff]  ;;  %v14651_v1 = vld [vmem:[#allocation97_spill] sm:$0xff] }
 0xac3   : > { %v7461_v44 = vadd.f32 %v13160_v29, %v7422_v43  ;;  %v7423_v17 = vadd.f32 %v7331_v35, %v7231_v49  ;;  %7525 = vrot.lane.b32.xlu1 %v7460_v41, %s8333_s21  ;;  %v6661_v11 = vadd.f32 %v14635_v53, %v13138_v9  ;;  %v6852_v30 = vadd.f32 %v14636_v62, %v6660_v63  ;;  %v14640_v49 = vld [vmem:[#allocation127_spill] sm:$0xff]  ;;  %v14641_v9 = vld [vmem:[#allocation22_spill] sm:$0xff]  ;;  %v14644_v35 = vld [vmem:[#allocation145_spill] sm:$0xff] }
 0xac4   : > { %v7333_v59 = vpop.permute.xlu0 %7332  ;;  %v7043_v5 = vadd.f32 %v14637_v14, %v6851_v27  ;;  %v7234_v40 = vadd.f32 %v14638_v54, %v7042_v21  ;;  %v6094_v42 = vadd.f32 %v8302_v55, %v14639_v20  ;;  %v6095_v41 = vadd.f32 %v8303_v56, %v14640_v49  ;;  %v14649_v58 = vld [vmem:[#allocation87_spill] sm:$0xff]  ;;  %v14658_v54 = vld [vmem:[#allocation158_spill] sm:$0xff] }
 0xac5   : > { %v7462_v31 = vadd.f32 %v13160_v29, %v7423_v17  ;;  %v7424_v23 = vadd.f32 %v7333_v59, %v7232_v15  ;;  %7527 = vrot.lane.b32.xlu0 %v7461_v44, %s8333_s21  ;;  %v6662_v43 = vadd.f32 %v14641_v9, %v13143_v32  ;;  %v6853_v47 = vadd.f32 %v14642_v48, %v6661_v11  ;;  %v14645_v15 = vld [vmem:[#allocation116_spill] sm:$0xff]  ;;  %v14646_v17 = vld [vmem:[#allocation27_spill] sm:$0xff]  ;;  %v14648_v32 = vld [vmem:[#allocation182_spill] sm:$0xff] }
 0xac6   : > { %v7335_v26 = vpop.permute.xlu1 %7334  ;;  %v7044_v36 = vadd.f32 %v14643_v34, %v6852_v30  ;;  %v7235_v52 = vadd.f32 %v14644_v35, %v7043_v5  ;;  %v6476_v44 = vadd.f32 %v14645_v15, %v6284_v4  ;;  %v6287_v0 = vadd.f32 %v14646_v17, %v6095_v41  ;;  %v14650_v27 = vld [vmem:[#allocation51_spill] sm:$0xff]  ;;  %v14652_v4 = vld [vmem:[#allocation110_spill] sm:$0xff]  ;;  %v14665_v34 = vld [vmem:[#allocation84_spill] sm:$0xff] }
 0xac7   : > { %v7463_v33 = vadd.f32 %v13160_v29, %v7424_v23  ;;  %v7425_v60 = vadd.f32 %v7335_v26, %v7233_v8  ;;  %7529 = vrot.lane.b32.xlu1 %v7462_v31, %s8333_s21  ;;  %v6663_v46 = vadd.f32 %v14647_v6, %v13133_v10  ;;  %v6854_v22 = vadd.f32 %v14648_v32, %v6662_v43  ;;  %v14653_v23 = vld [vmem:[#allocation181_spill] sm:$0xff]  ;;  %v14654_v10 = vld [vmem:[#allocation63_spill] sm:$0xff]  ;;  %v8304_v48 = vld [vmem:[#allocation2 + $0x128] sm:$0xff] }
 0xac8   : > { %v7337_v3 = vpop.permute.xlu0 %7336  ;;  %v7045_v45 = vadd.f32 %v14649_v58, %v6853_v47  ;;  %v7236_v59 = vadd.f32 %v14650_v27, %v7044_v36  ;;  %v6288_v8 = vadd.f32 %v14651_v1, %v6096_v24  ;;  %v6286_v31 = vadd.f32 %v14652_v4, %v6094_v42  ;;  %v14655_v53 = vld [vmem:[#allocation139_spill] sm:$0xff]  ;;  %v14661_v42 = vld [vmem:[#allocation16_spill] sm:$0xff]  ;;  %v14666_v35 = vld [vmem:[#allocation190_spill] sm:$0xff] }
 0xac9   : > { %v7464_v39 = vadd.f32 %v13160_v29, %v7425_v60  ;;  %v7426_v38 = vadd.f32 %v7337_v3, %v7234_v40  ;;  %7531 = vrot.lane.b32.xlu0 %v7463_v33, %s8333_s21  ;;  %v6664_v37 = vadd.f32 %v14653_v23, %v13166_v16  ;;  %v6855_v50 = vadd.f32 %v14654_v10, %v6663_v46  ;;  %v14656_v62 = vld [vmem:[#allocation79_spill] sm:$0xff]  ;;  %v14659_v33 = vld [vmem:[#allocation106_spill] sm:$0xff]  ;;  %v8305_v32 = vld [vmem:[#allocation2 + $0x120] sm:$0xff] }
 0xaca   : > { %v7339_v63 = vpop.permute.xlu1 %7338  ;;  %v7046_v11 = vadd.f32 %v14655_v53, %v6854_v22  ;;  %v7237_v30 = vadd.f32 %v14656_v62, %v7045_v45  ;;  %v14657_v5 = vld [vmem:[#allocation171_spill] sm:$0xff]  ;;  %v6665_v40 = vadd.f32 %v14658_v54, %v13183_v7  ;;  %v13248_v16 = vadd.f32 %v14659_v33, %v6287_v0  ;;  %v14660_v60 = vld [vmem:[#allocation134_spill] sm:$0xff]  ;;  %v14664_v7 = vld [vmem:[#allocation189_spill] sm:$0xff] }
 0xacb   : > { %v7465_v61 = vadd.f32 %v13160_v29, %v7426_v38  ;;  %v7427_v21 = vadd.f32 %v7339_v63, %v7235_v52  ;;  %7533 = vrot.lane.b32.xlu1 %v7464_v39, %s8333_s21  ;;  %v6477_v24 = vadd.f32 %v14657_v5, %v13152_v12  ;;  %v6856_v55 = vadd.f32 %v14660_v60, %v6664_v37  ;;  %v14662_v49 = vld [vmem:[#allocation187_spill] sm:$0xff]  ;;  %v14667_v38 = vld [vmem:[#allocation74_spill] sm:$0xff]  ;;  %v14669_v22 = vld [vmem:[#allocation100_spill] sm:$0xff] }
 0xacc   : > { %v7341_v18 = vpop.permute.xlu0 %7340  ;;  %v7047_v56 = vadd.f32 %v14661_v42, %v6855_v50  ;;  %v7238_v41 = vadd.f32 %v14662_v49, %v7046_v11  ;;  %v14663_v12 = vld [vmem:[#allocation179_spill] sm:$0xff]  ;;  %v6666_v3 = vadd.f32 %v14664_v7, %v13198_v28  ;;  %v6478_v36 = vadd.f32 %v14665_v34, %v6286_v31  ;;  %v14668_v17 = vld [vmem:[#allocation14_spill] sm:$0xff]  ;;  %v14670_v58 = vld [vmem:[#allocation4_spill] sm:$0xff] }
 0xacd   : > { %v7466_v26 = vadd.f32 %v13160_v29, %v7427_v21  ;;  %v7428_v14 = vadd.f32 %v7341_v18, %v7236_v59  ;;  %7535 = vrot.lane.b32.xlu0 %v7465_v61, %s8333_s21  ;;  %v6101_v47 = vadd.f32 %v8304_v48, %v14663_v12  ;;  %v6857_v52 = vadd.f32 %v14666_v35, %v6665_v40  ;;  %v14671_v28 = vld [vmem:[#allocation114_spill] sm:$0xff]  ;;  %v14673_v1 = vld [vmem:[#allocation132_spill] sm:$0xff]  ;;  %v14674_v31 = vld [vmem:[#allocation7_spill] sm:$0xff] }
 0xace   : > { %v7343_v20 = vpop.permute.xlu1 %7342  ;;  %v7048_v15 = vadd.f32 %v14667_v38, %v6856_v55  ;;  %v7239_v0 = vadd.f32 %v14668_v17, %v7047_v56  ;;  %v6100_v63 = vadd.f32 %v8305_v32, %v14669_v22  ;;  %v6667_v27 = vadd.f32 %v14671_v28, %v13187_v2  ;;  %v14672_v59 = vld [vmem:[#allocation118_spill] sm:$0xff]  ;;  %v14675_v18 = vld [vmem:[#allocation113_spill] sm:$0xff]  ;;  %v8307_v11 = vld [vmem:[#allocation2 + $0x110] sm:$0xff] }
 0xacf   : > { %v7467_v9 = vadd.f32 %v13160_v29, %v7428_v14  ;;  %v7429_v43 = vadd.f32 %v7343_v20, %v7237_v30  ;;  %7537 = vrot.lane.b32.xlu1 %v7466_v26, %s8333_s21  ;;  %v13266_v45 = vadd.f32 %v14670_v58, %v6101_v47  ;;  %v6858_v61 = vadd.f32 %v14672_v59, %v6666_v3  ;;  %v8306_v50 = vld [vmem:[#allocation2 + $0x108] sm:$0xff]  ;;  %v14676_v62 = vld [vmem:[#allocation128_spill] sm:$0xff]  ;;  %v14678_v14 = vld [vmem:[#allocation45_spill] sm:$0xff] }
 0xad0   : > { %v7345_v39 = vpop.permute.xlu0 %7344  ;;  %v7049_v4 = vadd.f32 %v14673_v1, %v6857_v52  ;;  %v7240_v23 = vadd.f32 %v14674_v31, %v7048_v15  ;;  %v6098_v53 = vadd.f32 %v8306_v50, %v14675_v18  ;;  %v6099_v30 = vadd.f32 %v8307_v11, %v14676_v62  ;;  %v14677_v26 = vld [vmem:[#allocation10_spill] sm:$0xff]  ;;  %v14679_v40 = vld [vmem:[#allocation57_spill] sm:$0xff]  ;;  %v14681_v56 = vld [vmem:[#allocation99_spill] sm:$0xff] }
 0xad1   : > { %v7468_v6 = vadd.f32 %v13160_v29, %v7429_v43  ;;  %v7430_v46 = vadd.f32 %v7345_v39, %v7238_v41  ;;  %7539 = vrot.lane.b32.xlu0 %v7467_v9, %s8333_s21  ;;  %v6668_v2 = vadd.f32 %v14677_v26, %v6476_v44  ;;  %v6859_v5 = vadd.f32 %v14678_v14, %v6667_v27  ;;  %v14680_v60 = vld [vmem:[#allocation13_spill] sm:$0xff]  ;;  %v14684_v12 = vld [vmem:[#allocation155_spill] sm:$0xff]  ;;  %v14685_v7 = vld [vmem:[#allocation92_spill] sm:$0xff] }
 0xad2   : > { %v7347_v21 = vpop.permute.xlu1 %7346  ;;  %v7050_v33 = vadd.f32 %v14679_v40, %v6858_v61  ;;  %v7241_v55 = vadd.f32 %v14680_v60, %v7049_v4  ;;  %v6480_v49 = vadd.f32 %v14681_v56, %v6288_v8  ;;  %v14682_v41 = vld [vmem:[#allocation161_spill] sm:$0xff]  ;;  %v14686_v34 = vld [vmem:[#allocation28_spill] sm:$0xff]  ;;  %v14688_v17 = vld [vmem:[#allocation98_spill] sm:$0xff] }
 0xad3   : > { %v7469_v37 = vadd.f32 %v13160_v29, %v7430_v46  ;;  %v7431_v10 = vadd.f32 %v7347_v21, %v7239_v0  ;;  %7541 = vrot.lane.b32.xlu1 %v7468_v6, %s8333_s21  ;;  %v6291_v9 = vadd.f32 %v14682_v41, %v6099_v30  ;;  %v14683_v43 = vld [vmem:[#allocation53_spill] sm:$0xff]  ;;  %v6860_v44 = vadd.f32 %v14684_v12, %v6668_v2  ;;  %v14687_v38 = vld [vmem:[#allocation184_spill] sm:$0xff]  ;;  %v14689_v0 = vld [vmem:[#allocation130_spill] sm:$0xff] }
 0xad4   : > { %v7349_v54 = vpop.permute.xlu0 %7348  ;;  %v6669_v48 = vadd.f32 %v14683_v43, %v6477_v24  ;;  %v7051_v3 = vadd.f32 %v14685_v7, %v6859_v5  ;;  %v7242_v35 = vadd.f32 %v14686_v34, %v7050_v33  ;;  %v6292_v15 = vadd.f32 %v14687_v38, %v6100_v63  ;;  %v14690_v46 = vld [vmem:[#allocation67_spill] sm:$0xff]  ;;  %v14691_v22 = vld [vmem:[#allocation164_spill] sm:$0xff]  ;;  %v14693_v21 = vld [vmem:[#allocation146_spill] sm:$0xff] }
 0xad5   : > { %v7470_v20 = vadd.f32 %v13160_v29, %v7431_v10  ;;  %v7432_v42 = vadd.f32 %v7349_v54, %v7240_v23  ;;  %7543 = vrot.lane.b32.xlu0 %v7469_v37, %s8333_s21  ;;  %v6290_v8 = vadd.f32 %v14688_v17, %v6098_v53  ;;  %v6670_v6 = vadd.f32 %v14689_v0, %v6478_v36  ;;  %v14692_v28 = vld [vmem:[#allocation20_spill] sm:$0xff]  ;;  %v14694_v63 = vld [vmem:[#allocation185_spill] sm:$0xff]  ;;  %v14695_v31 = vld [vmem:[#allocation6_spill] sm:$0xff] }
 0xad6   : > { %v7351_v47 = vpop.permute.xlu1 %7350  ;;  %v6861_v24 = vadd.f32 %v14690_v46, %v6669_v48  ;;  %v7052_v58 = vadd.f32 %v14691_v22, %v6860_v44  ;;  %v7243_v27 = vadd.f32 %v14692_v28, %v7051_v3  ;;  %v6481_v1 = vadd.f32 %v14693_v21, %v13207_v19  ;;  %v14696_v23 = vld [vmem:[#allocation159_spill] sm:$0xff]  ;;  %v14698_v53 = vld [vmem:[#allocation48_spill] sm:$0xff]  ;;  %v14700_v14 = vld [vmem:[#allocation90_spill] sm:$0xff] }
 0xad7   : > { %v7471_v52 = vadd.f32 %v13160_v29, %v7432_v42  ;;  %v7433_v39 = vadd.f32 %v7351_v47, %v7241_v55  ;;  %7545 = vrot.lane.b32.xlu1 %v7470_v20, %s8333_s21  ;;  %v6671_v4 = vadd.f32 %v14694_v63, %v13248_v16  ;;  %v6483_v36 = vadd.f32 %v14695_v31, %v6291_v9  ;;  %v14697_v50 = vld [vmem:[#allocation103_spill] sm:$0xff]  ;;  %v8308_v26 = vld [vmem:[#allocation2 + $0x158] sm:$0xff]  ;;  %v14701_v16 = vld [vmem:[#allocation157_spill] sm:$0xff] }
 0xad8   : > { %v7353_v32 = vpop.permute.xlu0 %7352  ;;  %v6862_v37 = vadd.f32 %v14696_v23, %v6670_v6  ;;  %v7053_v18 = vadd.f32 %v14697_v50, %v6861_v24  ;;  %v7244_v11 = vadd.f32 %v14698_v53, %v7052_v58  ;;  %v14699_v2 = vld [vmem:[#allocation180_spill] sm:$0xff]  ;;  %v6672_v5 = vadd.f32 %v14700_v14, %v6480_v49  ;;  %v14702_v40 = vld [vmem:[#allocation91_spill] sm:$0xff]  ;;  %v14703_v55 = vld [vmem:[#allocation149_spill] sm:$0xff] }
 0xad9   : > { %v7472_v59 = vadd.f32 %v13160_v29, %v7433_v39  ;;  %v7434_v61 = vadd.f32 %v7353_v32, %v7242_v35  ;;  %7547 = vrot.lane.b32.xlu0 %v7471_v52, %s8333_s21  ;;  %v6105_v19 = vadd.f32 %v8308_v26, %v14699_v2  ;;  %v6482_v54 = vadd.f32 %v14701_v16, %v6290_v8  ;;  %v14704_v42 = vld [vmem:[#allocation32_spill] sm:$0xff]  ;;  %v8309_v43 = vld [vmem:[#allocation2 + $0x150] sm:$0xff]  ;;  %v14707_v49 = vld [vmem:[#allocation142_spill] sm:$0xff] }
 0xada   : > { %v7355_v10 = vpop.permute.xlu1 %7354  ;;  %v6863_v33 = vadd.f32 %v14702_v40, %v6671_v4  ;;  %v7054_v20 = vadd.f32 %v14703_v55, %v6862_v37  ;;  %v7245_v56 = vadd.f32 %v14704_v42, %v7053_v18  ;;  %v14705_v48 = vld [vmem:[#allocation120_spill] sm:$0xff]  ;;  %v6673_v7 = vadd.f32 %v14707_v49, %v6481_v1  ;;  %v14708_v3 = vld [vmem:[#allocation102_spill] sm:$0xff]  ;;  %v14709_v52 = vld [vmem:[#allocation11_spill] sm:$0xff] }
 0xadb   : > { %v7473_v62 = vadd.f32 %v13160_v29, %v7434_v61  ;;  %v7435_v30 = vadd.f32 %v7355_v10, %v7243_v27  ;;  %7549 = vrot.lane.b32.xlu1 %v7472_v59, %s8333_s21  ;;  %v6104_v12 = vadd.f32 %v8309_v43, %v14705_v48  ;;  %v14706_v44 = vld [vmem:[#allocation188_spill] sm:$0xff]  ;;  %v6864_v34 = vadd.f32 %v14708_v3, %v6672_v5  ;;  %v14711_v46 = vld [vmem:[#allocation141_spill] sm:$0xff]  ;;  %v14714_v27 = vld [vmem:[#allocation122_spill] sm:$0xff] }
 0xadc   : > { %v7357_v60 = vpop.permute.xlu0 %7356  ;;  %v13319_v47 = vadd.f32 %v14706_v44, %v6105_v19  ;;  %v7055_v39 = vadd.f32 %v14709_v52, %v6863_v33  ;;  %v14710_v38 = vld [vmem:[#allocation8_spill] sm:$0xff]  ;;  %v14712_v32 = vld [vmem:[#allocation153_spill] sm:$0xff]  ;;  %v6865_v59 = vadd.f32 %v14714_v27, %v6673_v7  ;;  %v14715_v21 = vld [vmem:[#allocation46_spill] sm:$0xff] }
 0xadd   : > { %v7474_v41 = vadd.f32 %v13160_v29, %v7435_v30  ;;  %v7436_v9 = vadd.f32 %v7357_v60, %v7244_v11  ;;  %7551 = vrot.lane.b32.xlu0 %v7473_v62, %s8333_s21  ;;  %v7246_v17 = vadd.f32 %v14710_v38, %v7054_v20  ;;  %v8310_v6 = vld [vmem:[#allocation2 + $0x138] sm:$0xff]  ;;  %v6484_v22 = vadd.f32 %v14712_v32, %v6292_v15  ;;  %v14713_v58 = vld [vmem:[#allocation33_spill] sm:$0xff]  ;;  %v14716_v63 = vld [vmem:[#allocation43_spill] sm:$0xff] }
 0xade   : > { %v7359_v35 = vpop.permute.xlu1 %7358  ;;  %v6102_v24 = vadd.f32 %v8310_v6, %v14711_v46  ;;  %v6674_v28 = vadd.f32 %v14713_v58, %v6482_v54  ;;  %v7056_v1 = vadd.f32 %v14715_v21, %v6864_v34  ;;  %v7247_v4 = vadd.f32 %v14716_v63, %v7055_v39  ;;  %v8311_v37 = vld [vmem:[#allocation2 + $0x140] sm:$0xff]  ;;  %v14717_v10 = vld [vmem:[#allocation58_spill] sm:$0xff]  ;;  %v14719_v15 = vld [vmem:[#allocation104_spill] sm:$0xff] }
 0xadf   : > { %v7475_v8 = vadd.f32 %v13160_v29, %v7436_v9  ;;  %v7437_v0 = vadd.f32 %v7359_v35, %v7245_v56  ;;  %7553 = vrot.lane.b32.xlu1 %v7474_v41, %s8333_s21  ;;  %v6103_v50 = vadd.f32 %v8311_v37, %v14717_v10  ;;  %v14718_v18 = vld [vmem:[#allocation166_spill] sm:$0xff]  ;;  %v6675_v11 = vadd.f32 %v14719_v15, %v6483_v36  ;;  %v14721_v2 = vld [vmem:[#allocation29_spill] sm:$0xff]  ;;  %v14728_v48 = vld [vmem:[#allocation15_spill] sm:$0xff] }
 0xae0   : > { %v7361_v61 = vpop.permute.xlu0 %7360  ;;  %v6294_v53 = vadd.f32 %v14718_v18, %v6102_v24  ;;  %v14720_v62 = vld [vmem:[#allocation186_spill] sm:$0xff]  ;;  %v7057_v19 = vadd.f32 %v14721_v2, %v6865_v59  ;;  %v14722_v14 = vld [vmem:[#allocation41_spill] sm:$0xff]  ;;  %v14729_v3 = vld [vmem:[#allocation75_spill] sm:$0xff] }
 0xae1   : > { %v7476_v31 = vadd.f32 %v13160_v29, %v7437_v0  ;;  %v7438_v23 = vadd.f32 %v7361_v61, %v7246_v17  ;;  %7555 = vrot.lane.b32.xlu0 %v7475_v8, %s8333_s21  ;;  %v6866_v30 = vadd.f32 %v14720_v62, %v6674_v28  ;;  %v7248_v5 = vadd.f32 %v14722_v14, %v7056_v1  ;;  %v14723_v40 = vld [vmem:[#allocation78_spill] sm:$0xff]  ;;  %v14725_v20 = vld [vmem:[#allocation77_spill] sm:$0xff]  ;;  %v14731_v39 = vld [vmem:[#allocation76_spill] sm:$0xff] }
 0xae2   : > { %v7363_v26 = vpop.permute.xlu1 %7362  ;;  %v6295_v33 = vadd.f32 %v14723_v40, %v6103_v50  ;;  %v14724_v60 = vld [vmem:[#allocation174_spill] sm:$0xff]  ;;  %v6676_v42 = vadd.f32 %v14725_v20, %v6484_v22  ;;  %v14727_v9 = vld [vmem:[#allocation121_spill] sm:$0xff]  ;;  %v7249_v44 = vadd.f32 %v14728_v48, %v7057_v19  ;;  %v6296_v34 = vadd.f32 %v14729_v3, %v6104_v12  ;;  %v14732_v38 = vld [vmem:[#allocation35_spill] sm:$0xff] }
 0xae3   : > { %v7477_v16 = vadd.f32 %v13160_v29, %v7438_v23  ;;  %v7439_v54 = vadd.f32 %v7363_v26, %v7247_v4  ;;  %7557 = vrot.lane.b32.xlu1 %v7476_v31, %s8333_s21  ;;  %v6485_v55 = vadd.f32 %v14724_v60, %v13266_v45  ;;  %v14726_v36 = vld [vmem:[#allocation154_spill] sm:$0xff]  ;;  %v7058_v43 = vadd.f32 %v14727_v9, %v6866_v30  ;;  %v14730_v35 = vld [vmem:[#allocation105_spill] sm:$0xff]  ;;  %v14733_v0 = vld [vmem:[#allocation175_spill] sm:$0xff] }
 0xae4   : > { %v6867_v56 = vadd.f32 %v14726_v36, %v6675_v11  ;;  %v7365_v41 = vpop.permute.xlu0 %7364  ;;  %v6486_v45 = vadd.f32 %v14731_v39, %v6294_v53  ;;  %v6868_v17 = vadd.f32 %v14732_v38, %v6676_v42  ;;  %v14734_v46 = vld [vmem:[#allocation30_spill] sm:$0xff]  ;;  %v14735_v28 = vld [vmem:[#allocation72_spill] sm:$0xff]  ;;  %v14736_v12 = vld [vmem:[#allocation85_spill] sm:$0xff] }
 0xae5   : > { %v7478_v49 = vadd.f32 %v13160_v29, %v7439_v54  ;;  %v7440_v7 = vadd.f32 %v7365_v41, %v7248_v5  ;;  %7559 = vrot.lane.b32.xlu0 %v7477_v16, %s8333_s21  ;;  %v6677_v52 = vadd.f32 %v14730_v35, %v6485_v55  ;;  %v7250_v24 = vadd.f32 %v14734_v46, %v7058_v43  ;;  %v8312_v58 = vld [vmem:[#allocation2 + $0x168] sm:$0xff]  ;;  %v14737_v61 = vld [vmem:[#allocation172_spill] sm:$0xff]  ;;  %v14738_v1 = vld [vmem:[#allocation119_spill] sm:$0xff] }
 0xae6   : > { %v7367_v8 = vpop.permute.xlu1 %7366  ;;  %v7059_v6 = vadd.f32 %v14733_v0, %v6867_v56  ;;  %v6106_v27 = vadd.f32 %v8312_v58, %v14735_v28  ;;  %v6678_v59 = vadd.f32 %v14736_v12, %v6486_v45  ;;  %v6487_v21 = vadd.f32 %v14737_v61, %v6295_v33  ;;  %v14739_v31 = vld [vmem:[#allocation135_spill] sm:$0xff]  ;;  %v14741_v15 = vld [vmem:[#allocation133_spill] sm:$0xff]  ;;  %v14743_v26 = vld [vmem:[#allocation44_spill] sm:$0xff] }
 0xae7   : > { %v7479_v32 = vadd.f32 %v13160_v29, %v7440_v7  ;;  %v7441_v22 = vadd.f32 %v7367_v8, %v7249_v44  ;;  %7561 = vrot.lane.b32.xlu1 %v7478_v49, %s8333_s21  ;;  %v6869_v63 = vadd.f32 %v14738_v1, %v6677_v52  ;;  %v7060_v23 = vadd.f32 %v14739_v31, %v6868_v17  ;;  %v14740_v37 = vld [vmem:[#allocation55_spill] sm:$0xff]  ;;  %v14742_v62 = vld [vmem:[#allocation101_spill] sm:$0xff]  ;;  %v14751_v49 = vld [vmem:[#allocation82_spill] sm:$0xff] }
 0xae8   : > { %v7369_v4 = vpop.permute.xlu0 %7368  ;;  %v7251_v10 = vadd.f32 %v14740_v37, %v7059_v6  ;;  %v8313_v53 = vld [vmem:[#allocation2 + $0x170] sm:$0xff]  ;;  %v6488_v30 = vadd.f32 %v14742_v62, %v6296_v34  ;;  %v6679_v2 = vadd.f32 %v14743_v26, %v6487_v21  ;;  %v14746_v40 = vld [vmem:[#allocation173_spill] sm:$0xff]  ;;  %v14755_v8 = vld [vmem:[#allocation138_spill] sm:$0xff] }
 0xae9   : > { %v7480_v50 = vadd.f32 %v13160_v29, %v7441_v22  ;;  %v7442_v18 = vadd.f32 %v7369_v4, %v7250_v24  ;;  %7563 = vrot.lane.b32.xlu0 %v7479_v32, %s8333_s21  ;;  %v6107_v11 = vadd.f32 %v8313_v53, %v14741_v15  ;;  %v14744_v19 = vld [vmem:[#allocation143_spill] sm:$0xff]  ;;  %v7252_v33 = vadd.f32 %v14746_v40, %v7060_v23  ;;  %v14748_v36 = vld [vmem:[#allocation69_spill] sm:$0xff]  ;;  %v14756_v0 = vld [vmem:[#allocation156_spill] sm:$0xff] }
 0xaea   : > { %v6870_v14 = vadd.f32 %v14744_v19, %v6678_v59  ;;  %v7371_v5 = vpop.permute.xlu1 %7370  ;;  %v14745_v16 = vld [vmem:[#allocation131_spill] sm:$0xff]  ;;  %v6489_v56 = vadd.f32 %v14748_v36, %v13319_v47  ;;  %v14752_v3 = vld [vmem:[#allocation73_spill] sm:$0xff]  ;;  %v14757_v24 = vld [vmem:[#allocation144_spill] sm:$0xff] }
 0xaeb   : > { %v7061_v54 = vadd.f32 %v14745_v16, %v6869_v63  ;;  %v7481_v60 = vadd.f32 %v13160_v29, %v7442_v18  ;;  %v7443_v55 = vadd.f32 %v7371_v5, %v7251_v10  ;;  %7565 = vrot.lane.b32.xlu1 %v7480_v50, %s8333_s21  ;;  %v14747_v20 = vld [vmem:[#allocation3_spill] sm:$0xff]  ;;  %v14753_v39 = vld [vmem:[#allocation137_spill] sm:$0xff]  ;;  %v14758_v22 = vld [vmem:[#allocation108_spill] sm:$0xff] }
 0xaec   : > { %v6298_v42 = vadd.f32 %v14747_v20, %v6106_v27  ;;  %v14749_v41 = vld [vmem:[#allocation83_spill] sm:$0xff]  ;;  %v7373_v44 = vpop.permute.xlu0 %7372  ;;  %v7062_v7 = vadd.f32 %v14751_v49, %v6870_v14  ;;  %v6299_v45 = vadd.f32 %v14753_v39, %v6107_v11  ;;  %v14754_v38 = vld [vmem:[#allocation129_spill] sm:$0xff]  ;;  %v6681_v47 = vadd.f32 %v14755_v8, %v6489_v56  ;;  %v14759_v12 = vld [vmem:[#allocation50_spill] sm:$0xff] }
 0xaed   : > { %v6680_v9 = vadd.f32 %v14749_v41, %v6488_v30  ;;  %v14750_v43 = vld [vmem:[#allocation123_spill] sm:$0xff]  ;;  %v7253_v34 = vadd.f32 %v14752_v3, %v7061_v54  ;;  %v7482_v35 = vadd.f32 %v13160_v29, %v7443_v55  ;;  %v7444_v52 = vadd.f32 %v7373_v44, %v7252_v33  ;;  %7567 = vrot.lane.b32.xlu0 %v7481_v60, %s8333_s21  ;;  %v14763_v37 = vld [vmem:[#allocation177_spill] sm:$0xff]  ;;  %v14764_v53 = vld [vmem:[#allocation62_spill] sm:$0xff] }
 0xaee   : > { %v6871_v48 = vadd.f32 %v14750_v43, %v6679_v2  ;;  %v6490_v17 = vadd.f32 %v14754_v38, %v6298_v42  ;;  %v7375_v46 = vpop.permute.xlu1 %7374  ;;  %v7254_v58 = vadd.f32 %v14758_v22, %v7062_v7  ;;  %v6491_v59 = vadd.f32 %v14759_v12, %v6299_v45  ;;  %v14760_v61 = vld [vmem:[#allocation167_spill] sm:$0xff]  ;;  %v14765_v11 = vld [vmem:[#allocation88_spill] sm:$0xff]  ;;  %v14767_v16 = vld [vmem:[#allocation81_spill] sm:$0xff] }
 0xaef   : > { %v6872_v6 = vadd.f32 %v14756_v0, %v6680_v9  ;;  %v7483_v28 = vadd.f32 %v13160_v29, %v7444_v52  ;;  %v7445_v27 = vadd.f32 %v7375_v46, %v7253_v34  ;;  %7569 = vrot.lane.b32.xlu1 %v7482_v35, %s8333_s21  ;;  %v14761_v1 = vld [vmem:[#allocation183_spill] sm:$0xff]  ;;  %v14766_v26 = vld [vmem:[#allocation160_spill] sm:$0xff]  ;;  %v14769_v56 = vld [vmem:[#allocation169_spill] sm:$0xff] }
 0xaf0   : > { %v7063_v32 = vadd.f32 %v14757_v24, %v6871_v48  ;;  %v6682_v21 = vadd.f32 %v14760_v61, %v6490_v17  ;;  %v6873_v63 = vadd.f32 %v14761_v1, %v6681_v47  ;;  %v7377_v4 = vpop.permute.xlu0 %7376  ;;  %v14762_v31 = vld [vmem:[#allocation107_spill] sm:$0xff]  ;;  %v6683_v15 = vadd.f32 %v14764_v53, %v6491_v59 }
 0xaf1   : > { %v7064_v23 = vadd.f32 %v14762_v31, %v6872_v6  ;;  %v7484_v50 = vadd.f32 %v13160_v29, %v7445_v27  ;;  %v7446_v18 = vadd.f32 %v7377_v4, %v7254_v58  ;;  %7571 = vrot.lane.b32.xlu0 %v7483_v28, %s8333_s21  ;;  %v14768_v33 = vld [vmem:[#allocation95_spill] sm:$0xff] }
 0xaf2   : > { %v7255_v10 = vadd.f32 %v14763_v37, %v7063_v32  ;;  %v6874_v62 = vadd.f32 %v14765_v11, %v6682_v21  ;;  %v7379_v30 = vpop.permute.xlu1 %7378  ;;  %v7065_v2 = vadd.f32 %v14766_v26, %v6873_v63  ;;  %v6875_v54 = vadd.f32 %v14767_v16, %v6683_v15 }
 0xaf3   : > { %v7256_v19 = vadd.f32 %v13107_v25, %v7064_v23  ;;  %v7485_v14 = vadd.f32 %v13160_v29, %v7446_v18  ;;  %7573 = vrot.lane.b32.xlu1 %v7484_v50, %s8333_s21 }
 0xaf4   : > { %v7447_v5 = vadd.f32 %v7379_v30, %v7255_v10  ;;  %v7381_v40 = vpop.permute.xlu0 %7380  ;;  %v7066_v60 = vadd.f32 %v14768_v33, %v6874_v62  ;;  %v7257_v55 = vadd.f32 %v13117_v51, %v7065_v2  ;;  %v7067_v25 = vadd.f32 %v14769_v56, %v6875_v54 }
 0xaf5   : > { %v7448_v42 = vadd.f32 %v7381_v40, %v7256_v19  ;;  %7575 = vrot.lane.b32.xlu0 %v7485_v14, %s8333_s21 }
 0xaf6   : > { %v7486_v20 = vadd.f32 %v13160_v29, %v7447_v5  ;;  %v7383_v36 = vpop.permute.xlu1 %7382  ;;  %v7258_v41 = vadd.f32 %v13129_v57, %v7066_v60  ;;  %v7259_v51 = vadd.f32 %v13145_v13, %v7067_v25 }
 0xaf7   : > { %v7487_v9 = vadd.f32 %v13160_v29, %v7448_v42  ;;  %v7449_v43 = vadd.f32 %v7383_v36, %v7257_v55 }
 0xaf8   : > { %7577 = vrot.lane.b32.xlu1 %v7486_v20, %s8333_s21  ;;  %v7385_v48 = vpop.permute.xlu0 %7384 }
 0xaf9   : > { %v7488_v44 = vadd.f32 %v13160_v29, %v7449_v43  ;;  %v7450_v49 = vadd.f32 %v7385_v48, %v7258_v41  ;;  %7579 = vrot.lane.b32.xlu0 %v7487_v9, %s8333_s21 }
 0xafa   : > { %v7387_v7 = vpop.permute.xlu1 %7386 }
 0xafb   : > { %v7489_v57 = vadd.f32 %v13160_v29, %v7450_v49  ;;  %v7451_v3 = vadd.f32 %v7387_v7, %v7259_v51 }
 0xafc   : > { %7581 = vrot.lane.b32.xlu1 %v7488_v44, %s8333_s21 }
 0xafd   : > { %v7490_v34 = vadd.f32 %v13160_v29, %v7451_v3  ;;  %7583 = vrot.lane.b32.xlu0 %v7489_v57, %s8333_s21 }
 0xb00   : > { %7585 = vrot.lane.b32.xlu1 %v7490_v34, %s8333_s21 }
 0xb33   : > { %v7524_v13 = vpop.permute.xlu0 %7523 }
 0xb34   : > { %7620 = vst.msk [vmem:[%s9757_s15] sm:$0xff] %vm7619_vm10, %v7524_v13 }
 0xb35   : > { %v7526_v35 = vpop.permute.xlu1 %7525 }
 0xb36   : > { %7621 = vst.msk [vmem:[%s9757_s15 + $0x8] sm:$0xff] %vm7619_vm10, %v7526_v35 }
 0xb37   : > { %v7528_v52 = vpop.permute.xlu0 %7527 }
 0xb38   : > { %7622 = vst.msk [vmem:[%s9757_s15 + $0x10] sm:$0xff] %vm7619_vm10, %v7528_v52 }
 0xb39   : > { %v7530_v29 = vpop.permute.xlu1 %7529 }
 0xb3a   : > { %7623 = vst.msk [vmem:[%s9757_s15 + $0x18] sm:$0xff] %vm7619_vm10, %v7530_v29 }
 0xb3b   : > { %v7532_v39 = vpop.permute.xlu0 %7531 }
 0xb3c   : > { %7624 = vst.msk [vmem:[%s9757_s15 + $0x20] sm:$0xff] %vm7619_vm10, %v7532_v39 }
 0xb3d   : > { %v7534_v45 = vpop.permute.xlu1 %7533 }
 0xb3e   : > { %7625 = vst.msk [vmem:[%s9757_s15 + $0x28] sm:$0xff] %vm7619_vm10, %v7534_v45 }
 0xb3f   : > { %v7536_v38 = vpop.permute.xlu0 %7535 }
 0xb40   : > { %7626 = vst.msk [vmem:[%s9757_s15 + $0x30] sm:$0xff] %vm7619_vm10, %v7536_v38 }
 0xb41   : > { %v7538_v17 = vpop.permute.xlu1 %7537 }
 0xb42   : > { %7627 = vst.msk [vmem:[%s9757_s15 + $0x38] sm:$0xff] %vm7619_vm10, %v7538_v17 }
 0xb43   : > { %v7540_v8 = vpop.permute.xlu0 %7539 }
 0xb44   : > { %7628 = vst.msk [vmem:[%s9757_s15 + $0x40] sm:$0xff] %vm7619_vm10, %v7540_v8 }
 0xb45   : > { %v7542_v47 = vpop.permute.xlu1 %7541 }
 0xb46   : > { %7629 = vst.msk [vmem:[%s9757_s15 + $0x48] sm:$0xff] %vm7619_vm10, %v7542_v47 }
 0xb47   : > { %v7544_v0 = vpop.permute.xlu0 %7543 }
 0xb48   : > { %7630 = vst.msk [vmem:[%s9757_s15 + $0x50] sm:$0xff] %vm7619_vm10, %v7544_v0 }
 0xb49   : > { %v7546_v6 = vpop.permute.xlu1 %7545 }
 0xb4a   : > { %7631 = vst.msk [vmem:[%s9757_s15 + $0x58] sm:$0xff] %vm7619_vm10, %v7546_v6 }
 0xb4b   : > { %v7548_v46 = vpop.permute.xlu0 %7547 }
 0xb4c   : > { %7632 = vst.msk [vmem:[%s9757_s15 + $0x60] sm:$0xff] %vm7619_vm10, %v7548_v46 }
 0xb4d   : > { %v7550_v24 = vpop.permute.xlu1 %7549 }
 0xb4e   : > { %7633 = vst.msk [vmem:[%s9757_s15 + $0x68] sm:$0xff] %vm7619_vm10, %v7550_v24 }
 0xb4f   : > { %v7552_v32 = vpop.permute.xlu0 %7551 }
 0xb50   : > { %7634 = vst.msk [vmem:[%s9757_s15 + $0x70] sm:$0xff] %vm7619_vm10, %v7552_v32 }
 0xb51   : > { %v7554_v22 = vpop.permute.xlu1 %7553 }
 0xb52   : > { %7635 = vst.msk [vmem:[%s9757_s15 + $0x78] sm:$0xff] %vm7619_vm10, %v7554_v22 }
 0xb53   : > { %v7556_v58 = vpop.permute.xlu0 %7555 }
 0xb54   : > { %7636 = vst.msk [vmem:[%s9757_s15 + $0x80] sm:$0xff] %vm7619_vm10, %v7556_v58 }
 0xb55   : > { %v7558_v28 = vpop.permute.xlu1 %7557 }
 0xb56   : > { %7637 = vst.msk [vmem:[%s9757_s15 + $0x88] sm:$0xff] %vm7619_vm10, %v7558_v28 }
 0xb57   : > { %v7560_v27 = vpop.permute.xlu0 %7559 }
 0xb58   : > { %7638 = vst.msk [vmem:[%s9757_s15 + $0x90] sm:$0xff] %vm7619_vm10, %v7560_v27 }
 0xb59   : > { %v7562_v12 = vpop.permute.xlu1 %7561 }
 0xb5a   : > { %7639 = vst.msk [vmem:[%s9757_s15 + $0x98] sm:$0xff] %vm7619_vm10, %v7562_v12 }
 0xb5b   : > { %v7564_v59 = vpop.permute.xlu0 %7563 }
 0xb5c   : > { %7640 = vst.msk [vmem:[%s9757_s15 + $0xa0] sm:$0xff] %vm7619_vm10, %v7564_v59 }
 0xb5d   : > { %v7566_v61 = vpop.permute.xlu1 %7565 }
 0xb5e   : > { %7641 = vst.msk [vmem:[%s9757_s15 + $0xa8] sm:$0xff] %vm7619_vm10, %v7566_v61 }
 0xb5f   : > { %v7568_v21 = vpop.permute.xlu0 %7567 }
 0xb60   : > { %7642 = vst.msk [vmem:[%s9757_s15 + $0xb0] sm:$0xff] %vm7619_vm10, %v7568_v21 }
 0xb61   : > { %v7570_v1 = vpop.permute.xlu1 %7569 }
 0xb62   : > { %7643 = vst.msk [vmem:[%s9757_s15 + $0xb8] sm:$0xff] %vm7619_vm10, %v7570_v1 }
 0xb63   : > { %v7572_v63 = vpop.permute.xlu0 %7571 }
 0xb64   : > { %7644 = vst.msk [vmem:[%s9757_s15 + $0xc0] sm:$0xff] %vm7619_vm10, %v7572_v63 }
 0xb65   : > { %v7574_v4 = vpop.permute.xlu1 %7573 }
 0xb66   : > { %7645 = vst.msk [vmem:[%s9757_s15 + $0xc8] sm:$0xff] %vm7619_vm10, %v7574_v4 }
 0xb67   : > { %v7576_v31 = vpop.permute.xlu0 %7575 }
 0xb68   : > { %7646 = vst.msk [vmem:[%s9757_s15 + $0xd0] sm:$0xff] %vm7619_vm10, %v7576_v31 }
 0xb6a   : > { %v7578_v23 = vpop.permute.xlu1 %7577 }
 0xb6b   : > { %7647 = vst.msk [vmem:[%s9757_s15 + $0xd8] sm:$0xff] %vm7619_vm10, %v7578_v23  ;;  %v7580_v37 = vpop.permute.xlu0 %7579 }
 0xb6c   : > { %7648 = vst.msk [vmem:[%s9757_s15 + $0xe0] sm:$0xff] %vm7619_vm10, %v7580_v37 }
 0xb6e   : > { %v7582_v10 = vpop.permute.xlu1 %7581 }
 0xb6f   : > { %7649 = vst.msk [vmem:[%s9757_s15 + $0xe8] sm:$0xff] %vm7619_vm10, %v7582_v10  ;;  %v7584_v50 = vpop.permute.xlu0 %7583 }
 0xb70   : > { %7650 = vst.msk [vmem:[%s9757_s15 + $0xf0] sm:$0xff] %vm7619_vm10, %v7584_v50 }
 0xb72   : > { %v7586_v18 = vpop.permute.xlu1 %7585 }
 0xb73   : > { %7651 = vst.msk [vmem:[%s9757_s15 + $0xf8] sm:$0xff] %vm7619_vm10, %v7586_v18 }
 0xb74 PF: > { %s23_s25 = sadd.s32 1, %s8320_s25  }
 0xb75   : > { %p20_p4 = scmp.ge.s32.totalorder %s23_s25, 4  }
 0xb77   :  { %22 = sbr.rel (!%p20_p4) target bundleno = 1 (0x1), region = 105 }

</bundles_post_ra>
